<compile_context>
chip_gen: v6e
topology: v6e:2x2x1
jax: 0.10.0
libtpu: 0.0.40
codegen_flags: <defaults>
</compile_context>

<pallas_src>
import jax
import jax.numpy as jnp
from jax import lax
from jax.experimental import pallas as pl
from jax.experimental.pallas import tpu as pltpu

DIM = 64  # hidden size hard-coded in the reference module

_VMEM = pl.BlockSpec(memory_space=pltpu.MemorySpace.VMEM)


def _vspecs(n):
    return [pl.BlockSpec(memory_space=pltpu.MemorySpace.VMEM) for _ in range(n)]


def _round_up(v, m):
    return ((v + m - 1) // m) * m


# --------------------------------------------------------------------------- kernel 1
# Edge network: Linear(5,128) -> ReLU -> Linear(128, DIM*DIM), tiled over E.
# nn2 weights/bias are column-permuted at prepare time so the (free) HBM
# reshape of the output to [E, DIM, DIM] yields W_e^T, i.e.
# wedge[e, k, d] = W_e[d, k]; the in-kernel message contraction can then
# contract the LAST dims of both operands (MXU-friendly batched matmul form).
def _edge_mlp_kernel(ea_ref, w1_ref, b1_ref, w2_ref, b2_ref, o_ref):
    hid = jnp.maximum(
        jnp.dot(ea_ref[...], w1_ref[...], preferred_element_type=jnp.float32)
        + b1_ref[...], 0.0)
    wflat = (jnp.dot(hid.astype(jnp.bfloat16), w2_ref[...],
                     preferred_element_type=jnp.float32) + b2_ref[...])
    o_ref[...] = wflat.astype(jnp.bfloat16)


def edge_mlp(edge_attr, w1, b1, w2_bf16, b2, tile_e):
    E, F = edge_attr.shape
    flops = 2 * E * (F * 128 + 128 * DIM * DIM)
    bytes_accessed = (edge_attr.size * 4 + w1.size * 4 + b1.size * 4
                      + w2_bf16.size * 2 + b2.size * 4 + E * DIM * DIM * 2)
    return pl.pallas_call(
        _edge_mlp_kernel,
        out_shape=jax.ShapeDtypeStruct((E, DIM * DIM), jnp.bfloat16),
        grid=(E // tile_e,),
        in_specs=[pl.BlockSpec((tile_e, F), lambda i: (i, 0)),
                  pl.BlockSpec(w1.shape, lambda i: (0, 0)),
                  pl.BlockSpec(b1.shape, lambda i: (0, 0)),
                  pl.BlockSpec(w2_bf16.shape, lambda i: (0, 0)),
                  pl.BlockSpec(b2.shape, lambda i: (0, 0))],
        out_specs=pl.BlockSpec((tile_e, DIM * DIM), lambda i: (i, 0)),
        compiler_params=pltpu.CompilerParams(
            dimension_semantics=("parallel",),
            vmem_limit_bytes=32 * 1024 * 1024),
        cost_estimate=pl.CostEstimate(flops=flops, transcendentals=0,
                                      bytes_accessed=int(bytes_accessed)),
    )(edge_attr, w1, b1, w2_bf16, b2)


# --------------------------------------------------------------------------- kernel 2
# Fully fused network body: lin0+ReLU, 3 x (NNConv(mean)+ReLU + GRU),
# Set2Set (3 processing steps), lin1+ReLU, lin2.  Node/graph state never
# leaves VMEM.
def _gnn_fused_kernel(x_ref, l0w_ref, l0b_ref,
                      src_ref, dst_ref, invdeg_ref, wedge_ref,
                      root_ref, cb_ref,
                      gwi_ref, gbi_ref, gwh_ref, gbh_ref,
                      batch_ref,
                      lwq_ref, lwr_ref, lwh_ref, lb_ref,
                      w1q_ref, w1r_ref, b1_ref, w2_ref, b2_ref,
                      o_ref):
    d = DIM
    f32 = jnp.float32
    bf16 = jnp.bfloat16
    n_nodes = x_ref.shape[0]
    n_edges = src_ref.shape[0]
    bsz = o_ref.shape[0]

    # ---- lin0 + ReLU --------------------------------------------------------
    out = jnp.maximum(
        jnp.dot(x_ref[...], l0w_ref[...], preferred_element_type=f32)
        + l0b_ref[...], 0.0)                                          # [N, D]

    # ---- one-hot gather / mean-scatter operands built in-kernel -------------
    # (int32 index vectors + iota compares, hoisted out of the MP loop; no
    #  O(E*N) f32 HBM DMA.  Padded edges carry src/dst = -1 -> all-zero rows.)
    col_n = lax.broadcasted_iota(jnp.int32, (n_edges, n_nodes), 1)
    gat = (src_ref[...] == col_n).astype(bf16)                        # [E, N]
    row_n = lax.broadcasted_iota(jnp.int32, (n_nodes, n_edges), 0)
    scat = (dst_ref[...] == row_n).astype(bf16)                       # [N, E]
    inv_deg = invdeg_ref[...]                                         # [N, 1]

    wedge = wedge_ref[...]        # [E, D, D] bf16, wedge[e, k, d] = W_e[d, k]
    root = root_ref[...]
    cb = cb_ref[...]
    gwi = gwi_ref[...]
    gbi = gbi_ref[...]
    gwh = gwh_ref[...]
    gbh = gbh_ref[...]

    # ---- 3 x (NNConv(mean) + ReLU + GRU), state kept in VMEM ----------------
    # TODO(synk): for large E (v7x: 64 MiB VMEM), keep wedge in HBM
    # (memory_space=pl.ANY) and stream edge tiles per MP step with
    # pltpu.emit_pipeline, fusing the edge-MLP recompute into that tile loop
    # and accumulating `aggr`; also add a parallel grid axis so v7x's second
    # TensorCore gets work, and convert these unrolled 3-step loops to
    # lax.fori_loop once tiling is in (check spill stats).
    for _ in range(3):
        h = out
        out_b = out.astype(bf16)
        xsrc = jnp.dot(gat, out_b, preferred_element_type=f32)        # [E, D]
        # per-edge message on the MXU: msg[e,k] = sum_d xsrc[e,d] * W_e[d,k]
        msg = jnp.einsum('eod,ekd->eok',
                         xsrc.reshape(n_edges, 1, d).astype(bf16), wedge,
                         preferred_element_type=f32).reshape(n_edges, d)
        aggr = jnp.dot(scat, msg.astype(bf16),
                       preferred_element_type=f32) * inv_deg          # [N, D]
        m = jnp.maximum(
            jnp.dot(out, root, preferred_element_type=f32) + aggr + cb, 0.0)
        # GRU with split matmuls (no lane concats), exact PyTorch gate formula
        gi = jnp.dot(m, gwi, preferred_element_type=f32) + gbi        # [N, 3D]
        gh = jnp.dot(h, gwh, preferred_element_type=f32) + gbh        # [N, 3D]
        r = jax.nn.sigmoid(gi[:, :d] + gh[:, :d])
        z = jax.nn.sigmoid(gi[:, d:2 * d] + gh[:, d:2 * d])
        n = jnp.tanh(gi[:, 2 * d:] + r * gh[:, 2 * d:])
        out = (1.0 - z) * n + z * h

    # ---- Set2Set, processing_steps = 3 --------------------------------------
    b_iota = lax.broadcasted_iota(jnp.int32, (bsz, n_nodes), 0)
    seg = (batch_ref[...] == b_iota).astype(f32)                      # [B, N]
    neg_bias = jnp.where(seg > 0.0, 0.0, -1e30)                       # hoisted

    q = jnp.zeros((bsz, d), f32)
    r_att = jnp.zeros((bsz, d), f32)
    h_s = jnp.zeros((bsz, d), f32)
    c_s = jnp.zeros((bsz, d), f32)
    for _ in range(3):
        # LSTM on q_star = [q | r_att]; split matmuls, no concat
        gates = (jnp.dot(q, lwq_ref[...], preferred_element_type=f32)
                 + jnp.dot(r_att, lwr_ref[...], preferred_element_type=f32)
                 + jnp.dot(h_s, lwh_ref[...], preferred_element_type=f32)
                 + lb_ref[...])                                        # [B, 4D]
        i_g = jax.nn.sigmoid(gates[:, :d])
        f_g = jax.nn.sigmoid(gates[:, d:2 * d])
        g_g = jnp.tanh(gates[:, 2 * d:3 * d])
        o_g = jax.nn.sigmoid(gates[:, 3 * d:])
        c_s = f_g * c_s + i_g * g_g
        q = o_g * jnp.tanh(c_s)                                        # [B, D]
        h_s = q
        # per-graph masked softmax over nodes; scores via a transposed-B MXU
        # contraction (no XLU transpose of `out`)
        scores = lax.dot_general(q, out, (((1,), (1,)), ((), ())),
                                 preferred_element_type=f32) + neg_bias
        scores = scores - jnp.max(scores, axis=1, keepdims=True)
        ex = jnp.exp(scores) * seg
        denom = jnp.maximum(jnp.sum(ex, axis=1, keepdims=True), 1e-20)
        a = ex * pl.reciprocal(denom, approx=True)                     # [B, N]
        r_att = jnp.dot(a, out, preferred_element_type=f32)            # [B, D]

    # ---- lin1 + ReLU + lin2 on q_star = [q | r_att] (split, no concat) ------
    y = jnp.maximum(
        jnp.dot(q, w1q_ref[...], preferred_element_type=f32)
        + jnp.dot(r_att, w1r_ref[...], preferred_element_type=f32)
        + b1_ref[...], 0.0)
    o_ref[...] = (jnp.dot(y, w2_ref[...], preferred_element_type=f32)
                  + b2_ref[...])


def gnn_fused(x, params, src_col, dst_row, inv_deg, wedge, batch_row, bsz):
    N, F = x.shape
    E = src_col.shape[0]
    d = DIM
    args = (x, params["lin0_w"], params["lin0_b"],
            src_col, dst_row, inv_deg, wedge,
            params["conv_root"], params["conv_b"],
            params["gru_wih"], params["gru_bih"],
            params["gru_whh"], params["gru_bhh"],
            batch_row,
            params["lstm_wq"], params["lstm_wr"], params["lstm_wh"],
            params["lstm_b"],
            params["lin1_wq"], params["lin1_wr"], params["lin1_b"],
            params["lin2_w"], params["lin2_b"])
    flops = (2 * N * F * d
             + 3 * (2 * E * N * d + 2 * E * d * d + 2 * N * E * d
                    + 2 * N * d * d + 2 * N * d * 6 * d)
             + 3 * (2 * bsz * d * 12 * d + 4 * bsz * N * d)
             + 4 * bsz * d * d + 2 * bsz * d)
    trans = 3 * 3 * N * d + 3 * (5 * bsz * d + bsz * N)
    bytes_accessed = sum(int(a.size) * a.dtype.itemsize for a in args) + bsz * 4
    return pl.pallas_call(
        _gnn_fused_kernel,
        out_shape=jax.ShapeDtypeStruct((bsz, 1), jnp.float32),
        in_specs=_vspecs(len(args)),
        out_specs=_VMEM,
        compiler_params=pltpu.CompilerParams(
            vmem_limit_bytes=64 * 1024 * 1024),
        cost_estimate=pl.CostEstimate(flops=int(flops), transcendentals=int(trans),
                                      bytes_accessed=int(bytes_accessed)),
    )(*args)


# --------------------------------------------------------------------------- parameters
def init_params(key, num_features):
    def w(k, shape, scale=0.1):
        return scale * jax.random.normal(k, shape, jnp.float32)

    ks = jax.random.split(key, 20)
    p = {}
    p["lin0_w"] = w(ks[0], (num_features, DIM))
    p["lin0_b"] = w(ks[1], (1, DIM))
    # edge network: Linear(5,128) -> ReLU -> Linear(128, DIM*DIM)
    p["nn1_w"] = w(ks[2], (5, 128))
    p["nn1_b"] = w(ks[3], (1, 128))
    p["nn2_w"] = w(ks[4], (128, DIM * DIM), scale=0.02)
    p["nn2_b"] = w(ks[5], (1, DIM * DIM), scale=0.02)
    p["conv_root"] = w(ks[6], (DIM, DIM))
    p["conv_b"] = w(ks[7], (1, DIM))
    # GRU(dim, dim): gate order r|z|n, stored as [in, 3*dim]
    p["gru_wih"] = w(ks[8], (DIM, 3 * DIM))
    p["gru_whh"] = w(ks[9], (DIM, 3 * DIM))
    p["gru_bih"] = w(ks[10], (1, 3 * DIM))
    p["gru_bhh"] = w(ks[11], (1, 3 * DIM))
    # Set2Set LSTM(2*dim -> dim): gate order i|f|g|o
    p["s2s_wih"] = w(ks[12], (2 * DIM, 4 * DIM))
    p["s2s_whh"] = w(ks[13], (DIM, 4 * DIM))
    p["s2s_bih"] = w(ks[14], (1, 4 * DIM))
    p["s2s_bhh"] = w(ks[15], (1, 4 * DIM))
    p["lin1_w"] = w(ks[16], (2 * DIM, DIM))
    p["lin1_b"] = w(ks[17], (1, DIM))
    p["lin2_w"] = w(ks[18], (DIM, 1))
    p["lin2_b"] = w(ks[19], (1, 1))
    return p


def prepare_params(p):
    """One-time weight prep: nn2 column permutation (-> W_e^T layout, bf16),
    Set2Set-LSTM / lin1 input-splits (no in-kernel concats)."""
    d = DIM
    out = dict(p)
    out["nn2_w_perm"] = (p["nn2_w"].reshape(128, d, d).transpose(0, 2, 1)
                         .reshape(128, d * d).astype(jnp.bfloat16))
    out["nn2_b_perm"] = (p["nn2_b"].reshape(1, d, d).transpose(0, 2, 1)
                         .reshape(1, d * d))
    out["lstm_wq"] = p["s2s_wih"][:d]          # acts on q
    out["lstm_wr"] = p["s2s_wih"][d:]          # acts on r_att
    out["lstm_wh"] = p["s2s_whh"]
    out["lstm_b"] = p["s2s_bih"] + p["s2s_bhh"]
    out["lin1_wq"] = p["lin1_w"][:d]
    out["lin1_wr"] = p["lin1_w"][d:]
    return out


# --------------------------------------------------------------------------- forward
def net_forward(params, x, edge_index, edge_attr, batch, num_graphs):
    N0, _ = x.shape
    E0 = edge_attr.shape[0]
    # pad row dims so kernel tiles are (8,128)-friendly; padding stays inert
    # (src/dst/batch = -1 never match any iota column, deg clamp handles it)
    N = _round_up(max(N0, 8), 8)
    tile_e = min(128, _round_up(max(E0, 8), 8))
    E = _round_up(max(E0, 8), tile_e)
    B = max(_round_up(num_graphs, 8), 8)

    src = jnp.pad(edge_index[0].astype(jnp.int32), (0, E - E0), constant_values=-1)
    dst = jnp.pad(edge_index[1].astype(jnp.int32), (0, E - E0), constant_values=-1)
    batch_p = jnp.pad(batch.astype(jnp.int32), (0, N - N0), constant_values=-1)
    x_p = jnp.pad(x, ((0, N - N0), (0, 0)))
    ea_p = jnp.pad(edge_attr, ((0, E - E0), (0, 0)))

    # per-node incoming degree for 'mean' aggregation (padded edges -> overflow)
    dst_seg = jnp.where(dst >= 0, dst, N)
    deg = jnp.zeros((N + 1,), jnp.float32).at[dst_seg].add(1.0)[:N]
    inv_deg = (1.0 / jnp.maximum(deg, 1.0)).reshape(N, 1)

    src_col = src.reshape(E, 1)
    dst_row = dst.reshape(1, E)
    batch_row = batch_p.reshape(1, N)

    # kernel 1: edge network -> per-edge weights (bf16, [e, out_k, in_d] layout)
    w_flat = edge_mlp(ea_p, params["nn1_w"], params["nn1_b"],
                      params["nn2_w_perm"], params["nn2_b_perm"], tile_e)
    wedge = w_flat.reshape(E, DIM, DIM)          # free reshape on the HBM array
    # TODO(synk): fuse the edge MLP into the main kernel's edge-tile pipeline
    # (recompute per MP step) to remove this [E, DIM*DIM] HBM round trip.

    # kernel 2: lin0 + 3x(NNConv+GRU) + Set2Set(3) + lin1 + lin2, fully fused
    y = gnn_fused(x_p, params, src_col, dst_row, inv_deg, wedge, batch_row, B)
    return y[:num_graphs].reshape(-1)


# --------------------------------------------------------------------------- main
if __name__ == "__main__":
    key = jax.random.PRNGKey(0)
    num_features = 8
    nodes_per_graph, num_graphs = 8, 2
    N = nodes_per_graph * num_graphs

    # deterministic small graph: each node connects to +1 and +2 neighbours
    # within its graph
    src_list, dst_list = [], []
    for g in range(num_graphs):
        o = g * nodes_per_graph
        for i in range(nodes_per_graph):
            for step in (1, 2):
                src_list.append(o + i)
                dst_list.append(o + (i + step) % nodes_per_graph)
    edge_index = jnp.array([src_list, dst_list], dtype=jnp.int32)           # [2, E]
    E = edge_index.shape[1]

    kx, ke, kp = jax.random.split(key, 3)
    x = jax.random.normal(kx, (N, num_features), jnp.float32)
    edge_attr = jax.random.normal(ke, (E, 5), jnp.float32)
    batch = jnp.repeat(jnp.arange(num_graphs, dtype=jnp.int32), nodes_per_graph)

    params = prepare_params(init_params(kp, num_features))
    fwd = jax.jit(net_forward, static_argnames=("num_graphs",))
    y = fwd(params, x, edge_index, edge_attr, batch, num_graphs=num_graphs)
    jax.block_until_ready(y)
    assert y.shape == (num_graphs,) and y.dtype == jnp.float32
    print("KERNEL_OK")
</pallas_src>

<mosaic_0001>
module attributes {stable_mosaic.version = 11 : i64} {
  func.func private @main(%arg0: i32) attributes {dimension_semantics = [#tpu.dimension_semantics<core_parallel>], iteration_bounds = array<i64: 2>, tpu.core_type = #tpu.core_type<sc_scalar_subcore>, window_params = []} {
    return
  }
}

module attributes {stable_mosaic.version = 11 : i64} {
  func.func private @main(%arg0: i32) attributes {dimension_semantics = [#tpu.dimension_semantics<core_parallel>], iteration_bounds = array<i64: 2>, tpu.core_type = #tpu.core_type<sc_scalar_subcore>, window_params = []} {
    return
  }
}

module attributes {stable_mosaic.version = 11 : i64} {
  func.func @_edge_mlp_kernel(%arg0: i32, %arg1: memref<32x5xf32, #tpu.memory_space<vmem>>, %arg2: memref<5x128xf32, #tpu.memory_space<vmem>>, %arg3: memref<1x128xf32, #tpu.memory_space<vmem>>, %arg4: memref<128x4096xbf16, #tpu.memory_space<vmem>>, %arg5: memref<1x4096xf32, #tpu.memory_space<vmem>>, %arg6: memref<32x4096xbf16, #tpu.memory_space<vmem>>) attributes {dimension_semantics = [#tpu.dimension_semantics<parallel>], iteration_bounds = array<i64: 1>, scalar_prefetch = 0 : i64, scratch_operands = 0 : i64, tpu.core_type = #tpu.core_type<tc>, window_params = [{transform_indices = @transform_0, window_bounds = array<i64: 32, 5>}, {pipeline_mode = #tpu.pipeline_mode<synchronous>, transform_indices = @transform_1, window_bounds = array<i64: 5, 128>}, {pipeline_mode = #tpu.pipeline_mode<synchronous>, transform_indices = @transform_2, window_bounds = array<i64: 1, 128>}, {pipeline_mode = #tpu.pipeline_mode<synchronous>, transform_indices = @transform_3, window_bounds = array<i64: 128, 4096>}, {pipeline_mode = #tpu.pipeline_mode<synchronous>, transform_indices = @transform_4, window_bounds = array<i64: 1, 4096>}, {transform_indices = @transform_5, window_bounds = array<i64: 32, 4096>}]} {
    %c0 = arith.constant 0 : index
    %c0_0 = arith.constant 0 : index
    %0 = vector.load %arg1[%c0, %c0_0] : memref<32x5xf32, #tpu.memory_space<vmem>>, vector<32x5xf32>
    %c0_1 = arith.constant 0 : index
    %c0_2 = arith.constant 0 : index
    %1 = vector.load %arg2[%c0_1, %c0_2] : memref<5x128xf32, #tpu.memory_space<vmem>>, vector<5x128xf32>
    %cst = arith.constant dense<0.000000e+00> : vector<32x128xf32>
    %2 = tpu.matmul %0, %1, %cst {dimension_numbers = #tpu.dot_dimension_numbers<[1], [0], [0], [1], [0, 0, 1, 1], [], []>} : vector<32x5xf32>, vector<5x128xf32>, vector<32x128xf32> -> vector<32x128xf32>
    %c0_3 = arith.constant 0 : index
    %c0_4 = arith.constant 0 : index
    %3 = vector.load %arg3[%c0_3, %c0_4] : memref<1x128xf32, #tpu.memory_space<vmem>>, vector<1x128xf32>
    %4 = vector.broadcast %3 : vector<1x128xf32> to vector<32x128xf32>
    %5 = arith.addf %2, %4 : vector<32x128xf32>
    %cst_5 = arith.constant 0.000000e+00 : f32
    %6 = vector.broadcast %cst_5 : f32 to vector<32x128xf32>
    %7 = arith.maximumf %5, %6 : vector<32x128xf32>
    %8 = arith.truncf %7 : vector<32x128xf32> to vector<32x128xbf16>
    %c0_6 = arith.constant 0 : index
    %c0_7 = arith.constant 0 : index
    %9 = vector.load %arg4[%c0_6, %c0_7] : memref<128x4096xbf16, #tpu.memory_space<vmem>>, vector<128x4096xbf16>
    %cst_8 = arith.constant dense<0.000000e+00> : vector<32x4096xf32>
    %10 = tpu.matmul %8, %9, %cst_8 {dimension_numbers = #tpu.dot_dimension_numbers<[1], [0], [0], [1], [0, 0, 1, 1], [], []>} : vector<32x128xbf16>, vector<128x4096xbf16>, vector<32x4096xf32> -> vector<32x4096xf32>
    %c0_9 = arith.constant 0 : index
    %c0_10 = arith.constant 0 : index
    %11 = vector.load %arg5[%c0_9, %c0_10] : memref<1x4096xf32, #tpu.memory_space<vmem>>, vector<1x4096xf32>
    %12 = vector.broadcast %11 : vector<1x4096xf32> to vector<32x4096xf32>
    %13 = arith.addf %10, %12 : vector<32x4096xf32>
    %14 = arith.truncf %13 : vector<32x4096xf32> to vector<32x4096xbf16>
    %c0_11 = arith.constant 0 : index
    %c0_12 = arith.constant 0 : index
    %15 = vector.load %arg6[%c0_11, %c0_12] : memref<32x4096xbf16, #tpu.memory_space<vmem>>, vector<32x4096xbf16>
    tpu.vector_store %arg6[%c0_11, %c0_12], %14 {strides = array<i32>} : memref<32x4096xbf16, #tpu.memory_space<vmem>>, vector<32x4096xbf16>,
    return
  }
  func.func @transform_0(%arg0: i32) -> (i32, i32) {
    %c0_i32 = arith.constant 0 : i32
    %c0_i32_0 = arith.constant 0 : i32
    return %arg0, %c0_i32 : i32, i32
  }
  func.func @transform_1(%arg0: i32) -> (i32, i32) {
    %c0_i32 = arith.constant 0 : i32
    %c0_i32_0 = arith.constant 0 : i32
    %c0_i32_1 = arith.constant 0 : i32
    return %c0_i32, %c0_i32_0 : i32, i32
  }
  func.func @transform_2(%arg0: i32) -> (i32, i32) {
    %c0_i32 = arith.constant 0 : i32
    %c0_i32_0 = arith.constant 0 : i32
    %c0_i32_1 = arith.constant 0 : i32
    return %c0_i32, %c0_i32_0 : i32, i32
  }
  func.func @transform_3(%arg0: i32) -> (i32, i32) {
    %c0_i32 = arith.constant 0 : i32
    %c0_i32_0 = arith.constant 0 : i32
    %c0_i32_1 = arith.constant 0 : i32
    return %c0_i32, %c0_i32_0 : i32, i32
  }
  func.func @transform_4(%arg0: i32) -> (i32, i32) {
    %c0_i32 = arith.constant 0 : i32
    %c0_i32_0 = arith.constant 0 : i32
    %c0_i32_1 = arith.constant 0 : i32
    return %c0_i32, %c0_i32_0 : i32, i32
  }
  func.func @transform_5(%arg0: i32) -> (i32, i32) {
    %c0_i32 = arith.constant 0 : i32
    %c0_i32_0 = arith.constant 0 : i32
    return %arg0, %c0_i32 : i32, i32
  }
}

module attributes {stable_mosaic.version = 11 : i64} {
  func.func @_gnn_fused_kernel(%arg0: memref<16x8xf32, #tpu.memory_space<vmem>>, %arg1: memref<8x64xf32, #tpu.memory_space<vmem>>, %arg2: memref<1x64xf32, #tpu.memory_space<vmem>>, %arg3: memref<32x1xi32, #tpu.memory_space<vmem>>, %arg4: memref<1x32xi32, #tpu.memory_space<vmem>>, %arg5: memref<16x1xf32, #tpu.memory_space<vmem>>, %arg6: memref<32x64x64xbf16, #tpu.memory_space<vmem>>, %arg7: memref<64x64xf32, #tpu.memory_space<vmem>>, %arg8: memref<1x64xf32, #tpu.memory_space<vmem>>, %arg9: memref<64x192xf32, #tpu.memory_space<vmem>>, %arg10: memref<1x192xf32, #tpu.memory_space<vmem>>, %arg11: memref<64x192xf32, #tpu.memory_space<vmem>>, %arg12: memref<1x192xf32, #tpu.memory_space<vmem>>, %arg13: memref<1x16xi32, #tpu.memory_space<vmem>>, %arg14: memref<64x256xf32, #tpu.memory_space<vmem>>, %arg15: memref<64x256xf32, #tpu.memory_space<vmem>>, %arg16: memref<64x256xf32, #tpu.memory_space<vmem>>, %arg17: memref<1x256xf32, #tpu.memory_space<vmem>>, %arg18: memref<64x64xf32, #tpu.memory_space<vmem>>, %arg19: memref<64x64xf32, #tpu.memory_space<vmem>>, %arg20: memref<1x64xf32, #tpu.memory_space<vmem>>, %arg21: memref<64x1xf32, #tpu.memory_space<vmem>>, %arg22: memref<1x1xf32, #tpu.memory_space<vmem>>, %arg23: memref<8x1xf32, #tpu.memory_space<vmem>>) attributes {dimension_semantics = [], scalar_prefetch = 0 : i64, scratch_operands = 0 : i64, tpu.core_type = #tpu.core_type<tc>} {
    %c0 = arith.constant 0 : index
    %c0_0 = arith.constant 0 : index
    %0 = vector.load %arg0[%c0, %c0_0] : memref<16x8xf32, #tpu.memory_space<vmem>>, vector<16x8xf32>
    %c0_1 = arith.constant 0 : index
    %c0_2 = arith.constant 0 : index
    %1 = vector.load %arg1[%c0_1, %c0_2] : memref<8x64xf32, #tpu.memory_space<vmem>>, vector<8x64xf32>
    %cst = arith.constant dense<0.000000e+00> : vector<16x64xf32>
    %2 = tpu.matmul %0, %1, %cst {dimension_numbers = #tpu.dot_dimension_numbers<[1], [0], [0], [1], [0, 0, 1, 1], [], []>} : vector<16x8xf32>, vector<8x64xf32>, vector<16x64xf32> -> vector<16x64xf32>
    %c0_3 = arith.constant 0 : index
    %c0_4 = arith.constant 0 : index
    %3 = vector.load %arg2[%c0_3, %c0_4] : memref<1x64xf32, #tpu.memory_space<vmem>>, vector<1x64xf32>
    %4 = vector.broadcast %3 : vector<1x64xf32> to vector<16x64xf32>
    %5 = arith.addf %2, %4 : vector<16x64xf32>
    %cst_5 = arith.constant 0.000000e+00 : f32
    %6 = vector.broadcast %cst_5 : f32 to vector<16x64xf32>
    %7 = arith.maximumf %5, %6 : vector<16x64xf32>
    %8 = tpu.iota {dimensions = array<i32: 1>} : vector<32x16xi32>
    %c0_6 = arith.constant 0 : index
    %c0_7 = arith.constant 0 : index
    %9 = vector.load %arg3[%c0_6, %c0_7] : memref<32x1xi32, #tpu.memory_space<vmem>>, vector<32x1xi32>
    %10 = vector.broadcast %9 : vector<32x1xi32> to vector<32x16xi32>
    %11 = arith.cmpi eq, %10, %8 : vector<32x16xi32>
    %12 = arith.extui %11 : vector<32x16xi1> to vector<32x16xi32>
    %13 = arith.sitofp %12 : vector<32x16xi32> to vector<32x16xf32>
    %14 = arith.truncf %13 : vector<32x16xf32> to vector<32x16xbf16>
    %15 = tpu.iota {dimensions = array<i32: 0>} : vector<16x32xi32>
    %c0_8 = arith.constant 0 : index
    %c0_9 = arith.constant 0 : index
    %16 = vector.load %arg4[%c0_8, %c0_9] : memref<1x32xi32, #tpu.memory_space<vmem>>, vector<1x32xi32>
    %17 = vector.broadcast %16 : vector<1x32xi32> to vector<16x32xi32>
    %18 = arith.cmpi eq, %17, %15 : vector<16x32xi32>
    %19 = arith.extui %18 : vector<16x32xi1> to vector<16x32xi32>
    %20 = arith.sitofp %19 : vector<16x32xi32> to vector<16x32xf32>
    %21 = arith.truncf %20 : vector<16x32xf32> to vector<16x32xbf16>
    %c0_10 = arith.constant 0 : index
    %c0_11 = arith.constant 0 : index
    %22 = vector.load %arg5[%c0_10, %c0_11] : memref<16x1xf32, #tpu.memory_space<vmem>>, vector<16x1xf32>
    %c0_12 = arith.constant 0 : index
    %c0_13 = arith.constant 0 : index
    %c0_14 = arith.constant 0 : index
    %23 = vector.load %arg6[%c0_12, %c0_13, %c0_14] : memref<32x64x64xbf16, #tpu.memory_space<vmem>>, vector<32x64x64xbf16>
    %c0_15 = arith.constant 0 : index
    %c0_16 = arith.constant 0 : index
    %24 = vector.load %arg7[%c0_15, %c0_16] : memref<64x64xf32, #tpu.memory_space<vmem>>, vector<64x64xf32>
    %c0_17 = arith.constant 0 : index
    %c0_18 = arith.constant 0 : index
    %25 = vector.load %arg8[%c0_17, %c0_18] : memref<1x64xf32, #tpu.memory_space<vmem>>, vector<1x64xf32>
    %c0_19 = arith.constant 0 : index
    %c0_20 = arith.constant 0 : index
    %26 = vector.load %arg9[%c0_19, %c0_20] : memref<64x192xf32, #tpu.memory_space<vmem>>, vector<64x192xf32>
    %c0_21 = arith.constant 0 : index
    %c0_22 = arith.constant 0 : index
    %27 = vector.load %arg10[%c0_21, %c0_22] : memref<1x192xf32, #tpu.memory_space<vmem>>, vector<1x192xf32>
    %c0_23 = arith.constant 0 : index
    %c0_24 = arith.constant 0 : index
    %28 = vector.load %arg11[%c0_23, %c0_24] : memref<64x192xf32, #tpu.memory_space<vmem>>, vector<64x192xf32>
    %c0_25 = arith.constant 0 : index
    %c0_26 = arith.constant 0 : index
    %29 = vector.load %arg12[%c0_25, %c0_26] : memref<1x192xf32, #tpu.memory_space<vmem>>, vector<1x192xf32>
    %30 = arith.truncf %7 : vector<16x64xf32> to vector<16x64xbf16>
    %cst_27 = arith.constant dense<0.000000e+00> : vector<32x64xf32>
    %31 = tpu.matmul %14, %30, %cst_27 {dimension_numbers = #tpu.dot_dimension_numbers<[1], [0], [0], [1], [0, 0, 1, 1], [], []>} : vector<32x16xbf16>, vector<16x64xbf16>, vector<32x64xf32> -> vector<32x64xf32>
    %32 = vector.shape_cast %31 : vector<32x64xf32> to vector<32x1x64xf32>
    %33 = arith.truncf %32 : vector<32x1x64xf32> to vector<32x1x64xbf16>
    "tpu.trace_start"() <{level = 10 : i32, message = "eod,ekd->eok"}> : () -> ()
    %cst_28 = arith.constant dense<0.000000e+00> : vector<32x1x64xf32>
    %34 = tpu.matmul %33, %23, %cst_28 {dimension_numbers = #tpu.dot_dimension_numbers<[2], [2], [1], [1], [0, 0, 0, 1, 1, 1], [0], [0]>} : vector<32x1x64xbf16>, vector<32x64x64xbf16>, vector<32x1x64xf32> -> vector<32x1x64xf32>
    "tpu.trace_stop"() : () -> ()
    %35 = vector.shape_cast %34 : vector<32x1x64xf32> to vector<32x64xf32>
    %36 = arith.truncf %35 : vector<32x64xf32> to vector<32x64xbf16>
    %cst_29 = arith.constant dense<0.000000e+00> : vector<16x64xf32>
    %37 = tpu.matmul %21, %36, %cst_29 {dimension_numbers = #tpu.dot_dimension_numbers<[1], [0], [0], [1], [0, 0, 1, 1], [], []>} : vector<16x32xbf16>, vector<32x64xbf16>, vector<16x64xf32> -> vector<16x64xf32>
    %38 = vector.broadcast %22 : vector<16x1xf32> to vector<16x64xf32>
    %39 = arith.mulf %37, %38 : vector<16x64xf32>
    %cst_30 = arith.constant dense<0.000000e+00> : vector<16x64xf32>
    %40 = tpu.matmul %7, %24, %cst_30 {dimension_numbers = #tpu.dot_dimension_numbers<[1], [0], [0], [1], [0, 0, 1, 1], [], []>} : vector<16x64xf32>, vector<64x64xf32>, vector<16x64xf32> -> vector<16x64xf32>
    %41 = arith.addf %40, %39 : vector<16x64xf32>
    %42 = vector.broadcast %25 : vector<1x64xf32> to vector<16x64xf32>
    %43 = arith.addf %41, %42 : vector<16x64xf32>
    %cst_31 = arith.constant 0.000000e+00 : f32
    %44 = vector.broadcast %cst_31 : f32 to vector<16x64xf32>
    %45 = arith.maximumf %43, %44 : vector<16x64xf32>
    %cst_32 = arith.constant dense<0.000000e+00> : vector<16x192xf32>
    %46 = tpu.matmul %45, %26, %cst_32 {dimension_numbers = #tpu.dot_dimension_numbers<[1], [0], [0], [1], [0, 0, 1, 1], [], []>} : vector<16x64xf32>, vector<64x192xf32>, vector<16x192xf32> -> vector<16x192xf32>
    %47 = vector.broadcast %27 : vector<1x192xf32> to vector<16x192xf32>
    %48 = arith.addf %46, %47 : vector<16x192xf32>
    %cst_33 = arith.constant dense<0.000000e+00> : vector<16x192xf32>
    %49 = tpu.matmul %7, %28, %cst_33 {dimension_numbers = #tpu.dot_dimension_numbers<[1], [0], [0], [1], [0, 0, 1, 1], [], []>} : vector<16x64xf32>, vector<64x192xf32>, vector<16x192xf32> -> vector<16x192xf32>
    %50 = vector.broadcast %29 : vector<1x192xf32> to vector<16x192xf32>
    %51 = arith.addf %49, %50 : vector<16x192xf32>
    %52 = vector.extract_strided_slice %48 {offsets = [0, 0], sizes = [16, 64], strides = [1, 1]} : vector<16x192xf32> to vector<16x64xf32>
    %53 = vector.extract_strided_slice %51 {offsets = [0, 0], sizes = [16, 64], strides = [1, 1]} : vector<16x192xf32> to vector<16x64xf32>
    %54 = arith.addf %52, %53 : vector<16x64xf32>
    %55 = arith.negf %54 : vector<16x64xf32>
    %56 = math.exp %55 : vector<16x64xf32>
    %cst_34 = arith.constant 1.000000e+00 : f32
    %57 = vector.broadcast %cst_34 : f32 to vector<16x64xf32>
    %58 = arith.addf %57, %56 : vector<16x64xf32>
    %59 = arith.divf %57, %58 : vector<16x64xf32>
    %60 = vector.extract_strided_slice %48 {offsets = [0, 64], sizes = [16, 64], strides = [1, 1]} : vector<16x192xf32> to vector<16x64xf32>
    %61 = vector.extract_strided_slice %51 {offsets = [0, 64], sizes = [16, 64], strides = [1, 1]} : vector<16x192xf32> to vector<16x64xf32>
    %62 = arith.addf %60, %61 : vector<16x64xf32>
    %63 = arith.negf %62 : vector<16x64xf32>
    %64 = math.exp %63 : vector<16x64xf32>
    %cst_35 = arith.constant 1.000000e+00 : f32
    %65 = vector.broadcast %cst_35 : f32 to vector<16x64xf32>
    %66 = arith.addf %65, %64 : vector<16x64xf32>
    %67 = arith.divf %65, %66 : vector<16x64xf32>
    %68 = vector.extract_strided_slice %48 {offsets = [0, 128], sizes = [16, 64], strides = [1, 1]} : vector<16x192xf32> to vector<16x64xf32>
    %69 = vector.extract_strided_slice %51 {offsets = [0, 128], sizes = [16, 64], strides = [1, 1]} : vector<16x192xf32> to vector<16x64xf32>
    %70 = arith.mulf %59, %69 : vector<16x64xf32>
    %71 = arith.addf %68, %70 : vector<16x64xf32>
    %72 = math.tanh %71 : vector<16x64xf32>
    %cst_36 = arith.constant 1.000000e+00 : f32
    %73 = vector.broadcast %cst_36 : f32 to vector<16x64xf32>
    %74 = arith.subf %73, %67 : vector<16x64xf32>
    %75 = arith.mulf %74, %72 : vector<16x64xf32>
    %76 = arith.mulf %67, %7 : vector<16x64xf32>
    %77 = arith.addf %75, %76 : vector<16x64xf32>
    %78 = arith.truncf %77 : vector<16x64xf32> to vector<16x64xbf16>
    %cst_37 = arith.constant dense<0.000000e+00> : vector<32x64xf32>
    %79 = tpu.matmul %14, %78, %cst_37 {dimension_numbers = #tpu.dot_dimension_numbers<[1], [0], [0], [1], [0, 0, 1, 1], [], []>} : vector<32x16xbf16>, vector<16x64xbf16>, vector<32x64xf32> -> vector<32x64xf32>
    %80 = vector.shape_cast %79 : vector<32x64xf32> to vector<32x1x64xf32>
    %81 = arith.truncf %80 : vector<32x1x64xf32> to vector<32x1x64xbf16>
    "tpu.trace_start"() <{level = 10 : i32, message = "eod,ekd->eok"}> : () -> ()
    %cst_38 = arith.constant dense<0.000000e+00> : vector<32x1x64xf32>
    %82 = tpu.matmul %81, %23, %cst_38 {dimension_numbers = #tpu.dot_dimension_numbers<[2], [2], [1], [1], [0, 0, 0, 1, 1, 1], [0], [0]>} : vector<32x1x64xbf16>, vector<32x64x64xbf16>, vector<32x1x64xf32> -> vector<32x1x64xf32>
    "tpu.trace_stop"() : () -> ()
    %83 = vector.shape_cast %82 : vector<32x1x64xf32> to vector<32x64xf32>
    %84 = arith.truncf %83 : vector<32x64xf32> to vector<32x64xbf16>
    %cst_39 = arith.constant dense<0.000000e+00> : vector<16x64xf32>
    %85 = tpu.matmul %21, %84, %cst_39 {dimension_numbers = #tpu.dot_dimension_numbers<[1], [0], [0], [1], [0, 0, 1, 1], [], []>} : vector<16x32xbf16>, vector<32x64xbf16>, vector<16x64xf32> -> vector<16x64xf32>
    %86 = vector.broadcast %22 : vector<16x1xf32> to vector<16x64xf32>
    %87 = arith.mulf %85, %86 : vector<16x64xf32>
    %cst_40 = arith.constant dense<0.000000e+00> : vector<16x64xf32>
    %88 = tpu.matmul %77, %24, %cst_40 {dimension_numbers = #tpu.dot_dimension_numbers<[1], [0], [0], [1], [0, 0, 1, 1], [], []>} : vector<16x64xf32>, vector<64x64xf32>, vector<16x64xf32> -> vector<16x64xf32>
    %89 = arith.addf %88, %87 : vector<16x64xf32>
    %90 = vector.broadcast %25 : vector<1x64xf32> to vector<16x64xf32>
    %91 = arith.addf %89, %90 : vector<16x64xf32>
    %cst_41 = arith.constant 0.000000e+00 : f32
    %92 = vector.broadcast %cst_41 : f32 to vector<16x64xf32>
    %93 = arith.maximumf %91, %92 : vector<16x64xf32>
    %cst_42 = arith.constant dense<0.000000e+00> : vector<16x192xf32>
    %94 = tpu.matmul %93, %26, %cst_42 {dimension_numbers = #tpu.dot_dimension_numbers<[1], [0], [0], [1], [0, 0, 1, 1], [], []>} : vector<16x64xf32>, vector<64x192xf32>, vector<16x192xf32> -> vector<16x192xf32>
    %95 = vector.broadcast %27 : vector<1x192xf32> to vector<16x192xf32>
    %96 = arith.addf %94, %95 : vector<16x192xf32>
    %cst_43 = arith.constant dense<0.000000e+00> : vector<16x192xf32>
    %97 = tpu.matmul %77, %28, %cst_43 {dimension_numbers = #tpu.dot_dimension_numbers<[1], [0], [0], [1], [0, 0, 1, 1], [], []>} : vector<16x64xf32>, vector<64x192xf32>, vector<16x192xf32> -> vector<16x192xf32>
    %98 = vector.broadcast %29 : vector<1x192xf32> to vector<16x192xf32>
    %99 = arith.addf %97, %98 : vector<16x192xf32>
    %100 = vector.extract_strided_slice %96 {offsets = [0, 0], sizes = [16, 64], strides = [1, 1]} : vector<16x192xf32> to vector<16x64xf32>
    %101 = vector.extract_strided_slice %99 {offsets = [0, 0], sizes = [16, 64], strides = [1, 1]} : vector<16x192xf32> to vector<16x64xf32>
    %102 = arith.addf %100, %101 : vector<16x64xf32>
    %103 = arith.negf %102 : vector<16x64xf32>
    %104 = math.exp %103 : vector<16x64xf32>
    %cst_44 = arith.constant 1.000000e+00 : f32
    %105 = vector.broadcast %cst_44 : f32 to vector<16x64xf32>
    %106 = arith.addf %105, %104 : vector<16x64xf32>
    %107 = arith.divf %105, %106 : vector<16x64xf32>
    %108 = vector.extract_strided_slice %96 {offsets = [0, 64], sizes = [16, 64], strides = [1, 1]} : vector<16x192xf32> to vector<16x64xf32>
    %109 = vector.extract_strided_slice %99 {offsets = [0, 64], sizes = [16, 64], strides = [1, 1]} : vector<16x192xf32> to vector<16x64xf32>
    %110 = arith.addf %108, %109 : vector<16x64xf32>
    %111 = arith.negf %110 : vector<16x64xf32>
    %112 = math.exp %111 : vector<16x64xf32>
    %cst_45 = arith.constant 1.000000e+00 : f32
    %113 = vector.broadcast %cst_45 : f32 to vector<16x64xf32>
    %114 = arith.addf %113, %112 : vector<16x64xf32>
    %115 = arith.divf %113, %114 : vector<16x64xf32>
    %116 = vector.extract_strided_slice %96 {offsets = [0, 128], sizes = [16, 64], strides = [1, 1]} : vector<16x192xf32> to vector<16x64xf32>
    %117 = vector.extract_strided_slice %99 {offsets = [0, 128], sizes = [16, 64], strides = [1, 1]} : vector<16x192xf32> to vector<16x64xf32>
    %118 = arith.mulf %107, %117 : vector<16x64xf32>
    %119 = arith.addf %116, %118 : vector<16x64xf32>
    %120 = math.tanh %119 : vector<16x64xf32>
    %cst_46 = arith.constant 1.000000e+00 : f32
    %121 = vector.broadcast %cst_46 : f32 to vector<16x64xf32>
    %122 = arith.subf %121, %115 : vector<16x64xf32>
    %123 = arith.mulf %122, %120 : vector<16x64xf32>
    %124 = arith.mulf %115, %77 : vector<16x64xf32>
    %125 = arith.addf %123, %124 : vector<16x64xf32>
    %126 = arith.truncf %125 : vector<16x64xf32> to vector<16x64xbf16>
    %cst_47 = arith.constant dense<0.000000e+00> : vector<32x64xf32>
    %127 = tpu.matmul %14, %126, %cst_47 {dimension_numbers = #tpu.dot_dimension_numbers<[1], [0], [0], [1], [0, 0, 1, 1], [], []>} : vector<32x16xbf16>, vector<16x64xbf16>, vector<32x64xf32> -> vector<32x64xf32>
    %128 = vector.shape_cast %127 : vector<32x64xf32> to vector<32x1x64xf32>
    %129 = arith.truncf %128 : vector<32x1x64xf32> to vector<32x1x64xbf16>
    "tpu.trace_start"() <{level = 10 : i32, message = "eod,ekd->eok"}> : () -> ()
    %cst_48 = arith.constant dense<0.000000e+00> : vector<32x1x64xf32>
    %130 = tpu.matmul %129, %23, %cst_48 {dimension_numbers = #tpu.dot_dimension_numbers<[2], [2], [1], [1], [0, 0, 0, 1, 1, 1], [0], [0]>} : vector<32x1x64xbf16>, vector<32x64x64xbf16>, vector<32x1x64xf32> -> vector<32x1x64xf32>
    "tpu.trace_stop"() : () -> ()
    %131 = vector.shape_cast %130 : vector<32x1x64xf32> to vector<32x64xf32>
    %132 = arith.truncf %131 : vector<32x64xf32> to vector<32x64xbf16>
    %cst_49 = arith.constant dense<0.000000e+00> : vector<16x64xf32>
    %133 = tpu.matmul %21, %132, %cst_49 {dimension_numbers = #tpu.dot_dimension_numbers<[1], [0], [0], [1], [0, 0, 1, 1], [], []>} : vector<16x32xbf16>, vector<32x64xbf16>, vector<16x64xf32> -> vector<16x64xf32>
    %134 = vector.broadcast %22 : vector<16x1xf32> to vector<16x64xf32>
    %135 = arith.mulf %133, %134 : vector<16x64xf32>
    %cst_50 = arith.constant dense<0.000000e+00> : vector<16x64xf32>
    %136 = tpu.matmul %125, %24, %cst_50 {dimension_numbers = #tpu.dot_dimension_numbers<[1], [0], [0], [1], [0, 0, 1, 1], [], []>} : vector<16x64xf32>, vector<64x64xf32>, vector<16x64xf32> -> vector<16x64xf32>
    %137 = arith.addf %136, %135 : vector<16x64xf32>
    %138 = vector.broadcast %25 : vector<1x64xf32> to vector<16x64xf32>
    %139 = arith.addf %137, %138 : vector<16x64xf32>
    %cst_51 = arith.constant 0.000000e+00 : f32
    %140 = vector.broadcast %cst_51 : f32 to vector<16x64xf32>
    %141 = arith.maximumf %139, %140 : vector<16x64xf32>
    %cst_52 = arith.constant dense<0.000000e+00> : vector<16x192xf32>
    %142 = tpu.matmul %141, %26, %cst_52 {dimension_numbers = #tpu.dot_dimension_numbers<[1], [0], [0], [1], [0, 0, 1, 1], [], []>} : vector<16x64xf32>, vector<64x192xf32>, vector<16x192xf32> -> vector<16x192xf32>
    %143 = vector.broadcast %27 : vector<1x192xf32> to vector<16x192xf32>
    %144 = arith.addf %142, %143 : vector<16x192xf32>
    %cst_53 = arith.constant dense<0.000000e+00> : vector<16x192xf32>
    %145 = tpu.matmul %125, %28, %cst_53 {dimension_numbers = #tpu.dot_dimension_numbers<[1], [0], [0], [1], [0, 0, 1, 1], [], []>} : vector<16x64xf32>, vector<64x192xf32>, vector<16x192xf32> -> vector<16x192xf32>
    %146 = vector.broadcast %29 : vector<1x192xf32> to vector<16x192xf32>
    %147 = arith.addf %145, %146 : vector<16x192xf32>
    %148 = vector.extract_strided_slice %144 {offsets = [0, 0], sizes = [16, 64], strides = [1, 1]} : vector<16x192xf32> to vector<16x64xf32>
    %149 = vector.extract_strided_slice %147 {offsets = [0, 0], sizes = [16, 64], strides = [1, 1]} : vector<16x192xf32> to vector<16x64xf32>
    %150 = arith.addf %148, %149 : vector<16x64xf32>
    %151 = arith.negf %150 : vector<16x64xf32>
    %152 = math.exp %151 : vector<16x64xf32>
    %cst_54 = arith.constant 1.000000e+00 : f32
    %153 = vector.broadcast %cst_54 : f32 to vector<16x64xf32>
    %154 = arith.addf %153, %152 : vector<16x64xf32>
    %155 = arith.divf %153, %154 : vector<16x64xf32>
    %156 = vector.extract_strided_slice %144 {offsets = [0, 64], sizes = [16, 64], strides = [1, 1]} : vector<16x192xf32> to vector<16x64xf32>
    %157 = vector.extract_strided_slice %147 {offsets = [0, 64], sizes = [16, 64], strides = [1, 1]} : vector<16x192xf32> to vector<16x64xf32>
    %158 = arith.addf %156, %157 : vector<16x64xf32>
    %159 = arith.negf %158 : vector<16x64xf32>
    %160 = math.exp %159 : vector<16x64xf32>
    %cst_55 = arith.constant 1.000000e+00 : f32
    %161 = vector.broadcast %cst_55 : f32 to vector<16x64xf32>
    %162 = arith.addf %161, %160 : vector<16x64xf32>
    %163 = arith.divf %161, %162 : vector<16x64xf32>
    %164 = vector.extract_strided_slice %144 {offsets = [0, 128], sizes = [16, 64], strides = [1, 1]} : vector<16x192xf32> to vector<16x64xf32>
    %165 = vector.extract_strided_slice %147 {offsets = [0, 128], sizes = [16, 64], strides = [1, 1]} : vector<16x192xf32> to vector<16x64xf32>
    %166 = arith.mulf %155, %165 : vector<16x64xf32>
    %167 = arith.addf %164, %166 : vector<16x64xf32>
    %168 = math.tanh %167 : vector<16x64xf32>
    %cst_56 = arith.constant 1.000000e+00 : f32
    %169 = vector.broadcast %cst_56 : f32 to vector<16x64xf32>
    %170 = arith.subf %169, %163 : vector<16x64xf32>
    %171 = arith.mulf %170, %168 : vector<16x64xf32>
    %172 = arith.mulf %163, %125 : vector<16x64xf32>
    %173 = arith.addf %171, %172 : vector<16x64xf32>
    %174 = tpu.iota {dimensions = array<i32: 0>} : vector<8x16xi32>
    %c0_57 = arith.constant 0 : index
    %c0_58 = arith.constant 0 : index
    %175 = vector.load %arg13[%c0_57, %c0_58] : memref<1x16xi32, #tpu.memory_space<vmem>>, vector<1x16xi32>
    %176 = vector.broadcast %175 : vector<1x16xi32> to vector<8x16xi32>
    %177 = arith.cmpi eq, %176, %174 : vector<8x16xi32>
    %178 = arith.extui %177 : vector<8x16xi1> to vector<8x16xi32>
    %179 = arith.sitofp %178 : vector<8x16xi32> to vector<8x16xf32>
    %cst_59 = arith.constant 0.000000e+00 : f32
    %180 = vector.broadcast %cst_59 : f32 to vector<8x16xf32>
    %181 = arith.cmpf ogt, %179, %180 : vector<8x16xf32>
    %cst_60 = arith.constant 0.000000e+00 : f32
    %cst_61 = arith.constant -1.000000e+30 : f32
    %182 = vector.broadcast %cst_60 : f32 to vector<8x16xf32>
    %183 = vector.broadcast %cst_61 : f32 to vector<8x16xf32>
    %184 = arith.select %181, %182, %183 : vector<8x16xi1>, vector<8x16xf32>
    %cst_62 = arith.constant 0.000000e+00 : f32
    %185 = vector.broadcast %cst_62 : f32 to vector<8x64xf32>
    %cst_63 = arith.constant 0.000000e+00 : f32
    %186 = vector.broadcast %cst_63 : f32 to vector<8x64xf32>
    %cst_64 = arith.constant 0.000000e+00 : f32
    %187 = vector.broadcast %cst_64 : f32 to vector<8x64xf32>
    %cst_65 = arith.constant 0.000000e+00 : f32
    %188 = vector.broadcast %cst_65 : f32 to vector<8x64xf32>
    %c0_66 = arith.constant 0 : index
    %c0_67 = arith.constant 0 : index
    %189 = vector.load %arg14[%c0_66, %c0_67] : memref<64x256xf32, #tpu.memory_space<vmem>>, vector<64x256xf32>
    %cst_68 = arith.constant dense<0.000000e+00> : vector<8x256xf32>
    %190 = tpu.matmul %185, %189, %cst_68 {dimension_numbers = #tpu.dot_dimension_numbers<[1], [0], [0], [1], [0, 0, 1, 1], [], []>} : vector<8x64xf32>, vector<64x256xf32>, vector<8x256xf32> -> vector<8x256xf32>
    %c0_69 = arith.constant 0 : index
    %c0_70 = arith.constant 0 : index
    %191 = vector.load %arg15[%c0_69, %c0_70] : memref<64x256xf32, #tpu.memory_space<vmem>>, vector<64x256xf32>
    %cst_71 = arith.constant dense<0.000000e+00> : vector<8x256xf32>
    %192 = tpu.matmul %186, %191, %cst_71 {dimension_numbers = #tpu.dot_dimension_numbers<[1], [0], [0], [1], [0, 0, 1, 1], [], []>} : vector<8x64xf32>, vector<64x256xf32>, vector<8x256xf32> -> vector<8x256xf32>
    %193 = arith.addf %190, %192 : vector<8x256xf32>
    %c0_72 = arith.constant 0 : index
    %c0_73 = arith.constant 0 : index
    %194 = vector.load %arg16[%c0_72, %c0_73] : memref<64x256xf32, #tpu.memory_space<vmem>>, vector<64x256xf32>
    %cst_74 = arith.constant dense<0.000000e+00> : vector<8x256xf32>
    %195 = tpu.matmul %187, %194, %cst_74 {dimension_numbers = #tpu.dot_dimension_numbers<[1], [0], [0], [1], [0, 0, 1, 1], [], []>} : vector<8x64xf32>, vector<64x256xf32>, vector<8x256xf32> -> vector<8x256xf32>
    %196 = arith.addf %193, %195 : vector<8x256xf32>
    %c0_75 = arith.constant 0 : index
    %c0_76 = arith.constant 0 : index
    %197 = vector.load %arg17[%c0_75, %c0_76] : memref<1x256xf32, #tpu.memory_space<vmem>>, vector<1x256xf32>
    %198 = vector.broadcast %197 : vector<1x256xf32> to vector<8x256xf32>
    %199 = arith.addf %196, %198 : vector<8x256xf32>
    %200 = vector.extract_strided_slice %199 {offsets = [0, 0], sizes = [8, 64], strides = [1, 1]} : vector<8x256xf32> to vector<8x64xf32>
    %201 = arith.negf %200 : vector<8x64xf32>
    %202 = math.exp %201 : vector<8x64xf32>
    %cst_77 = arith.constant 1.000000e+00 : f32
    %203 = vector.broadcast %cst_77 : f32 to vector<8x64xf32>
    %204 = arith.addf %203, %202 : vector<8x64xf32>
    %205 = arith.divf %203, %204 : vector<8x64xf32>
    %206 = vector.extract_strided_slice %199 {offsets = [0, 64], sizes = [8, 64], strides = [1, 1]} : vector<8x256xf32> to vector<8x64xf32>
    %207 = arith.negf %206 : vector<8x64xf32>
    %208 = math.exp %207 : vector<8x64xf32>
    %cst_78 = arith.constant 1.000000e+00 : f32
    %209 = vector.broadcast %cst_78 : f32 to vector<8x64xf32>
    %210 = arith.addf %209, %208 : vector<8x64xf32>
    %211 = arith.divf %209, %210 : vector<8x64xf32>
    %212 = vector.extract_strided_slice %199 {offsets = [0, 128], sizes = [8, 64], strides = [1, 1]} : vector<8x256xf32> to vector<8x64xf32>
    %213 = math.tanh %212 : vector<8x64xf32>
    %214 = vector.extract_strided_slice %199 {offsets = [0, 192], sizes = [8, 64], strides = [1, 1]} : vector<8x256xf32> to vector<8x64xf32>
    %215 = arith.negf %214 : vector<8x64xf32>
    %216 = math.exp %215 : vector<8x64xf32>
    %cst_79 = arith.constant 1.000000e+00 : f32
    %217 = vector.broadcast %cst_79 : f32 to vector<8x64xf32>
    %218 = arith.addf %217, %216 : vector<8x64xf32>
    %219 = arith.divf %217, %218 : vector<8x64xf32>
    %220 = arith.mulf %211, %188 : vector<8x64xf32>
    %221 = arith.mulf %205, %213 : vector<8x64xf32>
    %222 = arith.addf %220, %221 : vector<8x64xf32>
    %223 = math.tanh %222 : vector<8x64xf32>
    %224 = arith.mulf %219, %223 : vector<8x64xf32>
    %cst_80 = arith.constant dense<0.000000e+00> : vector<8x16xf32>
    %225 = tpu.matmul %224, %173, %cst_80 {dimension_numbers = #tpu.dot_dimension_numbers<[1], [1], [0], [0], [0, 0, 1, 0], [], []>} : vector<8x64xf32>, vector<16x64xf32>, vector<8x16xf32> -> vector<8x16xf32>
    %226 = arith.addf %225, %184 : vector<8x16xf32>
    %cst_81 = arith.constant dense<0xFF800000> : vector<8xf32>
    %227 = vector.multi_reduction <maximumf>, %226, %cst_81 [1] : vector<8x16xf32> to vector<8xf32>
    %228 = vector.shape_cast %227 : vector<8xf32> to vector<8x1xf32>
    %229 = vector.broadcast %228 : vector<8x1xf32> to vector<8x16xf32>
    %230 = arith.subf %226, %229 : vector<8x16xf32>
    %231 = math.exp %230 : vector<8x16xf32>
    %232 = arith.mulf %231, %179 : vector<8x16xf32>
    %cst_82 = arith.constant dense<0.000000e+00> : vector<8xf32>
    %233 = vector.multi_reduction <add>, %232, %cst_82 [1] : vector<8x16xf32> to vector<8xf32>
    %234 = vector.shape_cast %233 : vector<8xf32> to vector<8x1xf32>
    %cst_83 = arith.constant 9.99999968E-21 : f32
    %235 = vector.broadcast %cst_83 : f32 to vector<8x1xf32>
    %236 = arith.maximumf %234, %235 : vector<8x1xf32>
    %237 = tpu.reciprocal %236 {approx = true} : vector<8x1xf32> -> vector<8x1xf32>
    %238 = vector.broadcast %237 : vector<8x1xf32> to vector<8x16xf32>
    %239 = arith.mulf %232, %238 : vector<8x16xf32>
    %cst_84 = arith.constant dense<0.000000e+00> : vector<8x64xf32>
    %240 = tpu.matmul %239, %173, %cst_84 {dimension_numbers = #tpu.dot_dimension_numbers<[1], [0], [0], [1], [0, 0, 1, 1], [], []>} : vector<8x16xf32>, vector<16x64xf32>, vector<8x64xf32> -> vector<8x64xf32>
    %c0_85 = arith.constant 0 : index
    %c0_86 = arith.constant 0 : index
    %241 = vector.load %arg14[%c0_85, %c0_86] : memref<64x256xf32, #tpu.memory_space<vmem>>, vector<64x256xf32>
    %cst_87 = arith.constant dense<0.000000e+00> : vector<8x256xf32>
    %242 = tpu.matmul %224, %241, %cst_87 {dimension_numbers = #tpu.dot_dimension_numbers<[1], [0], [0], [1], [0, 0, 1, 1], [], []>} : vector<8x64xf32>, vector<64x256xf32>, vector<8x256xf32> -> vector<8x256xf32>
    %c0_88 = arith.constant 0 : index
    %c0_89 = arith.constant 0 : index
    %243 = vector.load %arg15[%c0_88, %c0_89] : memref<64x256xf32, #tpu.memory_space<vmem>>, vector<64x256xf32>
    %cst_90 = arith.constant dense<0.000000e+00> : vector<8x256xf32>
    %244 = tpu.matmul %240, %243, %cst_90 {dimension_numbers = #tpu.dot_dimension_numbers<[1], [0], [0], [1], [0, 0, 1, 1], [], []>} : vector<8x64xf32>, vector<64x256xf32>, vector<8x256xf32> -> vector<8x256xf32>
    %245 = arith.addf %242, %244 : vector<8x256xf32>
    %c0_91 = arith.constant 0 : index
    %c0_92 = arith.constant 0 : index
    %246 = vector.load %arg16[%c0_91, %c0_92] : memref<64x256xf32, #tpu.memory_space<vmem>>, vector<64x256xf32>
    %cst_93 = arith.constant dense<0.000000e+00> : vector<8x256xf32>
    %247 = tpu.matmul %224, %246, %cst_93 {dimension_numbers = #tpu.dot_dimension_numbers<[1], [0], [0], [1], [0, 0, 1, 1], [], []>} : vector<8x64xf32>, vector<64x256xf32>, vector<8x256xf32> -> vector<8x256xf32>
    %248 = arith.addf %245, %247 : vector<8x256xf32>
    %c0_94 = arith.constant 0 : index
    %c0_95 = arith.constant 0 : index
    %249 = vector.load %arg17[%c0_94, %c0_95] : memref<1x256xf32, #tpu.memory_space<vmem>>, vector<1x256xf32>
    %250 = vector.broadcast %249 : vector<1x256xf32> to vector<8x256xf32>
    %251 = arith.addf %248, %250 : vector<8x256xf32>
    %252 = vector.extract_strided_slice %251 {offsets = [0, 0], sizes = [8, 64], strides = [1, 1]} : vector<8x256xf32> to vector<8x64xf32>
    %253 = arith.negf %252 : vector<8x64xf32>
    %254 = math.exp %253 : vector<8x64xf32>
    %cst_96 = arith.constant 1.000000e+00 : f32
    %255 = vector.broadcast %cst_96 : f32 to vector<8x64xf32>
    %256 = arith.addf %255, %254 : vector<8x64xf32>
    %257 = arith.divf %255, %256 : vector<8x64xf32>
    %258 = vector.extract_strided_slice %251 {offsets = [0, 64], sizes = [8, 64], strides = [1, 1]} : vector<8x256xf32> to vector<8x64xf32>
    %259 = arith.negf %258 : vector<8x64xf32>
    %260 = math.exp %259 : vector<8x64xf32>
    %cst_97 = arith.constant 1.000000e+00 : f32
    %261 = vector.broadcast %cst_97 : f32 to vector<8x64xf32>
    %262 = arith.addf %261, %260 : vector<8x64xf32>
    %263 = arith.divf %261, %262 : vector<8x64xf32>
    %264 = vector.extract_strided_slice %251 {offsets = [0, 128], sizes = [8, 64], strides = [1, 1]} : vector<8x256xf32> to vector<8x64xf32>
    %265 = math.tanh %264 : vector<8x64xf32>
    %266 = vector.extract_strided_slice %251 {offsets = [0, 192], sizes = [8, 64], strides = [1, 1]} : vector<8x256xf32> to vector<8x64xf32>
    %267 = arith.negf %266 : vector<8x64xf32>
    %268 = math.exp %267 : vector<8x64xf32>
    %cst_98 = arith.constant 1.000000e+00 : f32
    %269 = vector.broadcast %cst_98 : f32 to vector<8x64xf32>
    %270 = arith.addf %269, %268 : vector<8x64xf32>
    %271 = arith.divf %269, %270 : vector<8x64xf32>
    %272 = arith.mulf %263, %222 : vector<8x64xf32>
    %273 = arith.mulf %257, %265 : vector<8x64xf32>
    %274 = arith.addf %272, %273 : vector<8x64xf32>
    %275 = math.tanh %274 : vector<8x64xf32>
    %276 = arith.mulf %271, %275 : vector<8x64xf32>
    %cst_99 = arith.constant dense<0.000000e+00> : vector<8x16xf32>
    %277 = tpu.matmul %276, %173, %cst_99 {dimension_numbers = #tpu.dot_dimension_numbers<[1], [1], [0], [0], [0, 0, 1, 0], [], []>} : vector<8x64xf32>, vector<16x64xf32>, vector<8x16xf32> -> vector<8x16xf32>
    %278 = arith.addf %277, %184 : vector<8x16xf32>
    %cst_100 = arith.constant dense<0xFF800000> : vector<8xf32>
    %279 = vector.multi_reduction <maximumf>, %278, %cst_100 [1] : vector<8x16xf32> to vector<8xf32>
    %280 = vector.shape_cast %279 : vector<8xf32> to vector<8x1xf32>
    %281 = vector.broadcast %280 : vector<8x1xf32> to vector<8x16xf32>
    %282 = arith.subf %278, %281 : vector<8x16xf32>
    %283 = math.exp %282 : vector<8x16xf32>
    %284 = arith.mulf %283, %179 : vector<8x16xf32>
    %cst_101 = arith.constant dense<0.000000e+00> : vector<8xf32>
    %285 = vector.multi_reduction <add>, %284, %cst_101 [1] : vector<8x16xf32> to vector<8xf32>
    %286 = vector.shape_cast %285 : vector<8xf32> to vector<8x1xf32>
    %cst_102 = arith.constant 9.99999968E-21 : f32
    %287 = vector.broadcast %cst_102 : f32 to vector<8x1xf32>
    %288 = arith.maximumf %286, %287 : vector<8x1xf32>
    %289 = tpu.reciprocal %288 {approx = true} : vector<8x1xf32> -> vector<8x1xf32>
    %290 = vector.broadcast %289 : vector<8x1xf32> to vector<8x16xf32>
    %291 = arith.mulf %284, %290 : vector<8x16xf32>
    %cst_103 = arith.constant dense<0.000000e+00> : vector<8x64xf32>
    %292 = tpu.matmul %291, %173, %cst_103 {dimension_numbers = #tpu.dot_dimension_numbers<[1], [0], [0], [1], [0, 0, 1, 1], [], []>} : vector<8x16xf32>, vector<16x64xf32>, vector<8x64xf32> -> vector<8x64xf32>
    %c0_104 = arith.constant 0 : index
    %c0_105 = arith.constant 0 : index
    %293 = vector.load %arg14[%c0_104, %c0_105] : memref<64x256xf32, #tpu.memory_space<vmem>>, vector<64x256xf32>
    %cst_106 = arith.constant dense<0.000000e+00> : vector<8x256xf32>
    %294 = tpu.matmul %276, %293, %cst_106 {dimension_numbers = #tpu.dot_dimension_numbers<[1], [0], [0], [1], [0, 0, 1, 1], [], []>} : vector<8x64xf32>, vector<64x256xf32>, vector<8x256xf32> -> vector<8x256xf32>
    %c0_107 = arith.constant 0 : index
    %c0_108 = arith.constant 0 : index
    %295 = vector.load %arg15[%c0_107, %c0_108] : memref<64x256xf32, #tpu.memory_space<vmem>>, vector<64x256xf32>
    %cst_109 = arith.constant dense<0.000000e+00> : vector<8x256xf32>
    %296 = tpu.matmul %292, %295, %cst_109 {dimension_numbers = #tpu.dot_dimension_numbers<[1], [0], [0], [1], [0, 0, 1, 1], [], []>} : vector<8x64xf32>, vector<64x256xf32>, vector<8x256xf32> -> vector<8x256xf32>
    %297 = arith.addf %294, %296 : vector<8x256xf32>
    %c0_110 = arith.constant 0 : index
    %c0_111 = arith.constant 0 : index
    %298 = vector.load %arg16[%c0_110, %c0_111] : memref<64x256xf32, #tpu.memory_space<vmem>>, vector<64x256xf32>
    %cst_112 = arith.constant dense<0.000000e+00> : vector<8x256xf32>
    %299 = tpu.matmul %276, %298, %cst_112 {dimension_numbers = #tpu.dot_dimension_numbers<[1], [0], [0], [1], [0, 0, 1, 1], [], []>} : vector<8x64xf32>, vector<64x256xf32>, vector<8x256xf32> -> vector<8x256xf32>
    %300 = arith.addf %297, %299 : vector<8x256xf32>
    %c0_113 = arith.constant 0 : index
    %c0_114 = arith.constant 0 : index
    %301 = vector.load %arg17[%c0_113, %c0_114] : memref<1x256xf32, #tpu.memory_space<vmem>>, vector<1x256xf32>
    %302 = vector.broadcast %301 : vector<1x256xf32> to vector<8x256xf32>
    %303 = arith.addf %300, %302 : vector<8x256xf32>
    %304 = vector.extract_strided_slice %303 {offsets = [0, 0], sizes = [8, 64], strides = [1, 1]} : vector<8x256xf32> to vector<8x64xf32>
    %305 = arith.negf %304 : vector<8x64xf32>
    %306 = math.exp %305 : vector<8x64xf32>
    %cst_115 = arith.constant 1.000000e+00 : f32
    %307 = vector.broadcast %cst_115 : f32 to vector<8x64xf32>
    %308 = arith.addf %307, %306 : vector<8x64xf32>
    %309 = arith.divf %307, %308 : vector<8x64xf32>
    %310 = vector.extract_strided_slice %303 {offsets = [0, 64], sizes = [8, 64], strides = [1, 1]} : vector<8x256xf32> to vector<8x64xf32>
    %311 = arith.negf %310 : vector<8x64xf32>
    %312 = math.exp %311 : vector<8x64xf32>
    %cst_116 = arith.constant 1.000000e+00 : f32
    %313 = vector.broadcast %cst_116 : f32 to vector<8x64xf32>
    %314 = arith.addf %313, %312 : vector<8x64xf32>
    %315 = arith.divf %313, %314 : vector<8x64xf32>
    %316 = vector.extract_strided_slice %303 {offsets = [0, 128], sizes = [8, 64], strides = [1, 1]} : vector<8x256xf32> to vector<8x64xf32>
    %317 = math.tanh %316 : vector<8x64xf32>
    %318 = vector.extract_strided_slice %303 {offsets = [0, 192], sizes = [8, 64], strides = [1, 1]} : vector<8x256xf32> to vector<8x64xf32>
    %319 = arith.negf %318 : vector<8x64xf32>
    %320 = math.exp %319 : vector<8x64xf32>
    %cst_117 = arith.constant 1.000000e+00 : f32
    %321 = vector.broadcast %cst_117 : f32 to vector<8x64xf32>
    %322 = arith.addf %321, %320 : vector<8x64xf32>
    %323 = arith.divf %321, %322 : vector<8x64xf32>
    %324 = arith.mulf %315, %274 : vector<8x64xf32>
    %325 = arith.mulf %309, %317 : vector<8x64xf32>
    %326 = arith.addf %324, %325 : vector<8x64xf32>
    %327 = math.tanh %326 : vector<8x64xf32>
    %328 = arith.mulf %323, %327 : vector<8x64xf32>
    %cst_118 = arith.constant dense<0.000000e+00> : vector<8x16xf32>
    %329 = tpu.matmul %328, %173, %cst_118 {dimension_numbers = #tpu.dot_dimension_numbers<[1], [1], [0], [0], [0, 0, 1, 0], [], []>} : vector<8x64xf32>, vector<16x64xf32>, vector<8x16xf32> -> vector<8x16xf32>
    %330 = arith.addf %329, %184 : vector<8x16xf32>
    %cst_119 = arith.constant dense<0xFF800000> : vector<8xf32>
    %331 = vector.multi_reduction <maximumf>, %330, %cst_119 [1] : vector<8x16xf32> to vector<8xf32>
    %332 = vector.shape_cast %331 : vector<8xf32> to vector<8x1xf32>
    %333 = vector.broadcast %332 : vector<8x1xf32> to vector<8x16xf32>
    %334 = arith.subf %330, %333 : vector<8x16xf32>
    %335 = math.exp %334 : vector<8x16xf32>
    %336 = arith.mulf %335, %179 : vector<8x16xf32>
    %cst_120 = arith.constant dense<0.000000e+00> : vector<8xf32>
    %337 = vector.multi_reduction <add>, %336, %cst_120 [1] : vector<8x16xf32> to vector<8xf32>
    %338 = vector.shape_cast %337 : vector<8xf32> to vector<8x1xf32>
    %cst_121 = arith.constant 9.99999968E-21 : f32
    %339 = vector.broadcast %cst_121 : f32 to vector<8x1xf32>
    %340 = arith.maximumf %338, %339 : vector<8x1xf32>
    %341 = tpu.reciprocal %340 {approx = true} : vector<8x1xf32> -> vector<8x1xf32>
    %342 = vector.broadcast %341 : vector<8x1xf32> to vector<8x16xf32>
    %343 = arith.mulf %336, %342 : vector<8x16xf32>
    %cst_122 = arith.constant dense<0.000000e+00> : vector<8x64xf32>
    %344 = tpu.matmul %343, %173, %cst_122 {dimension_numbers = #tpu.dot_dimension_numbers<[1], [0], [0], [1], [0, 0, 1, 1], [], []>} : vector<8x16xf32>, vector<16x64xf32>, vector<8x64xf32> -> vector<8x64xf32>
    %c0_123 = arith.constant 0 : index
    %c0_124 = arith.constant 0 : index
    %345 = vector.load %arg18[%c0_123, %c0_124] : memref<64x64xf32, #tpu.memory_space<vmem>>, vector<64x64xf32>
    %cst_125 = arith.constant dense<0.000000e+00> : vector<8x64xf32>
    %346 = tpu.matmul %328, %345, %cst_125 {dimension_numbers = #tpu.dot_dimension_numbers<[1], [0], [0], [1], [0, 0, 1, 1], [], []>} : vector<8x64xf32>, vector<64x64xf32>, vector<8x64xf32> -> vector<8x64xf32>
    %c0_126 = arith.constant 0 : index
    %c0_127 = arith.constant 0 : index
    %347 = vector.load %arg19[%c0_126, %c0_127] : memref<64x64xf32, #tpu.memory_space<vmem>>, vector<64x64xf32>
    %cst_128 = arith.constant dense<0.000000e+00> : vector<8x64xf32>
    %348 = tpu.matmul %344, %347, %cst_128 {dimension_numbers = #tpu.dot_dimension_numbers<[1], [0], [0], [1], [0, 0, 1, 1], [], []>} : vector<8x64xf32>, vector<64x64xf32>, vector<8x64xf32> -> vector<8x64xf32>
    %349 = arith.addf %346, %348 : vector<8x64xf32>
    %c0_129 = arith.constant 0 : index
    %c0_130 = arith.constant 0 : index
    %350 = vector.load %arg20[%c0_129, %c0_130] : memref<1x64xf32, #tpu.memory_space<vmem>>, vector<1x64xf32>
    %351 = vector.broadcast %350 : vector<1x64xf32> to vector<8x64xf32>
    %352 = arith.addf %349, %351 : vector<8x64xf32>
    %cst_131 = arith.constant 0.000000e+00 : f32
    %353 = vector.broadcast %cst_131 : f32 to vector<8x64xf32>
    %354 = arith.maximumf %352, %353 : vector<8x64xf32>
    %c0_132 = arith.constant 0 : index
    %c0_133 = arith.constant 0 : index
    %355 = vector.load %arg21[%c0_132, %c0_133] : memref<64x1xf32, #tpu.memory_space<vmem>>, vector<64x1xf32>
    %cst_134 = arith.constant dense<0.000000e+00> : vector<8x1xf32>
    %356 = tpu.matmul %354, %355, %cst_134 {dimension_numbers = #tpu.dot_dimension_numbers<[1], [0], [0], [1], [0, 0, 1, 1], [], []>} : vector<8x64xf32>, vector<64x1xf32>, vector<8x1xf32> -> vector<8x1xf32>
    %c0_135 = arith.constant 0 : index
    %c0_136 = arith.constant 0 : index
    %357 = vector.load %arg22[%c0_135, %c0_136] : memref<1x1xf32, #tpu.memory_space<vmem>>, vector<1x1xf32>
    %358 = vector.broadcast %357 : vector<1x1xf32> to vector<8x1xf32>
    %359 = arith.addf %356, %358 : vector<8x1xf32>
    %c0_137 = arith.constant 0 : index
    %c0_138 = arith.constant 0 : index
    %360 = vector.load %arg23[%c0_137, %c0_138] : memref<8x1xf32, #tpu.memory_space<vmem>>, vector<8x1xf32>
    tpu.vector_store %arg23[%c0_137, %c0_138], %359 {strides = array<i32>} : memref<8x1xf32, #tpu.memory_space<vmem>>, vector<8x1xf32>,
    return
  }
}

</mosaic_0001>

<bundles_post_ra>
// kernel: net_forward.2
= control target key start
LH: loop header
LB: loop body
LE: loop exit
PB: predicated region body
PF: predicated region fallthrough
CT: control target
= control target key end

     0   :  { %10 = vsyncpa [#allocation3], 0  ;;  %s3589_s18 = smov [#allocation2]   ;;  %s4016_s0 = inlined_call_operand.vmem [shape: f32[32,5], index: 0, kind: input, shape index: {}]   ;;  %s4017_s1 = inlined_call_operand.vmem [shape: f32[5,128], index: 1, kind: input, shape index: {}]   ;;  %s4018_s2 = inlined_call_operand.vmem [shape: f32[1,128], index: 2, kind: input, shape index: {}]   ;;  %s4019_s3 = inlined_call_operand.hbm [shape: bf16[128,4096], index: 3, kind: input, shape index: {}]   ;;  %s4020_s4 = inlined_call_operand.vmem [shape: f32[1,4096], index: 4, kind: input, shape index: {}]   ;;  %s4021_s5 = inlined_call_operand.vmem [shape: bf16[32,4096], index: 5, kind: output, shape index: {}]  }
   0x1   :  { %s22_s19 = sshll.u32 %s3589_s18, 4  ;;  %s23_s19 = int_to_ptr.vmem [resolvable:$true] %s22_s19 }
   0x2   :  { %s3575_s20 = scalar_lea.vmem %s23_s19, 32768  ;;  %p3580_p1 = scmp.lt.s32.totalorder %s23_s19, %s23_s19 }
   0x3   :  { %p3576_p0 = scmp.ne.s32.totalorder %s23_s19, %s3575_s20  ;;  %p3581_p2 = scmp.lt.s32.totalorder %s3575_s20, %s3575_s20 }
   0x5   :  { %p3582_p3 = por %p3581_p2, %p3580_p1 }
   0x7   :  { %p3583_p4 = pnand %p3582_p3, %p3576_p0 }
   0x9   :  { %3586 = shalt.err (!%p3583_p4)
}
   0xa   :  { %s3590_s21 = smov 2048   ;;  %s3591_s22 = smov 128  }
   0xb   :  { %28 = dma.hbm_to_vmem [thread:$0]  %s4019_s3, 32768, %s23_s19, [#allocation3], %s3590_s21, %s3590_s21, %s3591_s22  }
   0xc   :  { %3587 = dma.done.wait [#allocation3], 32768  }
   0xd   :  { %3588 = vsyncadd [#allocation3], 4294934528  ;;  %vm60_vm0 = vcmask 1044480   ;;  %vm47_vm1 = vcmask 39936   ;;  %v39_v0 = vld [vmem:[%s4017_s1] sm:$0x1f] }
   0xe   :  { %v35_v1 = vld [vmem:[%s4016_s0] sm:$0xff]  ;;  %v36_v2 = vld [vmem:[%s4016_s0 + $0x8] sm:$0xff]  ;;  %3555 = vmatprep.subr.msk.mxu0 %vm60_vm0, %v39_v0  ;;  %v37_v3 = vld [vmem:[%s4016_s0 + $0x10] sm:$0xff] }
   0xf   :  { %3557 = vmatprep.mubr.msk.f32.mxu0 %vm47_vm1, %v35_v1  ;;  %v379_v4 = vld [vmem:[#allocation2 + $0x700] sm:$0xff]  ;;  %3556 = vmatpush3.msk.msra.mxu0 %vm60_vm0, %v39_v0  ;;  %v38_v5 = vld [vmem:[%s4016_s0 + $0x18] sm:$0xff]  ;;  %v380_v7 = vld [vmem:[#allocation2 + $0x708] sm:$0xff] }
  0x10   :  { %v395_v6 = vld [vmem:[#allocation2 + $0x780] sm:$0xff]  ;;  %v396_v8 = vld [vmem:[#allocation2 + $0x788] sm:$0xff]  ;;  %3558 = vmatmul.mubr.msk.f32.vlgmr.msra.gmra.mxu0 %vm47_vm1, %v36_v2 }
  0x11   :  { %v3391_v9 = vcombine.high %v379_v4, %v395_v6  ;;  %v3392_v10 = vcombine.low %v380_v7, %v396_v8  ;;  %v3393_v11 = vcombine.high %v380_v7, %v396_v8  ;;  %v3390_v12 = vcombine.low %v379_v4, %v395_v6  ;;  %v347_v13 = vld [vmem:[#allocation2 + $0x600] sm:$0xff]  ;;  %v348_v15 = vld [vmem:[#allocation2 + $0x608] sm:$0xff]  ;;  %3560 = vmatprep.mubr.msk.f32.mxu0 %vm47_vm1, %v37_v3  ;;  %v397_v6 = vld [vmem:[#allocation2 + $0x790] sm:$0xff] }
  0x12   :  { %v363_v14 = vld [vmem:[#allocation2 + $0x680] sm:$0xff]  ;;  %v364_v17 = vld [vmem:[#allocation2 + $0x688] sm:$0xff]  ;;  %v382_v7 = vld [vmem:[#allocation2 + $0x718] sm:$0xff] }
  0x13   :  { %v3359_v16 = vcombine.high %v347_v13, %v363_v14  ;;  %v315_v18 = vld [vmem:[#allocation2 + $0x500] sm:$0xff]  ;;  %1859 = vmatprep.subr.bf16.mxu1 %v3391_v9  ;;  %1912 = vmatprep.subr.bf16.mxu0 %v3393_v11  ;;  %v3361_v20 = vcombine.high %v348_v15, %v364_v17  ;;  %v316_v21 = vld [vmem:[#allocation2 + $0x508] sm:$0xff]  ;;  %v3360_v23 = vcombine.low %v348_v15, %v364_v17  ;;  %v398_v9 = vld [vmem:[#allocation2 + $0x798] sm:$0xff] }
  0x14   :  { %v331_v19 = vld [vmem:[#allocation2 + $0x580] sm:$0xff]  ;;  %v332_v22 = vld [vmem:[#allocation2 + $0x588] sm:$0xff]  ;;  %1860 = vmatpush1.bf16.msra.mxu1 %v3390_v12  ;;  %1913 = vmatpush1.bf16.msra.mxu0 %v3392_v10  ;;  %v3358_v24 = vcombine.low %v347_v13, %v363_v14  ;;  %v3396_v11 = vcombine.low %v382_v7, %v398_v9  ;;  %v3397_v12 = vcombine.high %v382_v7, %v398_v9  ;;  %v3592_v13 = vmov 0  }
  0x15   :  { %3561 = vmatmul.mubr.msk.f32.gmra.mxu0 %vm47_vm1, %v38_v5  ;;  %1861 = vmatprep.subr.bf16.mxu1 %v3359_v16  ;;  %v3327_v25 = vcombine.high %v315_v18, %v331_v19  ;;  %v3329_v26 = vcombine.high %v316_v21, %v332_v22  ;;  %v283_v27 = vld [vmem:[#allocation2 + $0x400] sm:$0xff]  ;;  %v284_v29 = vld [vmem:[#allocation2 + $0x408] sm:$0xff]  ;;  %v3328_v31 = vcombine.low %v316_v21, %v332_v22  ;;  %v381_v5 = vld [vmem:[#allocation2 + $0x710] sm:$0xff] }
  0x16   :  { %1914 = vmatprep.subr.bf16.mxu0 %v3361_v20  ;;  %v299_v28 = vld [vmem:[#allocation2 + $0x480] sm:$0xff]  ;;  %v300_v30 = vld [vmem:[#allocation2 + $0x488] sm:$0xff]  ;;  %v3326_v32 = vcombine.low %v315_v18, %v331_v19  ;;  %v3395_v8 = vcombine.high %v381_v5, %v397_v6  ;;  %v3394_v10 = vcombine.low %v381_v5, %v397_v6  ;;  %1891 = vmatprep.mubr.bf16.mxu1 %v3592_v13  ;;  %v349_v19 = vld [vmem:[#allocation2 + $0x610] sm:$0xff] }
  0x17   :  { %v3295_v33 = vcombine.high %v283_v27, %v299_v28  ;;  %v3297_v34 = vcombine.high %v284_v29, %v300_v30  ;;  %v251_v35 = vld [vmem:[#allocation2 + $0x300] sm:$0xff]  ;;  %v252_v37 = vld [vmem:[#allocation2 + $0x308] sm:$0xff]  ;;  %v3296_v39 = vcombine.low %v284_v29, %v300_v30  ;;  %v3294_v40 = vcombine.low %v283_v27, %v299_v28  ;;  %1944 = vmatprep.mubr.bf16.mxu0 %v3592_v13  ;;  %v365_v20 = vld [vmem:[#allocation2 + $0x690] sm:$0xff] }
  0x18   :  { %1862 = vmatpush1.bf16.msra.mxu1 %v3358_v24  ;;  %1915 = vmatpush1.bf16.msra.mxu0 %v3360_v23  ;;  %v267_v36 = vld [vmem:[#allocation2 + $0x380] sm:$0xff]  ;;  %v268_v38 = vld [vmem:[#allocation2 + $0x388] sm:$0xff]  ;;  %v350_v21 = vld [vmem:[#allocation2 + $0x618] sm:$0xff]  ;;  %v3363_v29 = vcombine.high %v349_v19, %v365_v20 }
  0x19   :  { %1863 = vmatprep.subr.bf16.mxu1 %v3327_v25  ;;  %1916 = vmatprep.subr.bf16.mxu0 %v3329_v26  ;;  %v3263_v41 = vcombine.high %v251_v35, %v267_v36  ;;  %v3265_v42 = vcombine.high %v252_v37, %v268_v38  ;;  %v219_v43 = vld [vmem:[#allocation2 + $0x200] sm:$0xff]  ;;  %v220_v45 = vld [vmem:[#allocation2 + $0x208] sm:$0xff]  ;;  %v3264_v47 = vcombine.low %v252_v37, %v268_v38  ;;  %v366_v22 = vld [vmem:[#allocation2 + $0x698] sm:$0xff] }
  0x1a   :  { %v235_v44 = vld [vmem:[#allocation2 + $0x280] sm:$0xff]  ;;  %v236_v46 = vld [vmem:[#allocation2 + $0x288] sm:$0xff]  ;;  %v3262_v48 = vcombine.low %v251_v35, %v267_v36  ;;  %v3365_v30 = vcombine.high %v350_v21, %v366_v22  ;;  %v334_v35 = vld [vmem:[#allocation2 + $0x598] sm:$0xff]  ;;  %v3362_v38 = vcombine.low %v349_v19, %v365_v20 }
  0x1b   :  { %v3231_v49 = vcombine.high %v219_v43, %v235_v44  ;;  %v3233_v50 = vcombine.high %v220_v45, %v236_v46  ;;  %v3232_v51 = vcombine.low %v220_v45, %v236_v46  ;;  %v3230_v52 = vcombine.low %v219_v43, %v235_v44  ;;  %v187_v53 = vld [vmem:[#allocation2 + $0x100] sm:$0xff]  ;;  %v188_v55 = vld [vmem:[#allocation2 + $0x108] sm:$0xff]  ;;  %v301_v43 = vld [vmem:[#allocation2 + $0x490] sm:$0xff] }
  0x1c   :  { %1864 = vmatpush1.bf16.msra.mxu1 %v3326_v32  ;;  %1917 = vmatpush1.bf16.msra.mxu0 %v3328_v31  ;;  %v203_v54 = vld [vmem:[#allocation2 + $0x180] sm:$0xff]  ;;  %v204_v57 = vld [vmem:[#allocation2 + $0x188] sm:$0xff]  ;;  %v317_v31 = vld [vmem:[#allocation2 + $0x510] sm:$0xff] }
  0x1d   :  { %1865 = vmatprep.subr.bf16.mxu1 %v3295_v33  ;;  %1918 = vmatprep.subr.bf16.mxu0 %v3297_v34  ;;  %v3199_v56 = vcombine.high %v187_v53, %v203_v54  ;;  %v3200_v58 = vcombine.low %v188_v55, %v204_v57  ;;  %v3201_v59 = vcombine.high %v188_v55, %v204_v57  ;;  %v155_v61 = vld [vmem:[#allocation2] sm:$0xff]  ;;  %v156_v63 = vld [vmem:[#allocation2 + $0x8] sm:$0xff]  ;;  %v333_v33 = vld [vmem:[#allocation2 + $0x590] sm:$0xff] }
  0x1e   :  { %v3198_v60 = vcombine.low %v187_v53, %v203_v54  ;;  %v171_v62 = vld [vmem:[#allocation2 + $0x80] sm:$0xff]  ;;  %v172_v1 = vld [vmem:[#allocation2 + $0x88] sm:$0xff]  ;;  %v318_v34 = vld [vmem:[#allocation2 + $0x518] sm:$0xff] }
  0x1f   :  { %v3167_v0 = vcombine.high %v155_v61, %v171_v62  ;;  %v3168_v2 = vcombine.low %v156_v63, %v172_v1  ;;  %v3169_v3 = vcombine.high %v156_v63, %v172_v1  ;;  %v3166_v4 = vcombine.low %v155_v61, %v171_v62  ;;  %v3160_v14 = vld [vmem:[%s4018_s2] ss:$0 sm:$0xff]  ;;  %v286_v44 = vld [vmem:[#allocation2 + $0x418] sm:$0xff] }
  0x20   :  { %1866 = vmatpush1.bf16.msra.mxu1 %v3294_v40  ;;  %1919 = vmatpush1.bf16.msra.mxu0 %v3296_v39  ;;  %v3364_v39 = vcombine.low %v350_v21, %v366_v22  ;;  %v3331_v40 = vcombine.high %v317_v31, %v333_v33  ;;  %v302_v45 = vld [vmem:[#allocation2 + $0x498] sm:$0xff]  ;;  %v383_v20 = vld [vmem:[#allocation2 + $0x720] sm:$0xff]  ;;  %v384_v22 = vld [vmem:[#allocation2 + $0x728] sm:$0xff] }
  0x21   :  { %1867 = vmatprep.subr.bf16.mxu1 %v3263_v41  ;;  %1920 = vmatprep.subr.bf16.mxu0 %v3265_v42  ;;  %v3333_v41 = vcombine.high %v318_v34, %v334_v35  ;;  %v285_v42 = vld [vmem:[#allocation2 + $0x410] sm:$0xff]  ;;  %v254_v53 = vld [vmem:[#allocation2 + $0x318] sm:$0xff]  ;;  %v399_v21 = vld [vmem:[#allocation2 + $0x7a0] sm:$0xff] }
  0x22   :  { %v270_v54 = vld [vmem:[#allocation2 + $0x398] sm:$0xff]  ;;  %v3298_v55 = vcombine.low %v285_v42, %v301_v43 }
  0x23   :  { %v222_v61 = vld [vmem:[#allocation2 + $0x218] sm:$0xff] }
  0x24   :  { %1868 = vmatpush1.bf16.msra.mxu1 %v3262_v48  ;;  %1921 = vmatpush1.bf16.msra.mxu0 %v3264_v47  ;;  %v3330_v47 = vcombine.low %v317_v31, %v333_v33  ;;  %v3332_v48 = vcombine.low %v318_v34, %v334_v35  ;;  %v238_v62 = vld [vmem:[#allocation2 + $0x298] sm:$0xff]  ;;  %v352_v31 = vld [vmem:[#allocation2 + $0x628] sm:$0xff]  ;;  %v3398_v33 = vcombine.low %v383_v20, %v399_v21 }
  0x25   :  { %1869 = vmatprep.subr.bf16.mxu1 %v3231_v49  ;;  %1922 = vmatprep.subr.bf16.mxu0 %v3233_v50  ;;  %v3299_v49 = vcombine.high %v285_v42, %v301_v43  ;;  %v3301_v50 = vcombine.high %v286_v44, %v302_v45  ;;  %v190_v5 = vld [vmem:[#allocation2 + $0x118] sm:$0xff] }
  0x26   :  { %v206_v6 = vld [vmem:[#allocation2 + $0x198] sm:$0xff] }
  0x28   :  { %1870 = vmatpush1.bf16.msra.mxu1 %v3230_v52  ;;  %1923 = vmatpush1.bf16.msra.mxu0 %v3232_v51  ;;  %v253_v51 = vld [vmem:[#allocation2 + $0x310] sm:$0xff] }
  0x29   :  { %1871 = vmatprep.subr.bf16.mxu1 %v3199_v56  ;;  %1924 = vmatprep.subr.bf16.mxu0 %v3201_v59  ;;  %v269_v52 = vld [vmem:[#allocation2 + $0x390] sm:$0xff]  ;;  %v3300_v56 = vcombine.low %v286_v44, %v302_v45  ;;  %v287_v45 = vld [vmem:[#allocation2 + $0x420] sm:$0xff] }
  0x2a   :  { %v3267_v57 = vcombine.high %v253_v51, %v269_v52  ;;  %v221_v59 = vld [vmem:[#allocation2 + $0x210] sm:$0xff]  ;;  %v3266_v63 = vcombine.low %v253_v51, %v269_v52 }
  0x2c   :  { %1872 = vmatpush1.bf16.msra.mxu1 %v3198_v60  ;;  %1925 = vmatpush1.bf16.msra.mxu0 %v3200_v58  ;;  %v3269_v58 = vcombine.high %v254_v53, %v270_v54  ;;  %v237_v60 = vld [vmem:[#allocation2 + $0x290] sm:$0xff] }
  0x2d   :  { %1873 = vmatprep.subr.bf16.mxu1 %v3167_v0  ;;  %1926 = vmatprep.subr.bf16.mxu0 %v3169_v3  ;;  %v3268_v0 = vcombine.low %v254_v53, %v270_v54  ;;  %v3235_v1 = vcombine.high %v221_v59, %v237_v60  ;;  %v189_v3 = vld [vmem:[#allocation2 + $0x110] sm:$0xff]  ;;  %v3234_v7 = vcombine.low %v221_v59, %v237_v60  ;;  %v255_v54 = vld [vmem:[#allocation2 + $0x320] sm:$0xff] }
  0x30   :  { %1874 = vmatpush1.bf16.msra.mxu1 %v3166_v4  ;;  %1927 = vmatpush1.bf16.msra.mxu0 %v3168_v2  ;;  %v3237_v2 = vcombine.high %v222_v61, %v238_v62  ;;  %v205_v4 = vld [vmem:[#allocation2 + $0x190] sm:$0xff] }
  0x31   :  { %1965 = vmatprep.subr.bf16.mxu1 %v3395_v8  ;;  %2018 = vmatprep.subr.bf16.mxu0 %v3397_v12  ;;  %v3236_v8 = vcombine.low %v222_v61, %v238_v62  ;;  %v3203_v9 = vcombine.high %v189_v3, %v205_v4  ;;  %v173_v12 = vld [vmem:[#allocation2 + $0x90] sm:$0xff]  ;;  %v223_v62 = vld [vmem:[#allocation2 + $0x220] sm:$0xff] }
  0xd0   :  { %v3559_v15 = vpop.f32.mrf.mxu0 }
  0xd1   :  { %v136_v16 = vadd.f32 %v3559_v15, %v3160_v14  ;;  %v174_v15 = vld [vmem:[#allocation2 + $0x98] sm:$0xff] }
  0xd2   :  { %v130_v17 = vpop.f32.mrf.mxu0 }
  0xd3   :  { %v131_v18 = vadd.f32 %v3160_v14, %v130_v17  ;;  %v150_v24 = vmax.f32 %v136_v16, 0.0  ;;  %v3202_v16 = vcombine.low %v189_v3, %v205_v4  ;;  %v3204_v17 = vcombine.low %v190_v5, %v206_v6 }
  0xd5   :  { %v3562_v23 = vpop.f32.mrf.mxu0  ;;  %v149_v25 = vmax.f32 %v131_v18, 0.0 }
  0xd6   :  { %v146_v26 = vadd.f32 %v3562_v23, %v3160_v14  ;;  %v400_v23 = vld [vmem:[#allocation2 + $0x7a8] sm:$0xff] }
  0xd7   :  { %v140_v27 = vpop.f32.mrf.mxu0  ;;  %v3650_v28 = vpack.c.bf16 %v150_v24, %v149_v25  ;;  %v3400_v34 = vcombine.low %v384_v22, %v400_v23 }
  0xd8   :  { %v141_v32 = vadd.f32 %v3160_v14, %v140_v27  ;;  %v152_v36 = vmax.f32 %v146_v26, 0.0  ;;  %v158_v14 = vld [vmem:[#allocation2 + $0x18] sm:$0xff]  ;;  %v3399_v26 = vcombine.high %v383_v20, %v399_v21  ;;  %v3401_v27 = vcombine.high %v384_v22, %v400_v23  ;;  %v385_v23 = vld [vmem:[#allocation2 + $0x730] sm:$0xff] }
  0xd9   :  { %1892 = vmatmul.mubr.bf16.vlgmr.msra.gmra.mxu1 %v3650_v28  ;;  %1945 = vmatmul.mubr.bf16.vlgmr.msra.gmra.mxu0 %v3650_v28  ;;  %v3173_v19 = vcombine.high %v158_v14, %v174_v15  ;;  %v3172_v25 = vcombine.low %v158_v14, %v174_v15  ;;  %v159_v15 = vld [vmem:[#allocation2 + $0x20] sm:$0xff] }
  0xda   :  { %v151_v37 = vmax.f32 %v141_v32, 0.0  ;;  %1966 = vmatpush1.bf16.msra.mxu1 %v3394_v10  ;;  %2019 = vmatpush1.bf16.msra.mxu0 %v3396_v11  ;;  %v3205_v10 = vcombine.high %v190_v5, %v206_v6  ;;  %v157_v11 = vld [vmem:[#allocation2 + $0x10] sm:$0xff]  ;;  %v368_v32 = vld [vmem:[#allocation2 + $0x6a8] sm:$0xff]  ;;  %v191_v6 = vld [vmem:[#allocation2 + $0x120] sm:$0xff] }
  0xdb   :  { %1967 = vmatprep.subr.bf16.mxu1 %v3363_v29  ;;  %2020 = vmatprep.subr.bf16.mxu0 %v3365_v30  ;;  %v3171_v18 = vcombine.high %v157_v11, %v173_v12  ;;  %v3170_v24 = vcombine.low %v157_v11, %v173_v12  ;;  %v351_v29 = vld [vmem:[#allocation2 + $0x620] sm:$0xff]  ;;  %v3368_v42 = vcombine.low %v352_v31, %v368_v32 }
  0xdc   :  { %1901 = vmatprep.mubr.bf16.mxu1 %v3592_v13  ;;  %1954 = vmatprep.mubr.bf16.mxu0 %v3592_v13  ;;  %v3656_v46 = vpack.c.bf16 %v152_v36, %v151_v37  ;;  %v367_v30 = vld [vmem:[#allocation2 + $0x6a0] sm:$0xff]  ;;  %v3369_v36 = vcombine.high %v352_v31, %v368_v32  ;;  %v353_v32 = vld [vmem:[#allocation2 + $0x630] sm:$0xff] }
  0xdd   :  { %v3367_v35 = vcombine.high %v351_v29, %v367_v30  ;;  %v319_v37 = vld [vmem:[#allocation2 + $0x520] sm:$0xff] }
  0xde   :  { %1968 = vmatpush1.bf16.msra.mxu1 %v3362_v38  ;;  %2021 = vmatpush1.bf16.msra.mxu0 %v3364_v39  ;;  %v335_v38 = vld [vmem:[#allocation2 + $0x5a0] sm:$0xff]  ;;  %v320_v39 = vld [vmem:[#allocation2 + $0x528] sm:$0xff] }
  0xdf   :  { %1969 = vmatprep.subr.bf16.mxu1 %v3331_v40  ;;  %2022 = vmatprep.subr.bf16.mxu0 %v3333_v41  ;;  %v336_v40 = vld [vmem:[#allocation2 + $0x5a8] sm:$0xff]  ;;  %v3366_v41 = vcombine.low %v351_v29, %v367_v30  ;;  %v3335_v43 = vcombine.high %v319_v37, %v335_v38 }
  0xe0   :  { %v3337_v44 = vcombine.high %v320_v39, %v336_v40  ;;  %v3336_v51 = vcombine.low %v320_v39, %v336_v40  ;;  %v321_v40 = vld [vmem:[#allocation2 + $0x530] sm:$0xff] }
  0xe1   :  { %1902 = vmatmul.mubr.bf16.gmra.mxu1 %v3656_v46  ;;  %1955 = vmatmul.mubr.bf16.gmra.mxu0 %v3656_v46 }
  0xe2   :  { %1970 = vmatpush1.bf16.msra.mxu1 %v3330_v47  ;;  %2023 = vmatpush1.bf16.msra.mxu0 %v3332_v48  ;;  %v303_v47 = vld [vmem:[#allocation2 + $0x4a0] sm:$0xff]  ;;  %v288_v48 = vld [vmem:[#allocation2 + $0x428] sm:$0xff] }
  0xe3   :  { %1971 = vmatprep.subr.bf16.mxu1 %v3299_v49  ;;  %2024 = vmatprep.subr.bf16.mxu0 %v3301_v50  ;;  %v304_v49 = vld [vmem:[#allocation2 + $0x4a8] sm:$0xff]  ;;  %v3334_v50 = vcombine.low %v319_v37, %v335_v38  ;;  %v3303_v52 = vcombine.high %v287_v45, %v303_v47 }
  0xe4   :  { %1997 = vmatprep.mubr.bf16.mxu1 %v3592_v13  ;;  %2050 = vmatprep.mubr.bf16.mxu0 %v3592_v13  ;;  %v3305_v53 = vcombine.high %v288_v48, %v304_v49  ;;  %v3304_v59 = vcombine.low %v288_v48, %v304_v49  ;;  %v289_v49 = vld [vmem:[#allocation2 + $0x430] sm:$0xff] }
  0xe6   :  { %1972 = vmatpush1.bf16.msra.mxu1 %v3298_v55  ;;  %2025 = vmatpush1.bf16.msra.mxu0 %v3300_v56  ;;  %v271_v55 = vld [vmem:[#allocation2 + $0x3a0] sm:$0xff]  ;;  %v256_v56 = vld [vmem:[#allocation2 + $0x328] sm:$0xff] }
  0xe7   :  { %1973 = vmatprep.subr.bf16.mxu1 %v3267_v57  ;;  %2026 = vmatprep.subr.bf16.mxu0 %v3269_v58  ;;  %v272_v57 = vld [vmem:[#allocation2 + $0x3a8] sm:$0xff]  ;;  %v3302_v58 = vcombine.low %v287_v45, %v303_v47  ;;  %v3271_v60 = vcombine.high %v255_v54, %v271_v55 }
  0xe8   :  { %v3273_v61 = vcombine.high %v256_v56, %v272_v57  ;;  %v3272_v3 = vcombine.low %v256_v56, %v272_v57  ;;  %v257_v57 = vld [vmem:[#allocation2 + $0x330] sm:$0xff] }
  0xea   :  { %1974 = vmatpush1.bf16.msra.mxu1 %v3266_v63  ;;  %2027 = vmatpush1.bf16.msra.mxu0 %v3268_v0  ;;  %v239_v63 = vld [vmem:[#allocation2 + $0x2a0] sm:$0xff]  ;;  %v224_v0 = vld [vmem:[#allocation2 + $0x228] sm:$0xff] }
  0xeb   :  { %1975 = vmatprep.subr.bf16.mxu1 %v3235_v1  ;;  %2028 = vmatprep.subr.bf16.mxu0 %v3237_v2  ;;  %v240_v1 = vld [vmem:[#allocation2 + $0x2a8] sm:$0xff]  ;;  %v3270_v2 = vcombine.low %v255_v54, %v271_v55  ;;  %v3239_v4 = vcombine.high %v223_v62, %v239_v63 }
  0xec   :  { %v3241_v5 = vcombine.high %v224_v0, %v240_v1  ;;  %v3240_v11 = vcombine.low %v224_v0, %v240_v1  ;;  %v225_v1 = vld [vmem:[#allocation2 + $0x230] sm:$0xff] }
  0xee   :  { %1976 = vmatpush1.bf16.msra.mxu1 %v3234_v7  ;;  %2029 = vmatpush1.bf16.msra.mxu0 %v3236_v8  ;;  %v207_v7 = vld [vmem:[#allocation2 + $0x1a0] sm:$0xff]  ;;  %v192_v8 = vld [vmem:[#allocation2 + $0x128] sm:$0xff] }
  0xef   :  { %1977 = vmatprep.subr.bf16.mxu1 %v3203_v9  ;;  %2030 = vmatprep.subr.bf16.mxu0 %v3205_v10  ;;  %v208_v9 = vld [vmem:[#allocation2 + $0x1a8] sm:$0xff]  ;;  %v3238_v10 = vcombine.low %v223_v62, %v239_v63  ;;  %v3207_v12 = vcombine.high %v191_v6, %v207_v7 }
  0xf0   :  { %v3209_v14 = vcombine.high %v192_v8, %v208_v9  ;;  %v3208_v20 = vcombine.low %v192_v8, %v208_v9  ;;  %v193_v9 = vld [vmem:[#allocation2 + $0x130] sm:$0xff] }
  0xf2   :  { %1978 = vmatpush1.bf16.msra.mxu1 %v3202_v16  ;;  %2031 = vmatpush1.bf16.msra.mxu0 %v3204_v17  ;;  %v175_v16 = vld [vmem:[#allocation2 + $0xa0] sm:$0xff]  ;;  %v160_v17 = vld [vmem:[#allocation2 + $0x28] sm:$0xff] }
  0xf3   :  { %1979 = vmatprep.subr.bf16.mxu1 %v3171_v18  ;;  %2032 = vmatprep.subr.bf16.mxu0 %v3173_v19  ;;  %v176_v18 = vld [vmem:[#allocation2 + $0xa8] sm:$0xff]  ;;  %v3206_v19 = vcombine.low %v191_v6, %v207_v7  ;;  %v3175_v21 = vcombine.high %v159_v15, %v175_v16 }
  0xf4   :  { %v3177_v22 = vcombine.high %v160_v17, %v176_v18  ;;  %v3176_v29 = vcombine.low %v160_v17, %v176_v18  ;;  %v161_v18 = vld [vmem:[#allocation2 + $0x30] sm:$0xff] }
  0xf6   :  { %1980 = vmatpush1.bf16.msra.mxu1 %v3170_v24  ;;  %2033 = vmatpush1.bf16.msra.mxu0 %v3172_v25  ;;  %v401_v24 = vld [vmem:[#allocation2 + $0x7b0] sm:$0xff]  ;;  %v386_v25 = vld [vmem:[#allocation2 + $0x738] sm:$0xff] }
  0xf7   :  { %2071 = vmatprep.subr.bf16.mxu1 %v3399_v26  ;;  %2124 = vmatprep.subr.bf16.mxu0 %v3401_v27  ;;  %v402_v26 = vld [vmem:[#allocation2 + $0x7b8] sm:$0xff]  ;;  %v3174_v27 = vcombine.low %v159_v15, %v175_v16  ;;  %v3403_v30 = vcombine.high %v385_v23, %v401_v24 }
  0xf8   :  { %v3405_v31 = vcombine.high %v386_v25, %v402_v26  ;;  %v3404_v37 = vcombine.low %v386_v25, %v402_v26  ;;  %v387_v26 = vld [vmem:[#allocation2 + $0x740] sm:$0xff] }
  0xf9   :  { %1998 = vmatmul.mubr.bf16.vlgmr.msra.gmra.mxu1 %v3650_v28  ;;  %2051 = vmatmul.mubr.bf16.vlgmr.msra.gmra.mxu0 %v3650_v28 }
  0xfa   :  { %2072 = vmatpush1.bf16.msra.mxu1 %v3398_v33  ;;  %2125 = vmatpush1.bf16.msra.mxu0 %v3400_v34  ;;  %v369_v33 = vld [vmem:[#allocation2 + $0x6b0] sm:$0xff]  ;;  %v354_v34 = vld [vmem:[#allocation2 + $0x638] sm:$0xff] }
  0xfb   :  { %2073 = vmatprep.subr.bf16.mxu1 %v3367_v35  ;;  %2126 = vmatprep.subr.bf16.mxu0 %v3369_v36  ;;  %v370_v35 = vld [vmem:[#allocation2 + $0x6b8] sm:$0xff]  ;;  %v3402_v36 = vcombine.low %v385_v23, %v401_v24  ;;  %v3371_v38 = vcombine.high %v353_v32, %v369_v33 }
  0xfc   :  { %2007 = vmatprep.mubr.bf16.mxu1 %v3592_v13  ;;  %2060 = vmatprep.mubr.bf16.mxu0 %v3592_v13  ;;  %v3373_v39 = vcombine.high %v354_v34, %v370_v35  ;;  %v3372_v45 = vcombine.low %v354_v34, %v370_v35  ;;  %v355_v35 = vld [vmem:[#allocation2 + $0x640] sm:$0xff] }
  0xfe   :  { %2074 = vmatpush1.bf16.msra.mxu1 %v3366_v41  ;;  %2127 = vmatpush1.bf16.msra.mxu0 %v3368_v42  ;;  %v337_v41 = vld [vmem:[#allocation2 + $0x5b0] sm:$0xff]  ;;  %v322_v42 = vld [vmem:[#allocation2 + $0x538] sm:$0xff] }
  0xff   :  { %2075 = vmatprep.subr.bf16.mxu1 %v3335_v43  ;;  %2128 = vmatprep.subr.bf16.mxu0 %v3337_v44  ;;  %v338_v43 = vld [vmem:[#allocation2 + $0x5b8] sm:$0xff]  ;;  %v3370_v44 = vcombine.low %v353_v32, %v369_v33  ;;  %v3339_v47 = vcombine.high %v321_v40, %v337_v41 }
 0x100   :  { %v3341_v48 = vcombine.high %v322_v42, %v338_v43  ;;  %v3340_v54 = vcombine.low %v322_v42, %v338_v43  ;;  %v323_v43 = vld [vmem:[#allocation2 + $0x540] sm:$0xff] }
 0x101   :  { %2008 = vmatmul.mubr.bf16.gmra.mxu1 %v3656_v46  ;;  %2061 = vmatmul.mubr.bf16.gmra.mxu0 %v3656_v46 }
 0x102   :  { %2076 = vmatpush1.bf16.msra.mxu1 %v3334_v50  ;;  %2129 = vmatpush1.bf16.msra.mxu0 %v3336_v51  ;;  %v305_v50 = vld [vmem:[#allocation2 + $0x4b0] sm:$0xff]  ;;  %v290_v51 = vld [vmem:[#allocation2 + $0x438] sm:$0xff] }
 0x103   :  { %2077 = vmatprep.subr.bf16.mxu1 %v3303_v52  ;;  %2130 = vmatprep.subr.bf16.mxu0 %v3305_v53  ;;  %v306_v52 = vld [vmem:[#allocation2 + $0x4b8] sm:$0xff]  ;;  %v3338_v53 = vcombine.low %v321_v40, %v337_v41  ;;  %v3307_v55 = vcombine.high %v289_v49, %v305_v50 }
 0x104   :  { %2103 = vmatprep.mubr.bf16.mxu1 %v3592_v13  ;;  %2156 = vmatprep.mubr.bf16.mxu0 %v3592_v13  ;;  %v3309_v56 = vcombine.high %v290_v51, %v306_v52  ;;  %v3308_v62 = vcombine.low %v290_v51, %v306_v52  ;;  %v291_v52 = vld [vmem:[#allocation2 + $0x440] sm:$0xff] }
 0x106   :  { %2078 = vmatpush1.bf16.msra.mxu1 %v3302_v58  ;;  %2131 = vmatpush1.bf16.msra.mxu0 %v3304_v59  ;;  %v273_v58 = vld [vmem:[#allocation2 + $0x3b0] sm:$0xff]  ;;  %v258_v59 = vld [vmem:[#allocation2 + $0x338] sm:$0xff] }
 0x107   :  { %2079 = vmatprep.subr.bf16.mxu1 %v3271_v60  ;;  %2132 = vmatprep.subr.bf16.mxu0 %v3273_v61  ;;  %v274_v60 = vld [vmem:[#allocation2 + $0x3b8] sm:$0xff]  ;;  %v3306_v61 = vcombine.low %v289_v49, %v305_v50  ;;  %v3275_v63 = vcombine.high %v257_v57, %v273_v58 }
 0x108   :  { %v3277_v0 = vcombine.high %v258_v59, %v274_v60  ;;  %v3276_v6 = vcombine.low %v258_v59, %v274_v60  ;;  %v259_v60 = vld [vmem:[#allocation2 + $0x340] sm:$0xff] }
 0x10a   :  { %2080 = vmatpush1.bf16.msra.mxu1 %v3270_v2  ;;  %2133 = vmatpush1.bf16.msra.mxu0 %v3272_v3  ;;  %v241_v2 = vld [vmem:[#allocation2 + $0x2b0] sm:$0xff]  ;;  %v226_v3 = vld [vmem:[#allocation2 + $0x238] sm:$0xff] }
 0x10b   :  { %2081 = vmatprep.subr.bf16.mxu1 %v3239_v4  ;;  %2134 = vmatprep.subr.bf16.mxu0 %v3241_v5  ;;  %v242_v4 = vld [vmem:[#allocation2 + $0x2b8] sm:$0xff]  ;;  %v3274_v5 = vcombine.low %v257_v57, %v273_v58  ;;  %v3243_v7 = vcombine.high %v225_v1, %v241_v2 }
 0x10c   :  { %v3245_v8 = vcombine.high %v226_v3, %v242_v4  ;;  %v3244_v15 = vcombine.low %v226_v3, %v242_v4  ;;  %v227_v4 = vld [vmem:[#allocation2 + $0x240] sm:$0xff] }
 0x10e   :  { %2082 = vmatpush1.bf16.msra.mxu1 %v3238_v10  ;;  %2135 = vmatpush1.bf16.msra.mxu0 %v3240_v11  ;;  %v209_v10 = vld [vmem:[#allocation2 + $0x1b0] sm:$0xff]  ;;  %v194_v11 = vld [vmem:[#allocation2 + $0x138] sm:$0xff] }
 0x10f   :  { %2083 = vmatprep.subr.bf16.mxu1 %v3207_v12  ;;  %2136 = vmatprep.subr.bf16.mxu0 %v3209_v14  ;;  %v210_v12 = vld [vmem:[#allocation2 + $0x1b8] sm:$0xff]  ;;  %v3242_v14 = vcombine.low %v225_v1, %v241_v2  ;;  %v3211_v16 = vcombine.high %v193_v9, %v209_v10 }
 0x110   :  { %v3213_v17 = vcombine.high %v194_v11, %v210_v12  ;;  %v3212_v23 = vcombine.low %v194_v11, %v210_v12  ;;  %v195_v12 = vld [vmem:[#allocation2 + $0x140] sm:$0xff] }
 0x112   :  { %2084 = vmatpush1.bf16.msra.mxu1 %v3206_v19  ;;  %2137 = vmatpush1.bf16.msra.mxu0 %v3208_v20  ;;  %v177_v19 = vld [vmem:[#allocation2 + $0xb0] sm:$0xff]  ;;  %v162_v20 = vld [vmem:[#allocation2 + $0x38] sm:$0xff] }
 0x113   :  { %2085 = vmatprep.subr.bf16.mxu1 %v3175_v21  ;;  %2138 = vmatprep.subr.bf16.mxu0 %v3177_v22  ;;  %v178_v21 = vld [vmem:[#allocation2 + $0xb8] sm:$0xff]  ;;  %v3210_v22 = vcombine.low %v193_v9, %v209_v10  ;;  %v3179_v24 = vcombine.high %v161_v18, %v177_v19 }
 0x114   :  { %v3181_v25 = vcombine.high %v162_v20, %v178_v21  ;;  %v3180_v32 = vcombine.low %v162_v20, %v178_v21  ;;  %v163_v21 = vld [vmem:[#allocation2 + $0x40] sm:$0xff] }
 0x116   :  { %2086 = vmatpush1.bf16.msra.mxu1 %v3174_v27  ;;  %2139 = vmatpush1.bf16.msra.mxu0 %v3176_v29  ;;  %v403_v27 = vld [vmem:[#allocation2 + $0x7c0] sm:$0xff]  ;;  %v388_v29 = vld [vmem:[#allocation2 + $0x748] sm:$0xff] }
 0x117   :  { %2177 = vmatprep.subr.bf16.mxu1 %v3403_v30  ;;  %2230 = vmatprep.subr.bf16.mxu0 %v3405_v31  ;;  %v404_v30 = vld [vmem:[#allocation2 + $0x7c8] sm:$0xff]  ;;  %v3178_v31 = vcombine.low %v161_v18, %v177_v19  ;;  %v3407_v33 = vcombine.high %v387_v26, %v403_v27 }
 0x118   :  { %v3409_v34 = vcombine.high %v388_v29, %v404_v30  ;;  %v3408_v40 = vcombine.low %v388_v29, %v404_v30  ;;  %v389_v30 = vld [vmem:[#allocation2 + $0x750] sm:$0xff] }
 0x119   :  { %2104 = vmatmul.mubr.bf16.vlgmr.msra.gmra.mxu1 %v3650_v28  ;;  %2157 = vmatmul.mubr.bf16.vlgmr.msra.gmra.mxu0 %v3650_v28 }
 0x11a   :  { %2178 = vmatpush1.bf16.msra.mxu1 %v3402_v36  ;;  %2231 = vmatpush1.bf16.msra.mxu0 %v3404_v37  ;;  %v371_v36 = vld [vmem:[#allocation2 + $0x6c0] sm:$0xff]  ;;  %v356_v37 = vld [vmem:[#allocation2 + $0x648] sm:$0xff] }
 0x11b   :  { %2179 = vmatprep.subr.bf16.mxu1 %v3371_v38  ;;  %2232 = vmatprep.subr.bf16.mxu0 %v3373_v39  ;;  %v372_v38 = vld [vmem:[#allocation2 + $0x6c8] sm:$0xff]  ;;  %v3406_v39 = vcombine.low %v387_v26, %v403_v27  ;;  %v3375_v41 = vcombine.high %v355_v35, %v371_v36 }
 0x11c   :  { %2113 = vmatprep.mubr.bf16.mxu1 %v3592_v13  ;;  %2166 = vmatprep.mubr.bf16.mxu0 %v3592_v13  ;;  %v3377_v42 = vcombine.high %v356_v37, %v372_v38  ;;  %v3376_v49 = vcombine.low %v356_v37, %v372_v38  ;;  %v357_v38 = vld [vmem:[#allocation2 + $0x650] sm:$0xff] }
 0x11e   :  { %2180 = vmatpush1.bf16.msra.mxu1 %v3370_v44  ;;  %2233 = vmatpush1.bf16.msra.mxu0 %v3372_v45  ;;  %v339_v44 = vld [vmem:[#allocation2 + $0x5c0] sm:$0xff]  ;;  %v324_v45 = vld [vmem:[#allocation2 + $0x548] sm:$0xff] }
 0x11f   :  { %2181 = vmatprep.subr.bf16.mxu1 %v3339_v47  ;;  %2234 = vmatprep.subr.bf16.mxu0 %v3341_v48  ;;  %v340_v47 = vld [vmem:[#allocation2 + $0x5c8] sm:$0xff]  ;;  %v3374_v48 = vcombine.low %v355_v35, %v371_v36  ;;  %v3343_v50 = vcombine.high %v323_v43, %v339_v44 }
 0x120   :  { %v3345_v51 = vcombine.high %v324_v45, %v340_v47  ;;  %v3344_v57 = vcombine.low %v324_v45, %v340_v47  ;;  %v325_v47 = vld [vmem:[#allocation2 + $0x550] sm:$0xff] }
 0x121   :  { %2114 = vmatmul.mubr.bf16.gmra.mxu1 %v3656_v46  ;;  %2167 = vmatmul.mubr.bf16.gmra.mxu0 %v3656_v46 }
 0x122   :  { %2182 = vmatpush1.bf16.msra.mxu1 %v3338_v53  ;;  %2235 = vmatpush1.bf16.msra.mxu0 %v3340_v54  ;;  %v307_v53 = vld [vmem:[#allocation2 + $0x4c0] sm:$0xff]  ;;  %v292_v54 = vld [vmem:[#allocation2 + $0x448] sm:$0xff] }
 0x123   :  { %2183 = vmatprep.subr.bf16.mxu1 %v3307_v55  ;;  %2236 = vmatprep.subr.bf16.mxu0 %v3309_v56  ;;  %v308_v55 = vld [vmem:[#allocation2 + $0x4c8] sm:$0xff]  ;;  %v3342_v56 = vcombine.low %v323_v43, %v339_v44  ;;  %v3311_v58 = vcombine.high %v291_v52, %v307_v53 }
 0x124   :  { %2209 = vmatprep.mubr.bf16.mxu1 %v3592_v13  ;;  %2262 = vmatprep.mubr.bf16.mxu0 %v3592_v13  ;;  %v3313_v59 = vcombine.high %v292_v54, %v308_v55  ;;  %v3312_v1 = vcombine.low %v292_v54, %v308_v55  ;;  %v293_v55 = vld [vmem:[#allocation2 + $0x450] sm:$0xff] }
 0x126   :  { %2184 = vmatpush1.bf16.msra.mxu1 %v3306_v61  ;;  %2237 = vmatpush1.bf16.msra.mxu0 %v3308_v62  ;;  %v275_v61 = vld [vmem:[#allocation2 + $0x3c0] sm:$0xff]  ;;  %v260_v62 = vld [vmem:[#allocation2 + $0x348] sm:$0xff] }
 0x127   :  { %2185 = vmatprep.subr.bf16.mxu1 %v3275_v63  ;;  %2238 = vmatprep.subr.bf16.mxu0 %v3277_v0  ;;  %v276_v63 = vld [vmem:[#allocation2 + $0x3c8] sm:$0xff]  ;;  %v3310_v0 = vcombine.low %v291_v52, %v307_v53  ;;  %v3279_v2 = vcombine.high %v259_v60, %v275_v61 }
 0x128   :  { %v3281_v3 = vcombine.high %v260_v62, %v276_v63  ;;  %v3280_v9 = vcombine.low %v260_v62, %v276_v63  ;;  %v261_v63 = vld [vmem:[#allocation2 + $0x350] sm:$0xff] }
 0x12a   :  { %2186 = vmatpush1.bf16.msra.mxu1 %v3274_v5  ;;  %2239 = vmatpush1.bf16.msra.mxu0 %v3276_v6  ;;  %v243_v5 = vld [vmem:[#allocation2 + $0x2c0] sm:$0xff]  ;;  %v228_v6 = vld [vmem:[#allocation2 + $0x248] sm:$0xff] }
 0x12b   :  { %2187 = vmatprep.subr.bf16.mxu1 %v3243_v7  ;;  %2240 = vmatprep.subr.bf16.mxu0 %v3245_v8  ;;  %v244_v7 = vld [vmem:[#allocation2 + $0x2c8] sm:$0xff]  ;;  %v3278_v8 = vcombine.low %v259_v60, %v275_v61  ;;  %v3247_v10 = vcombine.high %v227_v4, %v243_v5 }
 0x12c   :  { %v3249_v11 = vcombine.high %v228_v6, %v244_v7  ;;  %v3248_v18 = vcombine.low %v228_v6, %v244_v7  ;;  %v229_v7 = vld [vmem:[#allocation2 + $0x250] sm:$0xff] }
 0x12e   :  { %2188 = vmatpush1.bf16.msra.mxu1 %v3242_v14  ;;  %2241 = vmatpush1.bf16.msra.mxu0 %v3244_v15  ;;  %v211_v14 = vld [vmem:[#allocation2 + $0x1c0] sm:$0xff]  ;;  %v196_v15 = vld [vmem:[#allocation2 + $0x148] sm:$0xff] }
 0x12f   :  { %2189 = vmatprep.subr.bf16.mxu1 %v3211_v16  ;;  %2242 = vmatprep.subr.bf16.mxu0 %v3213_v17  ;;  %v212_v16 = vld [vmem:[#allocation2 + $0x1c8] sm:$0xff]  ;;  %v3246_v17 = vcombine.low %v227_v4, %v243_v5  ;;  %v3215_v19 = vcombine.high %v195_v12, %v211_v14 }
 0x130   :  { %v3217_v20 = vcombine.high %v196_v15, %v212_v16  ;;  %v3216_v26 = vcombine.low %v196_v15, %v212_v16  ;;  %v197_v16 = vld [vmem:[#allocation2 + $0x150] sm:$0xff] }
 0x132   :  { %2190 = vmatpush1.bf16.msra.mxu1 %v3210_v22  ;;  %2243 = vmatpush1.bf16.msra.mxu0 %v3212_v23  ;;  %v179_v22 = vld [vmem:[#allocation2 + $0xc0] sm:$0xff]  ;;  %v164_v23 = vld [vmem:[#allocation2 + $0x48] sm:$0xff] }
 0x133   :  { %2191 = vmatprep.subr.bf16.mxu1 %v3179_v24  ;;  %2244 = vmatprep.subr.bf16.mxu0 %v3181_v25  ;;  %v180_v24 = vld [vmem:[#allocation2 + $0xc8] sm:$0xff]  ;;  %v3214_v25 = vcombine.low %v195_v12, %v211_v14  ;;  %v3183_v27 = vcombine.high %v163_v21, %v179_v22 }
 0x134   :  { %v3185_v29 = vcombine.high %v164_v23, %v180_v24  ;;  %v3184_v35 = vcombine.low %v164_v23, %v180_v24  ;;  %v165_v24 = vld [vmem:[#allocation2 + $0x50] sm:$0xff] }
 0x136   :  { %2192 = vmatpush1.bf16.msra.mxu1 %v3178_v31  ;;  %2245 = vmatpush1.bf16.msra.mxu0 %v3180_v32  ;;  %v405_v31 = vld [vmem:[#allocation2 + $0x7d0] sm:$0xff]  ;;  %v390_v32 = vld [vmem:[#allocation2 + $0x758] sm:$0xff] }
 0x137   :  { %2283 = vmatprep.subr.bf16.mxu1 %v3407_v33  ;;  %2336 = vmatprep.subr.bf16.mxu0 %v3409_v34  ;;  %v406_v33 = vld [vmem:[#allocation2 + $0x7d8] sm:$0xff]  ;;  %v3182_v34 = vcombine.low %v163_v21, %v179_v22  ;;  %v3411_v36 = vcombine.high %v389_v30, %v405_v31 }
 0x138   :  { %v3413_v37 = vcombine.high %v390_v32, %v406_v33  ;;  %v3412_v43 = vcombine.low %v390_v32, %v406_v33  ;;  %v391_v33 = vld [vmem:[#allocation2 + $0x760] sm:$0xff] }
 0x139   :  { %2210 = vmatmul.mubr.bf16.vlgmr.msra.gmra.mxu1 %v3650_v28  ;;  %2263 = vmatmul.mubr.bf16.vlgmr.msra.gmra.mxu0 %v3650_v28 }
 0x13a   :  { %2284 = vmatpush1.bf16.msra.mxu1 %v3406_v39  ;;  %2337 = vmatpush1.bf16.msra.mxu0 %v3408_v40  ;;  %v373_v39 = vld [vmem:[#allocation2 + $0x6d0] sm:$0xff]  ;;  %v358_v40 = vld [vmem:[#allocation2 + $0x658] sm:$0xff] }
 0x13b   :  { %2285 = vmatprep.subr.bf16.mxu1 %v3375_v41  ;;  %2338 = vmatprep.subr.bf16.mxu0 %v3377_v42  ;;  %v374_v41 = vld [vmem:[#allocation2 + $0x6d8] sm:$0xff]  ;;  %v3410_v42 = vcombine.low %v389_v30, %v405_v31  ;;  %v3379_v44 = vcombine.high %v357_v38, %v373_v39 }
 0x13c   :  { %2219 = vmatprep.mubr.bf16.mxu1 %v3592_v13  ;;  %2272 = vmatprep.mubr.bf16.mxu0 %v3592_v13  ;;  %v3381_v45 = vcombine.high %v358_v40, %v374_v41  ;;  %v3380_v52 = vcombine.low %v358_v40, %v374_v41  ;;  %v359_v41 = vld [vmem:[#allocation2 + $0x660] sm:$0xff] }
 0x13e   :  { %2286 = vmatpush1.bf16.msra.mxu1 %v3374_v48  ;;  %2339 = vmatpush1.bf16.msra.mxu0 %v3376_v49  ;;  %v341_v48 = vld [vmem:[#allocation2 + $0x5d0] sm:$0xff]  ;;  %v326_v49 = vld [vmem:[#allocation2 + $0x558] sm:$0xff] }
 0x13f   :  { %2287 = vmatprep.subr.bf16.mxu1 %v3343_v50  ;;  %2340 = vmatprep.subr.bf16.mxu0 %v3345_v51  ;;  %v342_v50 = vld [vmem:[#allocation2 + $0x5d8] sm:$0xff]  ;;  %v3378_v51 = vcombine.low %v357_v38, %v373_v39  ;;  %v3347_v53 = vcombine.high %v325_v47, %v341_v48 }
 0x140   :  { %v3349_v54 = vcombine.high %v326_v49, %v342_v50  ;;  %v3348_v60 = vcombine.low %v326_v49, %v342_v50  ;;  %v327_v50 = vld [vmem:[#allocation2 + $0x560] sm:$0xff] }
 0x141   :  { %2220 = vmatmul.mubr.bf16.gmra.mxu1 %v3656_v46  ;;  %2273 = vmatmul.mubr.bf16.gmra.mxu0 %v3656_v46 }
 0x142   :  { %2288 = vmatpush1.bf16.msra.mxu1 %v3342_v56  ;;  %2341 = vmatpush1.bf16.msra.mxu0 %v3344_v57  ;;  %v309_v56 = vld [vmem:[#allocation2 + $0x4d0] sm:$0xff]  ;;  %v294_v57 = vld [vmem:[#allocation2 + $0x458] sm:$0xff] }
 0x143   :  { %2289 = vmatprep.subr.bf16.mxu1 %v3311_v58  ;;  %2342 = vmatprep.subr.bf16.mxu0 %v3313_v59  ;;  %v310_v58 = vld [vmem:[#allocation2 + $0x4d8] sm:$0xff]  ;;  %v3346_v59 = vcombine.low %v325_v47, %v341_v48  ;;  %v3315_v61 = vcombine.high %v293_v55, %v309_v56 }
 0x144   :  { %2315 = vmatprep.mubr.bf16.mxu1 %v3592_v13  ;;  %2368 = vmatprep.mubr.bf16.mxu0 %v3592_v13  ;;  %v3317_v62 = vcombine.high %v294_v57, %v310_v58  ;;  %v3316_v4 = vcombine.low %v294_v57, %v310_v58  ;;  %v295_v58 = vld [vmem:[#allocation2 + $0x460] sm:$0xff] }
 0x146   :  { %2290 = vmatpush1.bf16.msra.mxu1 %v3310_v0  ;;  %2343 = vmatpush1.bf16.msra.mxu0 %v3312_v1  ;;  %v277_v0 = vld [vmem:[#allocation2 + $0x3d0] sm:$0xff]  ;;  %v262_v1 = vld [vmem:[#allocation2 + $0x358] sm:$0xff] }
 0x147   :  { %2291 = vmatprep.subr.bf16.mxu1 %v3279_v2  ;;  %2344 = vmatprep.subr.bf16.mxu0 %v3281_v3  ;;  %v278_v2 = vld [vmem:[#allocation2 + $0x3d8] sm:$0xff]  ;;  %v3314_v3 = vcombine.low %v293_v55, %v309_v56  ;;  %v3283_v5 = vcombine.high %v261_v63, %v277_v0 }
 0x148   :  { %v3285_v6 = vcombine.high %v262_v1, %v278_v2  ;;  %v3284_v12 = vcombine.low %v262_v1, %v278_v2  ;;  %v263_v2 = vld [vmem:[#allocation2 + $0x360] sm:$0xff] }
 0x14a   :  { %2292 = vmatpush1.bf16.msra.mxu1 %v3278_v8  ;;  %2345 = vmatpush1.bf16.msra.mxu0 %v3280_v9  ;;  %v245_v8 = vld [vmem:[#allocation2 + $0x2d0] sm:$0xff]  ;;  %v230_v9 = vld [vmem:[#allocation2 + $0x258] sm:$0xff] }
 0x14b   :  { %2293 = vmatprep.subr.bf16.mxu1 %v3247_v10  ;;  %2346 = vmatprep.subr.bf16.mxu0 %v3249_v11  ;;  %v246_v10 = vld [vmem:[#allocation2 + $0x2d8] sm:$0xff]  ;;  %v3282_v11 = vcombine.low %v261_v63, %v277_v0  ;;  %v3251_v14 = vcombine.high %v229_v7, %v245_v8 }
 0x14c   :  { %v3253_v15 = vcombine.high %v230_v9, %v246_v10  ;;  %v3252_v21 = vcombine.low %v230_v9, %v246_v10  ;;  %v231_v10 = vld [vmem:[#allocation2 + $0x260] sm:$0xff] }
 0x14e   :  { %2294 = vmatpush1.bf16.msra.mxu1 %v3246_v17  ;;  %2347 = vmatpush1.bf16.msra.mxu0 %v3248_v18  ;;  %v213_v17 = vld [vmem:[#allocation2 + $0x1d0] sm:$0xff]  ;;  %v198_v18 = vld [vmem:[#allocation2 + $0x158] sm:$0xff] }
 0x14f   :  { %2295 = vmatprep.subr.bf16.mxu1 %v3215_v19  ;;  %2348 = vmatprep.subr.bf16.mxu0 %v3217_v20  ;;  %v214_v19 = vld [vmem:[#allocation2 + $0x1d8] sm:$0xff]  ;;  %v3250_v20 = vcombine.low %v229_v7, %v245_v8  ;;  %v3219_v22 = vcombine.high %v197_v16, %v213_v17 }
 0x150   :  { %v3221_v23 = vcombine.high %v198_v18, %v214_v19  ;;  %v3220_v30 = vcombine.low %v198_v18, %v214_v19  ;;  %v199_v19 = vld [vmem:[#allocation2 + $0x160] sm:$0xff] }
 0x152   :  { %2296 = vmatpush1.bf16.msra.mxu1 %v3214_v25  ;;  %2349 = vmatpush1.bf16.msra.mxu0 %v3216_v26  ;;  %v181_v25 = vld [vmem:[#allocation2 + $0xd0] sm:$0xff]  ;;  %v166_v26 = vld [vmem:[#allocation2 + $0x58] sm:$0xff] }
 0x153   :  { %2297 = vmatprep.subr.bf16.mxu1 %v3183_v27  ;;  %2350 = vmatprep.subr.bf16.mxu0 %v3185_v29  ;;  %v182_v27 = vld [vmem:[#allocation2 + $0xd8] sm:$0xff]  ;;  %v3218_v29 = vcombine.low %v197_v16, %v213_v17  ;;  %v3187_v31 = vcombine.high %v165_v24, %v181_v25 }
 0x154   :  { %v3189_v32 = vcombine.high %v166_v26, %v182_v27  ;;  %v3188_v38 = vcombine.low %v166_v26, %v182_v27  ;;  %v167_v27 = vld [vmem:[#allocation2 + $0x60] sm:$0xff] }
 0x156   :  { %2298 = vmatpush1.bf16.msra.mxu1 %v3182_v34  ;;  %2351 = vmatpush1.bf16.msra.mxu0 %v3184_v35  ;;  %v407_v34 = vld [vmem:[#allocation2 + $0x7e0] sm:$0xff]  ;;  %v392_v35 = vld [vmem:[#allocation2 + $0x768] sm:$0xff] }
 0x157   :  { %2389 = vmatprep.subr.bf16.mxu1 %v3411_v36  ;;  %2442 = vmatprep.subr.bf16.mxu0 %v3413_v37  ;;  %v408_v36 = vld [vmem:[#allocation2 + $0x7e8] sm:$0xff]  ;;  %v3186_v37 = vcombine.low %v165_v24, %v181_v25  ;;  %v3415_v39 = vcombine.high %v391_v33, %v407_v34 }
 0x158   :  { %v3417_v40 = vcombine.high %v392_v35, %v408_v36  ;;  %v3416_v47 = vcombine.low %v392_v35, %v408_v36 }
 0x159   :  { %2316 = vmatmul.mubr.bf16.vlgmr.msra.gmra.mxu1 %v3650_v28  ;;  %2369 = vmatmul.mubr.bf16.vlgmr.msra.gmra.mxu0 %v3650_v28 }
 0x15a   :  { %2390 = vmatpush1.bf16.msra.mxu1 %v3410_v42  ;;  %2443 = vmatpush1.bf16.msra.mxu0 %v3412_v43  ;;  %v375_v42 = vld [vmem:[#allocation2 + $0x6e0] sm:$0xff]  ;;  %v360_v43 = vld [vmem:[#allocation2 + $0x668] sm:$0xff] }
 0x15b   :  { %2391 = vmatprep.subr.bf16.mxu1 %v3379_v44  ;;  %2444 = vmatprep.subr.bf16.mxu0 %v3381_v45  ;;  %v376_v44 = vld [vmem:[#allocation2 + $0x6e8] sm:$0xff]  ;;  %v3414_v45 = vcombine.low %v391_v33, %v407_v34  ;;  %v3383_v48 = vcombine.high %v359_v41, %v375_v42 }
 0x15c   :  { %2325 = vmatprep.mubr.bf16.mxu1 %v3592_v13  ;;  %2378 = vmatprep.mubr.bf16.mxu0 %v3592_v13  ;;  %v3385_v49 = vcombine.high %v360_v43, %v376_v44  ;;  %v3384_v55 = vcombine.low %v360_v43, %v376_v44 }
 0x15e   :  { %2392 = vmatpush1.bf16.msra.mxu1 %v3378_v51  ;;  %2445 = vmatpush1.bf16.msra.mxu0 %v3380_v52  ;;  %v343_v51 = vld [vmem:[#allocation2 + $0x5e0] sm:$0xff]  ;;  %v328_v52 = vld [vmem:[#allocation2 + $0x568] sm:$0xff] }
 0x15f   :  { %2393 = vmatprep.subr.bf16.mxu1 %v3347_v53  ;;  %2446 = vmatprep.subr.bf16.mxu0 %v3349_v54  ;;  %v344_v53 = vld [vmem:[#allocation2 + $0x5e8] sm:$0xff]  ;;  %v3382_v54 = vcombine.low %v359_v41, %v375_v42  ;;  %v3351_v56 = vcombine.high %v327_v50, %v343_v51  ;;  %v410_v41 = vld [vmem:[#allocation2 + $0x7f8] sm:$0xff] }
 0x160   :  { %v3353_v57 = vcombine.high %v328_v52, %v344_v53  ;;  %v3352_v63 = vcombine.low %v328_v52, %v344_v53  ;;  %v377_v53 = vld [vmem:[#allocation2 + $0x6f0] sm:$0xff] }
 0x161   :  { %2326 = vmatmul.mubr.bf16.gmra.mxu1 %v3656_v46  ;;  %2379 = vmatmul.mubr.bf16.gmra.mxu0 %v3656_v46 }
 0x162   :  { %2394 = vmatpush1.bf16.msra.mxu1 %v3346_v59  ;;  %2447 = vmatpush1.bf16.msra.mxu0 %v3348_v60  ;;  %v311_v59 = vld [vmem:[#allocation2 + $0x4e0] sm:$0xff]  ;;  %v296_v60 = vld [vmem:[#allocation2 + $0x468] sm:$0xff] }
 0x163   :  { %2395 = vmatprep.subr.bf16.mxu1 %v3315_v61  ;;  %2448 = vmatprep.subr.bf16.mxu0 %v3317_v62  ;;  %v312_v61 = vld [vmem:[#allocation2 + $0x4e8] sm:$0xff]  ;;  %v3350_v62 = vcombine.low %v327_v50, %v343_v51  ;;  %v3319_v0 = vcombine.high %v295_v58, %v311_v59 }
 0x164   :  { %2421 = vmatprep.mubr.bf16.mxu1 %v3592_v13  ;;  %2474 = vmatprep.mubr.bf16.mxu0 %v3592_v13  ;;  %v3321_v1 = vcombine.high %v296_v60, %v312_v61  ;;  %v3320_v7 = vcombine.low %v296_v60, %v312_v61  ;;  %v329_v61 = vld [vmem:[#allocation2 + $0x570] sm:$0xff] }
 0x166   :  { %2396 = vmatpush1.bf16.msra.mxu1 %v3314_v3  ;;  %2449 = vmatpush1.bf16.msra.mxu0 %v3316_v4  ;;  %v279_v3 = vld [vmem:[#allocation2 + $0x3e0] sm:$0xff]  ;;  %v264_v4 = vld [vmem:[#allocation2 + $0x368] sm:$0xff] }
 0x167   :  { %2397 = vmatprep.subr.bf16.mxu1 %v3283_v5  ;;  %2450 = vmatprep.subr.bf16.mxu0 %v3285_v6  ;;  %v280_v5 = vld [vmem:[#allocation2 + $0x3e8] sm:$0xff]  ;;  %v3318_v6 = vcombine.low %v295_v58, %v311_v59  ;;  %v3287_v8 = vcombine.high %v263_v2, %v279_v3 }
 0x168   :  { %v3289_v9 = vcombine.high %v264_v4, %v280_v5  ;;  %v3288_v16 = vcombine.low %v264_v4, %v280_v5 }
 0x16a   :  { %2398 = vmatpush1.bf16.msra.mxu1 %v3282_v11  ;;  %2451 = vmatpush1.bf16.msra.mxu0 %v3284_v12  ;;  %v247_v11 = vld [vmem:[#allocation2 + $0x2e0] sm:$0xff]  ;;  %v232_v12 = vld [vmem:[#allocation2 + $0x268] sm:$0xff] }
 0x16b   :  { %2399 = vmatprep.subr.bf16.mxu1 %v3251_v14  ;;  %2452 = vmatprep.subr.bf16.mxu0 %v3253_v15  ;;  %v248_v14 = vld [vmem:[#allocation2 + $0x2e8] sm:$0xff]  ;;  %v3286_v15 = vcombine.low %v263_v2, %v279_v3  ;;  %v3255_v17 = vcombine.high %v231_v10, %v247_v11  ;;  %v330_v2 = vld [vmem:[#allocation2 + $0x578] sm:$0xff] }
 0x16c   :  { %v3257_v18 = vcombine.high %v232_v12, %v248_v14  ;;  %v3256_v24 = vcombine.low %v232_v12, %v248_v14  ;;  %v346_v3 = vld [vmem:[#allocation2 + $0x5f8] sm:$0xff]  ;;  %v3740_v14 = vld [vmem:[#allocation2 + $0x470] sm:$0xff] }
 0x16d   :  { %v3357_v12 = vcombine.high %v330_v2, %v346_v3 }
 0x16e   :  { %2400 = vmatpush1.bf16.msra.mxu1 %v3250_v20  ;;  %2453 = vmatpush1.bf16.msra.mxu0 %v3252_v21  ;;  %v215_v20 = vld [vmem:[#allocation2 + $0x1e0] sm:$0xff]  ;;  %v200_v21 = vld [vmem:[#allocation2 + $0x168] sm:$0xff] }
 0x16f   :  { %2401 = vmatprep.subr.bf16.mxu1 %v3219_v22  ;;  %2454 = vmatprep.subr.bf16.mxu0 %v3221_v23  ;;  %v216_v22 = vld [vmem:[#allocation2 + $0x1e8] sm:$0xff]  ;;  %v3254_v23 = vcombine.low %v231_v10, %v247_v11  ;;  %v3223_v25 = vcombine.high %v199_v19, %v215_v20  ;;  %v3222_v33 = vcombine.low %v199_v19, %v215_v20  ;;  %v298_v19 = vld [vmem:[#allocation2 + $0x478] sm:$0xff] }
 0x170   :  { %v3225_v26 = vcombine.high %v200_v21, %v216_v22  ;;  %v3224_v34 = vcombine.low %v200_v21, %v216_v22  ;;  %v314_v20 = vld [vmem:[#allocation2 + $0x4f8] sm:$0xff] }
 0x172   :  { %2402 = vmatpush1.bf16.msra.mxu1 %v3218_v29  ;;  %2455 = vmatpush1.bf16.msra.mxu0 %v3220_v30  ;;  %v419_v29 = vlaneseq  ;;  %v183_v30 = vld [vmem:[#allocation2 + $0xe0] sm:$0xff] }
 0x173   :  { %2403 = vmatprep.subr.bf16.mxu1 %v3187_v31  ;;  %2456 = vmatprep.subr.bf16.mxu0 %v3189_v32  ;;  %v168_v31 = vld [vmem:[#allocation2 + $0x68] sm:$0xff]  ;;  %v3191_v35 = vcombine.high %v167_v27, %v183_v30  ;;  %v3190_v42 = vcombine.low %v167_v27, %v183_v30 }
 0x174   :  { %v184_v32 = vld [vmem:[#allocation2 + $0xe8] sm:$0xff] }
 0x175   :  { %v3193_v36 = vcombine.high %v168_v31, %v184_v32  ;;  %v3192_v43 = vcombine.low %v168_v31, %v184_v32  ;;  %v3325_v31 = vcombine.high %v298_v19, %v314_v20 }
 0x176   :  { %2404 = vmatpush1.bf16.msra.mxu1 %v3186_v37  ;;  %2457 = vmatpush1.bf16.msra.mxu0 %v3188_v38  ;;  %v393_v37 = vld [vmem:[#allocation2 + $0x770] sm:$0xff]  ;;  %v3702_v38 = vshrl.u32 %v419_v29, 7  ;;  %v3356_v29 = vcombine.low %v330_v2, %v346_v3 }
 0x177   :  { %2495 = vmatprep.subr.bf16.mxu1 %v3415_v39  ;;  %2548 = vmatprep.subr.bf16.mxu0 %v3417_v40  ;;  %v409_v39 = vld [vmem:[#allocation2 + $0x7f0] sm:$0xff]  ;;  %v394_v40 = vld [vmem:[#allocation2 + $0x778] sm:$0xff] }
 0x178   :  { %v3419_v44 = vcombine.high %v393_v37, %v409_v39  ;;  %v3713_v50 = vsub.s32 2, %v3702_v38  ;;  %v3716_v51 = vsub.s32 1, %v3702_v38  ;;  %v3719_v52 = vsub.s32 3, %v3702_v38  ;;  %v249_v2 = vld [vmem:[#allocation2 + $0x2f0] sm:$0xff] }
 0x179   :  { %2422 = vmatmul.mubr.bf16.vlgmr.msra.gmra.mxu1 %v3650_v28  ;;  %2475 = vmatmul.mubr.bf16.vlgmr.msra.gmra.mxu0 %v3650_v28 }
 0x17a   :  { %2496 = vmatpush1.bf16.msra.mxu1 %v3414_v45  ;;  %2549 = vmatpush1.bf16.msra.mxu0 %v3416_v47  ;;  %v3421_v45 = vcombine.high %v394_v40, %v410_v41  ;;  %v3707_v47 = vld [vmem:[%s4020_s4] sm:$0xff] }
 0x17b   :  { %2497 = vmatprep.subr.bf16.mxu1 %v3383_v48  ;;  %2550 = vmatprep.subr.bf16.mxu0 %v3385_v49  ;;  %v3710_v48 = vsub.s32 0, %v3702_v38  ;;  %v361_v49 = vld [vmem:[#allocation2 + $0x670] sm:$0xff] }
 0x17c   :  { %2431 = vmatprep.mubr.bf16.mxu1 %v3592_v13  ;;  %2484 = vmatprep.mubr.bf16.mxu0 %v3592_v13  ;;  %v3387_v59 = vcombine.high %v361_v49, %v377_v53 }
 0x17d   :  { %v3723_v58 = vrot.slane %v3707_v47, %v3710_v48 }
 0x17e   :  { %2498 = vmatpush1.bf16.msra.mxu1 %v3382_v54  ;;  %2551 = vmatpush1.bf16.msra.mxu0 %v3384_v55  ;;  %v362_v54 = vld [vmem:[#allocation2 + $0x678] sm:$0xff] }
 0x17f   :  { %2499 = vmatprep.subr.bf16.mxu1 %v3351_v56  ;;  %2552 = vmatprep.subr.bf16.mxu0 %v3353_v57  ;;  %v378_v55 = vld [vmem:[#allocation2 + $0x6f8] sm:$0xff]  ;;  %v3418_v56 = vcombine.low %v393_v37, %v409_v39  ;;  %v3420_v57 = vcombine.low %v394_v40, %v410_v41  ;;  %v281_v37 = vld [vmem:[#allocation2 + $0x3f0] sm:$0xff] }
 0x180   :  { %v3389_v60 = vcombine.high %v362_v54, %v378_v55  ;;  %v266_v40 = vld [vmem:[#allocation2 + $0x378] sm:$0xff] }
 0x181   :  { %2432 = vmatmul.mubr.bf16.gmra.mxu1 %v3656_v46  ;;  %2485 = vmatmul.mubr.bf16.gmra.mxu0 %v3656_v46  ;;  %v282_v41 = vld [vmem:[#allocation2 + $0x3f8] sm:$0xff] }
 0x182   :  { %2500 = vmatpush1.bf16.msra.mxu1 %v3350_v62  ;;  %2553 = vmatpush1.bf16.msra.mxu0 %v3352_v63  ;;  %v3727_v62 = vrot.slane %v3707_v47, %v3713_v50  ;;  %v3731_v63 = vrot.slane %v3707_v47, %v3716_v51 }
 0x183   :  { %2501 = vmatprep.subr.bf16.mxu1 %v3319_v0  ;;  %2554 = vmatprep.subr.bf16.mxu0 %v3321_v1  ;;  %v3735_v0 = vrot.slane %v3707_v47, %v3719_v52  ;;  %v345_v1 = vld [vmem:[#allocation2 + $0x5f0] sm:$0xff] }
 0x184   :  { %2527 = vmatprep.mubr.bf16.mxu1 %v3592_v13  ;;  %2580 = vmatprep.mubr.bf16.mxu0 %v3592_v13  ;;  %v3355_v11 = vcombine.high %v329_v61, %v345_v1 }
 0x186   :  { %2502 = vmatpush1.bf16.msra.mxu1 %v3318_v6  ;;  %2555 = vmatpush1.bf16.msra.mxu0 %v3320_v7  ;;  %v3386_v6 = vcombine.low %v361_v49, %v377_v53  ;;  %v3388_v7 = vcombine.low %v362_v54, %v378_v55  ;;  %v3324_v54 = vcombine.low %v298_v19, %v314_v20  ;;  %v217_v19 = vld [vmem:[#allocation2 + $0x1f0] sm:$0xff]  ;;  %v202_v20 = vld [vmem:[#allocation2 + $0x178] sm:$0xff] }
 0x187   :  { %2503 = vmatprep.subr.bf16.mxu1 %v3287_v8  ;;  %2556 = vmatprep.subr.bf16.mxu0 %v3289_v9 }
 0x18a   :  { %2504 = vmatpush1.bf16.msra.mxu1 %v3286_v15  ;;  %2557 = vmatpush1.bf16.msra.mxu0 %v3288_v16 }
 0x18b   :  { %2505 = vmatprep.subr.bf16.mxu1 %v3255_v17  ;;  %2558 = vmatprep.subr.bf16.mxu0 %v3257_v18  ;;  %v313_v18 = vld [vmem:[#allocation2 + $0x4f0] sm:$0xff] }
 0x18c   :  { %v3323_v30 = vcombine.high %v3740_v14, %v313_v18  ;;  %v3322_v39 = vcombine.low %v3740_v14, %v313_v18  ;;  %v201_v18 = vld [vmem:[#allocation2 + $0x170] sm:$0xff] }
 0x18e   :  { %2506 = vmatpush1.bf16.msra.mxu1 %v3254_v23  ;;  %2559 = vmatpush1.bf16.msra.mxu0 %v3256_v24 }
 0x18f   :  { %2507 = vmatprep.subr.bf16.mxu1 %v3223_v25  ;;  %2560 = vmatprep.subr.bf16.mxu0 %v3225_v26  ;;  %v3354_v25 = vcombine.low %v329_v61, %v345_v1  ;;  %v233_v1 = vld [vmem:[#allocation2 + $0x270] sm:$0xff] }
 0x190   :  { %v3259_v14 = vcombine.high %v233_v1, %v249_v2 }
 0x192   :  { %2508 = vmatpush1.bf16.msra.mxu1 %v3222_v33  ;;  %2561 = vmatpush1.bf16.msra.mxu0 %v3224_v34 }
 0x193   :  { %2509 = vmatprep.subr.bf16.mxu1 %v3191_v35  ;;  %2562 = vmatprep.subr.bf16.mxu0 %v3193_v36  ;;  %v265_v36 = vld [vmem:[#allocation2 + $0x370] sm:$0xff] }
 0x194   :  { %v3291_v55 = vcombine.high %v265_v36, %v281_v37  ;;  %v3290_v3 = vcombine.low %v265_v36, %v281_v37  ;;  %v3790_v37 = vsub.s32 4, %v3702_v38 }
 0x196   :  { %2510 = vmatpush1.bf16.msra.mxu1 %v3190_v42  ;;  %2563 = vmatpush1.bf16.msra.mxu0 %v3192_v43 }
 0x197   :  { %2601 = vmatprep.subr.bf16.mxu1 %v3419_v44  ;;  %2654 = vmatprep.subr.bf16.mxu0 %v3421_v45 }
 0x199   :  { %2528 = vmatmul.mubr.bf16.vlgmr.msra.gmra.mxu1 %v3650_v28  ;;  %2581 = vmatmul.mubr.bf16.vlgmr.msra.gmra.mxu0 %v3650_v28  ;;  %v1893_v4 = vpop.f32.mrf.mxu1  ;;  %v1946_v5 = vpop.f32.mrf.mxu0 }
 0x19a   :  { %2602 = vmatpush1.bf16.msra.mxu1 %v3418_v56  ;;  %2655 = vmatpush1.bf16.msra.mxu0 %v3420_v57  ;;  %v1894_v8 = vadd.f32 %v1893_v4, %v3723_v58  ;;  %v1947_v15 = vadd.f32 %v1946_v5, %v3727_v62  ;;  %v234_v4 = vld [vmem:[#allocation2 + $0x278] sm:$0xff] }
 0x19b   :  { %v1895_v9 = vpop.f32.mrf.mxu1  ;;  %v1948_v10 = vpop.f32.mrf.mxu0  ;;  %2603 = vmatprep.subr.bf16.mxu1 %v3387_v59  ;;  %2656 = vmatprep.subr.bf16.mxu0 %v3389_v60  ;;  %v3293_v59 = vcombine.high %v266_v40, %v282_v41  ;;  %v250_v5 = vld [vmem:[#allocation2 + $0x2f8] sm:$0xff] }
 0x19c   :  { %v1896_v16 = vadd.f32 %v1895_v9, %v3731_v63  ;;  %v1949_v17 = vadd.f32 %v1948_v10, %v3735_v0  ;;  %2537 = vmatprep.mubr.bf16.mxu1 %v3592_v13  ;;  %2590 = vmatprep.mubr.bf16.mxu0 %v3592_v13 }
 0x19d   :  { %v1897_v21 = vpop.f32.mrf.mxu1  ;;  %v1950_v22 = vpop.f32.mrf.mxu0 }
 0x19e   :  { %v3486_v23 = vpack.c.bf16 %v1896_v16, %v1894_v8  ;;  %v3487_v24 = vpack.c.bf16 %v1949_v17, %v1947_v15  ;;  %2604 = vmatpush1.bf16.msra.mxu1 %v3386_v6  ;;  %2657 = vmatpush1.bf16.msra.mxu0 %v3388_v7  ;;  %v1898_v32 = vadd.f32 %v1897_v21, %v3723_v58  ;;  %v218_v21 = vld [vmem:[#allocation2 + $0x1f8] sm:$0xff] }
 0x19f   :  { %v1899_v26 = vpop.f32.mrf.mxu1  ;;  %v1952_v27 = vpop.f32.mrf.mxu0  ;;  %2605 = vmatprep.subr.bf16.mxu1 %v3355_v11  ;;  %v1951_v33 = vadd.f32 %v1950_v22, %v3727_v62  ;;  %2658 = vmatprep.subr.bf16.mxu0 %v3357_v12  ;;  %v3292_v12 = vcombine.low %v266_v40, %v282_v41  ;;  %v3261_v17 = vcombine.high %v234_v4, %v250_v5  ;;  %v3796_v40 = vsub.s32 5, %v3702_v38 }
 0x1a0   :  { %3091 = vst [vmem:[%s4021_s5] sm:$0xff] %v3486_v23  ;;  %3092 = vst [vmem:[%s4021_s5 + $0x8] sm:$0xff] %v3487_v24  ;;  %v1900_v34 = vadd.f32 %v1899_v26, %v3731_v63  ;;  %v1953_v35 = vadd.f32 %v1952_v27, %v3735_v0  ;;  %v3258_v22 = vcombine.low %v233_v1, %v249_v2  ;;  %v185_v27 = vld [vmem:[#allocation2 + $0xf0] sm:$0xff]  ;;  %v3799_v41 = vsub.s32 7, %v3702_v38 }
 0x1a1   :  { %2538 = vmatmul.mubr.bf16.gmra.mxu1 %v3656_v46  ;;  %2591 = vmatmul.mubr.bf16.gmra.mxu0 %v3656_v46  ;;  %v1903_v42 = vpop.f32.mrf.mxu1  ;;  %v1956_v43 = vpop.f32.mrf.mxu0  ;;  %v3227_v26 = vcombine.high %v201_v18, %v217_v19 }
 0x1a2   :  { %v3502_v44 = vpack.c.bf16 %v1900_v34, %v1898_v32  ;;  %v3503_v45 = vpack.c.bf16 %v1953_v35, %v1951_v33  ;;  %2606 = vmatpush1.bf16.msra.mxu1 %v3354_v25  ;;  %v1904_v49 = vadd.f32 %v1903_v42, %v3723_v58  ;;  %v1957_v53 = vadd.f32 %v1956_v43, %v3727_v62 }
 0x1a3   :  { %2659 = vmatpush1.bf16.msra.mxu0 %v3356_v29  ;;  %2607 = vmatprep.subr.bf16.mxu1 %v3323_v30  ;;  %v1905_v56 = vpop.f32.mrf.mxu1  ;;  %v1958_v57 = vpop.f32.mrf.mxu0  ;;  %v3260_v25 = vcombine.low %v234_v4, %v250_v5  ;;  %v170_v29 = vld [vmem:[#allocation2 + $0x78] sm:$0xff]  ;;  %v3228_v32 = vcombine.low %v202_v20, %v218_v21  ;;  %v438_v42 = vrot.slane %v3707_v47, %v3790_v37 }
 0x1a4   :  { %3107 = vst [vmem:[%s4021_s5 + $0x80] sm:$0xff] %v3502_v44  ;;  %3108 = vst [vmem:[%s4021_s5 + $0x88] sm:$0xff] %v3503_v45  ;;  %2660 = vmatprep.subr.bf16.mxu0 %v3325_v31  ;;  %v1906_v60 = vadd.f32 %v1905_v56, %v3731_v63  ;;  %v1959_v61 = vadd.f32 %v1958_v57, %v3735_v0  ;;  %2633 = vmatprep.mubr.bf16.mxu1 %v3592_v13  ;;  %v186_v30 = vld [vmem:[#allocation2 + $0xf8] sm:$0xff] }
 0x1a5   :  { %v1907_v6 = vpop.f32.mrf.mxu1  ;;  %v1960_v7 = vpop.f32.mrf.mxu0  ;;  %2686 = vmatprep.mubr.bf16.mxu0 %v3592_v13  ;;  %v3226_v31 = vcombine.low %v201_v18, %v217_v19  ;;  %v3197_v34 = vcombine.high %v170_v29, %v186_v30  ;;  %v3196_v36 = vcombine.low %v170_v29, %v186_v30  ;;  %v442_v44 = vrot.slane %v3707_v47, %v3796_v40 }
 0x1a6   :  { %2608 = vmatpush1.bf16.msra.mxu1 %v3322_v39  ;;  %v3518_v8 = vpack.c.bf16 %v1906_v60, %v1904_v49  ;;  %v3519_v9 = vpack.c.bf16 %v1959_v61, %v1957_v53  ;;  %v1908_v10 = vadd.f32 %v1907_v6, %v3723_v58  ;;  %v1961_v11 = vadd.f32 %v1960_v7, %v3727_v62 }
 0x1a7   :  { %2661 = vmatpush1.bf16.msra.mxu0 %v3324_v54  ;;  %2609 = vmatprep.subr.bf16.mxu1 %v3291_v55  ;;  %v1909_v15 = vpop.f32.mrf.mxu1  ;;  %v1962_v16 = vpop.f32.mrf.mxu0  ;;  %v3793_v39 = vsub.s32 6, %v3702_v38  ;;  %v450_v45 = vrot.slane %v3707_v47, %v3799_v41 }
 0x1a8   :  { %2662 = vmatprep.subr.bf16.mxu0 %v3293_v59  ;;  %3123 = vst [vmem:[%s4021_s5 + $0x100] sm:$0xff] %v3518_v8  ;;  %3124 = vst [vmem:[%s4021_s5 + $0x108] sm:$0xff] %v3519_v9  ;;  %v1910_v58 = vadd.f32 %v1909_v15, %v3731_v63  ;;  %v1963_v62 = vadd.f32 %v1962_v16, %v3735_v0  ;;  %v3229_v63 = vcombine.high %v202_v20, %v218_v21  ;;  %v169_v0 = vld [vmem:[#allocation2 + $0x70] sm:$0xff] }
 0x1a9   :  { %v3195_v33 = vcombine.high %v169_v0, %v185_v27  ;;  %v3194_v35 = vcombine.low %v169_v0, %v185_v27  ;;  %v446_v43 = vrot.slane %v3707_v47, %v3793_v39 }
 0x1aa   :  { %2610 = vmatpush1.bf16.msra.mxu1 %v3290_v3  ;;  %v3534_v23 = vpack.c.bf16 %v1910_v58, %v1908_v10  ;;  %v3535_v24 = vpack.c.bf16 %v1963_v62, %v1961_v11 }
 0x1ab   :  { %2663 = vmatpush1.bf16.msra.mxu0 %v3292_v12  ;;  %2611 = vmatprep.subr.bf16.mxu1 %v3259_v14 }
 0x1ac   :  { %2664 = vmatprep.subr.bf16.mxu0 %v3261_v17  ;;  %3139 = vst [vmem:[%s4021_s5 + $0x180] sm:$0xff] %v3534_v23  ;;  %3140 = vst [vmem:[%s4021_s5 + $0x188] sm:$0xff] %v3535_v24 }
 0x1ae   :  { %2612 = vmatpush1.bf16.msra.mxu1 %v3258_v22 }
 0x1af   :  { %2665 = vmatpush1.bf16.msra.mxu0 %v3260_v25  ;;  %2613 = vmatprep.subr.bf16.mxu1 %v3227_v26  ;;  %v412_v26 = vld [vmem:[%s4020_s4 + $0x8] sm:$0xff] }
 0x1b0   :  { %2666 = vmatprep.subr.bf16.mxu0 %v3229_v63  ;;  %v454_v63 = vrot.slane %v412_v26, %v3710_v48  ;;  %v462_v0 = vrot.slane %v412_v26, %v3713_v50  ;;  %v458_v27 = vrot.slane %v412_v26, %v3716_v51  ;;  %v466_v29 = vrot.slane %v412_v26, %v3719_v52 }
 0x1b2   :  { %2614 = vmatpush1.bf16.msra.mxu1 %v3226_v31 }
 0x1b3   :  { %2667 = vmatpush1.bf16.msra.mxu0 %v3228_v32  ;;  %2615 = vmatprep.subr.bf16.mxu1 %v3195_v33 }
 0x1b4   :  { %2668 = vmatprep.subr.bf16.mxu0 %v3197_v34 }
 0x1b6   :  { %2616 = vmatpush1.bf16.msra.mxu1 %v3194_v35 }
 0x1b7   :  { %2669 = vmatpush1.bf16.msra.mxu0 %v3196_v36 }
 0x1b9   :  { %v1999_v49 = vpop.f32.mrf.mxu1  ;;  %v2052_v53 = vpop.f32.mrf.mxu0  ;;  %2634 = vmatmul.mubr.bf16.vlgmr.msra.gmra.mxu1 %v3650_v28 }
 0x1ba   :  { %2687 = vmatmul.mubr.bf16.vlgmr.msra.gmra.mxu0 %v3650_v28  ;;  %2643 = vmatprep.mubr.bf16.mxu1 %v3592_v13  ;;  %v2000_v55 = vadd.f32 %v1999_v49, %v438_v42  ;;  %v2053_v56 = vadd.f32 %v2052_v53, %v446_v43 }
 0x1bb   :  { %v2001_v38 = vpop.f32.mrf.mxu1  ;;  %v2054_v54 = vpop.f32.mrf.mxu0  ;;  %2696 = vmatprep.mubr.bf16.mxu0 %v3592_v13 }
 0x1bc   :  { %v2002_v57 = vadd.f32 %v2001_v38, %v442_v44  ;;  %v2055_v59 = vadd.f32 %v2054_v54, %v450_v45 }
 0x1bd   :  { %v2003_v60 = vpop.f32.mrf.mxu1  ;;  %v2056_v61 = vpop.f32.mrf.mxu0 }
 0x1be   :  { %v3488_v1 = vpack.c.bf16 %v2002_v57, %v2000_v55  ;;  %v3489_v47 = vpack.c.bf16 %v2055_v59, %v2053_v56  ;;  %v2004_v28 = vadd.f32 %v2003_v60, %v438_v42  ;;  %v2057_v13 = vadd.f32 %v2056_v61, %v446_v43 }
 0x1bf   :  { %v2005_v2 = vpop.f32.mrf.mxu1  ;;  %v2058_v3 = vpop.f32.mrf.mxu0 }
 0x1c0   :  { %3093 = vst [vmem:[%s4021_s5 + $0x10] sm:$0xff] %v3488_v1  ;;  %3094 = vst [vmem:[%s4021_s5 + $0x18] sm:$0xff] %v3489_v47  ;;  %v2006_v4 = vadd.f32 %v2005_v2, %v442_v44  ;;  %v2059_v5 = vadd.f32 %v2058_v3, %v450_v45 }
 0x1c1   :  { %v2009_v6 = vpop.f32.mrf.mxu1  ;;  %v2062_v7 = vpop.f32.mrf.mxu0  ;;  %2644 = vmatmul.mubr.bf16.gmra.mxu1 %v3656_v46 }
 0x1c2   :  { %v3504_v8 = vpack.c.bf16 %v2006_v4, %v2004_v28  ;;  %v3505_v9 = vpack.c.bf16 %v2059_v5, %v2057_v13  ;;  %2697 = vmatmul.mubr.bf16.gmra.mxu0 %v3656_v46  ;;  %v2010_v12 = vadd.f32 %v2009_v6, %v438_v42  ;;  %v2063_v14 = vadd.f32 %v2062_v7, %v446_v43 }
 0x1c3   :  { %v2011_v10 = vpop.f32.mrf.mxu1  ;;  %v2064_v11 = vpop.f32.mrf.mxu0 }
 0x1c4   :  { %3109 = vst [vmem:[%s4021_s5 + $0x90] sm:$0xff] %v3504_v8  ;;  %3110 = vst [vmem:[%s4021_s5 + $0x98] sm:$0xff] %v3505_v9  ;;  %v2012_v15 = vadd.f32 %v2011_v10, %v442_v44  ;;  %v2065_v16 = vadd.f32 %v2064_v11, %v450_v45 }
 0x1c5   :  { %v2013_v17 = vpop.f32.mrf.mxu1  ;;  %v2066_v58 = vpop.f32.mrf.mxu0 }
 0x1c6   :  { %v3520_v62 = vpack.c.bf16 %v2012_v15, %v2010_v12  ;;  %v3521_v18 = vpack.c.bf16 %v2065_v16, %v2063_v14  ;;  %v2014_v20 = vadd.f32 %v2013_v17, %v438_v42  ;;  %v2067_v21 = vadd.f32 %v2066_v58, %v446_v43 }
 0x1c7   :  { %v2015_v19 = vpop.f32.mrf.mxu1  ;;  %v2068_v46 = vpop.f32.mrf.mxu0  ;;  %v470_v58 = vrot.slane %v412_v26, %v3790_v37 }
 0x1c8   :  { %3125 = vst [vmem:[%s4021_s5 + $0x110] sm:$0xff] %v3520_v62  ;;  %3126 = vst [vmem:[%s4021_s5 + $0x118] sm:$0xff] %v3521_v18  ;;  %v2016_v22 = vadd.f32 %v2015_v19, %v442_v44  ;;  %v2069_v23 = vadd.f32 %v2068_v46, %v450_v45  ;;  %v478_v62 = vrot.slane %v412_v26, %v3793_v39 }
 0x1c9   :  { %v474_v18 = vrot.slane %v412_v26, %v3796_v40  ;;  %v482_v19 = vrot.slane %v412_v26, %v3799_v41 }
 0x1ca   :  { %v3536_v24 = vpack.c.bf16 %v2016_v22, %v2014_v20  ;;  %v3537_v25 = vpack.c.bf16 %v2069_v23, %v2067_v21 }
 0x1cc   :  { %3141 = vst [vmem:[%s4021_s5 + $0x190] sm:$0xff] %v3536_v24  ;;  %3142 = vst [vmem:[%s4021_s5 + $0x198] sm:$0xff] %v3537_v25 }
 0x1d9   :  { %v2105_v30 = vpop.f32.mrf.mxu1  ;;  %v2158_v31 = vpop.f32.mrf.mxu0 }
 0x1da   :  { %v2106_v34 = vadd.f32 %v2105_v30, %v454_v63  ;;  %v2159_v35 = vadd.f32 %v2158_v31, %v462_v0 }
 0x1db   :  { %v2107_v32 = vpop.f32.mrf.mxu1  ;;  %v2160_v33 = vpop.f32.mrf.mxu0 }
 0x1dc   :  { %v2108_v36 = vadd.f32 %v2107_v32, %v458_v27  ;;  %v2161_v42 = vadd.f32 %v2160_v33, %v466_v29 }
 0x1dd   :  { %v2109_v43 = vpop.f32.mrf.mxu1  ;;  %v2162_v44 = vpop.f32.mrf.mxu0 }
 0x1de   :  { %v3490_v45 = vpack.c.bf16 %v2108_v36, %v2106_v34  ;;  %v3491_v49 = vpack.c.bf16 %v2161_v42, %v2159_v35  ;;  %v2110_v54 = vadd.f32 %v2109_v43, %v454_v63  ;;  %v2163_v55 = vadd.f32 %v2162_v44, %v462_v0 }
 0x1df   :  { %v2111_v53 = vpop.f32.mrf.mxu1  ;;  %v2164_v38 = vpop.f32.mrf.mxu0 }
 0x1e0   :  { %3095 = vst [vmem:[%s4021_s5 + $0x20] sm:$0xff] %v3490_v45  ;;  %3096 = vst [vmem:[%s4021_s5 + $0x28] sm:$0xff] %v3491_v49  ;;  %v2112_v56 = vadd.f32 %v2111_v53, %v458_v27  ;;  %v2165_v57 = vadd.f32 %v2164_v38, %v466_v29 }
 0x1e1   :  { %v2115_v59 = vpop.f32.mrf.mxu1  ;;  %v2168_v60 = vpop.f32.mrf.mxu0 }
 0x1e2   :  { %v3506_v61 = vpack.c.bf16 %v2112_v56, %v2110_v54  ;;  %v3507_v1 = vpack.c.bf16 %v2165_v57, %v2163_v55  ;;  %v2116_v3 = vadd.f32 %v2115_v59, %v454_v63  ;;  %v2169_v28 = vadd.f32 %v2168_v60, %v462_v0 }
 0x1e3   :  { %v2117_v47 = vpop.f32.mrf.mxu1  ;;  %v2170_v2 = vpop.f32.mrf.mxu0 }
 0x1e4   :  { %3111 = vst [vmem:[%s4021_s5 + $0xa0] sm:$0xff] %v3506_v61  ;;  %3112 = vst [vmem:[%s4021_s5 + $0xa8] sm:$0xff] %v3507_v1  ;;  %v2118_v13 = vadd.f32 %v2117_v47, %v458_v27  ;;  %v2171_v4 = vadd.f32 %v2170_v2, %v466_v29 }
 0x1e5   :  { %v2119_v5 = vpop.f32.mrf.mxu1  ;;  %v2172_v6 = vpop.f32.mrf.mxu0 }
 0x1e6   :  { %v3522_v7 = vpack.c.bf16 %v2118_v13, %v2116_v3  ;;  %v3523_v8 = vpack.c.bf16 %v2171_v4, %v2169_v28  ;;  %v2120_v11 = vadd.f32 %v2119_v5, %v454_v63  ;;  %v2173_v12 = vadd.f32 %v2172_v6, %v462_v0  ;;  %v413_v5 = vld [vmem:[%s4020_s4 + $0x10] sm:$0xff] }
 0x1e7   :  { %v2121_v9 = vpop.f32.mrf.mxu1  ;;  %v2174_v10 = vpop.f32.mrf.mxu0  ;;  %v486_v6 = vrot.slane %v413_v5, %v3710_v48 }
 0x1e8   :  { %3127 = vst [vmem:[%s4021_s5 + $0x120] sm:$0xff] %v3522_v7  ;;  %3128 = vst [vmem:[%s4021_s5 + $0x128] sm:$0xff] %v3523_v8  ;;  %v2122_v14 = vadd.f32 %v2121_v9, %v458_v27  ;;  %v2175_v15 = vadd.f32 %v2174_v10, %v466_v29  ;;  %v494_v7 = vrot.slane %v413_v5, %v3713_v50 }
 0x1e9   :  { %v490_v8 = vrot.slane %v413_v5, %v3716_v51  ;;  %v498_v9 = vrot.slane %v413_v5, %v3719_v52 }
 0x1ea   :  { %v3538_v16 = vpack.c.bf16 %v2122_v14, %v2120_v11  ;;  %v3539_v17 = vpack.c.bf16 %v2175_v15, %v2173_v12 }
 0x1ec   :  { %3143 = vst [vmem:[%s4021_s5 + $0x1a0] sm:$0xff] %v3538_v16  ;;  %3144 = vst [vmem:[%s4021_s5 + $0x1a8] sm:$0xff] %v3539_v17 }
 0x1f9   :  { %v2211_v46 = vpop.f32.mrf.mxu1  ;;  %v2264_v20 = vpop.f32.mrf.mxu0 }
 0x1fa   :  { %v2212_v23 = vadd.f32 %v2211_v46, %v470_v58  ;;  %v2265_v24 = vadd.f32 %v2264_v20, %v478_v62 }
 0x1fb   :  { %v2213_v21 = vpop.f32.mrf.mxu1  ;;  %v2266_v22 = vpop.f32.mrf.mxu0 }
 0x1fc   :  { %v2214_v25 = vadd.f32 %v2213_v21, %v474_v18  ;;  %v2267_v63 = vadd.f32 %v2266_v22, %v482_v19 }
 0x1fd   :  { %v2215_v0 = vpop.f32.mrf.mxu1  ;;  %v2268_v27 = vpop.f32.mrf.mxu0 }
 0x1fe   :  { %v3492_v29 = vpack.c.bf16 %v2214_v25, %v2212_v23  ;;  %v3493_v30 = vpack.c.bf16 %v2267_v63, %v2265_v24  ;;  %v2216_v26 = vadd.f32 %v2215_v0, %v470_v58  ;;  %v2269_v33 = vadd.f32 %v2268_v27, %v478_v62 }
 0x1ff   :  { %v2217_v31 = vpop.f32.mrf.mxu1  ;;  %v2270_v32 = vpop.f32.mrf.mxu0 }
 0x200   :  { %3097 = vst [vmem:[%s4021_s5 + $0x30] sm:$0xff] %v3492_v29  ;;  %3098 = vst [vmem:[%s4021_s5 + $0x38] sm:$0xff] %v3493_v30  ;;  %v2218_v34 = vadd.f32 %v2217_v31, %v474_v18  ;;  %v2271_v35 = vadd.f32 %v2270_v32, %v482_v19 }
 0x201   :  { %v2221_v36 = vpop.f32.mrf.mxu1  ;;  %v2274_v42 = vpop.f32.mrf.mxu0 }
 0x202   :  { %v3508_v43 = vpack.c.bf16 %v2218_v34, %v2216_v26  ;;  %v3509_v44 = vpack.c.bf16 %v2271_v35, %v2269_v33  ;;  %v2222_v53 = vadd.f32 %v2221_v36, %v470_v58  ;;  %v2275_v38 = vadd.f32 %v2274_v42, %v478_v62 }
 0x203   :  { %v2223_v45 = vpop.f32.mrf.mxu1  ;;  %v2276_v49 = vpop.f32.mrf.mxu0 }
 0x204   :  { %3113 = vst [vmem:[%s4021_s5 + $0xb0] sm:$0xff] %v3508_v43  ;;  %3114 = vst [vmem:[%s4021_s5 + $0xb8] sm:$0xff] %v3509_v44  ;;  %v2224_v54 = vadd.f32 %v2223_v45, %v474_v18  ;;  %v2277_v55 = vadd.f32 %v2276_v49, %v482_v19 }
 0x205   :  { %v2225_v56 = vpop.f32.mrf.mxu1  ;;  %v2278_v57 = vpop.f32.mrf.mxu0 }
 0x206   :  { %v3524_v59 = vpack.c.bf16 %v2224_v54, %v2222_v53  ;;  %v3525_v60 = vpack.c.bf16 %v2277_v55, %v2275_v38  ;;  %v2226_v47 = vadd.f32 %v2225_v56, %v470_v58  ;;  %v2279_v2 = vadd.f32 %v2278_v57, %v478_v62 }
 0x207   :  { %v2227_v61 = vpop.f32.mrf.mxu1  ;;  %v2280_v1 = vpop.f32.mrf.mxu0  ;;  %v502_v57 = vrot.slane %v413_v5, %v3790_v37 }
 0x208   :  { %3129 = vst [vmem:[%s4021_s5 + $0x130] sm:$0xff] %v3524_v59  ;;  %3130 = vst [vmem:[%s4021_s5 + $0x138] sm:$0xff] %v3525_v60  ;;  %v2228_v3 = vadd.f32 %v2227_v61, %v474_v18  ;;  %v2281_v28 = vadd.f32 %v2280_v1, %v482_v19  ;;  %v510_v59 = vrot.slane %v413_v5, %v3793_v39 }
 0x209   :  { %v506_v60 = vrot.slane %v413_v5, %v3796_v40  ;;  %v514_v61 = vrot.slane %v413_v5, %v3799_v41 }
 0x20a   :  { %v3540_v13 = vpack.c.bf16 %v2228_v3, %v2226_v47  ;;  %v3541_v4 = vpack.c.bf16 %v2281_v28, %v2279_v2 }
 0x20c   :  { %3145 = vst [vmem:[%s4021_s5 + $0x1b0] sm:$0xff] %v3540_v13  ;;  %3146 = vst [vmem:[%s4021_s5 + $0x1b8] sm:$0xff] %v3541_v4 }
 0x219   :  { %v2317_v10 = vpop.f32.mrf.mxu1  ;;  %v2370_v11 = vpop.f32.mrf.mxu0 }
 0x21a   :  { %v2318_v15 = vadd.f32 %v2317_v10, %v486_v6  ;;  %v2371_v16 = vadd.f32 %v2370_v11, %v494_v7 }
 0x21b   :  { %v2319_v12 = vpop.f32.mrf.mxu1  ;;  %v2372_v14 = vpop.f32.mrf.mxu0 }
 0x21c   :  { %v2320_v17 = vadd.f32 %v2319_v12, %v490_v8  ;;  %v2373_v58 = vadd.f32 %v2372_v14, %v498_v9 }
 0x21d   :  { %v2321_v62 = vpop.f32.mrf.mxu1  ;;  %v2374_v18 = vpop.f32.mrf.mxu0 }
 0x21e   :  { %v3494_v19 = vpack.c.bf16 %v2320_v17, %v2318_v15  ;;  %v3495_v46 = vpack.c.bf16 %v2373_v58, %v2371_v16  ;;  %v2322_v22 = vadd.f32 %v2321_v62, %v486_v6  ;;  %v2375_v23 = vadd.f32 %v2374_v18, %v494_v7 }
 0x21f   :  { %v2323_v20 = vpop.f32.mrf.mxu1  ;;  %v2376_v21 = vpop.f32.mrf.mxu0 }
 0x220   :  { %3099 = vst [vmem:[%s4021_s5 + $0x40] sm:$0xff] %v3494_v19  ;;  %3100 = vst [vmem:[%s4021_s5 + $0x48] sm:$0xff] %v3495_v46  ;;  %v2324_v24 = vadd.f32 %v2323_v20, %v490_v8  ;;  %v2377_v25 = vadd.f32 %v2376_v21, %v498_v9 }
 0x221   :  { %v2327_v63 = vpop.f32.mrf.mxu1  ;;  %v2380_v0 = vpop.f32.mrf.mxu0 }
 0x222   :  { %v3510_v27 = vpack.c.bf16 %v2324_v24, %v2322_v22  ;;  %v3511_v29 = vpack.c.bf16 %v2377_v25, %v2375_v23  ;;  %v2328_v32 = vadd.f32 %v2327_v63, %v486_v6  ;;  %v2381_v26 = vadd.f32 %v2380_v0, %v494_v7 }
 0x223   :  { %v2329_v30 = vpop.f32.mrf.mxu1  ;;  %v2382_v31 = vpop.f32.mrf.mxu0 }
 0x224   :  { %3115 = vst [vmem:[%s4021_s5 + $0xc0] sm:$0xff] %v3510_v27  ;;  %3116 = vst [vmem:[%s4021_s5 + $0xc8] sm:$0xff] %v3511_v29  ;;  %v2330_v33 = vadd.f32 %v2329_v30, %v490_v8  ;;  %v2383_v34 = vadd.f32 %v2382_v31, %v498_v9 }
 0x225   :  { %v2331_v35 = vpop.f32.mrf.mxu1  ;;  %v2384_v36 = vpop.f32.mrf.mxu0 }
 0x226   :  { %v3526_v42 = vpack.c.bf16 %v2330_v33, %v2328_v32  ;;  %v3527_v43 = vpack.c.bf16 %v2383_v34, %v2381_v26  ;;  %v2332_v49 = vadd.f32 %v2331_v35, %v486_v6  ;;  %v2385_v53 = vadd.f32 %v2384_v36, %v494_v7  ;;  %v414_v35 = vld [vmem:[%s4020_s4 + $0x18] sm:$0xff] }
 0x227   :  { %v2333_v44 = vpop.f32.mrf.mxu1  ;;  %v2386_v45 = vpop.f32.mrf.mxu0  ;;  %v518_v36 = vrot.slane %v414_v35, %v3710_v48 }
 0x228   :  { %3131 = vst [vmem:[%s4021_s5 + $0x140] sm:$0xff] %v3526_v42  ;;  %3132 = vst [vmem:[%s4021_s5 + $0x148] sm:$0xff] %v3527_v43  ;;  %v2334_v38 = vadd.f32 %v2333_v44, %v490_v8  ;;  %v2387_v54 = vadd.f32 %v2386_v45, %v498_v9  ;;  %v526_v42 = vrot.slane %v414_v35, %v3713_v50 }
 0x229   :  { %v522_v43 = vrot.slane %v414_v35, %v3716_v51  ;;  %v530_v44 = vrot.slane %v414_v35, %v3719_v52 }
 0x22a   :  { %v3542_v55 = vpack.c.bf16 %v2334_v38, %v2332_v49  ;;  %v3543_v56 = vpack.c.bf16 %v2387_v54, %v2385_v53 }
 0x22c   :  { %3147 = vst [vmem:[%s4021_s5 + $0x1c0] sm:$0xff] %v3542_v55  ;;  %3148 = vst [vmem:[%s4021_s5 + $0x1c8] sm:$0xff] %v3543_v56 }
 0x239   :  { %v2423_v1 = vpop.f32.mrf.mxu1  ;;  %v2476_v47 = vpop.f32.mrf.mxu0 }
 0x23a   :  { %v2424_v28 = vadd.f32 %v2423_v1, %v502_v57  ;;  %v2477_v13 = vadd.f32 %v2476_v47, %v510_v59 }
 0x23b   :  { %v2425_v2 = vpop.f32.mrf.mxu1  ;;  %v2478_v3 = vpop.f32.mrf.mxu0 }
 0x23c   :  { %v2426_v4 = vadd.f32 %v2425_v2, %v506_v60  ;;  %v2479_v6 = vadd.f32 %v2478_v3, %v514_v61 }
 0x23d   :  { %v2427_v7 = vpop.f32.mrf.mxu1  ;;  %v2480_v8 = vpop.f32.mrf.mxu0 }
 0x23e   :  { %v3496_v9 = vpack.c.bf16 %v2426_v4, %v2424_v28  ;;  %v3497_v10 = vpack.c.bf16 %v2479_v6, %v2477_v13  ;;  %v2428_v5 = vadd.f32 %v2427_v7, %v502_v57  ;;  %v2481_v14 = vadd.f32 %v2480_v8, %v510_v59 }
 0x23f   :  { %v2429_v11 = vpop.f32.mrf.mxu1  ;;  %v2482_v12 = vpop.f32.mrf.mxu0 }
 0x240   :  { %3101 = vst [vmem:[%s4021_s5 + $0x50] sm:$0xff] %v3496_v9  ;;  %3102 = vst [vmem:[%s4021_s5 + $0x58] sm:$0xff] %v3497_v10  ;;  %v2430_v15 = vadd.f32 %v2429_v11, %v506_v60  ;;  %v2483_v16 = vadd.f32 %v2482_v12, %v514_v61 }
 0x241   :  { %v2433_v17 = vpop.f32.mrf.mxu1  ;;  %v2486_v58 = vpop.f32.mrf.mxu0 }
 0x242   :  { %v3512_v62 = vpack.c.bf16 %v2430_v15, %v2428_v5  ;;  %v3513_v18 = vpack.c.bf16 %v2483_v16, %v2481_v14  ;;  %v2434_v20 = vadd.f32 %v2433_v17, %v502_v57  ;;  %v2487_v21 = vadd.f32 %v2486_v58, %v510_v59 }
 0x243   :  { %v2435_v19 = vpop.f32.mrf.mxu1  ;;  %v2488_v46 = vpop.f32.mrf.mxu0 }
 0x244   :  { %3117 = vst [vmem:[%s4021_s5 + $0xd0] sm:$0xff] %v3512_v62  ;;  %3118 = vst [vmem:[%s4021_s5 + $0xd8] sm:$0xff] %v3513_v18  ;;  %v2436_v22 = vadd.f32 %v2435_v19, %v506_v60  ;;  %v2489_v23 = vadd.f32 %v2488_v46, %v514_v61 }
 0x245   :  { %v2437_v24 = vpop.f32.mrf.mxu1  ;;  %v2490_v25 = vpop.f32.mrf.mxu0 }
 0x246   :  { %v3528_v63 = vpack.c.bf16 %v2436_v22, %v2434_v20  ;;  %v3529_v0 = vpack.c.bf16 %v2489_v23, %v2487_v21  ;;  %v2438_v30 = vadd.f32 %v2437_v24, %v502_v57  ;;  %v2491_v31 = vadd.f32 %v2490_v25, %v510_v59 }
 0x247   :  { %v2439_v27 = vpop.f32.mrf.mxu1  ;;  %v2492_v29 = vpop.f32.mrf.mxu0  ;;  %v534_v21 = vrot.slane %v414_v35, %v3790_v37  ;;  %v538_v22 = vrot.slane %v414_v35, %v3796_v40  ;;  %v542_v24 = vrot.slane %v414_v35, %v3793_v39  ;;  %v546_v25 = vrot.slane %v414_v35, %v3799_v41 }
 0x248   :  { %3133 = vst [vmem:[%s4021_s5 + $0x150] sm:$0xff] %v3528_v63  ;;  %3134 = vst [vmem:[%s4021_s5 + $0x158] sm:$0xff] %v3529_v0  ;;  %v2440_v32 = vadd.f32 %v2439_v27, %v506_v60  ;;  %v2493_v26 = vadd.f32 %v2492_v29, %v514_v61 }
 0x24a   :  { %v3544_v33 = vpack.c.bf16 %v2440_v32, %v2438_v30  ;;  %v3545_v34 = vpack.c.bf16 %v2493_v26, %v2491_v31 }
 0x24c   :  { %3149 = vst [vmem:[%s4021_s5 + $0x1d0] sm:$0xff] %v3544_v33  ;;  %3150 = vst [vmem:[%s4021_s5 + $0x1d8] sm:$0xff] %v3545_v34 }
 0x259   :  { %v2529_v45 = vpop.f32.mrf.mxu1  ;;  %v2582_v49 = vpop.f32.mrf.mxu0 }
 0x25a   :  { %v2530_v54 = vadd.f32 %v2529_v45, %v518_v36  ;;  %v2583_v55 = vadd.f32 %v2582_v49, %v526_v42 }
 0x25b   :  { %v2531_v53 = vpop.f32.mrf.mxu1  ;;  %v2584_v38 = vpop.f32.mrf.mxu0 }
 0x25c   :  { %v2532_v56 = vadd.f32 %v2531_v53, %v522_v43  ;;  %v2585_v57 = vadd.f32 %v2584_v38, %v530_v44 }
 0x25d   :  { %v2533_v59 = vpop.f32.mrf.mxu1  ;;  %v2586_v60 = vpop.f32.mrf.mxu0 }
 0x25e   :  { %v3498_v61 = vpack.c.bf16 %v2532_v56, %v2530_v54  ;;  %v3499_v1 = vpack.c.bf16 %v2585_v57, %v2583_v55  ;;  %v2534_v50 = vadd.f32 %v2533_v59, %v518_v36  ;;  %v2587_v51 = vadd.f32 %v2586_v60, %v526_v42 }
 0x25f   :  { %v2535_v47 = vpop.f32.mrf.mxu1  ;;  %v2588_v48 = vpop.f32.mrf.mxu0 }
 0x260   :  { %3103 = vst [vmem:[%s4021_s5 + $0x60] sm:$0xff] %v3498_v61  ;;  %3104 = vst [vmem:[%s4021_s5 + $0x68] sm:$0xff] %v3499_v1  ;;  %v2536_v52 = vadd.f32 %v2535_v47, %v522_v43  ;;  %v2589_v2 = vadd.f32 %v2588_v48, %v530_v44 }
 0x261   :  { %v2539_v3 = vpop.f32.mrf.mxu1  ;;  %v2592_v28 = vpop.f32.mrf.mxu0 }
 0x262   :  { %v3514_v13 = vpack.c.bf16 %v2536_v52, %v2534_v50  ;;  %v3515_v4 = vpack.c.bf16 %v2589_v2, %v2587_v51  ;;  %v2540_v8 = vadd.f32 %v2539_v3, %v518_v36  ;;  %v2593_v9 = vadd.f32 %v2592_v28, %v526_v42 }
 0x263   :  { %v2541_v6 = vpop.f32.mrf.mxu1  ;;  %v2594_v7 = vpop.f32.mrf.mxu0 }
 0x264   :  { %3119 = vst [vmem:[%s4021_s5 + $0xe0] sm:$0xff] %v3514_v13  ;;  %3120 = vst [vmem:[%s4021_s5 + $0xe8] sm:$0xff] %v3515_v4  ;;  %v2542_v10 = vadd.f32 %v2541_v6, %v522_v43  ;;  %v2595_v11 = vadd.f32 %v2594_v7, %v530_v44 }
 0x265   :  { %v2543_v12 = vpop.f32.mrf.mxu1  ;;  %v2596_v5 = vpop.f32.mrf.mxu0 }
 0x266   :  { %v3530_v14 = vpack.c.bf16 %v2542_v10, %v2540_v8  ;;  %v3531_v15 = vpack.c.bf16 %v2595_v11, %v2593_v9  ;;  %v2544_v58 = vadd.f32 %v2543_v12, %v518_v36  ;;  %v2597_v62 = vadd.f32 %v2596_v5, %v526_v42 }
 0x267   :  { %v2545_v16 = vpop.f32.mrf.mxu1  ;;  %v2598_v17 = vpop.f32.mrf.mxu0 }
 0x268   :  { %3135 = vst [vmem:[%s4021_s5 + $0x160] sm:$0xff] %v3530_v14  ;;  %3136 = vst [vmem:[%s4021_s5 + $0x168] sm:$0xff] %v3531_v15  ;;  %v2546_v18 = vadd.f32 %v2545_v16, %v522_v43  ;;  %v2599_v19 = vadd.f32 %v2598_v17, %v530_v44 }
 0x26a   :  { %v3546_v46 = vpack.c.bf16 %v2546_v18, %v2544_v58  ;;  %v3547_v20 = vpack.c.bf16 %v2599_v19, %v2597_v62 }
 0x26c   :  { %3151 = vst [vmem:[%s4021_s5 + $0x1e0] sm:$0xff] %v3546_v46  ;;  %3152 = vst [vmem:[%s4021_s5 + $0x1e8] sm:$0xff] %v3547_v20 }
 0x279   :  { %v2635_v23 = vpop.f32.mrf.mxu1 }
 0x27a   :  { %v2688_v63 = vpop.f32.mrf.mxu0  ;;  %v2636_v27 = vadd.f32 %v2635_v23, %v534_v21 }
 0x27b   :  { %v2637_v0 = vpop.f32.mrf.mxu1  ;;  %v2689_v31 = vadd.f32 %v2688_v63, %v542_v24 }
 0x27c   :  { %v2638_v29 = vadd.f32 %v2637_v0, %v538_v22  ;;  %v2690_v30 = vpop.f32.mrf.mxu0 }
 0x27d   :  { %v2691_v32 = vadd.f32 %v2690_v30, %v546_v25  ;;  %v2639_v26 = vpop.f32.mrf.mxu1 }
 0x27e   :  { %v3500_v33 = vpack.c.bf16 %v2638_v29, %v2636_v27  ;;  %v2692_v34 = vpop.f32.mrf.mxu0  ;;  %v2640_v37 = vadd.f32 %v2639_v26, %v534_v21 }
 0x27f   :  { %v3501_v36 = vpack.c.bf16 %v2691_v32, %v2689_v31  ;;  %v2641_v42 = vpop.f32.mrf.mxu1  ;;  %v2693_v41 = vadd.f32 %v2692_v34, %v542_v24 }
 0x280   :  { %3105 = vst [vmem:[%s4021_s5 + $0x70] sm:$0xff] %v3500_v33  ;;  %v2642_v39 = vadd.f32 %v2641_v42, %v538_v22  ;;  %v2694_v40 = vpop.f32.mrf.mxu0 }
 0x281   :  { %3106 = vst [vmem:[%s4021_s5 + $0x78] sm:$0xff] %v3501_v36  ;;  %v2695_v35 = vadd.f32 %v2694_v40, %v546_v25  ;;  %v2645_v43 = vpop.f32.mrf.mxu1 }
 0x282   :  { %v3516_v44 = vpack.c.bf16 %v2642_v39, %v2640_v37  ;;  %v2698_v45 = vpop.f32.mrf.mxu0  ;;  %v2646_v38 = vadd.f32 %v2645_v43, %v534_v21 }
 0x283   :  { %v3517_v49 = vpack.c.bf16 %v2695_v35, %v2693_v41  ;;  %v2647_v53 = vpop.f32.mrf.mxu1  ;;  %v2699_v56 = vadd.f32 %v2698_v45, %v542_v24 }
 0x284   :  { %3121 = vst [vmem:[%s4021_s5 + $0xf0] sm:$0xff] %v3516_v44  ;;  %v2648_v54 = vadd.f32 %v2647_v53, %v538_v22  ;;  %v2700_v55 = vpop.f32.mrf.mxu0 }
 0x285   :  { %3122 = vst [vmem:[%s4021_s5 + $0xf8] sm:$0xff] %v3517_v49  ;;  %v2701_v57 = vadd.f32 %v2700_v55, %v546_v25  ;;  %v2649_v59 = vpop.f32.mrf.mxu1 }
 0x286   :  { %v3532_v60 = vpack.c.bf16 %v2648_v54, %v2646_v38  ;;  %v2702_v61 = vpop.f32.mrf.mxu0  ;;  %v2650_v48 = vadd.f32 %v2649_v59, %v534_v21 }
 0x287   :  { %v3533_v1 = vpack.c.bf16 %v2701_v57, %v2699_v56  ;;  %v2651_v47 = vpop.f32.mrf.mxu1  ;;  %v2703_v52 = vadd.f32 %v2702_v61, %v542_v24 }
 0x288   :  { %3137 = vst [vmem:[%s4021_s5 + $0x170] sm:$0xff] %v3532_v60  ;;  %v2652_v50 = vadd.f32 %v2651_v47, %v538_v22  ;;  %v2704_v51 = vpop.f32.mrf.mxu0 }
 0x289   :  { %3138 = vst [vmem:[%s4021_s5 + $0x178] sm:$0xff] %v3533_v1  ;;  %v2705_v2 = vadd.f32 %v2704_v51, %v546_v25 }
 0x28a   :  { %v3548_v3 = vpack.c.bf16 %v2652_v50, %v2650_v48 }
 0x28b   :  { %v3549_v28 = vpack.c.bf16 %v2705_v2, %v2703_v52 }
 0x28c   :  { %3153 = vst [vmem:[%s4021_s5 + $0x1f0] sm:$0xff] %v3548_v3 }
 0x28d   :  { %3154 = vst [vmem:[%s4021_s5 + $0x1f8] sm:$0xff] %v3549_v28 }
 0x28e   :  { %3159 = vsyncpa [#allocation3], 1 }

// kernel: net_forward.3
= control target key start
LH: loop header
LB: loop body
LE: loop exit
PB: predicated region body
PF: predicated region fallthrough
CT: control target
= control target key end

     0   :  { %vm87_vm0 = vcmask 64512   ;;  %v12217_v3 = vmov 0   ;;  %v15687_v8 = vmov 0.0   ;;  %vm860_vm1 = vcmask 523264   ;;  %s15635_s1 = inlined_call_operand.vmem [shape: f32[8,64], index: 1, kind: input, shape index: {}]   ;;  %s15636_s0 = inlined_call_operand.vmem [shape: f32[16,8], index: 0, kind: input, shape index: {}]   ;;  %s15637_s3 = inlined_call_operand.vmem [shape: s32[32,1], index: 3, kind: input, shape index: {}]   ;;  %s15638_s5 = inlined_call_operand.vmem [shape: f32[16,1], index: 5, kind: input, shape index: {}]   ;;  %s15639_s6 = inlined_call_operand.vmem [shape: bf16[32,64,64], index: 6, kind: input, shape index: {}]   ;;  %s15640_s2 = inlined_call_operand.vmem [shape: f32[1,64], index: 2, kind: input, shape index: {}]   ;;  %s15641_s7 = inlined_call_operand.vmem [shape: f32[64,64], index: 7, kind: input, shape index: {}]   ;;  %s15642_s11 = inlined_call_operand.vmem [shape: f32[64,192], index: 11, kind: input, shape index: {}]   ;;  %s15643_s4 = inlined_call_operand.vmem [shape: s32[1,32], index: 4, kind: input, shape index: {}]   ;;  %s15644_s9 = inlined_call_operand.vmem [shape: f32[64,192], index: 9, kind: input, shape index: {}]   ;;  %s15645_s8 = inlined_call_operand.vmem [shape: f32[1,64], index: 8, kind: input, shape index: {}]   ;;  %s15646_s12 = inlined_call_operand.vmem [shape: f32[1,192], index: 12, kind: input, shape index: {}]   ;;  %s15647_s10 = inlined_call_operand.vmem [shape: f32[1,192], index: 10, kind: input, shape index: {}]   ;;  %s15648_s15 = inlined_call_operand.vmem [shape: f32[64,256], index: 15, kind: input, shape index: {}]   ;;  %s15649_s14 = inlined_call_operand.vmem [shape: f32[64,256], index: 14, kind: input, shape index: {}]   ;;  %s15650_s16 = inlined_call_operand.vmem [shape: f32[64,256], index: 16, kind: input, shape index: {}]   ;;  %s15651_s17 = inlined_call_operand.vmem [shape: f32[1,256], index: 17, kind: input, shape index: {}]   ;;  %s15652_s13 = inlined_call_operand.vmem [shape: s32[1,16], index: 13, kind: input, shape index: {}]   ;;  %s15653_s18 = inlined_call_operand.vmem [shape: f32[64,64], index: 18, kind: input, shape index: {}]   ;;  %s15654_s19 = inlined_call_operand.vmem [shape: f32[64,64], index: 19, kind: input, shape index: {}]   ;;  %s15655_s21 = inlined_call_operand.vmem [shape: f32[64,1], index: 21, kind: input, shape index: {}]   ;;  %s15656_s22 = inlined_call_operand.<no memory space> [shape: f32[1,1], index: 22, kind: input, shape index: {}]   ;;  %s15657_s20 = inlined_call_operand.vmem [shape: f32[1,64], index: 20, kind: input, shape index: {}]   ;;  %s15658_s23 = inlined_call_operand.vmem [shape: f32[8,1], index: 23, kind: output, shape index: {}]  }
   0x1   :  { %15881 = sst [smem:[#allocation110_spill]] %s15635_s1  ;;  %11921 = vset.pattern.permute.xlu0 %v12217_v3  ;;  %11922 = vset.pattern.permute.xlu1 %v12217_v3  ;;  %v171_v14 = vlaneseq  ;;  %vm520_vm4 = vcmask 130048   ;;  %vm12219_vm7 = vmmov 0   ;;  %v12220_v47 = vmov 1966171168  }
   0x2   :  { %15882 = sst [smem:[#allocation111_spill]] %s15636_s0  ;;  %v582_v48 = vunpack.c.l.s4 %v12220_v47  ;;  %vm3338_vm8 = vcmask 1041409   ;;  %vm3341_vm9 = vcmask 1042434   ;;  %vm3344_vm10 = vcmask 1043459  }
   0x3   :  { %15883 = sst [smem:[#allocation112_spill]] %s15637_s3  ;;  %v172_v17 = vand.u32 127, %v171_v14  ;;  %v12461_v49 = vshrl.u32 %v171_v14, 7  ;;  %vm3347_vm11 = vcmask 1044484   ;;  %vm3350_vm12 = vcmask 1045509  }
   0x4   :  { %15884 = sst [smem:[#allocation113_spill]] %s15638_s5  ;;  %v583_v50 = vunpack.c.0.s8 %v582_v48  ;;  %vm3353_vm13 = vcmask 1046534   ;;  %vm3356_vm14 = vcmask 1047559  }
   0x5   :  { %15885 = sst [smem:[#allocation114_spill]] %s15639_s6  ;;  %15899 = vst [vmem:[#allocation7_spill] sm:$0xff] %v12461_v49 }
   0x6   :  { %15886 = sst [smem:[#allocation115_spill]] %s15640_s2  ;;  %v12466_v52 = vsub.s32 %v583_v50, %v12461_v49 }
   0x7   :  { %15887 = sst [smem:[#allocation116_spill]] %s15641_s7 }
   0x8   :  { %15888 = sst [smem:[#allocation117_spill]] %s15642_s11 }
   0x9   :  { %s15889_s24 = sld [smem:[#allocation110_spill]] }
   0xa   :  { %s15890_s0 = sld [smem:[#allocation111_spill]] }
   0xb   :  { %s15891_s11 = sld [smem:[#allocation112_spill]] }
   0xc   :  { %s15892_s2 = sld [smem:[#allocation113_spill]] }
   0xd   :  { %s15893_s27 = sld [smem:[#allocation114_spill]] }
   0xe   :  { %s15894_s30 = sld [smem:[#allocation115_spill]] }
   0xf   :  { %v79_v0 = vld [vmem:[%s15889_s24] sm:$0xff]  ;;  %s16001_s24 = sld [smem:[#allocation116_spill]] }
  0x10   :  { %v77_v1 = vld [vmem:[%s15890_s0] sm:$0xff]  ;;  %v78_v2 = vld [vmem:[%s15890_s0 + $0x8] sm:$0xff]  ;;  %10560 = vmatprep.subr.mxu0 %v79_v0 }
  0x11   :  { %10562 = vmatprep.mubr.msk.f32.mxu0 %vm87_vm0, %v77_v1  ;;  %v173_v4 = vld [vmem:[%s15891_s11] sm:$0xff]  ;;  %v175_v5 = vld [vmem:[%s15891_s11 + $0x10] sm:$0xff]  ;;  %10561 = vmatpush3.msra.mxu0 %v79_v0  ;;  %v174_v6 = vld [vmem:[%s15891_s11 + $0x8] sm:$0xff] }
  0x12   :  { %178 = vperm.xlu0 %11921, %v173_v4   ;;  %10563 = vmatmul.mubr.msk.f32.vlgmr.msra.gmra.mxu0 %vm87_vm0, %v78_v2  ;;  %v176_v7 = vld [vmem:[%s15891_s11 + $0x18] sm:$0xff]  ;;  %v218_v9 = vld [vmem:[%s15892_s2] sm:$0xff]  ;;  %v219_v10 = vld [vmem:[%s15892_s2 + $0x8] sm:$0xff]  ;;  %s16002_s2 = sld [smem:[#allocation117_spill]] }
  0x13   :  { %184 = vperm.xlu1 %11922, %v175_v5   ;;  %10571 = vmatprep.subr.bf16.mxu0 %v15687_v8  ;;  %v11923_v11 = vld [vmem:[%s15893_s27 + $0x18] sm:$0xff]   ;;  %v11925_v13 = vld [vmem:[%s15893_s27 + $0x10] sm:$0xff]   ;;  %v11927_v16 = vld [vmem:[%s15893_s27 + $0x8] sm:$0xff]  }
  0x14   :  { %v12375_v12 = vsel %vm860_vm1, %v11923_v11, 0  ;;  %v12383_v15 = vsel %vm860_vm1, %v11925_v13, 0  ;;  %v12390_v18 = vsel %vm860_vm1, %v11927_v16, 0  ;;  %v9685_v25 = vld [vmem:[%s15894_s30] ss:$0 sm:$0xff]  ;;  %v11924_v34 = vld [vmem:[%s15893_s27 + $0x38] sm:$0xff]   ;;  %10579 = vmatprep.mubr.msk.bf16.mxu0 %vm12219_vm7, %v15687_v8 }
  0x15   :  { %10572 = vmatpush3.bf16.xpose.msra.mxu0 %v12375_v12  ;;  %v12419_v38 = vsel %vm860_vm1, %v11924_v34, 0  ;;  %v11926_v39 = vld [vmem:[%s15893_s27 + $0x30] sm:$0xff]   ;;  %v11928_v41 = vld [vmem:[%s15893_s27 + $0x28] sm:$0xff]   ;;  %v11929_v43 = vld [vmem:[%s15893_s27] sm:$0xff]  }
  0x16   :  { %181 = vperm.xlu0 %11921, %v174_v6   ;;  %10573 = vmatprep.subr.bf16.mxu0 %v15687_v8  ;;  %15895 = vst [vmem:[#allocation3_spill] sm:$0xff] %v12419_v38  ;;  %v12429_v40 = vsel %vm860_vm1, %v11926_v39, 0  ;;  %v12437_v42 = vsel %vm860_vm1, %v11928_v41, 0  ;;  %v12445_v44 = vsel %vm860_vm1, %v11929_v43, 0  ;;  %v11930_v45 = vld [vmem:[%s15893_s27 + $0x20] sm:$0xff]   ;;  %v11931_v57 = vld [vmem:[%s15893_s27 + $0x58] sm:$0xff]  }
  0x17   :  { %187 = vperm.xlu1 %11922, %v176_v7   ;;  %15896 = vst [vmem:[#allocation4_spill] sm:$0xff] %v12429_v40  ;;  %15897 = vst [vmem:[#allocation5_spill] sm:$0xff] %v12437_v42  ;;  %v12453_v46 = vsel %vm860_vm1, %v11930_v45, 0  ;;  %v11932_v58 = vld [vmem:[%s15893_s27 + $0x78] sm:$0xff]   ;;  %v12481_v61 = vsel %vm860_vm1, %v11931_v57, 0  ;;  %v11933_v0 = vld [vmem:[%s15893_s27 + $0x50] sm:$0xff]  }
  0x18   :  { %15898 = vst [vmem:[#allocation6_spill] sm:$0xff] %v12453_v46  ;;  %v12484_v63 = vsel %vm860_vm1, %v11932_v58, 0  ;;  %v11934_v1 = vld [vmem:[%s15893_s27 + $0x70] sm:$0xff]   ;;  %v12503_v2 = vsel %vm860_vm1, %v11933_v0, 0  ;;  %v11935_v4 = vld [vmem:[%s15893_s27 + $0x48] sm:$0xff]   ;;  %v11939_v16 = vld [vmem:[%s15893_s27 + $0x98] sm:$0xff]  }
  0x19   :  { %v12506_v3 = vsel %vm860_vm1, %v11934_v1, 0  ;;  %v11936_v5 = vld [vmem:[%s15893_s27 + $0x68] sm:$0xff]   ;;  %v12519_v6 = vsel %vm860_vm1, %v11935_v4, 0  ;;  %v11946_v41 = vld [vmem:[%s15893_s27 + $0xa0] sm:$0xff]   ;;  %v11947_v50 = vld [vmem:[%s15893_s27 + $0xd8] sm:$0xff]  }
  0x1a   :  { %3451 = vperm.xlu0 %11921, %v218_v9   ;;  %v12522_v7 = vsel %vm860_vm1, %v11936_v5, 0  ;;  %v11937_v9 = vld [vmem:[%s15893_s27 + $0x40] sm:$0xff]   ;;  %v12611_v47 = vsel %vm860_vm1, %v11946_v41, 0  ;;  %v11951_v1 = vld [vmem:[%s15893_s27 + $0xc8] sm:$0xff]  }
  0x1b   :  { %3456 = vperm.xlu1 %11922, %v219_v10   ;;  %v11938_v10 = vld [vmem:[%s15893_s27 + $0x60] sm:$0xff]   ;;  %v12535_v11 = vsel %vm860_vm1, %v11937_v9, 0  ;;  %v11952_v4 = vld [vmem:[%s15893_s27 + $0xe8] sm:$0xff]   ;;  %v12664_v5 = vsel %vm860_vm1, %v11951_v1, 0 }
  0x1c   :  { %v12538_v13 = vsel %vm860_vm1, %v11938_v10, 0  ;;  %15900 = vst [vmem:[#allocation8_spill] sm:$0xff] %v12664_v5  ;;  %v12667_v9 = vsel %vm860_vm1, %v11952_v4, 0  ;;  %v11953_v10 = vld [vmem:[%s15893_s27 + $0xc0] sm:$0xff]  }
  0x1d   :  { %10574 = vmatpush3.bf16.xpose.msra.mxu0 %v12383_v15  ;;  %15901 = vst [vmem:[#allocation9_spill] sm:$0xff] %v12667_v9  ;;  %v11962_v1 = vld [vmem:[%s15893_s27 + $0x120] sm:$0xff]  }
  0x1e   :  { %10575 = vmatprep.subr.bf16.mxu0 %v15687_v8 }
  0x25   :  { %10576 = vmatpush3.bf16.xpose.msra.mxu0 %v12390_v18 }
  0x26   :  { %10577 = vmatprep.subr.bf16.mxu0 %v15687_v8 }
  0x2d   :  { %10578 = vmatpush3.bf16.xpose.msra.mxu0 %v12445_v44 }
  0x2e   :  { %10595 = vmatprep.subr.bf16.mxu0 %v15687_v8 }
  0x8d   :  { %v179_v19 = vpop.permute.xlu0 %178 }
  0x8e   :  { %vm189_vm2 = vcmp.eq.s32.totalorder %v179_v19, %v172_v17  ;;  %v185_v24 = vpop.permute.xlu1 %184  ;;  %v11940_v19 = vld [vmem:[%s15893_s27 + $0xb8] sm:$0xff]  }
  0x8f   :  { %v9688_v20 = vsel %vm189_vm2, 1.0, %v15687_v8  ;;  %vm191_vm5 = vcmp.eq.s32.totalorder %v185_v24, %v172_v17  ;;  %v12554_v24 = vsel %vm860_vm1, %v11940_v19, 0  ;;  %vm3404_vm2 = vcmask 261120  }
  0x90   :  { %v9690_v35 = vsel %vm191_vm5, 1.0, %v15687_v8 }
  0x91   :  { %v182_v21 = vpop.permute.xlu0 %181 }
  0x92   :  { %vm190_vm3 = vcmp.eq.s32.totalorder %v182_v21, %v172_v17  ;;  %v188_v30 = vpop.permute.xlu1 %187  ;;  %v12551_v21 = vsel %vm860_vm1, %v11939_v16, 0  ;;  %v12680_v16 = vsel %vm860_vm1, %v11953_v10, 0 }
  0x93   :  { %v9689_v22 = vsel %vm190_vm3, 1.0, %v15687_v8  ;;  %vm192_vm6 = vcmp.eq.s32.totalorder %v188_v30, %v172_v17  ;;  %v11944_v30 = vld [vmem:[%s15893_s27 + $0xa8] sm:$0xff]   ;;  %15902 = vst [vmem:[#allocation10_spill] sm:$0xff] %v12680_v16 }
  0x94   :  { %v12397_v23 = vpack.c.bf16 %v9689_v22, %v9688_v20  ;;  %v9691_v36 = vsel %vm192_vm6, 1.0, %v15687_v8 }
  0x95   :  { %v12415_v37 = vpack.c.bf16 %v9691_v36, %v9690_v35  ;;  %v12594_v35 = vsel %vm860_vm1, %v11944_v30, 0  ;;  %v11945_v36 = vld [vmem:[%s15893_s27 + $0x80] sm:$0xff]  }
  0x96   :  { %10567 = vmatprep.mubr.msk.bf16.mxu1 %vm520_vm4, %v12397_v23  ;;  %v12608_v43 = vsel %vm860_vm1, %v11945_v36, 0  ;;  %v11957_v36 = vld [vmem:[%s15893_s27 + $0x110] sm:$0xff]  }
  0x97   :  { %v12718_v41 = vsel %vm860_vm1, %v11957_v36, 0 }
  0x98   :  { %15906 = vst [vmem:[#allocation14_spill] sm:$0xff] %v12718_v41 }
  0xd2   :  { %v10564_v26 = vpop.f32.mrf.mxu0 }
  0xd3   :  { %v166_v27 = vadd.f32 %v10564_v26, %v9685_v25  ;;  %v11942_v26 = vld [vmem:[%s15893_s27 + $0xb0] sm:$0xff]  }
  0xd4   :  { %v160_v28 = vpop.f32.mrf.mxu0 }
  0xd5   :  { %v161_v29 = vadd.f32 %v9685_v25, %v160_v28  ;;  %v12404_v31 = vmax.f32 %v166_v27, 0.0  ;;  %v11941_v25 = vld [vmem:[%s15893_s27 + $0x90] sm:$0xff]   ;;  %v12576_v28 = vsel %vm860_vm1, %v11942_v26, 0 }
  0xd6   :  { %v12573_v27 = vsel %vm860_vm1, %v11941_v25, 0  ;;  %v11956_v25 = vld [vmem:[%s15893_s27 + $0x138] sm:$0xff]  }
  0xd7   :  { %v12406_v32 = vmax.f32 %v161_v29, 0.0  ;;  %v11943_v29 = vld [vmem:[%s15893_s27 + $0x88] sm:$0xff]  }
  0xd9   :  { %v519_v33 = vpack.c.bf16 %v12404_v31, %v12406_v32 }
  0xdb   :  { %10565 = vmatprep.subr.bf16.mxu1 %v519_v33 }
  0xdc   :  { %10566 = vmatpush3.bf16.msra.mxu1 %v519_v33  ;;  %v12589_v33 = vsel %vm860_vm1, %v11943_v29, 0 }
  0xdd   :  { %10583 = vmatprep.subr.bf16.mxu1 %v15687_v8 }
  0xdf   :  { %10568 = vmatmul.mubr.msk.bf16.vlgmr.msra.gmra.mxu1 %vm520_vm4, %v12415_v37 }
  0xe0   :  { %10584 = vmatpush3.bf16.xpose.msra.mxu1 %v12419_v38  ;;  %10591 = vmatprep.mubr.msk.bf16.mxu1 %vm12219_vm7, %v15687_v8 }
  0xe1   :  { %10585 = vmatprep.subr.bf16.mxu1 %v15687_v8 }
  0xe8   :  { %10586 = vmatpush3.bf16.xpose.msra.mxu1 %v12429_v40 }
  0xe9   :  { %10587 = vmatprep.subr.bf16.mxu1 %v15687_v8 }
  0xf0   :  { %10588 = vmatpush3.bf16.xpose.msra.mxu1 %v12437_v42 }
  0xf1   :  { %10589 = vmatprep.subr.bf16.mxu1 %v15687_v8 }
  0xf8   :  { %10590 = vmatpush3.bf16.xpose.msra.mxu1 %v12453_v46 }
  0xf9   :  { %10607 = vmatprep.subr.bf16.mxu1 %v15687_v8 }
 0x19f   :  { %v12463_v51 = vpop.f32.mrf.mxu1 }
 0x1a1   :  { %v12468_v53 = vpop.f32.mrf.mxu1 }
 0x1a2   :  { %v587_v54 = vrot.slane %v12468_v53, %v12466_v52  ;;  %v580_v34 = vcombine.high %v12468_v53, %v12468_v53 }
 0x1a4   :  { %v595_v55 = vcombine.high %v587_v54, %v587_v54  ;;  %v603_v56 = vrot.slane %v587_v54, %v12466_v52  ;;  %v594_v39 = vrot.slane %v580_v34, %v12466_v52  ;;  %v11948_v54 = vld [vmem:[%s15893_s27 + $0xf8] sm:$0xff]   ;;  %v12699_v34 = vsel %vm860_vm1, %v11956_v25, 0 }
 0x1a5   :  { %v12629_v58 = vsel %vm860_vm1, %v11948_v54, 0  ;;  %15905 = vst [vmem:[#allocation13_spill] sm:$0xff] %v12699_v34  ;;  %v11964_v25 = vld [vmem:[%s15893_s27 + $0x178] sm:$0xff]  }
 0x1a6   :  { %v617_v59 = vrot.slane %v595_v55, %v12466_v52  ;;  %v808_v60 = vpack.c.bf16 %v603_v56, %v603_v56  ;;  %v625_v14 = vcombine.high %v603_v56, %v603_v56  ;;  %v596_v45 = vcombine.high %v594_v39, %v594_v39 }
 0x1a7   :  { %v610_v48 = vrot.slane %v594_v39, %v12466_v52  ;;  %v12626_v56 = vsel %vm860_vm1, %v11947_v50, 0  ;;  %v11958_v39 = vld [vmem:[%s15893_s27 + $0x130] sm:$0xff]   ;;  %v11960_v50 = vld [vmem:[%s15893_s27 + $0x128] sm:$0xff]  }
 0x1a8   :  { %v809_v62 = vpack.c.bf16 %v617_v59, %v617_v59  ;;  %10580 = vmatmul.mubr.msk.bf16.vlgmr.msra.gmra.mxu0 %vm860_vm1, %v808_v60  ;;  %v627_v17 = vcombine.high %v617_v59, %v617_v59  ;;  %v810_v20 = vpack.c.bf16 %v625_v14, %v625_v14  ;;  %v624_v53 = vrot.slane %v596_v45, %v12466_v52  ;;  %v11949_v59 = vld [vmem:[%s15893_s27 + $0xd0] sm:$0xff]   ;;  %v11954_v14 = vld [vmem:[%s15893_s27 + $0xe0] sm:$0xff]  }
 0x1a9   :  { %10596 = vmatpush3.bf16.xpose.msra.mxu0 %v12481_v61  ;;  %10603 = vmatprep.mubr.msk.bf16.mxu0 %vm12219_vm7, %v15687_v8  ;;  %v812_v55 = vpack.c.bf16 %v610_v48, %v610_v48  ;;  %v11950_v60 = vld [vmem:[%s15893_s27 + $0xf0] sm:$0xff]   ;;  %v626_v19 = vcombine.high %v610_v48, %v610_v48  ;;  %v12721_v45 = vsel %vm860_vm1, %v11958_v39, 0  ;;  %v11959_v48 = vld [vmem:[%s15893_s27 + $0x108] sm:$0xff]   ;;  %v12777_v39 = vsel %vm860_vm1, %v11964_v25, 0 }
 0x1aa   :  { %10592 = vmatmul.mubr.msk.bf16.vlgmr.msra.gmra.mxu1 %vm860_vm1, %v809_v62  ;;  %10597 = vmatprep.subr.bf16.mxu0 %v15687_v8  ;;  %v811_v22 = vpack.c.bf16 %v627_v17, %v627_v17  ;;  %v813_v57 = vpack.c.bf16 %v624_v53, %v624_v53  ;;  %v12648_v62 = vsel %vm860_vm1, %v11949_v59, 0  ;;  %v12651_v0 = vsel %vm860_vm1, %v11950_v60, 0  ;;  %15907 = vst [vmem:[#allocation15_spill] sm:$0xff] %v12721_v45  ;;  %v11961_v59 = vld [vmem:[%s15893_s27 + $0x100] sm:$0xff]  }
 0x1ab   :  { %10608 = vmatpush3.bf16.xpose.msra.mxu1 %v12484_v63  ;;  %10615 = vmatprep.mubr.msk.bf16.mxu1 %vm12219_vm7, %v15687_v8  ;;  %v12683_v17 = vsel %vm860_vm1, %v11954_v14, 0  ;;  %v814_v26 = vpack.c.bf16 %v626_v19, %v626_v19  ;;  %v12736_v54 = vsel %vm860_vm1, %v11959_v48, 0  ;;  %v12756_v4 = vsel %vm860_vm1, %v11961_v59, 0  ;;  %15913 = vst [vmem:[#allocation21_spill] sm:$0xff] %v12777_v39  ;;  %v11965_v48 = vld [vmem:[%s15893_s27 + $0x150] sm:$0xff]  }
 0x1ac   :  { %10609 = vmatprep.subr.bf16.mxu1 %v15687_v8  ;;  %15903 = vst [vmem:[#allocation11_spill] sm:$0xff] %v12683_v17  ;;  %15908 = vst [vmem:[#allocation16_spill] sm:$0xff] %v12736_v54  ;;  %v12759_v14 = vsel %vm860_vm1, %v11962_v1, 0  ;;  %v12796_v59 = vsel %vm860_vm1, %v11965_v48, 0  ;;  %v11967_v1 = vld [vmem:[%s15893_s27 + $0x148] sm:$0xff]  }
 0x1ad   :  { %15910 = vst [vmem:[#allocation18_spill] sm:$0xff] %v12756_v4  ;;  %15911 = vst [vmem:[#allocation19_spill] sm:$0xff] %v12759_v14 }
 0x1ae   :  { %15914 = vst [vmem:[#allocation22_spill] sm:$0xff] %v12796_v59 }
 0x1b1   :  { %10598 = vmatpush3.bf16.xpose.msra.mxu0 %v12503_v2 }
 0x1b2   :  { %10599 = vmatprep.subr.bf16.mxu0 %v15687_v8 }
 0x1b3   :  { %10610 = vmatpush3.bf16.xpose.msra.mxu1 %v12506_v3 }
 0x1b4   :  { %10611 = vmatprep.subr.bf16.mxu1 %v15687_v8 }
 0x1b9   :  { %10600 = vmatpush3.bf16.xpose.msra.mxu0 %v12519_v6 }
 0x1ba   :  { %10601 = vmatprep.subr.bf16.mxu0 %v15687_v8 }
 0x1bb   :  { %10612 = vmatpush3.bf16.xpose.msra.mxu1 %v12522_v7 }
 0x1bc   :  { %10613 = vmatprep.subr.bf16.mxu1 %v15687_v8 }
 0x1c1   :  { %10602 = vmatpush3.bf16.xpose.msra.mxu0 %v12535_v11 }
 0x1c2   :  { %10619 = vmatprep.subr.bf16.mxu0 %v15687_v8 }
 0x1c3   :  { %10614 = vmatpush3.bf16.xpose.msra.mxu1 %v12538_v13 }
 0x1c4   :  { %10631 = vmatprep.subr.bf16.mxu1 %v15687_v8 }
 0x1c8   :  { %10604 = vmatmul.mubr.msk.bf16.vlgmr.msra.gmra.mxu0 %vm860_vm1, %v810_v20  ;;  %v11955_v20 = vld [vmem:[%s15893_s27 + $0x118] sm:$0xff]  }
 0x1c9   :  { %10620 = vmatpush3.bf16.xpose.msra.mxu0 %v12551_v21  ;;  %10627 = vmatprep.mubr.msk.bf16.mxu0 %vm12219_vm7, %v15687_v8  ;;  %v12696_v29 = vsel %vm860_vm1, %v11955_v20, 0  ;;  %v11963_v20 = vld [vmem:[%s15893_s27 + $0x158] sm:$0xff]  }
 0x1ca   :  { %10616 = vmatmul.mubr.msk.bf16.vlgmr.msra.gmra.mxu1 %vm860_vm1, %v811_v22  ;;  %10621 = vmatprep.subr.bf16.mxu0 %v15687_v8  ;;  %v628_v22 = vcombine.high %v624_v53, %v624_v53  ;;  %15904 = vst [vmem:[#allocation12_spill] sm:$0xff] %v12696_v29  ;;  %v12733_v53 = vpop.f32.mrf.mxu1 }
 0x1cb   :  { %10632 = vmatpush3.bf16.xpose.msra.mxu1 %v12554_v24  ;;  %10639 = vmatprep.mubr.msk.bf16.mxu1 %vm12219_vm7, %v15687_v8 }
 0x1cc   :  { %10633 = vmatprep.subr.bf16.mxu1 %v15687_v8  ;;  %v815_v30 = vpack.c.bf16 %v628_v22, %v628_v22 }
 0x1d1   :  { %10622 = vmatpush3.bf16.xpose.msra.mxu0 %v12573_v27 }
 0x1d2   :  { %10623 = vmatprep.subr.bf16.mxu0 %v15687_v8 }
 0x1d3   :  { %10634 = vmatpush3.bf16.xpose.msra.mxu1 %v12576_v28 }
 0x1d4   :  { %10635 = vmatprep.subr.bf16.mxu1 %v15687_v8 }
 0x1d9   :  { %10624 = vmatpush3.bf16.xpose.msra.mxu0 %v12589_v33 }
 0x1da   :  { %10625 = vmatprep.subr.bf16.mxu0 %v15687_v8 }
 0x1db   :  { %10636 = vmatpush3.bf16.xpose.msra.mxu1 %v12594_v35 }
 0x1dc   :  { %10637 = vmatprep.subr.bf16.mxu1 %v15687_v8 }
 0x1e1   :  { %10626 = vmatpush3.bf16.xpose.msra.mxu0 %v12608_v43 }
 0x1e2   :  { %10643 = vmatprep.subr.bf16.mxu0 %v15687_v8 }
 0x1e3   :  { %10638 = vmatpush3.bf16.xpose.msra.mxu1 %v12611_v47 }
 0x1e4   :  { %10655 = vmatprep.subr.bf16.mxu1 %v15687_v8 }
 0x1e8   :  { %10628 = vmatmul.mubr.msk.bf16.vlgmr.msra.gmra.mxu0 %vm860_vm1, %v812_v55  ;;  %v12739_v55 = vsel %vm860_vm1, %v11960_v50, 0  ;;  %v11966_v50 = vld [vmem:[%s15893_s27 + $0x170] sm:$0xff]  }
 0x1e9   :  { %10644 = vmatpush3.bf16.xpose.msra.mxu0 %v12626_v56  ;;  %10651 = vmatprep.mubr.msk.bf16.mxu0 %vm12219_vm7, %v15687_v8  ;;  %15909 = vst [vmem:[#allocation17_spill] sm:$0xff] %v12739_v55 }
 0x1ea   :  { %10640 = vmatmul.mubr.msk.bf16.vlgmr.msra.gmra.mxu1 %vm860_vm1, %v813_v57  ;;  %10645 = vmatprep.subr.bf16.mxu0 %v15687_v8  ;;  %v12741_v57 = vpop.f32.mrf.mxu1 }
 0x1eb   :  { %10656 = vmatpush3.bf16.xpose.msra.mxu1 %v12629_v58  ;;  %10663 = vmatprep.mubr.msk.bf16.mxu1 %vm12219_vm7, %v15687_v8  ;;  %v636_v60 = vrot.slane %v12741_v57, %v12466_v52 }
 0x1ec   :  { %10657 = vmatprep.subr.bf16.mxu1 %v15687_v8 }
 0x1ed   :  { %v644_v10 = vcombine.high %v636_v60, %v636_v60  ;;  %v652_v19 = vrot.slane %v636_v60, %v12466_v52  ;;  %v12799_v60 = vsel %vm860_vm1, %v11966_v50, 0 }
 0x1ee   :  { %15915 = vst [vmem:[#allocation23_spill] sm:$0xff] %v12799_v60 }
 0x1ef   :  { %v666_v22 = vrot.slane %v644_v10, %v12466_v52  ;;  %v11968_v10 = vld [vmem:[%s15893_s27 + $0x168] sm:$0xff]  }
 0x1f0   :  { %v12815_v25 = vsel %vm860_vm1, %v11968_v10, 0  ;;  %v11971_v10 = vld [vmem:[%s15893_s27 + $0x198] sm:$0xff]  }
 0x1f1   :  { %10646 = vmatpush3.bf16.xpose.msra.mxu0 %v12648_v62  ;;  %v817_v36 = vpack.c.bf16 %v666_v22, %v666_v22  ;;  %15917 = vst [vmem:[#allocation25_spill] sm:$0xff] %v12815_v25 }
 0x1f2   :  { %10647 = vmatprep.subr.bf16.mxu0 %v15687_v8 }
 0x1f3   :  { %10658 = vmatpush3.bf16.xpose.msra.mxu1 %v12651_v0 }
 0x1f4   :  { %10659 = vmatprep.subr.bf16.mxu1 %v15687_v8 }
 0x1f9   :  { %10648 = vmatpush3.bf16.xpose.msra.mxu0 %v12664_v5 }
 0x1fa   :  { %10649 = vmatprep.subr.bf16.mxu0 %v15687_v8 }
 0x1fb   :  { %10660 = vmatpush3.bf16.xpose.msra.mxu1 %v12667_v9 }
 0x1fc   :  { %10661 = vmatprep.subr.bf16.mxu1 %v15687_v8 }
 0x201   :  { %10650 = vmatpush3.bf16.xpose.msra.mxu0 %v12680_v16 }
 0x202   :  { %10667 = vmatprep.subr.bf16.mxu0 %v15687_v8 }
 0x203   :  { %10662 = vmatpush3.bf16.xpose.msra.mxu1 %v12683_v17 }
 0x204   :  { %10679 = vmatprep.subr.bf16.mxu1 %v15687_v8 }
 0x208   :  { %10652 = vmatmul.mubr.msk.bf16.vlgmr.msra.gmra.mxu0 %vm860_vm1, %v814_v26  ;;  %v816_v26 = vpack.c.bf16 %v652_v19, %v652_v19 }
 0x209   :  { %10668 = vmatpush3.bf16.xpose.msra.mxu0 %v12696_v29  ;;  %10675 = vmatprep.mubr.msk.bf16.mxu0 %vm12219_vm7, %v15687_v8 }
 0x20a   :  { %10664 = vmatmul.mubr.msk.bf16.vlgmr.msra.gmra.mxu1 %vm860_vm1, %v815_v30  ;;  %10669 = vmatprep.subr.bf16.mxu0 %v15687_v8  ;;  %v12774_v30 = vsel %vm860_vm1, %v11963_v20, 0  ;;  %v12812_v20 = vsel %vm860_vm1, %v11967_v1, 0  ;;  %v674_v1 = vcombine.high %v652_v19, %v652_v19 }
 0x20b   :  { %10680 = vmatpush3.bf16.xpose.msra.mxu1 %v12699_v34  ;;  %10687 = vmatprep.mubr.msk.bf16.mxu1 %vm12219_vm7, %v15687_v8  ;;  %15912 = vst [vmem:[#allocation20_spill] sm:$0xff] %v12774_v30  ;;  %15916 = vst [vmem:[#allocation24_spill] sm:$0xff] %v12812_v20 }
 0x20c   :  { %10681 = vmatprep.subr.bf16.mxu1 %v15687_v8 }
 0x211   :  { %10670 = vmatpush3.bf16.xpose.msra.mxu0 %v12718_v41 }
 0x212   :  { %10671 = vmatprep.subr.bf16.mxu0 %v15687_v8 }
 0x213   :  { %10682 = vmatpush3.bf16.xpose.msra.mxu1 %v12721_v45 }
 0x214   :  { %10683 = vmatprep.subr.bf16.mxu1 %v15687_v8 }
 0x219   :  { %10672 = vmatpush3.bf16.xpose.msra.mxu0 %v12736_v54 }
 0x21a   :  { %10673 = vmatprep.subr.bf16.mxu0 %v15687_v8 }
 0x21b   :  { %10684 = vmatpush3.bf16.xpose.msra.mxu1 %v12739_v55 }
 0x21c   :  { %10685 = vmatprep.subr.bf16.mxu1 %v15687_v8 }
 0x221   :  { %10674 = vmatpush3.bf16.xpose.msra.mxu0 %v12756_v4 }
 0x222   :  { %10691 = vmatprep.subr.bf16.mxu0 %v15687_v8 }
 0x223   :  { %10686 = vmatpush3.bf16.xpose.msra.mxu1 %v12759_v14 }
 0x224   :  { %10703 = vmatprep.subr.bf16.mxu1 %v15687_v8 }
 0x228   :  { %10676 = vmatmul.mubr.msk.bf16.vlgmr.msra.gmra.mxu0 %vm860_vm1, %v816_v26  ;;  %v11969_v26 = vld [vmem:[%s15893_s27 + $0x140] sm:$0xff]  }
 0x229   :  { %10692 = vmatpush3.bf16.xpose.msra.mxu0 %v12774_v30  ;;  %10699 = vmatprep.mubr.msk.bf16.mxu0 %vm12219_vm7, %v15687_v8  ;;  %v12828_v48 = vsel %vm860_vm1, %v11969_v26, 0  ;;  %v11972_v26 = vld [vmem:[%s15893_s27 + $0x1b8] sm:$0xff]  }
 0x22a   :  { %10688 = vmatmul.mubr.msk.bf16.vlgmr.msra.gmra.mxu1 %vm860_vm1, %v817_v36  ;;  %10693 = vmatprep.subr.bf16.mxu0 %v15687_v8  ;;  %v11970_v36 = vld [vmem:[%s15893_s27 + $0x160] sm:$0xff]   ;;  %15918 = vst [vmem:[#allocation26_spill] sm:$0xff] %v12828_v48 }
 0x22b   :  { %10704 = vmatpush3.bf16.xpose.msra.mxu1 %v12777_v39  ;;  %10711 = vmatprep.mubr.msk.bf16.mxu1 %vm12219_vm7, %v15687_v8  ;;  %v12831_v50 = vsel %vm860_vm1, %v11970_v36, 0  ;;  %v818_v36 = vpack.c.bf16 %v674_v1, %v674_v1 }
 0x22c   :  { %10705 = vmatprep.subr.bf16.mxu1 %v15687_v8  ;;  %15919 = vst [vmem:[#allocation27_spill] sm:$0xff] %v12831_v50 }
 0x231   :  { %10694 = vmatpush3.bf16.xpose.msra.mxu0 %v12796_v59  ;;  %v15930_v59 = vmov 0.0  }
 0x232   :  { %10695 = vmatprep.subr.bf16.mxu0 %v15687_v8 }
 0x233   :  { %10706 = vmatpush3.bf16.xpose.msra.mxu1 %v12799_v60 }
 0x234   :  { %10707 = vmatprep.subr.bf16.mxu1 %v15687_v8 }
 0x239   :  { %10696 = vmatpush3.bf16.xpose.msra.mxu0 %v12812_v20  ;;  %v12844_v20 = vsel %vm860_vm1, %v11971_v10, 0 }
 0x23a   :  { %10697 = vmatprep.subr.bf16.mxu0 %v15687_v8  ;;  %15920 = vst [vmem:[#allocation28_spill] sm:$0xff] %v12844_v20 }
 0x23b   :  { %10708 = vmatpush3.bf16.xpose.msra.mxu1 %v12815_v25  ;;  %v676_v25 = vcombine.high %v666_v22, %v666_v22  ;;  %v11973_v22 = vld [vmem:[%s15893_s27 + $0x190] sm:$0xff]  }
 0x23c   :  { %10709 = vmatprep.subr.bf16.mxu1 %v15687_v8  ;;  %v12866_v1 = vsel %vm860_vm1, %v11973_v22, 0  ;;  %v629_v22 = vcombine.high %v12741_v57, %v12741_v57  ;;  %v11978_v57 = vld [vmem:[%s15893_s27 + $0x1a0] sm:$0xff]  }
 0x23d   :  { %v819_v19 = vpack.c.bf16 %v676_v25, %v676_v25  ;;  %v11974_v25 = vld [vmem:[%s15893_s27 + $0x1b0] sm:$0xff]   ;;  %15922 = vst [vmem:[#allocation30_spill] sm:$0xff] %v12866_v1 }
 0x23e   :  { %v12869_v10 = vsel %vm860_vm1, %v11974_v25, 0 }
 0x23f   :  { %15923 = vst [vmem:[#allocation31_spill] sm:$0xff] %v12869_v10 }
 0x241   :  { %10698 = vmatpush3.bf16.xpose.msra.mxu0 %v12828_v48 }
 0x242   :  { %10715 = vmatprep.subr.bf16.mxu0 %v15687_v8 }
 0x243   :  { %10710 = vmatpush3.bf16.xpose.msra.mxu1 %v12831_v50  ;;  %v12847_v50 = vsel %vm860_vm1, %v11972_v26, 0  ;;  %v11975_v26 = vld [vmem:[%s15893_s27 + $0x188] sm:$0xff]  }
 0x244   :  { %10727 = vmatprep.subr.bf16.mxu1 %v15687_v8  ;;  %15921 = vst [vmem:[#allocation29_spill] sm:$0xff] %v12847_v50 }
 0x248   :  { %10700 = vmatmul.mubr.msk.bf16.vlgmr.msra.gmra.mxu0 %vm860_vm1, %v818_v36  ;;  %v11976_v36 = vld [vmem:[%s15893_s27 + $0x1a8] sm:$0xff]  }
 0x249   :  { %10716 = vmatpush3.bf16.xpose.msra.mxu0 %v12844_v20  ;;  %10723 = vmatprep.mubr.msk.bf16.mxu0 %vm12219_vm7, %v15687_v8  ;;  %v12887_v25 = vsel %vm860_vm1, %v11976_v36, 0 }
 0x24a   :  { %10712 = vmatmul.mubr.msk.bf16.vlgmr.msra.gmra.mxu1 %vm860_vm1, %v819_v19  ;;  %10717 = vmatprep.subr.bf16.mxu0 %v15687_v8  ;;  %v12882_v19 = vsel %vm860_vm1, %v11975_v26, 0  ;;  %15925 = vst [vmem:[#allocation33_spill] sm:$0xff] %v12887_v25 }
 0x24b   :  { %10728 = vmatpush3.bf16.xpose.msra.mxu1 %v12847_v50  ;;  %10735 = vmatprep.mubr.msk.bf16.mxu1 %vm12219_vm7, %v15687_v8  ;;  %15924 = vst [vmem:[#allocation32_spill] sm:$0xff] %v12882_v19 }
 0x24c   :  { %10729 = vmatprep.subr.bf16.mxu1 %v15687_v8 }
 0x251   :  { %10718 = vmatpush3.bf16.xpose.msra.mxu0 %v12866_v1  ;;  %v643_v1 = vrot.slane %v629_v22, %v12466_v52  ;;  %v11979_v22 = vld [vmem:[%s15893_s27 + $0x1d8] sm:$0xff]  }
 0x252   :  { %10719 = vmatprep.subr.bf16.mxu0 %v15687_v8 }
 0x253   :  { %10730 = vmatpush3.bf16.xpose.msra.mxu1 %v12869_v10  ;;  %v11977_v10 = vld [vmem:[%s15893_s27 + $0x180] sm:$0xff]   ;;  %v645_v36 = vcombine.high %v643_v1, %v643_v1 }
 0x254   :  { %10731 = vmatprep.subr.bf16.mxu1 %v15687_v8  ;;  %v12901_v26 = vsel %vm860_vm1, %v11977_v10, 0  ;;  %v11980_v10 = vld [vmem:[%s15893_s27 + $0x1f8] sm:$0xff]  }
 0x255   :  { %15926 = vst [vmem:[#allocation34_spill] sm:$0xff] %v12901_v26  ;;  %v673_v50 = vrot.slane %v645_v36, %v12466_v52 }
 0x259   :  { %10720 = vmatpush3.bf16.xpose.msra.mxu0 %v12882_v19  ;;  %v659_v19 = vrot.slane %v643_v1, %v12466_v52  ;;  %v821_v1 = vpack.c.bf16 %v673_v50, %v673_v50 }
 0x25a   :  { %10721 = vmatprep.subr.bf16.mxu0 %v15687_v8 }
 0x25b   :  { %10732 = vmatpush3.bf16.xpose.msra.mxu1 %v12887_v25  ;;  %v12904_v25 = vsel %vm860_vm1, %v11978_v57, 0  ;;  %v820_v57 = vpack.c.bf16 %v659_v19, %v659_v19 }
 0x25c   :  { %10733 = vmatprep.subr.bf16.mxu1 %v15687_v8  ;;  %15927 = vst [vmem:[#allocation35_spill] sm:$0xff] %v12904_v25 }
 0x261   :  { %10722 = vmatpush3.bf16.xpose.msra.mxu0 %v12901_v26  ;;  %v12919_v26 = vsel %vm860_vm1, %v11979_v22, 0  ;;  %v11981_v22 = vld [vmem:[%s15893_s27 + $0x1d0] sm:$0xff]  }
 0x262   :  { %10739 = vmatprep.subr.bf16.mxu0 %v15687_v8  ;;  %15928 = vst [vmem:[#allocation36_spill] sm:$0xff] %v12919_v26 }
 0x263   :  { %10734 = vmatpush3.bf16.xpose.msra.mxu1 %v12904_v25  ;;  %v12922_v25 = vsel %vm860_vm1, %v11980_v10, 0 }
 0x264   :  { %10751 = vmatprep.subr.bf16.mxu1 %v15687_v8  ;;  %15929 = vst [vmem:[#allocation37_spill] sm:$0xff] %v12922_v25 }
 0x268   :  { %10724 = vmatmul.mubr.msk.bf16.vlgmr.msra.gmra.mxu0 %vm860_vm1, %v820_v57  ;;  %v910_v20 = vpop.f32.mrf.mxu0  ;;  %v11982_v57 = vld [vmem:[%s15893_s27 + $0x1f0] sm:$0xff]  }
 0x269   :  { %10740 = vmatpush3.bf16.xpose.msra.mxu0 %v12919_v26  ;;  %v3241_v8 = vpack.c.bf16 %v910_v20, %v910_v20  ;;  %10747 = vmatprep.mubr.msk.bf16.mxu0 %vm12219_vm7, %v15930_v59  ;;  %v12944_v30 = vsel %vm860_vm1, %v11982_v57, 0 }
 0x26a   :  { %10736 = vmatmul.mubr.msk.bf16.vlgmr.msra.gmra.mxu1 %vm860_vm1, %v821_v1  ;;  %v985_v36 = vpop.f32.mrf.mxu1  ;;  %v10581_v48 = vpop.f32.mrf.mxu0  ;;  %10741 = vmatprep.subr.bf16.mxu0 %v15930_v59  ;;  %15932 = vst [vmem:[#allocation39_spill] sm:$0xff] %v12944_v30 }
 0x26b   :  { %v3242_v60 = vpack.c.bf16 %v985_v36, %v985_v36  ;;  %10752 = vmatpush3.bf16.xpose.msra.mxu1 %v12922_v25  ;;  %10759 = vmatprep.mubr.msk.bf16.mxu1 %vm12219_vm7, %v15930_v59  ;;  %v3305_v36 = vunpack.c.l.b16 %v3241_v8  ;;  %v11983_v8 = vld [vmem:[%s15893_s27 + $0x1c8] sm:$0xff]  }
 0x26c   :  { %v10593_v10 = vpop.f32.mrf.mxu1  ;;  %10753 = vmatprep.subr.bf16.mxu1 %v15930_v59  ;;  %v913_v48 = vpop.f32.mrf.mxu0 }
 0x26d   :  { %v3306_v20 = vunpack.c.l.b16 %v3242_v60  ;;  %v12941_v10 = vsel %vm860_vm1, %v11981_v22, 0  ;;  %v12958_v60 = vsel %vm860_vm1, %v11983_v8, 0  ;;  %v11986_v22 = vld [vmem:[%s15893_s27 + $0x1e0] sm:$0xff]   ;;  %v675_v48 = vcombine.high %v659_v19, %v659_v19  ;;  %v11988_v8 = vld [vmem:[%s15893_s27 + $0x238] sm:$0xff]  }
 0x26e   :  { %v988_v1 = vpop.f32.mrf.mxu1  ;;  %v10582_v26 = vpop.f32.mrf.mxu0  ;;  %15931 = vst [vmem:[#allocation38_spill] sm:$0xff] %v12941_v10  ;;  %15933 = vst [vmem:[#allocation40_spill] sm:$0xff] %v12958_v60 }
 0x26f   :  { %v3337_v25 = vrot.slane %v3306_v20, 7  ;;  %v11985_v26 = vld [vmem:[%s15893_s27 + $0x1c0] sm:$0xff]   ;;  %v12977_v20 = vsel %vm860_vm1, %v11986_v22, 0  ;;  %v11987_v1 = vld [vmem:[%s15893_s27 + $0x218] sm:$0xff]   ;;  %v12993_v22 = vsel %vm860_vm1, %v11988_v8, 0 }
 0x270   :  { %v10594_v39 = vpop.f32.mrf.mxu1  ;;  %v12974_v57 = vsel %vm860_vm1, %v11985_v26, 0  ;;  %15936 = vst [vmem:[#allocation43_spill] sm:$0xff] %v12977_v20  ;;  %v12990_v26 = vsel %vm860_vm1, %v11987_v1, 0  ;;  %15938 = vst [vmem:[#allocation45_spill] sm:$0xff] %v12993_v22 }
 0x271   :  { %v3339_v14 = vsel %vm3338_vm8, %v3337_v25, %v3305_v36  ;;  %10742 = vmatpush3.bf16.xpose.msra.mxu0 %v12941_v10  ;;  %v11984_v39 = vld [vmem:[%s15893_s27 + $0x1e8] sm:$0xff]   ;;  %15935 = vst [vmem:[#allocation42_spill] sm:$0xff] %v12974_v57  ;;  %v677_v36 = vcombine.high %v673_v50, %v673_v50  ;;  %15937 = vst [vmem:[#allocation44_spill] sm:$0xff] %v12990_v26 }
 0x272   :  { %10743 = vmatprep.subr.bf16.mxu0 %v15930_v59  ;;  %v12961_v25 = vsel %vm860_vm1, %v11984_v39, 0  ;;  %v822_v39 = vpack.c.bf16 %v675_v48, %v675_v48  ;;  %v11989_v48 = vld [vmem:[%s15893_s27 + $0x210] sm:$0xff]  }
 0x273   :  { %10754 = vmatpush3.bf16.xpose.msra.mxu1 %v12944_v30  ;;  %15934 = vst [vmem:[#allocation41_spill] sm:$0xff] %v12961_v25  ;;  %v823_v19 = vpack.c.bf16 %v677_v36, %v677_v36 }
 0x274   :  { %10755 = vmatprep.subr.bf16.mxu1 %v15930_v59 }
 0x279   :  { %10744 = vmatpush3.bf16.xpose.msra.mxu0 %v12958_v60 }
 0x27a   :  { %10745 = vmatprep.subr.bf16.mxu0 %v15930_v59 }
 0x27b   :  { %10756 = vmatpush3.bf16.xpose.msra.mxu1 %v12961_v25 }
 0x27c   :  { %10757 = vmatprep.subr.bf16.mxu1 %v15930_v59 }
 0x281   :  { %10746 = vmatpush3.bf16.xpose.msra.mxu0 %v12974_v57 }
 0x282   :  { %10763 = vmatprep.subr.bf16.mxu0 %v15930_v59 }
 0x283   :  { %10758 = vmatpush3.bf16.xpose.msra.mxu1 %v12977_v20 }
 0x284   :  { %10775 = vmatprep.subr.bf16.mxu1 %v15930_v59 }
 0x288   :  { %v1060_v20 = vpop.f32.mrf.mxu0  ;;  %10748 = vmatmul.mubr.msk.bf16.vlgmr.msra.gmra.mxu0 %vm860_vm1, %v822_v39 }
 0x289   :  { %v3243_v57 = vpack.c.bf16 %v1060_v20, %v1060_v20  ;;  %10764 = vmatpush3.bf16.xpose.msra.mxu0 %v12990_v26  ;;  %v11990_v20 = vld [vmem:[%s15893_s27 + $0x230] sm:$0xff]   ;;  %10771 = vmatprep.mubr.msk.bf16.mxu0 %vm12219_vm7, %v15930_v59 }
 0x28a   :  { %v1135_v50 = vpop.f32.mrf.mxu1  ;;  %10760 = vmatmul.mubr.msk.bf16.vlgmr.msra.gmra.mxu1 %vm860_vm1, %v823_v19  ;;  %v10605_v25 = vpop.f32.mrf.mxu0  ;;  %10765 = vmatprep.subr.bf16.mxu0 %v15930_v59  ;;  %v13016_v30 = vsel %vm860_vm1, %v11990_v20, 0  ;;  %v685_v20 = vrot.slane %v12463_v51, %v12466_v52 }
 0x28b   :  { %v3244_v60 = vpack.c.bf16 %v1135_v50, %v1135_v50  ;;  %10776 = vmatpush3.bf16.xpose.msra.mxu1 %v12993_v22  ;;  %v3307_v1 = vunpack.c.l.b16 %v3243_v57  ;;  %10783 = vmatprep.mubr.msk.bf16.mxu1 %vm12219_vm7, %v15930_v59  ;;  %15940 = vst [vmem:[#allocation47_spill] sm:$0xff] %v13016_v30 }
 0x28c   :  { %v10617_v36 = vpop.f32.mrf.mxu1  ;;  %10777 = vmatprep.subr.bf16.mxu1 %v15930_v59  ;;  %v1063_v8 = vpop.f32.mrf.mxu0 }
 0x28d   :  { %v3308_v25 = vunpack.c.l.b16 %v3244_v60  ;;  %v3340_v39 = vrot.slane %v3307_v1, 6  ;;  %v13012_v36 = vsel %vm860_vm1, %v11989_v48, 0  ;;  %v11991_v1 = vld [vmem:[%s15893_s27 + $0x208] sm:$0xff]   ;;  %v11993_v48 = vld [vmem:[%s15893_s27 + $0x200] sm:$0xff]  }
 0x28e   :  { %v1138_v19 = vpop.f32.mrf.mxu1  ;;  %v10606_v50 = vpop.f32.mrf.mxu0  ;;  %15939 = vst [vmem:[#allocation46_spill] sm:$0xff] %v13012_v36  ;;  %v13048_v8 = vsel %vm860_vm1, %v11993_v48, 0 }
 0x28f   :  { %v3343_v57 = vrot.slane %v3308_v25, 5  ;;  %v3342_v22 = vsel %vm3341_vm9, %v3340_v39, %v3339_v14  ;;  %v11992_v14 = vld [vmem:[%s15893_s27 + $0x228] sm:$0xff]   ;;  %v11994_v25 = vld [vmem:[%s15893_s27 + $0x220] sm:$0xff]   ;;  %15943 = vst [vmem:[#allocation50_spill] sm:$0xff] %v13048_v8  ;;  %v693_v39 = vcombine.high %v685_v20, %v685_v20  ;;  %v11995_v50 = vld [vmem:[%s15893_s27 + $0x258] sm:$0xff]  }
 0x290   :  { %v10618_v26 = vpop.f32.mrf.mxu1  ;;  %v13051_v19 = vsel %vm860_vm1, %v11994_v25, 0  ;;  %v13066_v25 = vsel %vm860_vm1, %v11995_v50, 0  ;;  %v11997_v50 = vld [vmem:[%s15893_s27 + $0x250] sm:$0xff]  }
 0x291   :  { %v3345_v60 = vsel %vm3344_vm10, %v3343_v57, %v3342_v22  ;;  %10766 = vmatpush3.bf16.xpose.msra.mxu0 %v13012_v36  ;;  %v13030_v26 = vsel %vm860_vm1, %v11991_v1, 0  ;;  %v13033_v22 = vsel %vm860_vm1, %v11992_v14, 0  ;;  %15944 = vst [vmem:[#allocation51_spill] sm:$0xff] %v13051_v19  ;;  %v701_v57 = vrot.slane %v685_v20, %v12466_v52  ;;  %v11996_v14 = vld [vmem:[%s15893_s27 + $0x278] sm:$0xff]   ;;  %15945 = vst [vmem:[#allocation52_spill] sm:$0xff] %v13066_v25 }
 0x292   :  { %10767 = vmatprep.subr.bf16.mxu0 %v15930_v59  ;;  %15941 = vst [vmem:[#allocation48_spill] sm:$0xff] %v13030_v26  ;;  %15942 = vst [vmem:[#allocation49_spill] sm:$0xff] %v13033_v22  ;;  %v715_v1 = vrot.slane %v693_v39, %v12466_v52 }
 0x293   :  { %10778 = vmatpush3.bf16.xpose.msra.mxu1 %v13016_v30  ;;  %v824_v48 = vpack.c.bf16 %v701_v57, %v701_v57 }
 0x294   :  { %10779 = vmatprep.subr.bf16.mxu1 %v15930_v59  ;;  %v825_v20 = vpack.c.bf16 %v715_v1, %v715_v1 }
 0x299   :  { %10768 = vmatpush3.bf16.xpose.msra.mxu0 %v13030_v26 }
 0x29a   :  { %10769 = vmatprep.subr.bf16.mxu0 %v15930_v59 }
 0x29b   :  { %10780 = vmatpush3.bf16.xpose.msra.mxu1 %v13033_v22 }
 0x29c   :  { %10781 = vmatprep.subr.bf16.mxu1 %v15930_v59 }
 0x2a1   :  { %10770 = vmatpush3.bf16.xpose.msra.mxu0 %v13048_v8 }
 0x2a2   :  { %10787 = vmatprep.subr.bf16.mxu0 %v15930_v59 }
 0x2a3   :  { %10782 = vmatpush3.bf16.xpose.msra.mxu1 %v13051_v19  ;;  %v13069_v19 = vsel %vm860_vm1, %v11996_v14, 0 }
 0x2a4   :  { %10799 = vmatprep.subr.bf16.mxu1 %v15930_v59  ;;  %15946 = vst [vmem:[#allocation53_spill] sm:$0xff] %v13069_v19 }
 0x2a8   :  { %v1210_v8 = vpop.f32.mrf.mxu0  ;;  %10772 = vmatmul.mubr.msk.bf16.vlgmr.msra.gmra.mxu0 %vm860_vm1, %v824_v48 }
 0x2a9   :  { %v3245_v22 = vpack.c.bf16 %v1210_v8, %v1210_v8  ;;  %10788 = vmatpush3.bf16.xpose.msra.mxu0 %v13066_v25  ;;  %v11998_v8 = vld [vmem:[%s15893_s27 + $0x270] sm:$0xff]   ;;  %10795 = vmatprep.mubr.msk.bf16.mxu0 %vm12219_vm7, %v15930_v59 }
 0x2aa   :  { %v1285_v39 = vpop.f32.mrf.mxu1  ;;  %10784 = vmatmul.mubr.msk.bf16.vlgmr.msra.gmra.mxu1 %vm860_vm1, %v825_v20  ;;  %v10629_v26 = vpop.f32.mrf.mxu0  ;;  %10789 = vmatprep.subr.bf16.mxu0 %v15930_v59  ;;  %v13092_v4 = vsel %vm860_vm1, %v11998_v8, 0  ;;  %v12002_v8 = vld [vmem:[%s15893_s27 + $0x260] sm:$0xff]  }
 0x2ab   :  { %v3246_v30 = vpack.c.bf16 %v1285_v39, %v1285_v39  ;;  %10800 = vmatpush3.bf16.xpose.msra.mxu1 %v13069_v19  ;;  %v3309_v14 = vunpack.c.l.b16 %v3245_v22  ;;  %10807 = vmatprep.mubr.msk.bf16.mxu1 %vm12219_vm7, %v15930_v59  ;;  %v13088_v19 = vsel %vm860_vm1, %v11997_v50, 0  ;;  %15948 = vst [vmem:[#allocation55_spill] sm:$0xff] %v13092_v4  ;;  %v12001_v50 = vld [vmem:[%s15893_s27 + $0x240] sm:$0xff]  }
 0x2ac   :  { %v10641_v36 = vpop.f32.mrf.mxu1  ;;  %10801 = vmatprep.subr.bf16.mxu1 %v15930_v59  ;;  %v1213_v48 = vpop.f32.mrf.mxu0  ;;  %15947 = vst [vmem:[#allocation54_spill] sm:$0xff] %v13088_v19 }
 0x2ad   :  { %v3310_v26 = vunpack.c.l.b16 %v3246_v30  ;;  %v3346_v20 = vrot.slane %v3309_v14, 4  ;;  %v11999_v14 = vld [vmem:[%s15893_s27 + $0x248] sm:$0xff]   ;;  %v13125_v48 = vsel %vm860_vm1, %v12002_v8, 0 }
 0x2ae   :  { %v1288_v39 = vpop.f32.mrf.mxu1  ;;  %v10630_v36 = vpop.f32.mrf.mxu0  ;;  %15952 = vst [vmem:[#allocation59_spill] sm:$0xff] %v13125_v48 }
 0x2af   :  { %v3349_v22 = vrot.slane %v3310_v26, 3  ;;  %v3348_v25 = vsel %vm3347_vm11, %v3346_v20, %v3345_v60  ;;  %v13106_v60 = vsel %vm860_vm1, %v11999_v14, 0  ;;  %v13122_v26 = vsel %vm860_vm1, %v12001_v50, 0  ;;  %v12003_v39 = vld [vmem:[%s15893_s27 + $0x298] sm:$0xff]  }
 0x2b0   :  { %v10642_v10 = vpop.f32.mrf.mxu1  ;;  %15949 = vst [vmem:[#allocation56_spill] sm:$0xff] %v13106_v60  ;;  %15951 = vst [vmem:[#allocation58_spill] sm:$0xff] %v13122_v26  ;;  %v723_v20 = vcombine.high %v701_v57, %v701_v57  ;;  %v12004_v36 = vld [vmem:[%s15893_s27 + $0x2b8] sm:$0xff]  }
 0x2b1   :  { %v3351_v30 = vsel %vm3350_vm12, %v3349_v22, %v3348_v25  ;;  %10790 = vmatpush3.bf16.xpose.msra.mxu0 %v13088_v19  ;;  %v12000_v10 = vld [vmem:[%s15893_s27 + $0x268] sm:$0xff]   ;;  %v725_v22 = vcombine.high %v715_v1, %v715_v1  ;;  %v13141_v50 = vsel %vm860_vm1, %v12004_v36, 0  ;;  %v12006_v36 = vld [vmem:[%s15893_s27 + $0x2b0] sm:$0xff]  }
 0x2b2   :  { %10791 = vmatprep.subr.bf16.mxu0 %v15930_v59  ;;  %v13109_v25 = vsel %vm860_vm1, %v12000_v10, 0  ;;  %v826_v14 = vpack.c.bf16 %v723_v20, %v723_v20  ;;  %v13138_v10 = vsel %vm860_vm1, %v12003_v39, 0  ;;  %15954 = vst [vmem:[#allocation61_spill] sm:$0xff] %v13141_v50  ;;  %v12005_v20 = vld [vmem:[%s15893_s27 + $0x290] sm:$0xff]  }
 0x2b3   :  { %10802 = vmatpush3.bf16.xpose.msra.mxu1 %v13092_v4  ;;  %15950 = vst [vmem:[#allocation57_spill] sm:$0xff] %v13109_v25  ;;  %15953 = vst [vmem:[#allocation60_spill] sm:$0xff] %v13138_v10  ;;  %v827_v57 = vpack.c.bf16 %v725_v22, %v725_v22 }
 0x2b4   :  { %10803 = vmatprep.subr.bf16.mxu1 %v15930_v59 }
 0x2b9   :  { %10792 = vmatpush3.bf16.xpose.msra.mxu0 %v13106_v60  ;;  %v13164_v60 = vsel %vm860_vm1, %v12006_v36, 0  ;;  %v12009_v36 = vld [vmem:[%s15893_s27 + $0x280] sm:$0xff]  }
 0x2ba   :  { %10793 = vmatprep.subr.bf16.mxu0 %v15930_v59  ;;  %15956 = vst [vmem:[#allocation63_spill] sm:$0xff] %v13164_v60 }
 0x2bb   :  { %10804 = vmatpush3.bf16.xpose.msra.mxu1 %v13109_v25 }
 0x2bc   :  { %10805 = vmatprep.subr.bf16.mxu1 %v15930_v59 }
 0x2c1   :  { %10794 = vmatpush3.bf16.xpose.msra.mxu0 %v13122_v26 }
 0x2c2   :  { %10811 = vmatprep.subr.bf16.mxu0 %v15930_v59 }
 0x2c3   :  { %10806 = vmatpush3.bf16.xpose.msra.mxu1 %v13125_v48 }
 0x2c4   :  { %10823 = vmatprep.subr.bf16.mxu1 %v15930_v59 }
 0x2c8   :  { %v1360_v8 = vpop.f32.mrf.mxu0  ;;  %10796 = vmatmul.mubr.msk.bf16.vlgmr.msra.gmra.mxu0 %vm860_vm1, %v826_v14 }
 0x2c9   :  { %v3247_v48 = vpack.c.bf16 %v1360_v8, %v1360_v8  ;;  %10812 = vmatpush3.bf16.xpose.msra.mxu0 %v13138_v10  ;;  %10819 = vmatprep.mubr.msk.bf16.mxu0 %vm12219_vm7, %v15930_v59 }
 0x2ca   :  { %v1435_v1 = vpop.f32.mrf.mxu1  ;;  %10808 = vmatmul.mubr.msk.bf16.vlgmr.msra.gmra.mxu1 %vm860_vm1, %v827_v57  ;;  %v10653_v26 = vpop.f32.mrf.mxu0  ;;  %10813 = vmatprep.subr.bf16.mxu0 %v15930_v59 }
 0x2cb   :  { %v3248_v25 = vpack.c.bf16 %v1435_v1, %v1435_v1  ;;  %10824 = vmatpush3.bf16.xpose.msra.mxu1 %v13141_v50  ;;  %v3311_v39 = vunpack.c.l.b16 %v3247_v48  ;;  %10831 = vmatprep.mubr.msk.bf16.mxu1 %vm12219_vm7, %v15930_v59 }
 0x2cc   :  { %v10665_v22 = vpop.f32.mrf.mxu1  ;;  %10825 = vmatprep.subr.bf16.mxu1 %v15930_v59  ;;  %v1363_v14 = vpop.f32.mrf.mxu0 }
 0x2cd   :  { %v3312_v26 = vunpack.c.l.b16 %v3248_v25  ;;  %v3352_v57 = vrot.slane %v3311_v39, 2  ;;  %v13160_v22 = vsel %vm860_vm1, %v12005_v20, 0  ;;  %v12007_v20 = vld [vmem:[%s15893_s27 + $0x288] sm:$0xff]   ;;  %v13199_v14 = vsel %vm860_vm1, %v12009_v36, 0 }
 0x2ce   :  { %v1438_v8 = vpop.f32.mrf.mxu1  ;;  %v10654_v1 = vpop.f32.mrf.mxu0  ;;  %15955 = vst [vmem:[#allocation62_spill] sm:$0xff] %v13160_v22  ;;  %15959 = vst [vmem:[#allocation66_spill] sm:$0xff] %v13199_v14 }
 0x2cf   :  { %v3355_v48 = vrot.slane %v3312_v26, 1  ;;  %v3354_v50 = vsel %vm3353_vm13, %v3352_v57, %v3351_v30  ;;  %v12008_v30 = vld [vmem:[%s15893_s27 + $0x2a8] sm:$0xff]   ;;  %v12011_v1 = vld [vmem:[%s15893_s27 + $0x2d8] sm:$0xff]  }
 0x2d0   :  { %v10666_v10 = vpop.f32.mrf.mxu1  ;;  %v13185_v39 = vsel %vm860_vm1, %v12008_v30, 0  ;;  %v12012_v30 = vld [vmem:[%s15893_s27 + $0x2f8] sm:$0xff]   ;;  %v13217_v36 = vsel %vm860_vm1, %v12011_v1, 0  ;;  %v12013_v1 = vld [vmem:[%s15893_s27 + $0x2d0] sm:$0xff]  }
 0x2d1   :  { %v13167_v25 = vsel %vm3356_vm14, %v3355_v48, %v3354_v50  ;;  %10814 = vmatpush3.bf16.xpose.msra.mxu0 %v13160_v22  ;;  %v13180_v10 = vsel %vm860_vm1, %v12007_v20, 0  ;;  %v678_v50 = vcombine.high %v12463_v51, %v12463_v51  ;;  %15958 = vst [vmem:[#allocation65_spill] sm:$0xff] %v13185_v39  ;;  %v12010_v51 = vld [vmem:[%s15893_s27 + $0x2a0] sm:$0xff]   ;;  %15961 = vst [vmem:[#allocation68_spill] sm:$0xff] %v13217_v36 }
 0x2d2   :  { %10815 = vmatprep.subr.bf16.mxu0 %v15930_v59  ;;  %15957 = vst [vmem:[#allocation64_spill] sm:$0xff] %v13180_v10  ;;  %v13202_v8 = vsel %vm860_vm1, %v12010_v51, 0  ;;  %v13220_v51 = vsel %vm860_vm1, %v12012_v30, 0 }
 0x2d3   :  { %10826 = vmatpush3.bf16.xpose.msra.mxu1 %v13164_v60  ;;  %v692_v26 = vrot.slane %v678_v50, %v12466_v52  ;;  %15960 = vst [vmem:[#allocation67_spill] sm:$0xff] %v13202_v8  ;;  %15962 = vst [vmem:[#allocation69_spill] sm:$0xff] %v13220_v51 }
 0x2d4   :  { %10827 = vmatprep.subr.bf16.mxu1 %v15930_v59 }
 0x2d5   :  { %v694_v57 = vcombine.high %v692_v26, %v692_v26  ;;  %v708_v48 = vrot.slane %v692_v26, %v12466_v52 }
 0x2d7   :  { %v722_v20 = vrot.slane %v694_v57, %v12466_v52  ;;  %v828_v50 = vpack.c.bf16 %v708_v48, %v708_v48 }
 0x2d9   :  { %10816 = vmatpush3.bf16.xpose.msra.mxu0 %v13180_v10  ;;  %v829_v26 = vpack.c.bf16 %v722_v20, %v722_v20 }
 0x2da   :  { %10817 = vmatprep.subr.bf16.mxu0 %v15930_v59 }
 0x2db   :  { %10828 = vmatpush3.bf16.xpose.msra.mxu1 %v13185_v39 }
 0x2dc   :  { %10829 = vmatprep.subr.bf16.mxu1 %v15930_v59 }
 0x2e1   :  { %10818 = vmatpush3.bf16.xpose.msra.mxu0 %v13199_v14 }
 0x2e2   :  { %10835 = vmatprep.subr.bf16.mxu0 %v15930_v59 }
 0x2e3   :  { %10830 = vmatpush3.bf16.xpose.msra.mxu1 %v13202_v8 }
 0x2e4   :  { %10847 = vmatprep.subr.bf16.mxu1 %v15930_v59 }
 0x2e8   :  { %v1510_v8 = vpop.f32.mrf.mxu0  ;;  %10820 = vmatmul.mubr.msk.bf16.vlgmr.msra.gmra.mxu0 %vm860_vm1, %v828_v50  ;;  %v12014_v50 = vld [vmem:[%s15893_s27 + $0x2f0] sm:$0xff]  }
 0x2e9   :  { %10836 = vmatpush3.bf16.xpose.msra.mxu0 %v13217_v36  ;;  %v3249_v14 = vpack.c.bf16 %v1510_v8, %v1510_v8  ;;  %10843 = vmatprep.mubr.msk.bf16.mxu0 %vm12219_vm7, %v15930_v59  ;;  %v13242_v22 = vsel %vm860_vm1, %v12014_v50, 0 }
 0x2ea   :  { %v1585_v57 = vpop.f32.mrf.mxu1  ;;  %10832 = vmatmul.mubr.msk.bf16.vlgmr.msra.gmra.mxu1 %vm860_vm1, %v829_v26  ;;  %v10677_v39 = vpop.f32.mrf.mxu0  ;;  %10837 = vmatprep.subr.bf16.mxu0 %v15930_v59  ;;  %15964 = vst [vmem:[#allocation71_spill] sm:$0xff] %v13242_v22 }
 0x2eb   :  { %v3250_v10 = vpack.c.bf16 %v1585_v57, %v1585_v57  ;;  %10848 = vmatpush3.bf16.xpose.msra.mxu1 %v13220_v51  ;;  %10855 = vmatprep.mubr.msk.bf16.mxu1 %vm12219_vm7, %v15930_v59  ;;  %v3313_v57 = vunpack.c.l.b16 %v3249_v14 }
 0x2ec   :  { %v10689_v30 = vpop.f32.mrf.mxu1  ;;  %10849 = vmatprep.subr.bf16.mxu1 %v15930_v59  ;;  %v1513_v8 = vpop.f32.mrf.mxu0 }
 0x2ed   :  { %v3314_v39 = vunpack.c.l.b16 %v3250_v10  ;;  %v13239_v30 = vsel %vm860_vm1, %v12013_v1, 0  ;;  %v12015_v10 = vld [vmem:[%s15893_s27 + $0x2c8] sm:$0xff]   ;;  %v12018_v1 = vld [vmem:[%s15893_s27 + $0x2e0] sm:$0xff]   ;;  %v724_v8 = vcombine.high %v708_v48, %v708_v48 }
 0x2ee   :  { %v1588_v26 = vpop.f32.mrf.mxu1  ;;  %v10678_v36 = vpop.f32.mrf.mxu0  ;;  %15963 = vst [vmem:[#allocation70_spill] sm:$0xff] %v13239_v30  ;;  %v13256_v14 = vsel %vm860_vm1, %v12015_v10, 0  ;;  %v12020_v10 = vld [vmem:[%s15893_s27 + $0x338] sm:$0xff]  }
 0x2ef   :  { %v3358_v51 = vrot.slane %v3314_v39, 7  ;;  %15965 = vst [vmem:[#allocation72_spill] sm:$0xff] %v13256_v14  ;;  %v13275_v39 = vsel %vm860_vm1, %v12018_v1, 0  ;;  %v12019_v26 = vld [vmem:[%s15893_s27 + $0x318] sm:$0xff]   ;;  %v13291_v1 = vsel %vm860_vm1, %v12020_v10, 0 }
 0x2f0   :  { %v10690_v60 = vpop.f32.mrf.mxu1  ;;  %15968 = vst [vmem:[#allocation75_spill] sm:$0xff] %v13275_v39  ;;  %15970 = vst [vmem:[#allocation77_spill] sm:$0xff] %v13291_v1 }
 0x2f1   :  { %v3359_v4 = vsel %vm3338_vm8, %v3358_v51, %v3313_v57  ;;  %10838 = vmatpush3.bf16.xpose.msra.mxu0 %v13239_v30  ;;  %v12016_v60 = vld [vmem:[%s15893_s27 + $0x2e8] sm:$0xff]   ;;  %v12017_v51 = vld [vmem:[%s15893_s27 + $0x2c0] sm:$0xff]   ;;  %v726_v57 = vcombine.high %v722_v20, %v722_v20 }
 0x2f2   :  { %10839 = vmatprep.subr.bf16.mxu0 %v15930_v59  ;;  %v13259_v36 = vsel %vm860_vm1, %v12016_v60, 0  ;;  %v13272_v50 = vsel %vm860_vm1, %v12017_v51, 0  ;;  %v830_v60 = vpack.c.bf16 %v724_v8, %v724_v8  ;;  %v13288_v51 = vsel %vm860_vm1, %v12019_v26, 0  ;;  %v12021_v8 = vld [vmem:[%s15893_s27 + $0x310] sm:$0xff]  }
 0x2f3   :  { %10850 = vmatpush3.bf16.xpose.msra.mxu1 %v13242_v22  ;;  %15966 = vst [vmem:[#allocation73_spill] sm:$0xff] %v13259_v36  ;;  %15967 = vst [vmem:[#allocation74_spill] sm:$0xff] %v13272_v50  ;;  %v831_v48 = vpack.c.bf16 %v726_v57, %v726_v57 }
 0x2f4   :  { %10851 = vmatprep.subr.bf16.mxu1 %v15930_v59  ;;  %15969 = vst [vmem:[#allocation76_spill] sm:$0xff] %v13288_v51 }
 0x2f9   :  { %10840 = vmatpush3.bf16.xpose.msra.mxu0 %v13256_v14 }
 0x2fa   :  { %10841 = vmatprep.subr.bf16.mxu0 %v15930_v59 }
 0x2fb   :  { %10852 = vmatpush3.bf16.xpose.msra.mxu1 %v13259_v36 }
 0x2fc   :  { %10853 = vmatprep.subr.bf16.mxu1 %v15930_v59 }
 0x301   :  { %10842 = vmatpush3.bf16.xpose.msra.mxu0 %v13272_v50 }
 0x302   :  { %10859 = vmatprep.subr.bf16.mxu0 %v15930_v59 }
 0x303   :  { %10854 = vmatpush3.bf16.xpose.msra.mxu1 %v13275_v39 }
 0x304   :  { %10871 = vmatprep.subr.bf16.mxu1 %v15930_v59 }
 0x308   :  { %v1660_v39 = vpop.f32.mrf.mxu0  ;;  %10844 = vmatmul.mubr.msk.bf16.vlgmr.msra.gmra.mxu0 %vm860_vm1, %v830_v60 }
 0x309   :  { %v3251_v50 = vpack.c.bf16 %v1660_v39, %v1660_v39  ;;  %10860 = vmatpush3.bf16.xpose.msra.mxu0 %v13288_v51  ;;  %v12022_v39 = vld [vmem:[%s15893_s27 + $0x330] sm:$0xff]   ;;  %10867 = vmatprep.mubr.msk.bf16.mxu0 %vm12219_vm7, %v15930_v59 }
 0x30a   :  { %v1735_v20 = vpop.f32.mrf.mxu1  ;;  %10856 = vmatmul.mubr.msk.bf16.vlgmr.msra.gmra.mxu1 %vm860_vm1, %v831_v48  ;;  %v10701_v36 = vpop.f32.mrf.mxu0  ;;  %10861 = vmatprep.subr.bf16.mxu0 %v15930_v59  ;;  %v13314_v22 = vsel %vm860_vm1, %v12022_v39, 0  ;;  %v12026_v39 = vld [vmem:[%s15893_s27 + $0x320] sm:$0xff]  }
 0x30b   :  { %v3252_v14 = vpack.c.bf16 %v1735_v20, %v1735_v20  ;;  %10872 = vmatpush3.bf16.xpose.msra.mxu1 %v13291_v1  ;;  %v3315_v26 = vunpack.c.l.b16 %v3251_v50  ;;  %10879 = vmatprep.mubr.msk.bf16.mxu1 %vm12219_vm7, %v15930_v59  ;;  %v13310_v50 = vsel %vm860_vm1, %v12021_v8, 0  ;;  %15972 = vst [vmem:[#allocation79_spill] sm:$0xff] %v13314_v22  ;;  %v12025_v8 = vld [vmem:[%s15893_s27 + $0x300] sm:$0xff]  }
 0x30c   :  { %v10713_v57 = vpop.f32.mrf.mxu1  ;;  %10873 = vmatprep.subr.bf16.mxu1 %v15930_v59  ;;  %v1663_v10 = vpop.f32.mrf.mxu0  ;;  %15971 = vst [vmem:[#allocation78_spill] sm:$0xff] %v13310_v50 }
 0x30d   :  { %v3316_v36 = vunpack.c.l.b16 %v3252_v14  ;;  %v3360_v60 = vrot.slane %v3315_v26, 6  ;;  %v12023_v14 = vld [vmem:[%s15893_s27 + $0x308] sm:$0xff]   ;;  %v734_v26 = vrot.slane %v12733_v53, %v12466_v52 }
 0x30e   :  { %v1738_v48 = vpop.f32.mrf.mxu1  ;;  %v10702_v1 = vpop.f32.mrf.mxu0 }
 0x30f   :  { %v3362_v20 = vrot.slane %v3316_v36, 5  ;;  %v3361_v57 = vsel %vm3341_vm9, %v3360_v60, %v3359_v4  ;;  %v12024_v4 = vld [vmem:[%s15893_s27 + $0x328] sm:$0xff]   ;;  %v13346_v36 = vsel %vm860_vm1, %v12025_v8, 0  ;;  %v742_v10 = vcombine.high %v734_v26, %v734_v26 }
 0x310   :  { %v10714_v51 = vpop.f32.mrf.mxu1  ;;  %v13331_v1 = vsel %vm860_vm1, %v12024_v4, 0  ;;  %15975 = vst [vmem:[#allocation82_spill] sm:$0xff] %v13346_v36  ;;  %v13349_v60 = vsel %vm860_vm1, %v12026_v39, 0  ;;  %v750_v48 = vrot.slane %v734_v26, %v12466_v52 }
 0x311   :  { %v3363_v30 = vsel %vm3344_vm10, %v3362_v20, %v3361_v57  ;;  %10862 = vmatpush3.bf16.xpose.msra.mxu0 %v13310_v50  ;;  %v13328_v51 = vsel %vm860_vm1, %v12023_v14, 0  ;;  %15974 = vst [vmem:[#allocation81_spill] sm:$0xff] %v13331_v1  ;;  %15976 = vst [vmem:[#allocation83_spill] sm:$0xff] %v13349_v60  ;;  %v12027_v20 = vld [vmem:[%s15893_s27 + $0x358] sm:$0xff]   ;;  %v764_v57 = vrot.slane %v742_v10, %v12466_v52 }
 0x312   :  { %10863 = vmatprep.subr.bf16.mxu0 %v15930_v59  ;;  %15973 = vst [vmem:[#allocation80_spill] sm:$0xff] %v13328_v51  ;;  %v12028_v14 = vld [vmem:[%s15893_s27 + $0x378] sm:$0xff]   ;;  %v832_v4 = vpack.c.bf16 %v750_v48, %v750_v48  ;;  %v13364_v8 = vsel %vm860_vm1, %v12027_v20, 0  ;;  %v12029_v20 = vld [vmem:[%s15893_s27 + $0x350] sm:$0xff]  }
 0x313   :  { %10874 = vmatpush3.bf16.xpose.msra.mxu1 %v13314_v22  ;;  %15977 = vst [vmem:[#allocation84_spill] sm:$0xff] %v13364_v8  ;;  %v833_v26 = vpack.c.bf16 %v764_v57, %v764_v57  ;;  %v13367_v39 = vsel %vm860_vm1, %v12028_v14, 0 }
 0x314   :  { %10875 = vmatprep.subr.bf16.mxu1 %v15930_v59  ;;  %15978 = vst [vmem:[#allocation85_spill] sm:$0xff] %v13367_v39 }
 0x319   :  { %10864 = vmatpush3.bf16.xpose.msra.mxu0 %v13328_v51 }
 0x31a   :  { %10865 = vmatprep.subr.bf16.mxu0 %v15930_v59 }
 0x31b   :  { %10876 = vmatpush3.bf16.xpose.msra.mxu1 %v13331_v1 }
 0x31c   :  { %10877 = vmatprep.subr.bf16.mxu1 %v15930_v59 }
 0x321   :  { %10866 = vmatpush3.bf16.xpose.msra.mxu0 %v13346_v36 }
 0x322   :  { %10883 = vmatprep.subr.bf16.mxu0 %v15930_v59 }
 0x323   :  { %10878 = vmatpush3.bf16.xpose.msra.mxu1 %v13349_v60 }
 0x324   :  { %10895 = vmatprep.subr.bf16.mxu1 %v15930_v59 }
 0x328   :  { %v1810_v60 = vpop.f32.mrf.mxu0  ;;  %10868 = vmatmul.mubr.msk.bf16.vlgmr.msra.gmra.mxu0 %vm860_vm1, %v832_v4 }
 0x329   :  { %v3253_v36 = vpack.c.bf16 %v1810_v60, %v1810_v60  ;;  %10884 = vmatpush3.bf16.xpose.msra.mxu0 %v13364_v8  ;;  %v12030_v60 = vld [vmem:[%s15893_s27 + $0x370] sm:$0xff]   ;;  %10891 = vmatprep.mubr.msk.bf16.mxu0 %vm12219_vm7, %v15930_v59 }
 0x32a   :  { %v1885_v10 = vpop.f32.mrf.mxu1  ;;  %10880 = vmatmul.mubr.msk.bf16.vlgmr.msra.gmra.mxu1 %vm860_vm1, %v833_v26  ;;  %v10725_v1 = vpop.f32.mrf.mxu0  ;;  %10885 = vmatprep.subr.bf16.mxu0 %v15930_v59  ;;  %v13390_v19 = vsel %vm860_vm1, %v12030_v60, 0 }
 0x32b   :  { %v3254_v51 = vpack.c.bf16 %v1885_v10, %v1885_v10  ;;  %10896 = vmatpush3.bf16.xpose.msra.mxu1 %v13367_v39  ;;  %v3317_v14 = vunpack.c.l.b16 %v3253_v36  ;;  %10903 = vmatprep.mubr.msk.bf16.mxu1 %vm12219_vm7, %v15930_v59  ;;  %15980 = vst [vmem:[#allocation87_spill] sm:$0xff] %v13390_v19 }
 0x32c   :  { %v10737_v22 = vpop.f32.mrf.mxu1  ;;  %10897 = vmatprep.subr.bf16.mxu1 %v15930_v59  ;;  %v1813_v4 = vpop.f32.mrf.mxu0 }
 0x32d   :  { %v3318_v1 = vunpack.c.l.b16 %v3254_v51  ;;  %v3364_v26 = vrot.slane %v3317_v14, 4  ;;  %v13386_v22 = vsel %vm860_vm1, %v12029_v20, 0  ;;  %v12031_v51 = vld [vmem:[%s15893_s27 + $0x348] sm:$0xff]   ;;  %v12034_v20 = vld [vmem:[%s15893_s27 + $0x360] sm:$0xff]   ;;  %v12035_v4 = vld [vmem:[%s15893_s27 + $0x398] sm:$0xff]  }
 0x32e   :  { %v1888_v10 = vpop.f32.mrf.mxu1  ;;  %v10726_v8 = vpop.f32.mrf.mxu0  ;;  %15979 = vst [vmem:[#allocation86_spill] sm:$0xff] %v13386_v22  ;;  %v13423_v60 = vsel %vm860_vm1, %v12034_v20, 0 }
 0x32f   :  { %v3366_v39 = vrot.slane %v3318_v1, 3  ;;  %v3365_v36 = vsel %vm3347_vm11, %v3364_v26, %v3363_v30  ;;  %v12032_v30 = vld [vmem:[%s15893_s27 + $0x368] sm:$0xff]   ;;  %15984 = vst [vmem:[#allocation91_spill] sm:$0xff] %v13423_v60  ;;  %v772_v1 = vcombine.high %v750_v48, %v750_v48  ;;  %v774_v26 = vcombine.high %v764_v57, %v764_v57  ;;  %v12036_v10 = vld [vmem:[%s15893_s27 + $0x3b8] sm:$0xff]  }
 0x330   :  { %v10738_v50 = vpop.f32.mrf.mxu1  ;;  %v13407_v8 = vsel %vm860_vm1, %v12032_v30, 0  ;;  %v13439_v30 = vsel %vm860_vm1, %v12036_v10, 0  ;;  %v12038_v10 = vld [vmem:[%s15893_s27 + $0x3b0] sm:$0xff]  }
 0x331   :  { %v3367_v55 = vsel %vm3350_vm12, %v3366_v39, %v3365_v36  ;;  %10886 = vmatpush3.bf16.xpose.msra.mxu0 %v13386_v22  ;;  %v13404_v50 = vsel %vm860_vm1, %v12031_v51, 0  ;;  %15982 = vst [vmem:[#allocation89_spill] sm:$0xff] %v13407_v8  ;;  %v12033_v39 = vld [vmem:[%s15893_s27 + $0x340] sm:$0xff]   ;;  %v834_v36 = vpack.c.bf16 %v772_v1, %v772_v1  ;;  %v13436_v51 = vsel %vm860_vm1, %v12035_v4, 0  ;;  %15986 = vst [vmem:[#allocation93_spill] sm:$0xff] %v13439_v30  ;;  %v12037_v1 = vld [vmem:[%s15893_s27 + $0x390] sm:$0xff]  }
 0x332   :  { %10887 = vmatprep.subr.bf16.mxu0 %v15930_v59  ;;  %15981 = vst [vmem:[#allocation88_spill] sm:$0xff] %v13404_v50  ;;  %v13420_v14 = vsel %vm860_vm1, %v12033_v39, 0  ;;  %15985 = vst [vmem:[#allocation92_spill] sm:$0xff] %v13436_v51  ;;  %v835_v48 = vpack.c.bf16 %v774_v26, %v774_v26 }
 0x333   :  { %10898 = vmatpush3.bf16.xpose.msra.mxu1 %v13390_v19  ;;  %15983 = vst [vmem:[#allocation90_spill] sm:$0xff] %v13420_v14 }
 0x334   :  { %10899 = vmatprep.subr.bf16.mxu1 %v15930_v59 }
 0x339   :  { %10888 = vmatpush3.bf16.xpose.msra.mxu0 %v13404_v50 }
 0x33a   :  { %10889 = vmatprep.subr.bf16.mxu0 %v15930_v59 }
 0x33b   :  { %10900 = vmatpush3.bf16.xpose.msra.mxu1 %v13407_v8  ;;  %v13462_v8 = vsel %vm860_vm1, %v12038_v10, 0  ;;  %v12041_v10 = vld [vmem:[%s15893_s27 + $0x380] sm:$0xff]  }
 0x33c   :  { %10901 = vmatprep.subr.bf16.mxu1 %v15930_v59  ;;  %15988 = vst [vmem:[#allocation95_spill] sm:$0xff] %v13462_v8 }
 0x341   :  { %10890 = vmatpush3.bf16.xpose.msra.mxu0 %v13420_v14 }
 0x342   :  { %10907 = vmatprep.subr.bf16.mxu0 %v15930_v59 }
 0x343   :  { %10902 = vmatpush3.bf16.xpose.msra.mxu1 %v13423_v60 }
 0x344   :  { %10919 = vmatprep.subr.bf16.mxu1 %v15930_v59 }
 0x348   :  { %v1960_v39 = vpop.f32.mrf.mxu0  ;;  %10892 = vmatmul.mubr.msk.bf16.vlgmr.msra.gmra.mxu0 %vm860_vm1, %v834_v36 }
 0x349   :  { %v3255_v20 = vpack.c.bf16 %v1960_v39, %v1960_v39  ;;  %10908 = vmatpush3.bf16.xpose.msra.mxu0 %v13436_v51  ;;  %10915 = vmatprep.mubr.msk.bf16.mxu0 %vm12219_vm7, %v15930_v59 }
 0x34a   :  { %v2035_v57 = vpop.f32.mrf.mxu1  ;;  %10904 = vmatmul.mubr.msk.bf16.vlgmr.msra.gmra.mxu1 %vm860_vm1, %v835_v48  ;;  %v10749_v60 = vpop.f32.mrf.mxu0  ;;  %10909 = vmatprep.subr.bf16.mxu0 %v15930_v59 }
 0x34b   :  { %v3256_v14 = vpack.c.bf16 %v2035_v57, %v2035_v57  ;;  %10920 = vmatpush3.bf16.xpose.msra.mxu1 %v13439_v30  ;;  %v3319_v4 = vunpack.c.l.b16 %v3255_v20  ;;  %10927 = vmatprep.mubr.msk.bf16.mxu1 %vm12219_vm7, %v15930_v59  ;;  %v13458_v20 = vsel %vm860_vm1, %v12037_v1, 0  ;;  %v727_v1 = vcombine.high %v12733_v53, %v12733_v53  ;;  %v12042_v53 = vld [vmem:[%s15893_s27 + $0x3a0] sm:$0xff]  }
 0x34c   :  { %v10761_v26 = vpop.f32.mrf.mxu1  ;;  %10921 = vmatprep.subr.bf16.mxu1 %v15930_v59  ;;  %v1963_v36 = vpop.f32.mrf.mxu0  ;;  %15987 = vst [vmem:[#allocation94_spill] sm:$0xff] %v13458_v20 }
 0x34d   :  { %v3320_v60 = vunpack.c.l.b16 %v3256_v14  ;;  %v3368_v48 = vrot.slane %v3319_v4, 2  ;;  %v13499_v36 = vsel %vm860_vm1, %v12041_v10, 0 }
 0x34e   :  { %v2038_v39 = vpop.f32.mrf.mxu1  ;;  %v10750_v30 = vpop.f32.mrf.mxu0  ;;  %15991 = vst [vmem:[#allocation98_spill] sm:$0xff] %v13499_v36 }
 0x34f   :  { %v3370_v57 = vrot.slane %v3320_v60, 1  ;;  %v3369_v26 = vsel %vm3353_vm13, %v3368_v48, %v3367_v55  ;;  %v12039_v55 = vld [vmem:[%s15893_s27 + $0x388] sm:$0xff]   ;;  %v741_v60 = vrot.slane %v727_v1, %v12466_v52  ;;  %v13502_v39 = vsel %vm860_vm1, %v12042_v53, 0 }
 0x350   :  { %v10762_v51 = vpop.f32.mrf.mxu1  ;;  %v13480_v30 = vsel %vm860_vm1, %v12039_v55, 0  ;;  %15992 = vst [vmem:[#allocation99_spill] sm:$0xff] %v13502_v39 }
 0x351   :  { %v13465_v50 = vsel %vm3356_vm14, %v3370_v57, %v3369_v26  ;;  %10910 = vmatpush3.bf16.xpose.msra.mxu0 %v13458_v20  ;;  %v12040_v51 = vld [vmem:[%s15893_s27 + $0x3a8] sm:$0xff]   ;;  %15989 = vst [vmem:[#allocation96_spill] sm:$0xff] %v13480_v30  ;;  %v743_v48 = vcombine.high %v741_v60, %v741_v60  ;;  %v757_v57 = vrot.slane %v741_v60, %v12466_v52  ;;  %v12043_v26 = vld [vmem:[%s15893_s27 + $0x3d8] sm:$0xff]  }
 0x352   :  { %10911 = vmatprep.subr.bf16.mxu0 %v15930_v59  ;;  %v13485_v4 = vsel %vm860_vm1, %v12040_v51, 0  ;;  %v12044_v51 = vld [vmem:[%s15893_s27 + $0x3f8] sm:$0xff]   ;;  %v13517_v10 = vsel %vm860_vm1, %v12043_v26, 0  ;;  %v12045_v26 = vld [vmem:[%s15893_s27 + $0x3d0] sm:$0xff]  }
 0x353   :  { %10922 = vmatpush3.bf16.xpose.msra.mxu1 %v13462_v8  ;;  %15990 = vst [vmem:[#allocation97_spill] sm:$0xff] %v13485_v4  ;;  %v771_v55 = vrot.slane %v743_v48, %v12466_v52  ;;  %v836_v1 = vpack.c.bf16 %v757_v57, %v757_v57  ;;  %15993 = vst [vmem:[#allocation100_spill] sm:$0xff] %v13517_v10  ;;  %v13520_v53 = vsel %vm860_vm1, %v12044_v51, 0 }
 0x354   :  { %10923 = vmatprep.subr.bf16.mxu1 %v15930_v59  ;;  %15994 = vst [vmem:[#allocation101_spill] sm:$0xff] %v13520_v53 }
 0x355   :  { %v837_v60 = vpack.c.bf16 %v771_v55, %v771_v55 }
 0x359   :  { %10912 = vmatpush3.bf16.xpose.msra.mxu0 %v13480_v30 }
 0x35a   :  { %10913 = vmatprep.subr.bf16.mxu0 %v15930_v59 }
 0x35b   :  { %10924 = vmatpush3.bf16.xpose.msra.mxu1 %v13485_v4 }
 0x35c   :  { %10925 = vmatprep.subr.bf16.mxu1 %v15930_v59 }
 0x361   :  { %10914 = vmatpush3.bf16.xpose.msra.mxu0 %v13499_v36 }
 0x362   :  { %10931 = vmatprep.subr.bf16.mxu0 %v15930_v59 }
 0x363   :  { %10926 = vmatpush3.bf16.xpose.msra.mxu1 %v13502_v39 }
 0x364   :  { %10943 = vmatprep.subr.bf16.mxu1 %v15930_v59 }
 0x368   :  { %v2110_v14 = vpop.f32.mrf.mxu0  ;;  %10916 = vmatmul.mubr.msk.bf16.vlgmr.msra.gmra.mxu0 %vm860_vm1, %v836_v1  ;;  %v12046_v1 = vld [vmem:[%s15893_s27 + $0x3f0] sm:$0xff]  }
 0x369   :  { %10932 = vmatpush3.bf16.xpose.msra.mxu0 %v13517_v10  ;;  %v3257_v39 = vpack.c.bf16 %v2110_v14, %v2110_v14  ;;  %10939 = vmatprep.mubr.msk.bf16.mxu0 %vm12219_vm7, %v15930_v59  ;;  %v13542_v8 = vsel %vm860_vm1, %v12046_v1, 0 }
 0x36a   :  { %v2185_v48 = vpop.f32.mrf.mxu1  ;;  %10928 = vmatmul.mubr.msk.bf16.vlgmr.msra.gmra.mxu1 %vm860_vm1, %v837_v60  ;;  %v10773_v36 = vpop.f32.mrf.mxu0  ;;  %10933 = vmatprep.subr.bf16.mxu0 %v15930_v59  ;;  %15996 = vst [vmem:[#allocation103_spill] sm:$0xff] %v13542_v8 }
 0x36b   :  { %v3258_v4 = vpack.c.bf16 %v2185_v48, %v2185_v48  ;;  %10944 = vmatpush3.bf16.xpose.msra.mxu1 %v13520_v53  ;;  %10951 = vmatprep.mubr.msk.bf16.mxu1 %vm12219_vm7, %v15930_v59  ;;  %v3321_v48 = vunpack.c.l.b16 %v3257_v39 }
 0x36c   :  { %v10785_v51 = vpop.f32.mrf.mxu1  ;;  %10945 = vmatprep.subr.bf16.mxu1 %v15930_v59  ;;  %v2113_v36 = vpop.f32.mrf.mxu0 }
 0x36d   :  { %v3322_v14 = vunpack.c.l.b16 %v3258_v4  ;;  %v13539_v51 = vsel %vm860_vm1, %v12045_v26, 0  ;;  %v12047_v4 = vld [vmem:[%s15893_s27 + $0x3c8] sm:$0xff]   ;;  %v12050_v26 = vld [vmem:[%s15893_s27 + $0x3e0] sm:$0xff]   ;;  %v483_v36 = vld [vmem:[%s16001_s24 + $0x38] sm:$0xff] }
 0x36e   :  { %v2188_v60 = vpop.f32.mrf.mxu1  ;;  %v10774_v10 = vpop.f32.mrf.mxu0  ;;  %15995 = vst [vmem:[#allocation102_spill] sm:$0xff] %v13539_v51  ;;  %v13556_v39 = vsel %vm860_vm1, %v12047_v4, 0 }
 0x36f   :  { %v3372_v53 = vrot.slane %v3322_v14, 7  ;;  %15997 = vst [vmem:[#allocation104_spill] sm:$0xff] %v13556_v39  ;;  %v13575_v14 = vsel %vm860_vm1, %v12050_v26, 0  ;;  %v773_v60 = vcombine.high %v757_v57, %v757_v57  ;;  %v482_v26 = vld [vmem:[%s16001_s24 + $0x30] sm:$0xff] }
 0x370   :  { %v10786_v30 = vpop.f32.mrf.mxu1  ;;  %16000 = vst [vmem:[#allocation107_spill] sm:$0xff] %v13575_v14 }
 0x371   :  { %v3373_v20 = vsel %vm3338_vm8, %v3372_v53, %v3321_v48  ;;  %10934 = vmatpush3.bf16.xpose.msra.mxu0 %v13539_v51  ;;  %v12048_v30 = vld [vmem:[%s15893_s27 + $0x3e8] sm:$0xff]   ;;  %v12049_v53 = vld [vmem:[%s15893_s27 + $0x3c0] sm:$0xff]   ;;  %v775_v48 = vcombine.high %v771_v55, %v771_v55  ;;  %v838_v4 = vpack.c.bf16 %v773_v60, %v773_v60 }
 0x372   :  { %10935 = vmatprep.subr.bf16.mxu0 %v15930_v59  ;;  %v13559_v10 = vsel %vm860_vm1, %v12048_v30, 0  ;;  %v13572_v1 = vsel %vm860_vm1, %v12049_v53, 0  ;;  %v481_v55 = vld [vmem:[%s16001_s24 + $0x28] sm:$0xff] }
 0x373   :  { %10946 = vmatpush3.bf16.xpose.msra.mxu1 %v13542_v8  ;;  %15998 = vst [vmem:[#allocation105_spill] sm:$0xff] %v13559_v10  ;;  %15999 = vst [vmem:[#allocation106_spill] sm:$0xff] %v13572_v1  ;;  %v839_v30 = vpack.c.bf16 %v775_v48, %v775_v48  ;;  %v479_v8 = vld [vmem:[%s16001_s24 + $0x18] sm:$0xff] }
 0x374   :  { %10947 = vmatprep.subr.bf16.mxu1 %v15930_v59 }
 0x379   :  { %10936 = vmatpush3.bf16.xpose.msra.mxu0 %v13556_v39 }
 0x37a   :  { %10937 = vmatprep.subr.bf16.mxu0 %v15930_v59 }
 0x37b   :  { %10948 = vmatpush3.bf16.xpose.msra.mxu1 %v13559_v10 }
 0x37c   :  { %10949 = vmatprep.subr.bf16.mxu1 %v15930_v59 }
 0x381   :  { %10938 = vmatpush3.bf16.xpose.msra.mxu0 %v13572_v1 }
 0x382   :  { %10955 = vmatprep.subr.bf16.mxu0 %v15930_v59 }
 0x383   :  { %10950 = vmatpush3.bf16.xpose.msra.mxu1 %v13575_v14 }
 0x384   :  { %10963 = vmatprep.subr.mxu1 %v483_v36 }
 0x388   :  { %v2260_v53 = vpop.f32.mrf.mxu0  ;;  %10940 = vmatmul.mubr.msk.bf16.vlgmr.msra.gmra.mxu0 %vm860_vm1, %v838_v4 }
 0x389   :  { %v3259_v10 = vpack.c.bf16 %v2260_v53, %v2260_v53  ;;  %10959 = vmatprep.mubr.msk.bf16.mxu0 %vm12219_vm7, %v15930_v59 }
 0x38a   :  { %v2335_v39 = vpop.f32.mrf.mxu1  ;;  %10952 = vmatmul.mubr.msk.bf16.vlgmr.msra.gmra.mxu1 %vm860_vm1, %v839_v30  ;;  %v10797_v57 = vpop.f32.mrf.mxu0  ;;  %v480_v30 = vld [vmem:[%s16001_s24 + $0x20] sm:$0xff] }
 0x38b   :  { %v3260_v14 = vpack.c.bf16 %v2335_v39, %v2335_v39  ;;  %10964 = vmatpush3.msra.mxu1 %v483_v36  ;;  %10979 = vmatprep.mubr.msk.f32.mxu1 %vm860_vm1, %v12406_v32  ;;  %v3323_v60 = vunpack.c.l.b16 %v3259_v10 }
 0x38c   :  { %v10809_v48 = vpop.f32.mrf.mxu1  ;;  %10965 = vmatprep.subr.mxu1 %v482_v26  ;;  %v2263_v53 = vpop.f32.mrf.mxu0 }
 0x38d   :  { %v3324_v4 = vunpack.c.l.b16 %v3260_v14  ;;  %10966 = vmatpush3.msra.mxu1 %v482_v26  ;;  %v3374_v57 = vrot.slane %v3323_v60, 6  ;;  %v478_v26 = vld [vmem:[%s16001_s24 + $0x10] sm:$0xff]  ;;  %v515_v60 = vld [vmem:[%s16002_s2 + $0x68] sm:$0xff]  ;;  %v513_v53 = vld [vmem:[%s16002_s2 + $0x58] sm:$0xff] }
 0x38e   :  { %v2338_v39 = vpop.f32.mrf.mxu1  ;;  %10967 = vmatprep.subr.mxu1 %v481_v55  ;;  %v10798_v1 = vpop.f32.mrf.mxu0 }
 0x38f   :  { %v3376_v36 = vrot.slane %v3324_v4, 5  ;;  %10968 = vmatpush3.msra.mxu1 %v481_v55  ;;  %v3375_v10 = vsel %vm3341_vm9, %v3374_v57, %v3373_v20  ;;  %v477_v1 = vld [vmem:[%s16001_s24 + $0x8] sm:$0xff]  ;;  %v476_v20 = vld [vmem:[%s16001_s24] sm:$0xff]  ;;  %v517_v55 = vld [vmem:[%s16002_s2 + $0x78] sm:$0xff] }
 0x390   :  { %v10810_v48 = vpop.f32.mrf.mxu1  ;;  %10969 = vmatprep.subr.mxu1 %v480_v30  ;;  %v514_v4 = vld [vmem:[%s16002_s2 + $0x60] sm:$0xff]  ;;  %v511_v57 = vld [vmem:[%s16002_s2 + $0x48] sm:$0xff] }
 0x391   :  { %v13603_v14 = vsel %vm3344_vm10, %v3376_v36, %v3375_v10  ;;  %10970 = vmatpush3.msra.mxu1 %v480_v30  ;;  %v512_v30 = vld [vmem:[%s16002_s2 + $0x50] sm:$0xff]  ;;  %v510_v39 = vld [vmem:[%s16002_s2 + $0x40] sm:$0xff]  ;;  %v509_v36 = vld [vmem:[%s16002_s2 + $0x38] sm:$0xff] }
 0x392   :  { %10971 = vmatprep.subr.mxu1 %v479_v8  ;;  %v508_v10 = vld [vmem:[%s16002_s2 + $0x30] sm:$0xff]  ;;  %v507_v48 = vld [vmem:[%s16002_s2 + $0x28] sm:$0xff] }
 0x393   :  { %10972 = vmatpush3.msra.mxu1 %v479_v8  ;;  %v516_v8 = vld [vmem:[%s16002_s2 + $0x70] sm:$0xff] }
 0x394   :  { %10973 = vmatprep.subr.mxu1 %v478_v26 }
 0x395   :  { %10974 = vmatpush3.msra.mxu1 %v478_v26  ;;  %v506_v26 = vld [vmem:[%s16002_s2 + $0x20] sm:$0xff] }
 0x396   :  { %10975 = vmatprep.subr.mxu1 %v477_v1 }
 0x397   :  { %10976 = vmatpush3.msra.mxu1 %v477_v1  ;;  %v505_v1 = vld [vmem:[%s16002_s2 + $0x18] sm:$0xff] }
 0x398   :  { %10977 = vmatprep.subr.mxu1 %v476_v20 }
 0x399   :  { %10978 = vmatpush3.msra.mxu1 %v476_v20  ;;  %v504_v20 = vld [vmem:[%s16002_s2 + $0x10] sm:$0xff] }
 0x39a   :  { %10980 = vmatmul.mubr.msk.f32.vlgmr.msra.gmra.mxu1 %vm860_vm1, %v12404_v31  ;;  %3673 = vmatprep.subr.mxu1 %v517_v55  ;;  %v503_v55 = vld [vmem:[%s16002_s2 + $0x8] sm:$0xff] }
 0x39b   :  { %3674 = vmatpush1.msra.mxu1 %v516_v8  ;;  %3721 = vmatprep.mubr.f32.mxu1 %v15930_v59  ;;  %v502_v8 = vld [vmem:[%s16002_s2] sm:$0xff] }
 0x39c   :  { %3675 = vmatprep.subr.mxu1 %v515_v60 }
 0x39d   :  { %3676 = vmatpush1.msra.mxu1 %v514_v4 }
 0x39e   :  { %3677 = vmatprep.subr.mxu1 %v513_v53 }
 0x39f   :  { %3678 = vmatpush1.msra.mxu1 %v512_v30 }
 0x3a0   :  { %3679 = vmatprep.subr.mxu1 %v511_v57 }
 0x3a1   :  { %3680 = vmatpush1.msra.mxu1 %v510_v39 }
 0x3a2   :  { %3681 = vmatprep.subr.mxu1 %v509_v36 }
 0x3a3   :  { %3682 = vmatpush1.msra.mxu1 %v508_v10 }
 0x3a4   :  { %3683 = vmatprep.subr.mxu1 %v507_v48 }
 0x3a5   :  { %3684 = vmatpush1.msra.mxu1 %v506_v26 }
 0x3a6   :  { %3685 = vmatprep.subr.mxu1 %v505_v1 }
 0x3a7   :  { %3686 = vmatpush1.msra.mxu1 %v504_v20 }
 0x3a8   :  { %3687 = vmatprep.subr.mxu1 %v503_v55  ;;  %v2410_v60 = vpop.f32.mrf.mxu0 }
 0x3a9   :  { %3688 = vmatpush1.msra.mxu1 %v502_v8  ;;  %v3261_v4 = vpack.c.bf16 %v2410_v60, %v2410_v60 }
 0x3aa   :  { %v2485_v53 = vpop.f32.mrf.mxu1  ;;  %9863 = vmatmul.mubr.msk.f32.vlgmr.msra.gmra.mxu1 %vm860_vm1, %v12406_v32  ;;  %11000 = vmatprep.subr.bf16.mxu1 %v15930_v59  ;;  %v10821_v30 = vpop.f32.mrf.mxu0 }
 0x3ab   :  { %v3262_v57 = vpack.c.bf16 %v2485_v53, %v2485_v53  ;;  %3727 = vmatprep.mubr.f32.mxu1 %v15930_v59  ;;  %11001 = vmatpush3.bf16.xpose.msra.mxu1 %v12419_v38  ;;  %v3325_v39 = vunpack.c.l.b16 %v3261_v4 }
 0x3ac   :  { %v10833_v36 = vpop.f32.mrf.mxu1  ;;  %11002 = vmatprep.subr.bf16.mxu1 %v15930_v59  ;;  %v2413_v48 = vpop.f32.mrf.mxu0 }
 0x3ad   :  { %v3326_v10 = vunpack.c.l.b16 %v3262_v57  ;;  %v3378_v26 = vrot.slane %v3325_v39, 4 }
 0x3ae   :  { %v2488_v1 = vpop.f32.mrf.mxu1  ;;  %9864 = vmatmul.mubr.msk.f32.gmra.mxu1 %vm860_vm1, %v12404_v31  ;;  %v10822_v55 = vpop.f32.mrf.mxu0 }
 0x3af   :  { %v3380_v20 = vrot.slane %v3326_v10, 3  ;;  %11008 = vmatprep.mubr.msk.bf16.mxu1 %vm12219_vm7, %v15930_v59  ;;  %v3379_v8 = vsel %vm3347_vm11, %v3378_v26, %v13603_v14 }
 0x3b0   :  { %v10834_v60 = vpop.f32.mrf.mxu1 }
 0x3b1   :  { %v3381_v4 = vsel %vm3350_vm12, %v3380_v20, %v3379_v8 }
 0x3b3   :  { %11003 = vmatpush3.bf16.xpose.msra.mxu1 %v12429_v40 }
 0x3b4   :  { %11004 = vmatprep.subr.bf16.mxu1 %v15930_v59 }
 0x3bb   :  { %11005 = vmatpush3.bf16.xpose.msra.mxu1 %v12437_v42 }
 0x3bc   :  { %11006 = vmatprep.subr.bf16.mxu1 %v15930_v59 }
 0x3c3   :  { %11007 = vmatpush3.bf16.xpose.msra.mxu1 %v12453_v46 }
 0x3c4   :  { %11024 = vmatprep.subr.bf16.mxu1 %v15930_v59 }
 0x3c8   :  { %v2560_v53 = vpop.f32.mrf.mxu0 }
 0x3c9   :  { %v3263_v30 = vpack.c.bf16 %v2560_v53, %v2560_v53 }
 0x3ca   :  { %v2635_v57 = vpop.f32.mrf.mxu1  ;;  %v10845_v39 = vpop.f32.mrf.mxu0 }
 0x3cb   :  { %v3264_v14 = vpack.c.bf16 %v2635_v57, %v2635_v57  ;;  %v3327_v36 = vunpack.c.l.b16 %v3263_v30 }
 0x3cc   :  { %v10857_v10 = vpop.f32.mrf.mxu1  ;;  %v2563_v26 = vpop.f32.mrf.mxu0 }
 0x3cd   :  { %v3328_v48 = vunpack.c.l.b16 %v3264_v14  ;;  %v3382_v1 = vrot.slane %v3327_v36, 2 }
 0x3ce   :  { %v2638_v20 = vpop.f32.mrf.mxu1  ;;  %v10846_v8 = vpop.f32.mrf.mxu0 }
 0x3cf   :  { %v3384_v55 = vrot.slane %v3328_v48, 1  ;;  %v3383_v60 = vsel %vm3353_vm13, %v3382_v1, %v3381_v4 }
 0x3d0   :  { %v10858_v42 = vpop.f32.mrf.mxu1 }
 0x3d1   :  { %v13686_v46 = vsel %vm3356_vm14, %v3384_v55, %v3383_v60 }
 0x3e8   :  { %v2710_v40 = vpop.f32.mrf.mxu0 }
 0x3e9   :  { %v3265_v53 = vpack.c.bf16 %v2710_v40, %v2710_v40 }
 0x3ea   :  { %v2785_v38 = vpop.f32.mrf.mxu1  ;;  %v10869_v51 = vpop.f32.mrf.mxu0 }
 0x3eb   :  { %v3266_v39 = vpack.c.bf16 %v2785_v38, %v2785_v38  ;;  %v3329_v26 = vunpack.c.l.b16 %v3265_v53 }
 0x3ec   :  { %v10881_v57 = vpop.f32.mrf.mxu1  ;;  %v2713_v10 = vpop.f32.mrf.mxu0 }
 0x3ed   :  { %v3330_v30 = vunpack.c.l.b16 %v3266_v39 }
 0x3ee   :  { %v2788_v14 = vpop.f32.mrf.mxu1  ;;  %v10870_v20 = vpop.f32.mrf.mxu0 }
 0x3ef   :  { %v3386_v36 = vrot.slane %v3330_v30, 7 }
 0x3f0   :  { %v10882_v48 = vpop.f32.mrf.mxu1 }
 0x3f1   :  { %v3387_v8 = vsel %vm3338_vm8, %v3386_v36, %v3329_v26 }
 0x408   :  { %v2860_v4 = vpop.f32.mrf.mxu0 }
 0x409   :  { %v3267_v20 = vpack.c.bf16 %v2860_v4, %v2860_v4 }
 0x40a   :  { %v2935_v42 = vpop.f32.mrf.mxu1  ;;  %v10893_v1 = vpop.f32.mrf.mxu0 }
 0x40b   :  { %v3268_v48 = vpack.c.bf16 %v2935_v42, %v2935_v42  ;;  %v3331_v54 = vunpack.c.l.b16 %v3267_v20  ;;  %v205_v20 = vadd.s32 8, %v12461_v49 }
 0x40c   :  { %v10905_v55 = vpop.f32.mrf.mxu1  ;;  %v2863_v60 = vpop.f32.mrf.mxu0 }
 0x40d   :  { %v3332_v36 = vunpack.c.l.b16 %v3268_v48  ;;  %v3388_v1 = vrot.slane %v3331_v54, 6 }
 0x40e   :  { %v2938_v19 = vpop.f32.mrf.mxu1  ;;  %v10894_v22 = vpop.f32.mrf.mxu0 }
 0x40f   :  { %v3390_v60 = vrot.slane %v3332_v36, 5  ;;  %v3389_v22 = vsel %vm3341_vm9, %v3388_v1, %v3387_v8 }
 0x410   :  { %v10906_v40 = vpop.f32.mrf.mxu1 }
 0x428   :  { %v3010_v51 = vpop.f32.mrf.mxu0 }
 0x429   :  { %v3269_v26 = vpack.c.bf16 %v3010_v51, %v3010_v51 }
 0x42a   :  { %v3085_v38 = vpop.f32.mrf.mxu1  ;;  %v10917_v57 = vpop.f32.mrf.mxu0 }
 0x42b   :  { %v3270_v45 = vpack.c.bf16 %v3085_v38, %v3085_v38  ;;  %v3333_v55 = vunpack.c.l.b16 %v3269_v26 }
 0x42c   :  { %v10929_v39 = vpop.f32.mrf.mxu1  ;;  %v3013_v10 = vpop.f32.mrf.mxu0 }
 0x42d   :  { %v3334_v19 = vunpack.c.l.b16 %v3270_v45  ;;  %v3392_v40 = vrot.slane %v3333_v55, 4  ;;  %v3391_v10 = vsel %vm3344_vm10, %v3390_v60, %v3389_v22 }
 0x42e   :  { %v3088_v14 = vpop.f32.mrf.mxu1  ;;  %v10918_v53 = vpop.f32.mrf.mxu0 }
 0x42f   :  { %v3394_v14 = vrot.slane %v3334_v19, 3  ;;  %v3393_v42 = vsel %vm3347_vm11, %v3392_v40, %v3391_v10  ;;  %v16003_v10 = vpack.c.b16 %v13465_v50, %v13167_v25  ;;  %v496_v25 = vld [vmem:[%s15644_s9 + $0x58] sm:$0xff]  ;;  %v495_v50 = vld [vmem:[%s15644_s9 + $0x50] sm:$0xff] }
 0x430   :  { %v10930_v30 = vpop.f32.mrf.mxu1 }
 0x431   :  { %v3395_v8 = vsel %vm3350_vm12, %v3394_v14, %v3393_v42  ;;  %v498_v14 = vld [vmem:[%s15644_s9 + $0x68] sm:$0xff]  ;;  %v493_v42 = vld [vmem:[%s15644_s9 + $0x40] sm:$0xff] }
 0x448   :  { %v3160_v41 = vpop.f32.mrf.mxu0 }
 0x449   :  { %v3271_v57 = vpack.c.bf16 %v3160_v41, %v3160_v41  ;;  %v9692_v41 = vld [vmem:[%s15643_s4] ss:$0 sm:$0xff] }
 0x44a   :  { %v3235_v39 = vpop.f32.mrf.mxu1  ;;  %v10941_v53 = vpop.f32.mrf.mxu0  ;;  %vm211_vm15 = vcmp.eq.s32.totalorder %v9692_v41, %v12461_v49  ;;  %vm212_vm0 = vcmp.eq.s32.totalorder %v9692_v41, %v205_v20  ;;  %v488_v20 = vld [vmem:[%s15644_s9 + $0x18] sm:$0xff]  ;;  %v485_v41 = vld [vmem:[%s15644_s9] sm:$0xff] }
 0x44b   :  { %v3272_v4 = vpack.c.bf16 %v3235_v39, %v3235_v39  ;;  %v3335_v51 = vunpack.c.l.b16 %v3271_v57  ;;  %v9693_v22 = vsel %vm211_vm15, 1.0, %v15930_v59  ;;  %v9694_v40 = vsel %vm212_vm0, 1.0, %v15930_v59  ;;  %v500_v57 = vld [vmem:[%s15644_s9 + $0x78] sm:$0xff]  ;;  %v497_v53 = vld [vmem:[%s15644_s9 + $0x60] sm:$0xff] }
 0x44c   :  { %v10953_v30 = vpop.f32.mrf.mxu1  ;;  %v3163_v54 = vpop.f32.mrf.mxu0  ;;  %v13707_v39 = vpack.c.bf16 %v9694_v40, %v9693_v22 }
 0x44d   :  { %v3336_v38 = vunpack.c.l.b16 %v3272_v4  ;;  %v3396_v45 = vrot.slane %v3335_v51, 2  ;;  %v494_v4 = vld [vmem:[%s15644_s9 + $0x48] sm:$0xff]  ;;  %v492_v51 = vld [vmem:[%s15644_s9 + $0x38] sm:$0xff]  ;;  %v491_v30 = vld [vmem:[%s15644_s9 + $0x30] sm:$0xff]  ;;  %v13766_v40 = vpop.permute.xlu1 %3456 }
 0x44e   :  { %v3238_v48 = vpop.f32.mrf.mxu1  ;;  %v10942_v36 = vpop.f32.mrf.mxu0  ;;  %v489_v54 = vld [vmem:[%s15644_s9 + $0x20] sm:$0xff] }
 0x44f   :  { %v3398_v26 = vrot.slane %v3336_v38, 1  ;;  %v3397_v1 = vsel %vm3353_vm13, %v3396_v45, %v3395_v8  ;;  %v490_v38 = vld [vmem:[%s15644_s9 + $0x28] sm:$0xff]  ;;  %v487_v45 = vld [vmem:[%s15644_s9 + $0x10] sm:$0xff] }
 0x450   :  { %v10954_v55 = vpop.f32.mrf.mxu1  ;;  %v486_v48 = vld [vmem:[%s15644_s9 + $0x8] sm:$0xff] }
 0x451   :  { %v3399_v60 = vsel %vm3356_vm14, %v3398_v26, %v3397_v1  ;;  %v13760_v26 = vpop.permute.xlu0 %3451 }
 0x452   :  { %v3401_v19 = vpack.c.b16 %v3399_v60, %v13686_v46  ;;  %v499_v46 = vld [vmem:[%s15644_s9 + $0x70] sm:$0xff]  ;;  %v9860_v60 = vld [vmem:[%s15645_s8] ss:$0 sm:$0xff] }
 0x454   :  { %10956 = vmatpush3.bf16.msra.mxu0 %v3401_v19 }
 0x455   :  { %10957 = vmatprep.subr.bf16.mxu0 %v15930_v59 }
 0x458   :  { %10958 = vmatpush3.bf16.msra.mxu0 %v16003_v10 }
 0x459   :  { %3585 = vmatprep.subr.mxu0 %v500_v57 }
 0x45a   :  { %v10981_v8 = vpop.f32.mrf.mxu1 }
 0x45b   :  { %10960 = vmatmul.mubr.msk.bf16.vlgmr.msra.gmra.mxu0 %vm3404_vm2, %v13707_v39 }
 0x45c   :  { %3586 = vmatpush1.msra.mxu0 %v499_v46  ;;  %3633 = vmatprep.mubr.f32.mxu0 %v15930_v59  ;;  %v3533_v55 = vpop.f32.mrf.mxu1 }
 0x45d   :  { %3587 = vmatprep.subr.mxu0 %v498_v14 }
 0x45e   :  { %3588 = vmatpush1.msra.mxu0 %v497_v53 }
 0x45f   :  { %3589 = vmatprep.subr.mxu0 %v496_v25 }
 0x460   :  { %3590 = vmatpush1.msra.mxu0 %v495_v50 }
 0x461   :  { %3591 = vmatprep.subr.mxu0 %v494_v4 }
 0x462   :  { %3592 = vmatpush1.msra.mxu0 %v493_v42  ;;  %v13775_v42 = vsub.s32 0, %v12461_v49 }
 0x463   :  { %3593 = vmatprep.subr.mxu0 %v492_v51  ;;  %v518_v51 = vld [vmem:[%s15646_s12] sm:$0x3] }
 0x464   :  { %3594 = vmatpush1.msra.mxu0 %v491_v30  ;;  %16004 = vst [vmem:[#allocation108_spill] sm:$0xff] %v13775_v42 }
 0x465   :  { %3595 = vmatprep.subr.mxu0 %v490_v38  ;;  %v501_v38 = vld [vmem:[%s15647_s10] sm:$0x3]  ;;  %s12221_s10 = smov 64  }
 0x466   :  { %3596 = vmatpush1.msra.mxu0 %v489_v54  ;;  %v13784_v54 = vrot.slane %v518_v51, %v13775_v42 }
 0x467   :  { %3597 = vmatprep.subr.mxu0 %v488_v20  ;;  %v13787_v20 = vrot.slane %v501_v38, %v13775_v42 }
 0x468   :  { %3598 = vmatpush1.msra.mxu0 %v487_v45 }
 0x469   :  { %3599 = vmatprep.subr.mxu0 %v486_v48 }
 0x46a   :  { %3600 = vmatpush1.msra.mxu0 %v485_v41  ;;  %v3723_v30 = vpop.f32.mrf.mxu1 }
 0x46b   :  { %v3724_v41 = vadd.f32 %v3723_v30, %v13784_v54 }
 0x46c   :  { %v3725_v45 = vpop.f32.mrf.mxu1 }
 0x51b   :  { %v3442_v36 = vpop.f32.mrf.mxu0 }
 0x51c   :  { %v3459_v1 = vmul.f32 %v13760_v26, %v3442_v36  ;;  %v3729_v36 = vpop.f32.mrf.mxu1 }
 0x51d   :  { %v10961_v19 = vpop.f32.mrf.mxu0 }
 0x51e   :  { %v3534_v22 = vadd.f32 %v3533_v55, %v3459_v1  ;;  %v3730_v19 = vadd.f32 %v3729_v36, %v13784_v54  ;;  %v3731_v36 = vpop.f32.mrf.mxu1 }
 0x51f   :  { %v3445_v57 = vpop.f32.mrf.mxu0 }
 0x520   :  { %v3548_v10 = vadd.f32 %v9860_v60, %v3534_v22  ;;  %v3460_v46 = vmul.f32 %v13766_v40, %v3445_v57 }
 0x521   :  { %v10962_v14 = vpop.f32.mrf.mxu0 }
 0x522   :  { %v3550_v53 = vmax.f32 %v3548_v10, 0.0  ;;  %v3539_v25 = vadd.f32 %v10981_v8, %v3460_v46 }
 0x524   :  { %v3549_v50 = vadd.f32 %v9860_v60, %v3539_v25  ;;  %9861 = vmatmul.mubr.msk.f32.vlgmr.msra.gmra.mxu0 %vm860_vm1, %v3550_v53 }
 0x525   :  { %3639 = vmatprep.mubr.f32.mxu0 %v15930_v59 }
 0x526   :  { %v3551_v4 = vmax.f32 %v3549_v50, 0.0 }
 0x528   :  { %9862 = vmatmul.mubr.msk.f32.gmra.mxu0 %vm860_vm1, %v3551_v4  ;;  %v13794_v4 = vsub.s32 1, %v12461_v49 }
 0x529   :  { %10984 = vmatprep.mubr.msk.bf16.mxu0 %vm520_vm4, %v12397_v23 }
 0x52a   :  { %16005 = vst [vmem:[#allocation109_spill] sm:$0xff] %v13794_v4  ;;  %v13797_v30 = vrot.slane %v518_v51, %v13794_v4 }
 0x5e4   :  { %v3635_v48 = vpop.f32.mrf.mxu0 }
 0x5e5   :  { %v3636_v8 = vadd.f32 %v3635_v48, %v13787_v20  ;;  %v13800_v48 = vrot.slane %v501_v38, %v13794_v4  ;;  %v16019_v4 = vld [vmem:[#allocation27_spill] sm:$0xff] }
 0x5e6   :  { %v3637_v1 = vpop.f32.mrf.mxu0 }
 0x5e7   :  { %v3734_v55 = vadd.f32 %v3724_v41, %v3636_v8  ;;  %v3726_v41 = vadd.f32 %v3725_v45, %v13797_v30 }
 0x5e8   :  { %v3641_v60 = vpop.f32.mrf.mxu0 }
 0x5e9   :  { %v9865_v22 = vmul.f32 -1.442695, %v3734_v55  ;;  %v3642_v57 = vadd.f32 %v3641_v60, %v13787_v20  ;;  %v3638_v55 = vadd.f32 %v3637_v1, %v13800_v48 }
 0x5eb   :  { %12051 = vpow2.f32 %v9865_v22  ;;  %v3735_v10 = vadd.f32 %v3730_v19, %v3642_v57  ;;  %v3643_v19 = vpop.f32.mrf.mxu0  ;;  %v3732_v22 = vadd.f32 %v3731_v36, %v13797_v30 }
 0x5ed   :  { %v9866_v46 = vmul.f32 -1.442695, %v3735_v10 }
 0x5ef   :  { %12053 = vpow2.f32 %v9866_v46  ;;  %v3644_v46 = vadd.f32 %v3643_v19, %v13800_v48 }
 0x5f8   :  { %v12052_v14 = vpop.eup %12051 }
 0x5f9   :  { %v3742_v53 = vadd.f32 1.0, %v12052_v14 }
 0x5fb   :  { %12055 = vrcp.f32 %v3742_v53 }
 0x5fc   :  { %v12054_v25 = vpop.eup %12053 }
 0x5fd   :  { %v3743_v50 = vadd.f32 1.0, %v12054_v25 }
 0x5ff   :  { %12057 = vrcp.f32 %v3743_v50 }
 0x608   :  { %v12056_v8 = vpop.eup %12055 }
 0x609   :  { %v3748_v60 = vmul.f32 %v12056_v8, %v3726_v41  ;;  %v3754_v53 = vsub.f32 1.0, %v12056_v8 }
 0x60b   :  { %v3750_v57 = vadd.f32 %v3748_v60, %v3638_v55 }
 0x60c   :  { %v12058_v10 = vpop.eup %12057 }
 0x60d   :  { %12059 = vtanh.f32 %v3750_v57  ;;  %v3749_v51 = vmul.f32 %v12058_v10, %v3732_v22  ;;  %v3755_v55 = vsub.f32 1.0, %v12058_v10 }
 0x60f   :  { %v3751_v14 = vadd.f32 %v3749_v51, %v3644_v46 }
 0x611   :  { %12061 = vtanh.f32 %v3751_v14 }
 0x61a   :  { %v12060_v38 = vpop.eup %12059 }
 0x61b   :  { %3758 = vrot.lane.b32.xlu0 %v12060_v38, %s12221_s10 }
 0x61e   :  { %v12062_v45 = vpop.eup %12061 }
 0x61f   :  { %3760 = vrot.lane.b32.xlu1 %v12062_v45, %s12221_s10  ;;  %3766 = vrot.lane.b32.xlu0 %v12406_v32, %s12221_s10 }
 0x623   :  { %3768 = vrot.lane.b32.xlu1 %v12404_v31, %s12221_s10 }
 0x68d   :  { %v3759_v1 = vpop.permute.xlu0 %3758 }
 0x68e   :  { %v3764_v41 = vmul.f32 %v3759_v1, %v3754_v53 }
 0x691   :  { %v3761_v25 = vpop.permute.xlu1 %3760  ;;  %v3767_v50 = vpop.permute.xlu0 %3766 }
 0x692   :  { %v3772_v36 = vmul.f32 %v12056_v8, %v3767_v50  ;;  %v3765_v22 = vmul.f32 %v3761_v25, %v3755_v55 }
 0x694   :  { %v13812_v60 = vadd.f32 %v3772_v36, %v3764_v41 }
 0x695   :  { %v3769_v19 = vpop.permute.xlu1 %3768 }
 0x696   :  { %v3773_v57 = vmul.f32 %v12058_v10, %v3769_v19  ;;  %5671 = vrot.lane.b32.xlu1 %v13812_v60, %s12221_s10 }
 0x698   :  { %v13816_v46 = vadd.f32 %v3773_v57, %v3765_v22 }
 0x69a   :  { %v3776_v31 = vpack.c.bf16 %v13816_v46, %v13812_v60 }
 0x69c   :  { %3778 = vrot.lane.b32.xlu0 %v3776_v31, %s12221_s10 }
 0x6a0   :  { %5673 = vrot.lane.b32.xlu0 %v13816_v46, %s12221_s10 }
 0x70e   :  { %v3779_v32 = vpop.permute.xlu0 %3778 }
 0x70f   :  { %10982 = vmatprep.subr.bf16.mxu0 %v3779_v32 }
 0x710   :  { %10983 = vmatpush3.bf16.msra.mxu0 %v3779_v32 }
 0x711   :  { %10988 = vmatprep.subr.bf16.mxu0 %v15930_v59 }
 0x713   :  { %10985 = vmatmul.mubr.msk.bf16.vlgmr.msra.gmra.mxu0 %vm520_vm4, %v12415_v37 }
 0x714   :  { %10989 = vmatpush3.bf16.xpose.msra.mxu0 %v12375_v12  ;;  %10996 = vmatprep.mubr.msk.bf16.mxu0 %vm12219_vm7, %v15930_v59 }
 0x715   :  { %10990 = vmatprep.subr.bf16.mxu0 %v15930_v59 }
 0x71c   :  { %10991 = vmatpush3.bf16.xpose.msra.mxu0 %v12383_v15 }
 0x71d   :  { %10992 = vmatprep.subr.bf16.mxu0 %v15930_v59 }
 0x724   :  { %10993 = vmatpush3.bf16.xpose.msra.mxu0 %v12390_v18 }
 0x725   :  { %10994 = vmatprep.subr.bf16.mxu0 %v15930_v59 }
 0x72c   :  { %10995 = vmatpush3.bf16.xpose.msra.mxu0 %v12445_v44 }
 0x72d   :  { %11012 = vmatprep.subr.bf16.mxu0 %v15930_v59 }
 0x7d3   :  { %v13836_v8 = vpop.f32.mrf.mxu0 }
 0x7d5   :  { %v3815_v10 = vpop.f32.mrf.mxu0 }
 0x7d6   :  { %v3841_v51 = vrot.slane %v3815_v10, %v12466_v52  ;;  %v3834_v55 = vcombine.high %v3815_v10, %v3815_v10 }
 0x7d8   :  { %v3849_v14 = vcombine.high %v3841_v51, %v3841_v51  ;;  %v3857_v38 = vrot.slane %v3841_v51, %v12466_v52  ;;  %v3848_v19 = vrot.slane %v3834_v55, %v12466_v52 }
 0x7da   :  { %v3871_v45 = vrot.slane %v3849_v14, %v12466_v52  ;;  %v4062_v1 = vpack.c.bf16 %v3857_v38, %v3857_v38  ;;  %v3879_v25 = vcombine.high %v3857_v38, %v3857_v38  ;;  %v3850_v22 = vcombine.high %v3848_v19, %v3848_v19 }
 0x7db   :  { %v3864_v57 = vrot.slane %v3848_v19, %v12466_v52 }
 0x7dc   :  { %v4063_v53 = vpack.c.bf16 %v3871_v45, %v3871_v45  ;;  %10997 = vmatmul.mubr.msk.bf16.vlgmr.msra.gmra.mxu0 %vm860_vm1, %v4062_v1  ;;  %v3881_v50 = vcombine.high %v3871_v45, %v3871_v45  ;;  %v4064_v41 = vpack.c.bf16 %v3879_v25, %v3879_v25  ;;  %v3878_v31 = vrot.slane %v3850_v22, %v12466_v52  ;;  %v16006_v1 = vld [vmem:[#allocation14_spill] sm:$0xff]  ;;  %v13924_v25 = vpop.f32.mrf.mxu0 }
 0x7dd   :  { %11013 = vmatpush3.bf16.xpose.msra.mxu0 %v12481_v61  ;;  %11020 = vmatprep.mubr.msk.bf16.mxu0 %vm12219_vm7, %v15930_v59  ;;  %v4066_v32 = vpack.c.bf16 %v3864_v57, %v3864_v57  ;;  %v3880_v51 = vcombine.high %v3864_v57, %v3864_v57  ;;  %v16010_v22 = vld [vmem:[#allocation18_spill] sm:$0xff] }
 0x7de   :  { %11009 = vmatmul.mubr.msk.bf16.vlgmr.msra.gmra.mxu1 %vm860_vm1, %v4063_v53  ;;  %11014 = vmatprep.subr.bf16.mxu0 %v15930_v59  ;;  %v4065_v36 = vpack.c.bf16 %v3881_v50, %v3881_v50  ;;  %v4067_v10 = vpack.c.bf16 %v3878_v31, %v3878_v31  ;;  %v3882_v14 = vcombine.high %v3878_v31, %v3878_v31  ;;  %v16007_v53 = vld [vmem:[#allocation15_spill] sm:$0xff]  ;;  %v3818_v50 = vpop.f32.mrf.mxu0 }
 0x7df   :  { %11025 = vmatpush3.bf16.xpose.msra.mxu1 %v12484_v63  ;;  %11032 = vmatprep.mubr.msk.bf16.mxu1 %vm12219_vm7, %v15930_v59  ;;  %v4068_v38 = vpack.c.bf16 %v3880_v51, %v3880_v51  ;;  %v3890_v55 = vrot.slane %v3818_v50, %v12466_v52  ;;  %v16011_v31 = vld [vmem:[#allocation19_spill] sm:$0xff] }
 0x7e0   :  { %11026 = vmatprep.subr.bf16.mxu1 %v15930_v59  ;;  %v4069_v45 = vpack.c.bf16 %v3882_v14, %v3882_v14  ;;  %v16012_v14 = vld [vmem:[#allocation20_spill] sm:$0xff] }
 0x7e1   :  { %v3898_v19 = vcombine.high %v3890_v55, %v3890_v55  ;;  %v3906_v57 = vrot.slane %v3890_v55, %v12466_v52  ;;  %v16015_v55 = vld [vmem:[#allocation23_spill] sm:$0xff] }
 0x7e3   :  { %v3928_v49 = vcombine.high %v3906_v57, %v3906_v57 }
 0x7e5   :  { %11015 = vmatpush3.bf16.xpose.msra.mxu0 %v12503_v2 }
 0x7e6   :  { %11016 = vmatprep.subr.bf16.mxu0 %v15930_v59 }
 0x7e7   :  { %11027 = vmatpush3.bf16.xpose.msra.mxu1 %v12506_v3 }
 0x7e8   :  { %11028 = vmatprep.subr.bf16.mxu1 %v15930_v59 }
 0x7ed   :  { %11017 = vmatpush3.bf16.xpose.msra.mxu0 %v12519_v6 }
 0x7ee   :  { %11018 = vmatprep.subr.bf16.mxu0 %v15930_v59 }
 0x7ef   :  { %11029 = vmatpush3.bf16.xpose.msra.mxu1 %v12522_v7 }
 0x7f0   :  { %11030 = vmatprep.subr.bf16.mxu1 %v15930_v59 }
 0x7f5   :  { %11019 = vmatpush3.bf16.xpose.msra.mxu0 %v12535_v11 }
 0x7f6   :  { %11036 = vmatprep.subr.bf16.mxu0 %v15930_v59 }
 0x7f7   :  { %11031 = vmatpush3.bf16.xpose.msra.mxu1 %v12538_v13 }
 0x7f8   :  { %11048 = vmatprep.subr.bf16.mxu1 %v15930_v59 }
 0x7fc   :  { %11021 = vmatmul.mubr.msk.bf16.vlgmr.msra.gmra.mxu0 %vm860_vm1, %v4064_v41  ;;  %v16008_v41 = vld [vmem:[#allocation16_spill] sm:$0xff] }
 0x7fd   :  { %11037 = vmatpush3.bf16.xpose.msra.mxu0 %v12551_v21  ;;  %11044 = vmatprep.mubr.msk.bf16.mxu0 %vm12219_vm7, %v15930_v59 }
 0x7fe   :  { %11033 = vmatmul.mubr.msk.bf16.vlgmr.msra.gmra.mxu1 %vm860_vm1, %v4065_v36  ;;  %11038 = vmatprep.subr.bf16.mxu0 %v15930_v59  ;;  %v16009_v36 = vld [vmem:[#allocation17_spill] sm:$0xff] }
 0x7ff   :  { %11049 = vmatpush3.bf16.xpose.msra.mxu1 %v12554_v24  ;;  %11056 = vmatprep.mubr.msk.bf16.mxu1 %vm12219_vm7, %v15930_v59 }
 0x800   :  { %11050 = vmatprep.subr.bf16.mxu1 %v15930_v59 }
 0x805   :  { %11039 = vmatpush3.bf16.xpose.msra.mxu0 %v12573_v27 }
 0x806   :  { %11040 = vmatprep.subr.bf16.mxu0 %v15930_v59 }
 0x807   :  { %11051 = vmatpush3.bf16.xpose.msra.mxu1 %v12576_v28 }
 0x808   :  { %11052 = vmatprep.subr.bf16.mxu1 %v15930_v59 }
 0x80d   :  { %11041 = vmatpush3.bf16.xpose.msra.mxu0 %v12589_v33 }
 0x80e   :  { %11042 = vmatprep.subr.bf16.mxu0 %v15930_v59 }
 0x80f   :  { %11053 = vmatpush3.bf16.xpose.msra.mxu1 %v12594_v35 }
 0x810   :  { %11054 = vmatprep.subr.bf16.mxu1 %v15930_v59 }
 0x815   :  { %11043 = vmatpush3.bf16.xpose.msra.mxu0 %v12608_v43 }
 0x816   :  { %11060 = vmatprep.subr.bf16.mxu0 %v15930_v59 }
 0x817   :  { %11055 = vmatpush3.bf16.xpose.msra.mxu1 %v12611_v47 }
 0x818   :  { %11072 = vmatprep.subr.bf16.mxu1 %v15930_v59 }
 0x81c   :  { %11045 = vmatmul.mubr.msk.bf16.vlgmr.msra.gmra.mxu0 %vm860_vm1, %v4066_v32  ;;  %v3920_v32 = vrot.slane %v3898_v19, %v12466_v52  ;;  %v16016_v19 = vld [vmem:[#allocation24_spill] sm:$0xff] }
 0x81d   :  { %11061 = vmatpush3.bf16.xpose.msra.mxu0 %v12626_v56  ;;  %11068 = vmatprep.mubr.msk.bf16.mxu0 %vm12219_vm7, %v15930_v59 }
 0x81e   :  { %11057 = vmatmul.mubr.msk.bf16.vlgmr.msra.gmra.mxu1 %vm860_vm1, %v4067_v10  ;;  %11062 = vmatprep.subr.bf16.mxu0 %v15930_v59  ;;  %v4070_v10 = vpack.c.bf16 %v3906_v57, %v3906_v57  ;;  %v4071_v51 = vpack.c.bf16 %v3920_v32, %v3920_v32  ;;  %v3930_v42 = vcombine.high %v3920_v32, %v3920_v32  ;;  %v16021_v57 = vld [vmem:[#allocation29_spill] sm:$0xff] }
 0x81f   :  { %11073 = vmatpush3.bf16.xpose.msra.mxu1 %v12629_v58  ;;  %11080 = vmatprep.mubr.msk.bf16.mxu1 %vm12219_vm7, %v15930_v59  ;;  %v3883_v32 = vcombine.high %v3818_v50, %v3818_v50 }
 0x820   :  { %11074 = vmatprep.subr.bf16.mxu1 %v15930_v59 }
 0x825   :  { %11063 = vmatpush3.bf16.xpose.msra.mxu0 %v12648_v62 }
 0x826   :  { %11064 = vmatprep.subr.bf16.mxu0 %v15930_v59 }
 0x827   :  { %11075 = vmatpush3.bf16.xpose.msra.mxu1 %v12651_v0 }
 0x828   :  { %11076 = vmatprep.subr.bf16.mxu1 %v15930_v59 }
 0x82d   :  { %11065 = vmatpush3.bf16.xpose.msra.mxu0 %v12664_v5 }
 0x82e   :  { %11066 = vmatprep.subr.bf16.mxu0 %v15930_v59 }
 0x82f   :  { %11077 = vmatpush3.bf16.xpose.msra.mxu1 %v12667_v9 }
 0x830   :  { %11078 = vmatprep.subr.bf16.mxu1 %v15930_v59 }
 0x835   :  { %11067 = vmatpush3.bf16.xpose.msra.mxu0 %v12680_v16 }
 0x836   :  { %11084 = vmatprep.subr.bf16.mxu0 %v15930_v59 }
 0x837   :  { %11079 = vmatpush3.bf16.xpose.msra.mxu1 %v12683_v17 }
 0x838   :  { %11096 = vmatprep.subr.bf16.mxu1 %v15930_v59 }
 0x83c   :  { %11069 = vmatmul.mubr.msk.bf16.vlgmr.msra.gmra.mxu0 %vm860_vm1, %v4068_v38  ;;  %v16013_v38 = vld [vmem:[#allocation21_spill] sm:$0xff] }
 0x83d   :  { %11085 = vmatpush3.bf16.xpose.msra.mxu0 %v12696_v29  ;;  %11092 = vmatprep.mubr.msk.bf16.mxu0 %vm12219_vm7, %v15930_v59 }
 0x83e   :  { %11081 = vmatmul.mubr.msk.bf16.vlgmr.msra.gmra.mxu1 %vm860_vm1, %v4069_v45  ;;  %11086 = vmatprep.subr.bf16.mxu0 %v15930_v59  ;;  %v16014_v45 = vld [vmem:[#allocation22_spill] sm:$0xff] }
 0x83f   :  { %11097 = vmatpush3.bf16.xpose.msra.mxu1 %v12699_v34  ;;  %11104 = vmatprep.mubr.msk.bf16.mxu1 %vm12219_vm7, %v15930_v59 }
 0x840   :  { %11098 = vmatprep.subr.bf16.mxu1 %v15930_v59 }
 0x845   :  { %11087 = vmatpush3.bf16.xpose.msra.mxu0 %v16006_v1 }
 0x846   :  { %11088 = vmatprep.subr.bf16.mxu0 %v15930_v59 }
 0x847   :  { %11099 = vmatpush3.bf16.xpose.msra.mxu1 %v16007_v53 }
 0x848   :  { %11100 = vmatprep.subr.bf16.mxu1 %v15930_v59 }
 0x84d   :  { %11089 = vmatpush3.bf16.xpose.msra.mxu0 %v16008_v41  ;;  %v16030_v41 = vld [vmem:[#allocation38_spill] sm:$0xff] }
 0x84e   :  { %11090 = vmatprep.subr.bf16.mxu0 %v15930_v59 }
 0x84f   :  { %11101 = vmatpush3.bf16.xpose.msra.mxu1 %v16009_v36 }
 0x850   :  { %11102 = vmatprep.subr.bf16.mxu1 %v15930_v59 }
 0x855   :  { %11091 = vmatpush3.bf16.xpose.msra.mxu0 %v16010_v22 }
 0x856   :  { %11108 = vmatprep.subr.bf16.mxu0 %v15930_v59 }
 0x857   :  { %11103 = vmatpush3.bf16.xpose.msra.mxu1 %v16011_v31 }
 0x858   :  { %11120 = vmatprep.subr.bf16.mxu1 %v15930_v59 }
 0x85c   :  { %11093 = vmatmul.mubr.msk.bf16.vlgmr.msra.gmra.mxu0 %vm860_vm1, %v4070_v10  ;;  %v16017_v10 = vld [vmem:[#allocation25_spill] sm:$0xff] }
 0x85d   :  { %11109 = vmatpush3.bf16.xpose.msra.mxu0 %v16012_v14  ;;  %11116 = vmatprep.mubr.msk.bf16.mxu0 %vm12219_vm7, %v15930_v59 }
 0x85e   :  { %11105 = vmatmul.mubr.msk.bf16.vlgmr.msra.gmra.mxu1 %vm860_vm1, %v4071_v51  ;;  %11110 = vmatprep.subr.bf16.mxu0 %v15930_v59  ;;  %v16018_v51 = vld [vmem:[#allocation26_spill] sm:$0xff] }
 0x85f   :  { %11121 = vmatpush3.bf16.xpose.msra.mxu1 %v16013_v38  ;;  %11128 = vmatprep.mubr.msk.bf16.mxu1 %vm12219_vm7, %v15930_v59 }
 0x860   :  { %11122 = vmatprep.subr.bf16.mxu1 %v15930_v59 }
 0x865   :  { %11111 = vmatpush3.bf16.xpose.msra.mxu0 %v16014_v45  ;;  %v4073_v45 = vpack.c.bf16 %v3930_v42, %v3930_v42  ;;  %v16023_v42 = vld [vmem:[#allocation31_spill] sm:$0xff] }
 0x866   :  { %11112 = vmatprep.subr.bf16.mxu0 %v15930_v59 }
 0x867   :  { %11123 = vmatpush3.bf16.xpose.msra.mxu1 %v16015_v55  ;;  %v4072_v55 = vpack.c.bf16 %v3928_v49, %v3928_v49  ;;  %v16022_v49 = vld [vmem:[#allocation30_spill] sm:$0xff] }
 0x868   :  { %11124 = vmatprep.subr.bf16.mxu1 %v15930_v59 }
 0x86d   :  { %11113 = vmatpush3.bf16.xpose.msra.mxu0 %v16016_v19  ;;  %v16020_v19 = vld [vmem:[#allocation28_spill] sm:$0xff] }
 0x86e   :  { %11114 = vmatprep.subr.bf16.mxu0 %v15930_v59 }
 0x86f   :  { %11125 = vmatpush3.bf16.xpose.msra.mxu1 %v16017_v10  ;;  %v16029_v10 = vld [vmem:[#allocation37_spill] sm:$0xff] }
 0x870   :  { %11126 = vmatprep.subr.bf16.mxu1 %v15930_v59 }
 0x875   :  { %11115 = vmatpush3.bf16.xpose.msra.mxu0 %v16018_v51 }
 0x876   :  { %11132 = vmatprep.subr.bf16.mxu0 %v15930_v59 }
 0x877   :  { %11127 = vmatpush3.bf16.xpose.msra.mxu1 %v16019_v4  ;;  %v16026_v4 = vld [vmem:[#allocation34_spill] sm:$0xff] }
 0x878   :  { %11144 = vmatprep.subr.bf16.mxu1 %v15930_v59 }
 0x87c   :  { %11117 = vmatmul.mubr.msk.bf16.vlgmr.msra.gmra.mxu0 %vm860_vm1, %v4072_v55  ;;  %v16024_v55 = vld [vmem:[#allocation32_spill] sm:$0xff] }
 0x87d   :  { %11133 = vmatpush3.bf16.xpose.msra.mxu0 %v16020_v19  ;;  %11140 = vmatprep.mubr.msk.bf16.mxu0 %vm12219_vm7, %v15930_v59 }
 0x87e   :  { %11129 = vmatmul.mubr.msk.bf16.vlgmr.msra.gmra.mxu1 %vm860_vm1, %v4073_v45  ;;  %11134 = vmatprep.subr.bf16.mxu0 %v15930_v59  ;;  %v16025_v45 = vld [vmem:[#allocation33_spill] sm:$0xff] }
 0x87f   :  { %11145 = vmatpush3.bf16.xpose.msra.mxu1 %v16021_v57  ;;  %11152 = vmatprep.mubr.msk.bf16.mxu1 %vm12219_vm7, %v15930_v59  ;;  %v3897_v57 = vrot.slane %v3883_v32, %v12466_v52 }
 0x880   :  { %11146 = vmatprep.subr.bf16.mxu1 %v15930_v59 }
 0x881   :  { %v3899_v19 = vcombine.high %v3897_v57, %v3897_v57 }
 0x883   :  { %v3927_v50 = vrot.slane %v3899_v19, %v12466_v52 }
 0x885   :  { %11135 = vmatpush3.bf16.xpose.msra.mxu0 %v16022_v49  ;;  %v3913_v49 = vrot.slane %v3897_v57, %v12466_v52  ;;  %v4075_v51 = vpack.c.bf16 %v3927_v50, %v3927_v50 }
 0x886   :  { %11136 = vmatprep.subr.bf16.mxu0 %v15930_v59 }
 0x887   :  { %11147 = vmatpush3.bf16.xpose.msra.mxu1 %v16023_v42  ;;  %v16027_v42 = vld [vmem:[#allocation35_spill] sm:$0xff] }
 0x888   :  { %11148 = vmatprep.subr.bf16.mxu1 %v15930_v59 }
 0x88d   :  { %11137 = vmatpush3.bf16.xpose.msra.mxu0 %v16024_v55  ;;  %v4074_v55 = vpack.c.bf16 %v3913_v49, %v3913_v49 }
 0x88e   :  { %11138 = vmatprep.subr.bf16.mxu0 %v15930_v59 }
 0x88f   :  { %11149 = vmatpush3.bf16.xpose.msra.mxu1 %v16025_v45  ;;  %v16028_v45 = vld [vmem:[#allocation36_spill] sm:$0xff] }
 0x890   :  { %11150 = vmatprep.subr.bf16.mxu1 %v15930_v59 }
 0x895   :  { %11139 = vmatpush3.bf16.xpose.msra.mxu0 %v16026_v4 }
 0x896   :  { %11156 = vmatprep.subr.bf16.mxu0 %v15930_v59 }
 0x897   :  { %11151 = vmatpush3.bf16.xpose.msra.mxu1 %v16027_v42 }
 0x898   :  { %11168 = vmatprep.subr.bf16.mxu1 %v15930_v59 }
 0x89c   :  { %11141 = vmatmul.mubr.msk.bf16.vlgmr.msra.gmra.mxu0 %vm860_vm1, %v4074_v55  ;;  %v4131_v32 = vpop.f32.mrf.mxu0 }
 0x89d   :  { %11157 = vmatpush3.bf16.xpose.msra.mxu0 %v16028_v45  ;;  %11164 = vmatprep.mubr.msk.bf16.mxu0 %vm12219_vm7, %v15930_v59  ;;  %v5470_v42 = vpack.c.bf16 %v4131_v32, %v4131_v32  ;;  %v16032_v32 = vld [vmem:[#allocation40_spill] sm:$0xff] }
 0x89e   :  { %11153 = vmatmul.mubr.msk.bf16.vlgmr.msra.gmra.mxu1 %vm860_vm1, %v4075_v51  ;;  %v10998_v57 = vpop.f32.mrf.mxu0  ;;  %v4174_v4 = vpop.f32.mrf.mxu1  ;;  %11158 = vmatprep.subr.bf16.mxu0 %v15930_v59 }
 0x89f   :  { %v5471_v19 = vpack.c.bf16 %v4174_v4, %v4174_v4  ;;  %11169 = vmatpush3.bf16.xpose.msra.mxu1 %v16029_v10  ;;  %11176 = vmatprep.mubr.msk.bf16.mxu1 %vm12219_vm7, %v15930_v59  ;;  %v5534_v22 = vunpack.c.l.b16 %v5470_v42  ;;  %v16031_v4 = vld [vmem:[#allocation39_spill] sm:$0xff]  ;;  %v3931_v42 = vcombine.high %v3927_v50, %v3927_v50 }
 0x8a0   :  { %v4134_v55 = vpop.f32.mrf.mxu0  ;;  %v11010_v38 = vpop.f32.mrf.mxu1  ;;  %11170 = vmatprep.subr.bf16.mxu1 %v15930_v59 }
 0x8a1   :  { %v5535_v45 = vunpack.c.l.b16 %v5471_v19  ;;  %v16033_v38 = vld [vmem:[#allocation41_spill] sm:$0xff]  ;;  %v4077_v55 = vpack.c.bf16 %v3931_v42, %v3931_v42 }
 0x8a2   :  { %v10999_v14 = vpop.f32.mrf.mxu0  ;;  %v4177_v31 = vpop.f32.mrf.mxu1 }
 0x8a3   :  { %v5566_v51 = vrot.slane %v5535_v45, 7  ;;  %v16034_v31 = vld [vmem:[#allocation42_spill] sm:$0xff]  ;;  %v3929_v14 = vcombine.high %v3913_v49, %v3913_v49 }
 0x8a4   :  { %v11011_v57 = vpop.f32.mrf.mxu1 }
 0x8a5   :  { %v5567_v36 = vsel %vm3338_vm8, %v5566_v51, %v5534_v22  ;;  %11159 = vmatpush3.bf16.xpose.msra.mxu0 %v16030_v41  ;;  %v16035_v22 = vld [vmem:[#allocation43_spill] sm:$0xff]  ;;  %v4076_v45 = vpack.c.bf16 %v3929_v14, %v3929_v14  ;;  %v16036_v57 = vld [vmem:[#allocation44_spill] sm:$0xff] }
 0x8a6   :  { %11160 = vmatprep.subr.bf16.mxu0 %v15930_v59 }
 0x8a7   :  { %11171 = vmatpush3.bf16.xpose.msra.mxu1 %v16031_v4 }
 0x8a8   :  { %11172 = vmatprep.subr.bf16.mxu1 %v15930_v59 }
 0x8ad   :  { %11161 = vmatpush3.bf16.xpose.msra.mxu0 %v16032_v32 }
 0x8ae   :  { %11162 = vmatprep.subr.bf16.mxu0 %v15930_v59 }
 0x8af   :  { %11173 = vmatpush3.bf16.xpose.msra.mxu1 %v16033_v38  ;;  %v16037_v38 = vld [vmem:[#allocation45_spill] sm:$0xff] }
 0x8b0   :  { %11174 = vmatprep.subr.bf16.mxu1 %v15930_v59 }
 0x8b5   :  { %11163 = vmatpush3.bf16.xpose.msra.mxu0 %v16034_v31 }
 0x8b6   :  { %11180 = vmatprep.subr.bf16.mxu0 %v15930_v59 }
 0x8b7   :  { %11175 = vmatpush3.bf16.xpose.msra.mxu1 %v16035_v22 }
 0x8b8   :  { %11192 = vmatprep.subr.bf16.mxu1 %v15930_v59 }
 0x8bc   :  { %v4217_v19 = vpop.f32.mrf.mxu0  ;;  %11165 = vmatmul.mubr.msk.bf16.vlgmr.msra.gmra.mxu0 %vm860_vm1, %v4076_v45 }
 0x8bd   :  { %v5472_v51 = vpack.c.bf16 %v4217_v19, %v4217_v19  ;;  %11181 = vmatpush3.bf16.xpose.msra.mxu0 %v16036_v57  ;;  %11188 = vmatprep.mubr.msk.bf16.mxu0 %vm12219_vm7, %v15930_v59 }
 0x8be   :  { %v11022_v31 = vpop.f32.mrf.mxu0  ;;  %v4260_v49 = vpop.f32.mrf.mxu1  ;;  %11177 = vmatmul.mubr.msk.bf16.vlgmr.msra.gmra.mxu1 %vm860_vm1, %v4077_v55  ;;  %11182 = vmatprep.subr.bf16.mxu0 %v15930_v59 }
 0x8bf   :  { %v5536_v50 = vunpack.c.l.b16 %v5472_v51  ;;  %v5473_v22 = vpack.c.bf16 %v4260_v49, %v4260_v49  ;;  %11193 = vmatpush3.bf16.xpose.msra.mxu1 %v16037_v38  ;;  %11200 = vmatprep.mubr.msk.bf16.mxu1 %vm12219_vm7, %v15930_v59  ;;  %v16038_v49 = vld [vmem:[#allocation46_spill] sm:$0xff]  ;;  %v16039_v38 = vld [vmem:[#allocation47_spill] sm:$0xff] }
 0x8c0   :  { %v4220_v14 = vpop.f32.mrf.mxu0  ;;  %v11034_v42 = vpop.f32.mrf.mxu1  ;;  %11194 = vmatprep.subr.bf16.mxu1 %v15930_v59 }
 0x8c1   :  { %v5568_v45 = vrot.slane %v5536_v50, 6  ;;  %v5537_v19 = vunpack.c.l.b16 %v5473_v22  ;;  %v16040_v14 = vld [vmem:[#allocation48_spill] sm:$0xff]  ;;  %v16041_v22 = vld [vmem:[#allocation49_spill] sm:$0xff]  ;;  %v16043_v50 = vld [vmem:[#allocation51_spill] sm:$0xff] }
 0x8c2   :  { %v11023_v57 = vpop.f32.mrf.mxu0  ;;  %v4263_v31 = vpop.f32.mrf.mxu1 }
 0x8c3   :  { %v5569_v32 = vsel %vm3341_vm9, %v5568_v45, %v5567_v36  ;;  %v5570_v55 = vrot.slane %v5537_v19, 5  ;;  %v3939_v36 = vrot.slane %v13836_v8, %v12466_v52 }
 0x8c4   :  { %v11035_v4 = vpop.f32.mrf.mxu1 }
 0x8c5   :  { %v5571_v51 = vsel %vm3344_vm10, %v5570_v55, %v5569_v32  ;;  %11183 = vmatpush3.bf16.xpose.msra.mxu0 %v16038_v49  ;;  %v3947_v4 = vcombine.high %v3939_v36, %v3939_v36  ;;  %v16042_v32 = vld [vmem:[#allocation50_spill] sm:$0xff]  ;;  %v3955_v57 = vrot.slane %v3939_v36, %v12466_v52 }
 0x8c6   :  { %11184 = vmatprep.subr.bf16.mxu0 %v15930_v59 }
 0x8c7   :  { %11195 = vmatpush3.bf16.xpose.msra.mxu1 %v16039_v38  ;;  %v3969_v42 = vrot.slane %v3947_v4, %v12466_v52  ;;  %v4078_v45 = vpack.c.bf16 %v3955_v57, %v3955_v57 }
 0x8c8   :  { %11196 = vmatprep.subr.bf16.mxu1 %v15930_v59 }
 0x8c9   :  { %v4079_v19 = vpack.c.bf16 %v3969_v42, %v3969_v42 }
 0x8cd   :  { %11185 = vmatpush3.bf16.xpose.msra.mxu0 %v16040_v14  ;;  %v16045_v14 = vld [vmem:[#allocation53_spill] sm:$0xff] }
 0x8ce   :  { %11186 = vmatprep.subr.bf16.mxu0 %v15930_v59 }
 0x8cf   :  { %11197 = vmatpush3.bf16.xpose.msra.mxu1 %v16041_v22  ;;  %v16044_v22 = vld [vmem:[#allocation52_spill] sm:$0xff] }
 0x8d0   :  { %11198 = vmatprep.subr.bf16.mxu1 %v15930_v59 }
 0x8d5   :  { %11187 = vmatpush3.bf16.xpose.msra.mxu0 %v16042_v32 }
 0x8d6   :  { %11204 = vmatprep.subr.bf16.mxu0 %v15930_v59 }
 0x8d7   :  { %11199 = vmatpush3.bf16.xpose.msra.mxu1 %v16043_v50 }
 0x8d8   :  { %11216 = vmatprep.subr.bf16.mxu1 %v15930_v59 }
 0x8dc   :  { %v4303_v31 = vpop.f32.mrf.mxu0  ;;  %11189 = vmatmul.mubr.msk.bf16.vlgmr.msra.gmra.mxu0 %vm860_vm1, %v4078_v45 }
 0x8dd   :  { %v5474_v55 = vpack.c.bf16 %v4303_v31, %v4303_v31  ;;  %11205 = vmatpush3.bf16.xpose.msra.mxu0 %v16044_v22  ;;  %11212 = vmatprep.mubr.msk.bf16.mxu0 %vm12219_vm7, %v15930_v59 }
 0x8de   :  { %v11046_v36 = vpop.f32.mrf.mxu0  ;;  %v4346_v32 = vpop.f32.mrf.mxu1  ;;  %11201 = vmatmul.mubr.msk.bf16.vlgmr.msra.gmra.mxu1 %vm860_vm1, %v4079_v19  ;;  %11206 = vmatprep.subr.bf16.mxu0 %v15930_v59 }
 0x8df   :  { %v5538_v4 = vunpack.c.l.b16 %v5474_v55  ;;  %v5475_v50 = vpack.c.bf16 %v4346_v32, %v4346_v32  ;;  %11217 = vmatpush3.bf16.xpose.msra.mxu1 %v16045_v14  ;;  %11224 = vmatprep.mubr.msk.bf16.mxu1 %vm12219_vm7, %v15930_v59  ;;  %v16046_v32 = vld [vmem:[#allocation54_spill] sm:$0xff]  ;;  %v16047_v14 = vld [vmem:[#allocation55_spill] sm:$0xff] }
 0x8e0   :  { %v4306_v45 = vpop.f32.mrf.mxu0  ;;  %v11058_v31 = vpop.f32.mrf.mxu1  ;;  %11218 = vmatprep.subr.bf16.mxu1 %v15930_v59 }
 0x8e1   :  { %v5572_v22 = vrot.slane %v5538_v4, 4  ;;  %v5539_v38 = vunpack.c.l.b16 %v5475_v50  ;;  %v16048_v45 = vld [vmem:[#allocation56_spill] sm:$0xff] }
 0x8e2   :  { %v11047_v49 = vpop.f32.mrf.mxu0  ;;  %v4349_v36 = vpop.f32.mrf.mxu1 }
 0x8e3   :  { %v5573_v41 = vsel %vm3347_vm11, %v5572_v22, %v5571_v51  ;;  %v5574_v19 = vrot.slane %v5539_v38, 3  ;;  %v16049_v49 = vld [vmem:[#allocation57_spill] sm:$0xff]  ;;  %v16050_v38 = vld [vmem:[#allocation58_spill] sm:$0xff]  ;;  %v3979_v51 = vcombine.high %v3969_v42, %v3969_v42  ;;  %v16052_v36 = vld [vmem:[#allocation60_spill] sm:$0xff] }
 0x8e4   :  { %v11059_v10 = vpop.f32.mrf.mxu1 }
 0x8e5   :  { %v5575_v55 = vsel %vm3350_vm12, %v5574_v19, %v5573_v41  ;;  %11207 = vmatpush3.bf16.xpose.msra.mxu0 %v16046_v32  ;;  %v3977_v10 = vcombine.high %v3955_v57, %v3955_v57  ;;  %v16051_v41 = vld [vmem:[#allocation59_spill] sm:$0xff]  ;;  %v4081_v50 = vpack.c.bf16 %v3979_v51, %v3979_v51  ;;  %v16062_v32 = vld [vmem:[#allocation70_spill] sm:$0xff] }
 0x8e6   :  { %11208 = vmatprep.subr.bf16.mxu0 %v15930_v59 }
 0x8e7   :  { %11219 = vmatpush3.bf16.xpose.msra.mxu1 %v16047_v14  ;;  %v4080_v22 = vpack.c.bf16 %v3977_v10, %v3977_v10 }
 0x8e8   :  { %11220 = vmatprep.subr.bf16.mxu1 %v15930_v59 }
 0x8ed   :  { %11209 = vmatpush3.bf16.xpose.msra.mxu0 %v16048_v45 }
 0x8ee   :  { %11210 = vmatprep.subr.bf16.mxu0 %v15930_v59 }
 0x8ef   :  { %11221 = vmatpush3.bf16.xpose.msra.mxu1 %v16049_v49 }
 0x8f0   :  { %11222 = vmatprep.subr.bf16.mxu1 %v15930_v59 }
 0x8f5   :  { %11211 = vmatpush3.bf16.xpose.msra.mxu0 %v16050_v38  ;;  %v16053_v38 = vld [vmem:[#allocation61_spill] sm:$0xff] }
 0x8f6   :  { %11228 = vmatprep.subr.bf16.mxu0 %v15930_v59 }
 0x8f7   :  { %11223 = vmatpush3.bf16.xpose.msra.mxu1 %v16051_v41 }
 0x8f8   :  { %11240 = vmatprep.subr.bf16.mxu1 %v15930_v59 }
 0x8fc   :  { %v4389_v4 = vpop.f32.mrf.mxu0  ;;  %11213 = vmatmul.mubr.msk.bf16.vlgmr.msra.gmra.mxu0 %vm860_vm1, %v4080_v22 }
 0x8fd   :  { %v5476_v31 = vpack.c.bf16 %v4389_v4, %v4389_v4  ;;  %11229 = vmatpush3.bf16.xpose.msra.mxu0 %v16052_v36  ;;  %11236 = vmatprep.mubr.msk.bf16.mxu0 %vm12219_vm7, %v15930_v59 }
 0x8fe   :  { %v11070_v19 = vpop.f32.mrf.mxu0  ;;  %v4432_v57 = vpop.f32.mrf.mxu1  ;;  %11225 = vmatmul.mubr.msk.bf16.vlgmr.msra.gmra.mxu1 %vm860_vm1, %v4081_v50  ;;  %11230 = vmatprep.subr.bf16.mxu0 %v15930_v59 }
 0x8ff   :  { %v5540_v42 = vunpack.c.l.b16 %v5476_v31  ;;  %v5477_v41 = vpack.c.bf16 %v4432_v57, %v4432_v57  ;;  %11241 = vmatpush3.bf16.xpose.msra.mxu1 %v16053_v38  ;;  %11248 = vmatprep.mubr.msk.bf16.mxu1 %vm12219_vm7, %v15930_v59  ;;  %v16054_v57 = vld [vmem:[#allocation62_spill] sm:$0xff]  ;;  %v16055_v38 = vld [vmem:[#allocation63_spill] sm:$0xff] }
 0x900   :  { %v4392_v10 = vpop.f32.mrf.mxu0  ;;  %v11082_v51 = vpop.f32.mrf.mxu1  ;;  %11242 = vmatprep.subr.bf16.mxu1 %v15930_v59 }
 0x901   :  { %v5576_v22 = vrot.slane %v5540_v42, 2  ;;  %v5541_v4 = vunpack.c.l.b16 %v5477_v41  ;;  %v3932_v41 = vcombine.high %v13836_v8, %v13836_v8  ;;  %v16058_v42 = vld [vmem:[#allocation66_spill] sm:$0xff]  ;;  %v16059_v51 = vld [vmem:[#allocation67_spill] sm:$0xff] }
 0x902   :  { %v11071_v36 = vpop.f32.mrf.mxu0  ;;  %v4435_v19 = vpop.f32.mrf.mxu1 }
 0x903   :  { %v5577_v49 = vsel %vm3353_vm13, %v5576_v22, %v5575_v55  ;;  %v5578_v50 = vrot.slane %v5541_v4, 1  ;;  %v16056_v36 = vld [vmem:[#allocation64_spill] sm:$0xff]  ;;  %v16057_v55 = vld [vmem:[#allocation65_spill] sm:$0xff] }
 0x904   :  { %v11083_v45 = vpop.f32.mrf.mxu1 }
 0x905   :  { %v14071_v31 = vsel %vm3356_vm14, %v5578_v50, %v5577_v49  ;;  %11231 = vmatpush3.bf16.xpose.msra.mxu0 %v16054_v57  ;;  %v3946_v45 = vrot.slane %v3932_v41, %v12466_v52  ;;  %v16060_v50 = vld [vmem:[#allocation68_spill] sm:$0xff] }
 0x906   :  { %11232 = vmatprep.subr.bf16.mxu0 %v15930_v59 }
 0x907   :  { %11243 = vmatpush3.bf16.xpose.msra.mxu1 %v16055_v38  ;;  %v3948_v49 = vcombine.high %v3946_v45, %v3946_v45  ;;  %v3962_v10 = vrot.slane %v3946_v45, %v12466_v52 }
 0x908   :  { %11244 = vmatprep.subr.bf16.mxu1 %v15930_v59 }
 0x909   :  { %v3976_v8 = vrot.slane %v3948_v49, %v12466_v52  ;;  %v4082_v22 = vpack.c.bf16 %v3962_v10, %v3962_v10 }
 0x90b   :  { %v4083_v4 = vpack.c.bf16 %v3976_v8, %v3976_v8 }
 0x90d   :  { %11233 = vmatpush3.bf16.xpose.msra.mxu0 %v16056_v36 }
 0x90e   :  { %11234 = vmatprep.subr.bf16.mxu0 %v15930_v59 }
 0x90f   :  { %11245 = vmatpush3.bf16.xpose.msra.mxu1 %v16057_v55 }
 0x910   :  { %11246 = vmatprep.subr.bf16.mxu1 %v15930_v59 }
 0x915   :  { %11235 = vmatpush3.bf16.xpose.msra.mxu0 %v16058_v42  ;;  %v16061_v42 = vld [vmem:[#allocation69_spill] sm:$0xff] }
 0x916   :  { %11252 = vmatprep.subr.bf16.mxu0 %v15930_v59 }
 0x917   :  { %11247 = vmatpush3.bf16.xpose.msra.mxu1 %v16059_v51 }
 0x918   :  { %11264 = vmatprep.subr.bf16.mxu1 %v15930_v59 }
 0x91c   :  { %v4475_v19 = vpop.f32.mrf.mxu0  ;;  %11237 = vmatmul.mubr.msk.bf16.vlgmr.msra.gmra.mxu0 %vm860_vm1, %v4082_v22 }
 0x91d   :  { %11253 = vmatpush3.bf16.xpose.msra.mxu0 %v16060_v50  ;;  %11260 = vmatprep.mubr.msk.bf16.mxu0 %vm12219_vm7, %v15930_v59  ;;  %v5478_v51 = vpack.c.bf16 %v4475_v19, %v4475_v19  ;;  %v16063_v19 = vld [vmem:[#allocation71_spill] sm:$0xff] }
 0x91e   :  { %v11094_v41 = vpop.f32.mrf.mxu0  ;;  %v4518_v45 = vpop.f32.mrf.mxu1  ;;  %11249 = vmatmul.mubr.msk.bf16.vlgmr.msra.gmra.mxu1 %vm860_vm1, %v4083_v4  ;;  %11254 = vmatprep.subr.bf16.mxu0 %v15930_v59 }
 0x91f   :  { %v5479_v49 = vpack.c.bf16 %v4518_v45, %v4518_v45  ;;  %11265 = vmatpush3.bf16.xpose.msra.mxu1 %v16061_v42  ;;  %11272 = vmatprep.mubr.msk.bf16.mxu1 %vm12219_vm7, %v15930_v59  ;;  %v5542_v41 = vunpack.c.l.b16 %v5478_v51  ;;  %v16065_v45 = vld [vmem:[#allocation73_spill] sm:$0xff] }
 0x920   :  { %v4478_v55 = vpop.f32.mrf.mxu0  ;;  %v11106_v22 = vpop.f32.mrf.mxu1  ;;  %11266 = vmatprep.subr.bf16.mxu1 %v15930_v59 }
 0x921   :  { %v5543_v50 = vunpack.c.l.b16 %v5479_v49  ;;  %v16064_v55 = vld [vmem:[#allocation72_spill] sm:$0xff] }
 0x922   :  { %v11095_v36 = vpop.f32.mrf.mxu0  ;;  %v4521_v38 = vpop.f32.mrf.mxu1 }
 0x923   :  { %v5580_v57 = vrot.slane %v5543_v50, 7  ;;  %v16066_v38 = vld [vmem:[#allocation74_spill] sm:$0xff]  ;;  %v3980_v36 = vcombine.high %v3976_v8, %v3976_v8 }
 0x924   :  { %v11107_v14 = vpop.f32.mrf.mxu1 }
 0x925   :  { %v5581_v4 = vsel %vm3338_vm8, %v5580_v57, %v5542_v41  ;;  %11255 = vmatpush3.bf16.xpose.msra.mxu0 %v16062_v32  ;;  %v3978_v14 = vcombine.high %v3962_v10, %v3962_v10  ;;  %v16067_v57 = vld [vmem:[#allocation75_spill] sm:$0xff]  ;;  %v4085_v50 = vpack.c.bf16 %v3980_v36, %v3980_v36  ;;  %v16068_v41 = vld [vmem:[#allocation76_spill] sm:$0xff] }
 0x926   :  { %11256 = vmatprep.subr.bf16.mxu0 %v15930_v59 }
 0x927   :  { %11267 = vmatpush3.bf16.xpose.msra.mxu1 %v16063_v19  ;;  %v4084_v51 = vpack.c.bf16 %v3978_v14, %v3978_v14 }
 0x928   :  { %11268 = vmatprep.subr.bf16.mxu1 %v15930_v59 }
 0x92d   :  { %11257 = vmatpush3.bf16.xpose.msra.mxu0 %v16064_v55 }
 0x92e   :  { %11258 = vmatprep.subr.bf16.mxu0 %v15930_v59 }
 0x92f   :  { %11269 = vmatpush3.bf16.xpose.msra.mxu1 %v16065_v45  ;;  %v16069_v45 = vld [vmem:[#allocation77_spill] sm:$0xff] }
 0x930   :  { %11270 = vmatprep.subr.bf16.mxu1 %v15930_v59 }
 0x935   :  { %11259 = vmatpush3.bf16.xpose.msra.mxu0 %v16066_v38 }
 0x936   :  { %11276 = vmatprep.subr.bf16.mxu0 %v15930_v59 }
 0x937   :  { %11271 = vmatpush3.bf16.xpose.msra.mxu1 %v16067_v57 }
 0x938   :  { %11288 = vmatprep.subr.bf16.mxu1 %v15930_v59 }
 0x93c   :  { %v4561_v49 = vpop.f32.mrf.mxu0  ;;  %11261 = vmatmul.mubr.msk.bf16.vlgmr.msra.gmra.mxu0 %vm860_vm1, %v4084_v51 }
 0x93d   :  { %v5480_v22 = vpack.c.bf16 %v4561_v49, %v4561_v49  ;;  %11277 = vmatpush3.bf16.xpose.msra.mxu0 %v16068_v41  ;;  %11284 = vmatprep.mubr.msk.bf16.mxu0 %vm12219_vm7, %v15930_v59 }
 0x93e   :  { %v11118_v38 = vpop.f32.mrf.mxu0  ;;  %v4604_v10 = vpop.f32.mrf.mxu1  ;;  %11273 = vmatmul.mubr.msk.bf16.vlgmr.msra.gmra.mxu1 %vm860_vm1, %v4085_v50  ;;  %11278 = vmatprep.subr.bf16.mxu0 %v15930_v59 }
 0x93f   :  { %v5544_v8 = vunpack.c.l.b16 %v5480_v22  ;;  %v5481_v57 = vpack.c.bf16 %v4604_v10, %v4604_v10  ;;  %11289 = vmatpush3.bf16.xpose.msra.mxu1 %v16069_v45  ;;  %11296 = vmatprep.mubr.msk.bf16.mxu1 %vm12219_vm7, %v15930_v59  ;;  %v16070_v10 = vld [vmem:[#allocation78_spill] sm:$0xff]  ;;  %v16071_v45 = vld [vmem:[#allocation79_spill] sm:$0xff] }
 0x940   :  { %v4564_v14 = vpop.f32.mrf.mxu0  ;;  %v11130_v36 = vpop.f32.mrf.mxu1  ;;  %11290 = vmatprep.subr.bf16.mxu1 %v15930_v59 }
 0x941   :  { %v5582_v51 = vrot.slane %v5544_v8, 6  ;;  %v5545_v49 = vunpack.c.l.b16 %v5481_v57  ;;  %v16072_v14 = vld [vmem:[#allocation80_spill] sm:$0xff]  ;;  %v16073_v57 = vld [vmem:[#allocation81_spill] sm:$0xff]  ;;  %v16075_v8 = vld [vmem:[#allocation83_spill] sm:$0xff] }
 0x942   :  { %v11119_v41 = vpop.f32.mrf.mxu0  ;;  %v4607_v38 = vpop.f32.mrf.mxu1 }
 0x943   :  { %v5583_v55 = vsel %vm3341_vm9, %v5582_v51, %v5581_v4  ;;  %v5584_v50 = vrot.slane %v5545_v49, 5  ;;  %v3988_v4 = vrot.slane %v13924_v25, %v12466_v52 }
 0x944   :  { %v11131_v19 = vpop.f32.mrf.mxu1 }
 0x945   :  { %v5585_v22 = vsel %vm3344_vm10, %v5584_v50, %v5583_v55  ;;  %11279 = vmatpush3.bf16.xpose.msra.mxu0 %v16070_v10  ;;  %v3996_v19 = vcombine.high %v3988_v4, %v3988_v4  ;;  %v16074_v55 = vld [vmem:[#allocation82_spill] sm:$0xff]  ;;  %v4004_v41 = vrot.slane %v3988_v4, %v12466_v52 }
 0x946   :  { %11280 = vmatprep.subr.bf16.mxu0 %v15930_v59 }
 0x947   :  { %11291 = vmatpush3.bf16.xpose.msra.mxu1 %v16071_v45  ;;  %v4018_v36 = vrot.slane %v3996_v19, %v12466_v52  ;;  %v4086_v51 = vpack.c.bf16 %v4004_v41, %v4004_v41 }
 0x948   :  { %11292 = vmatprep.subr.bf16.mxu1 %v15930_v59 }
 0x949   :  { %v4087_v49 = vpack.c.bf16 %v4018_v36, %v4018_v36 }
 0x94d   :  { %11281 = vmatpush3.bf16.xpose.msra.mxu0 %v16072_v14  ;;  %v16077_v14 = vld [vmem:[#allocation85_spill] sm:$0xff] }
 0x94e   :  { %11282 = vmatprep.subr.bf16.mxu0 %v15930_v59 }
 0x94f   :  { %11293 = vmatpush3.bf16.xpose.msra.mxu1 %v16073_v57  ;;  %v16076_v57 = vld [vmem:[#allocation84_spill] sm:$0xff] }
 0x950   :  { %11294 = vmatprep.subr.bf16.mxu1 %v15930_v59 }
 0x955   :  { %11283 = vmatpush3.bf16.xpose.msra.mxu0 %v16074_v55 }
 0x956   :  { %11300 = vmatprep.subr.bf16.mxu0 %v15930_v59 }
 0x957   :  { %11295 = vmatpush3.bf16.xpose.msra.mxu1 %v16075_v8 }
 0x958   :  { %11312 = vmatprep.subr.bf16.mxu1 %v15930_v59 }
 0x95c   :  { %v4647_v38 = vpop.f32.mrf.mxu0  ;;  %11285 = vmatmul.mubr.msk.bf16.vlgmr.msra.gmra.mxu0 %vm860_vm1, %v4086_v51 }
 0x95d   :  { %v5482_v50 = vpack.c.bf16 %v4647_v38, %v4647_v38  ;;  %11301 = vmatpush3.bf16.xpose.msra.mxu0 %v16076_v57  ;;  %11308 = vmatprep.mubr.msk.bf16.mxu0 %vm12219_vm7, %v15930_v59 }
 0x95e   :  { %v11142_v4 = vpop.f32.mrf.mxu0  ;;  %v4690_v55 = vpop.f32.mrf.mxu1  ;;  %11297 = vmatmul.mubr.msk.bf16.vlgmr.msra.gmra.mxu1 %vm860_vm1, %v4087_v49  ;;  %11302 = vmatprep.subr.bf16.mxu0 %v15930_v59 }
 0x95f   :  { %v5546_v19 = vunpack.c.l.b16 %v5482_v50  ;;  %v5483_v8 = vpack.c.bf16 %v4690_v55, %v4690_v55  ;;  %11313 = vmatpush3.bf16.xpose.msra.mxu1 %v16077_v14  ;;  %11320 = vmatprep.mubr.msk.bf16.mxu1 %vm12219_vm7, %v15930_v59  ;;  %v16078_v55 = vld [vmem:[#allocation86_spill] sm:$0xff]  ;;  %v16079_v14 = vld [vmem:[#allocation87_spill] sm:$0xff] }
 0x960   :  { %v4650_v51 = vpop.f32.mrf.mxu0  ;;  %v11154_v38 = vpop.f32.mrf.mxu1  ;;  %11314 = vmatprep.subr.bf16.mxu1 %v15930_v59 }
 0x961   :  { %v5586_v57 = vrot.slane %v5546_v19, 4  ;;  %v5547_v45 = vunpack.c.l.b16 %v5483_v8  ;;  %v16080_v51 = vld [vmem:[#allocation88_spill] sm:$0xff] }
 0x962   :  { %v11143_v10 = vpop.f32.mrf.mxu0  ;;  %v4693_v4 = vpop.f32.mrf.mxu1 }
 0x963   :  { %v5587_v32 = vsel %vm3347_vm11, %v5586_v57, %v5585_v22  ;;  %v5588_v49 = vrot.slane %v5547_v45, 3  ;;  %v16081_v10 = vld [vmem:[#allocation89_spill] sm:$0xff]  ;;  %v16082_v45 = vld [vmem:[#allocation90_spill] sm:$0xff]  ;;  %v4028_v22 = vcombine.high %v4018_v36, %v4018_v36  ;;  %v16084_v4 = vld [vmem:[#allocation92_spill] sm:$0xff] }
 0x964   :  { %v11155_v42 = vpop.f32.mrf.mxu1 }
 0x965   :  { %v5589_v50 = vsel %vm3350_vm12, %v5588_v49, %v5587_v32  ;;  %11303 = vmatpush3.bf16.xpose.msra.mxu0 %v16078_v55  ;;  %v4026_v42 = vcombine.high %v4004_v41, %v4004_v41  ;;  %v16083_v32 = vld [vmem:[#allocation91_spill] sm:$0xff]  ;;  %v4089_v8 = vpack.c.bf16 %v4028_v22, %v4028_v22  ;;  %v16094_v55 = vld [vmem:[#allocation102_spill] sm:$0xff] }
 0x966   :  { %11304 = vmatprep.subr.bf16.mxu0 %v15930_v59 }
 0x967   :  { %11315 = vmatpush3.bf16.xpose.msra.mxu1 %v16079_v14  ;;  %v4088_v57 = vpack.c.bf16 %v4026_v42, %v4026_v42 }
 0x968   :  { %11316 = vmatprep.subr.bf16.mxu1 %v15930_v59 }
 0x96d   :  { %11305 = vmatpush3.bf16.xpose.msra.mxu0 %v16080_v51 }
 0x96e   :  { %11306 = vmatprep.subr.bf16.mxu0 %v15930_v59 }
 0x96f   :  { %11317 = vmatpush3.bf16.xpose.msra.mxu1 %v16081_v10 }
 0x970   :  { %11318 = vmatprep.subr.bf16.mxu1 %v15930_v59 }
 0x975   :  { %11307 = vmatpush3.bf16.xpose.msra.mxu0 %v16082_v45  ;;  %v16085_v45 = vld [vmem:[#allocation93_spill] sm:$0xff] }
 0x976   :  { %11324 = vmatprep.subr.bf16.mxu0 %v15930_v59 }
 0x977   :  { %11319 = vmatpush3.bf16.xpose.msra.mxu1 %v16083_v32 }
 0x978   :  { %11336 = vmatprep.subr.bf16.mxu1 %v15930_v59 }
 0x97c   :  { %v4733_v19 = vpop.f32.mrf.mxu0  ;;  %11309 = vmatmul.mubr.msk.bf16.vlgmr.msra.gmra.mxu0 %vm860_vm1, %v4088_v57 }
 0x97d   :  { %v5484_v38 = vpack.c.bf16 %v4733_v19, %v4733_v19  ;;  %11325 = vmatpush3.bf16.xpose.msra.mxu0 %v16084_v4  ;;  %11332 = vmatprep.mubr.msk.bf16.mxu0 %vm12219_vm7, %v15930_v59 }
 0x97e   :  { %v11166_v49 = vpop.f32.mrf.mxu0  ;;  %v4776_v41 = vpop.f32.mrf.mxu1  ;;  %11321 = vmatmul.mubr.msk.bf16.vlgmr.msra.gmra.mxu1 %vm860_vm1, %v4089_v8  ;;  %11326 = vmatprep.subr.bf16.mxu0 %v15930_v59 }
 0x97f   :  { %v5548_v36 = vunpack.c.l.b16 %v5484_v38  ;;  %v5485_v32 = vpack.c.bf16 %v4776_v41, %v4776_v41  ;;  %11337 = vmatpush3.bf16.xpose.msra.mxu1 %v16085_v45  ;;  %11344 = vmatprep.mubr.msk.bf16.mxu1 %vm12219_vm7, %v15930_v59  ;;  %v16086_v41 = vld [vmem:[#allocation94_spill] sm:$0xff] }
 0x980   :  { %v4736_v42 = vpop.f32.mrf.mxu0  ;;  %v11178_v22 = vpop.f32.mrf.mxu1  ;;  %11338 = vmatprep.subr.bf16.mxu1 %v15930_v59 }
 0x981   :  { %v5590_v57 = vrot.slane %v5548_v36, 2  ;;  %v5549_v19 = vunpack.c.l.b16 %v5485_v32  ;;  %v16087_v42 = vld [vmem:[#allocation95_spill] sm:$0xff]  ;;  %v3981_v32 = vcombine.high %v13924_v25, %v13924_v25  ;;  %v16090_v36 = vld [vmem:[#allocation98_spill] sm:$0xff] }
 0x982   :  { %v11167_v4 = vpop.f32.mrf.mxu0  ;;  %v4779_v49 = vpop.f32.mrf.mxu1 }
 0x983   :  { %v5591_v10 = vsel %vm3353_vm13, %v5590_v57, %v5589_v50  ;;  %v5592_v8 = vrot.slane %v5549_v19, 1  ;;  %v16088_v50 = vld [vmem:[#allocation96_spill] sm:$0xff]  ;;  %v16091_v57 = vld [vmem:[#allocation99_spill] sm:$0xff] }
 0x984   :  { %v11179_v51 = vpop.f32.mrf.mxu1 }
 0x985   :  { %v14177_v38 = vsel %vm3356_vm14, %v5592_v8, %v5591_v10  ;;  %11327 = vmatpush3.bf16.xpose.msra.mxu0 %v16086_v41  ;;  %v16089_v51 = vld [vmem:[#allocation97_spill] sm:$0xff]  ;;  %v3995_v10 = vrot.slane %v3981_v32, %v12466_v52  ;;  %v16092_v32 = vld [vmem:[#allocation100_spill] sm:$0xff] }
 0x986   :  { %11328 = vmatprep.subr.bf16.mxu0 %v15930_v59 }
 0x987   :  { %11339 = vmatpush3.bf16.xpose.msra.mxu1 %v16087_v42  ;;  %v3997_v4 = vcombine.high %v3995_v10, %v3995_v10  ;;  %v4011_v22 = vrot.slane %v3995_v10, %v12466_v52 }
 0x988   :  { %11340 = vmatprep.subr.bf16.mxu1 %v15930_v59 }
 0x989   :  { %v4025_v25 = vrot.slane %v3997_v4, %v12466_v52  ;;  %v4090_v19 = vpack.c.bf16 %v4011_v22, %v4011_v22 }
 0x98b   :  { %v4091_v49 = vpack.c.bf16 %v4025_v25, %v4025_v25 }
 0x98d   :  { %11329 = vmatpush3.bf16.xpose.msra.mxu0 %v16088_v50 }
 0x98e   :  { %11330 = vmatprep.subr.bf16.mxu0 %v15930_v59 }
 0x98f   :  { %11341 = vmatpush3.bf16.xpose.msra.mxu1 %v16089_v51 }
 0x990   :  { %11342 = vmatprep.subr.bf16.mxu1 %v15930_v59 }
 0x995   :  { %11331 = vmatpush3.bf16.xpose.msra.mxu0 %v16090_v36  ;;  %v16093_v36 = vld [vmem:[#allocation101_spill] sm:$0xff] }
 0x996   :  { %11348 = vmatprep.subr.bf16.mxu0 %v15930_v59 }
 0x997   :  { %11343 = vmatpush3.bf16.xpose.msra.mxu1 %v16091_v57 }
 0x998   :  { %11360 = vmatprep.subr.bf16.mxu1 %v15930_v59 }
 0x99c   :  { %v4819_v8 = vpop.f32.mrf.mxu0  ;;  %11333 = vmatmul.mubr.msk.bf16.vlgmr.msra.gmra.mxu0 %vm860_vm1, %v4090_v19 }
 0x99d   :  { %11349 = vmatpush3.bf16.xpose.msra.mxu0 %v16092_v32  ;;  %11356 = vmatprep.mubr.msk.bf16.mxu0 %vm12219_vm7, %v15930_v59  ;;  %v5486_v57 = vpack.c.bf16 %v4819_v8, %v4819_v8  ;;  %v16095_v8 = vld [vmem:[#allocation103_spill] sm:$0xff] }
 0x99e   :  { %v11190_v45 = vpop.f32.mrf.mxu0  ;;  %v4862_v10 = vpop.f32.mrf.mxu1  ;;  %11345 = vmatmul.mubr.msk.bf16.vlgmr.msra.gmra.mxu1 %vm860_vm1, %v4091_v49  ;;  %11350 = vmatprep.subr.bf16.mxu0 %v15930_v59 }
 0x99f   :  { %v5487_v4 = vpack.c.bf16 %v4862_v10, %v4862_v10  ;;  %11361 = vmatpush3.bf16.xpose.msra.mxu1 %v16093_v36  ;;  %11368 = vmatprep.mubr.msk.bf16.mxu1 %vm12219_vm7, %v15930_v59  ;;  %v5550_v45 = vunpack.c.l.b16 %v5486_v57  ;;  %v16097_v10 = vld [vmem:[#allocation105_spill] sm:$0xff] }
 0x9a0   :  { %v4822_v51 = vpop.f32.mrf.mxu0  ;;  %v11202_v19 = vpop.f32.mrf.mxu1  ;;  %11362 = vmatprep.subr.bf16.mxu1 %v15930_v59  ;;  %v12135_v57 = vld [vmem:[%s16001_s24 + $0x38] sm:$0xff] }
 0x9a1   :  { %v5551_v32 = vunpack.c.l.b16 %v5487_v4  ;;  %v16096_v51 = vld [vmem:[#allocation104_spill] sm:$0xff] }
 0x9a2   :  { %v11191_v50 = vpop.f32.mrf.mxu0  ;;  %v4865_v42 = vpop.f32.mrf.mxu1 }
 0x9a3   :  { %v5594_v41 = vrot.slane %v5551_v32, 7  ;;  %v16098_v42 = vld [vmem:[#allocation106_spill] sm:$0xff]  ;;  %v4029_v50 = vcombine.high %v4025_v25, %v4025_v25 }
 0x9a4   :  { %v11203_v14 = vpop.f32.mrf.mxu1 }
 0x9a5   :  { %v5595_v49 = vsel %vm3338_vm8, %v5594_v41, %v5550_v45  ;;  %11351 = vmatpush3.bf16.xpose.msra.mxu0 %v16094_v55  ;;  %v4027_v14 = vcombine.high %v4011_v22, %v4011_v22  ;;  %v16099_v41 = vld [vmem:[#allocation107_spill] sm:$0xff]  ;;  %v4093_v4 = vpack.c.bf16 %v4029_v50, %v4029_v50  ;;  %v14224_v45 = vpop.permute.xlu1 %5671 }
 0x9a6   :  { %11352 = vmatprep.subr.bf16.mxu0 %v15930_v59 }
 0x9a7   :  { %11363 = vmatpush3.bf16.xpose.msra.mxu1 %v16095_v8  ;;  %v4092_v32 = vpack.c.bf16 %v4027_v14, %v4027_v14 }
 0x9a8   :  { %11364 = vmatprep.subr.bf16.mxu1 %v15930_v59 }
 0x9ad   :  { %11353 = vmatpush3.bf16.xpose.msra.mxu0 %v16096_v51 }
 0x9ae   :  { %11354 = vmatprep.subr.bf16.mxu0 %v15930_v59 }
 0x9af   :  { %11365 = vmatpush3.bf16.xpose.msra.mxu1 %v16097_v10 }
 0x9b0   :  { %11366 = vmatprep.subr.bf16.mxu1 %v15930_v59 }
 0x9b5   :  { %11355 = vmatpush3.bf16.xpose.msra.mxu0 %v16098_v42 }
 0x9b6   :  { %11372 = vmatprep.subr.bf16.mxu0 %v15930_v59 }
 0x9b7   :  { %11367 = vmatpush3.bf16.xpose.msra.mxu1 %v16099_v41 }
 0x9b8   :  { %11380 = vmatprep.subr.mxu1 %v12135_v57 }
 0x9bc   :  { %v4905_v19 = vpop.f32.mrf.mxu0  ;;  %11357 = vmatmul.mubr.msk.bf16.vlgmr.msra.gmra.mxu0 %vm860_vm1, %v4092_v32  ;;  %v12136_v32 = vld [vmem:[%s16001_s24 + $0x30] sm:$0xff] }
 0x9bd   :  { %v5488_v10 = vpack.c.bf16 %v4905_v19, %v4905_v19  ;;  %11376 = vmatprep.mubr.msk.bf16.mxu0 %vm12219_vm7, %v15930_v59 }
 0x9be   :  { %v11214_v22 = vpop.f32.mrf.mxu0  ;;  %v4948_v42 = vpop.f32.mrf.mxu1  ;;  %11369 = vmatmul.mubr.msk.bf16.vlgmr.msra.gmra.mxu1 %vm860_vm1, %v4093_v4 }
 0x9bf   :  { %v5552_v25 = vunpack.c.l.b16 %v5488_v10  ;;  %v5489_v41 = vpack.c.bf16 %v4948_v42, %v4948_v42  ;;  %11381 = vmatpush3.msra.mxu1 %v12135_v57  ;;  %11396 = vmatprep.mubr.msk.f32.mxu1 %vm860_vm1, %v14224_v45  ;;  %v12137_v10 = vld [vmem:[%s16001_s24 + $0x28] sm:$0xff] }
 0x9c0   :  { %v4908_v14 = vpop.f32.mrf.mxu0  ;;  %v11226_v50 = vpop.f32.mrf.mxu1  ;;  %11382 = vmatprep.subr.mxu1 %v12136_v32 }
 0x9c1   :  { %v5596_v19 = vrot.slane %v5552_v25, 6  ;;  %v5553_v51 = vunpack.c.l.b16 %v5489_v41  ;;  %11383 = vmatpush3.msra.mxu1 %v12136_v32  ;;  %v12138_v14 = vld [vmem:[%s16001_s24 + $0x20] sm:$0xff]  ;;  %v5674_v50 = vpop.permute.xlu0 %5673  ;;  %v12143_v32 = vld [vmem:[%s16002_s2 + $0x78] sm:$0xff] }
 0x9c2   :  { %v11215_v22 = vpop.f32.mrf.mxu0  ;;  %v4951_v8 = vpop.f32.mrf.mxu1  ;;  %11384 = vmatprep.subr.mxu1 %v12137_v10  ;;  %v12142_v25 = vld [vmem:[%s16001_s24] sm:$0xff] }
 0x9c3   :  { %v5597_v42 = vsel %vm3341_vm9, %v5596_v19, %v5595_v49  ;;  %v5598_v57 = vrot.slane %v5553_v51, 5  ;;  %11385 = vmatpush3.msra.mxu1 %v12137_v10  ;;  %v12139_v8 = vld [vmem:[%s16001_s24 + $0x18] sm:$0xff]  ;;  %v12140_v49 = vld [vmem:[%s16001_s24 + $0x10] sm:$0xff]  ;;  %v12141_v51 = vld [vmem:[%s16001_s24 + $0x8] sm:$0xff] }
 0x9c4   :  { %v11227_v4 = vpop.f32.mrf.mxu1  ;;  %11386 = vmatprep.subr.mxu1 %v12138_v14  ;;  %v12144_v19 = vld [vmem:[%s16002_s2 + $0x70] sm:$0xff]  ;;  %v12145_v22 = vld [vmem:[%s16002_s2 + $0x68] sm:$0xff]  ;;  %v12146_v10 = vld [vmem:[%s16002_s2 + $0x60] sm:$0xff] }
 0x9c5   :  { %v14242_v41 = vsel %vm3344_vm10, %v5598_v57, %v5597_v42  ;;  %11387 = vmatpush3.msra.mxu1 %v12138_v14  ;;  %v12147_v42 = vld [vmem:[%s16002_s2 + $0x58] sm:$0xff]  ;;  %v12148_v57 = vld [vmem:[%s16002_s2 + $0x50] sm:$0xff]  ;;  %v12149_v4 = vld [vmem:[%s16002_s2 + $0x48] sm:$0xff] }
 0x9c6   :  { %11388 = vmatprep.subr.mxu1 %v12139_v8  ;;  %v12150_v14 = vld [vmem:[%s16002_s2 + $0x40] sm:$0xff] }
 0x9c7   :  { %11389 = vmatpush3.msra.mxu1 %v12139_v8  ;;  %v12151_v8 = vld [vmem:[%s16002_s2 + $0x38] sm:$0xff] }
 0x9c8   :  { %11390 = vmatprep.subr.mxu1 %v12140_v49 }
 0x9c9   :  { %11391 = vmatpush3.msra.mxu1 %v12140_v49  ;;  %v12152_v49 = vld [vmem:[%s16002_s2 + $0x30] sm:$0xff] }
 0x9ca   :  { %11392 = vmatprep.subr.mxu1 %v12141_v51 }
 0x9cb   :  { %11393 = vmatpush3.msra.mxu1 %v12141_v51  ;;  %v12153_v51 = vld [vmem:[%s16002_s2 + $0x28] sm:$0xff] }
 0x9cc   :  { %11394 = vmatprep.subr.mxu1 %v12142_v25 }
 0x9cd   :  { %11395 = vmatpush3.msra.mxu1 %v12142_v25  ;;  %v12154_v25 = vld [vmem:[%s16002_s2 + $0x20] sm:$0xff] }
 0x9ce   :  { %11397 = vmatmul.mubr.msk.f32.vlgmr.msra.gmra.mxu1 %vm860_vm1, %v5674_v50  ;;  %5857 = vmatprep.subr.mxu1 %v12143_v32  ;;  %v12155_v32 = vld [vmem:[%s16002_s2 + $0x18] sm:$0xff] }
 0x9cf   :  { %5858 = vmatpush1.msra.mxu1 %v12144_v19  ;;  %5905 = vmatprep.mubr.f32.mxu1 %v15930_v59  ;;  %v12156_v19 = vld [vmem:[%s16002_s2 + $0x10] sm:$0xff] }
 0x9d0   :  { %5859 = vmatprep.subr.mxu1 %v12145_v22 }
 0x9d1   :  { %5860 = vmatpush1.msra.mxu1 %v12146_v10  ;;  %v12157_v10 = vld [vmem:[%s16002_s2 + $0x8] sm:$0xff] }
 0x9d2   :  { %5861 = vmatprep.subr.mxu1 %v12147_v42 }
 0x9d3   :  { %5862 = vmatpush1.msra.mxu1 %v12148_v57  ;;  %v12158_v57 = vld [vmem:[%s16002_s2] sm:$0xff] }
 0x9d4   :  { %5863 = vmatprep.subr.mxu1 %v12149_v4 }
 0x9d5   :  { %5864 = vmatpush1.msra.mxu1 %v12150_v14 }
 0x9d6   :  { %5865 = vmatprep.subr.mxu1 %v12151_v8 }
 0x9d7   :  { %5866 = vmatpush1.msra.mxu1 %v12152_v49 }
 0x9d8   :  { %5867 = vmatprep.subr.mxu1 %v12153_v51  ;;  %v16100_v51 = vld [vmem:[#allocation3_spill] sm:$0xff] }
 0x9d9   :  { %5868 = vmatpush1.msra.mxu1 %v12154_v25 }
 0x9da   :  { %5869 = vmatprep.subr.mxu1 %v12155_v32 }
 0x9db   :  { %5870 = vmatpush1.msra.mxu1 %v12156_v19 }
 0x9dc   :  { %v4991_v22 = vpop.f32.mrf.mxu0  ;;  %5871 = vmatprep.subr.mxu1 %v12157_v10 }
 0x9dd   :  { %v5490_v42 = vpack.c.bf16 %v4991_v22, %v4991_v22  ;;  %5872 = vmatpush1.msra.mxu1 %v12158_v57 }
 0x9de   :  { %v11238_v4 = vpop.f32.mrf.mxu0  ;;  %v5034_v14 = vpop.f32.mrf.mxu1  ;;  %9906 = vmatmul.mubr.msk.f32.vlgmr.msra.gmra.mxu1 %vm860_vm1, %v14224_v45  ;;  %11417 = vmatprep.subr.bf16.mxu1 %v15930_v59 }
 0x9df   :  { %v5554_v8 = vunpack.c.l.b16 %v5490_v42  ;;  %v5491_v49 = vpack.c.bf16 %v5034_v14, %v5034_v14  ;;  %5911 = vmatprep.mubr.f32.mxu1 %v15930_v59  ;;  %11418 = vmatpush3.bf16.xpose.msra.mxu1 %v16100_v51  ;;  %v16101_v51 = vld [vmem:[#allocation4_spill] sm:$0xff] }
 0x9e0   :  { %v4994_v25 = vpop.f32.mrf.mxu0  ;;  %v11250_v32 = vpop.f32.mrf.mxu1  ;;  %11419 = vmatprep.subr.bf16.mxu1 %v15930_v59 }
 0x9e1   :  { %v5600_v19 = vrot.slane %v5554_v8, 4  ;;  %v5555_v22 = vunpack.c.l.b16 %v5491_v49  ;;  %v16102_v8 = vld [vmem:[#allocation5_spill] sm:$0xff]  ;;  %v16103_v49 = vld [vmem:[#allocation6_spill] sm:$0xff] }
 0x9e2   :  { %v11239_v10 = vpop.f32.mrf.mxu0  ;;  %v5037_v57 = vpop.f32.mrf.mxu1  ;;  %9907 = vmatmul.mubr.msk.f32.gmra.mxu1 %vm860_vm1, %v5674_v50 }
 0x9e3   :  { %v5601_v45 = vsel %vm3347_vm11, %v5600_v19, %v14242_v41  ;;  %v5602_v4 = vrot.slane %v5555_v22, 3  ;;  %11425 = vmatprep.mubr.msk.bf16.mxu1 %vm12219_vm7, %v15930_v59 }
 0x9e4   :  { %v11251_v42 = vpop.f32.mrf.mxu1 }
 0x9e5   :  { %v5603_v14 = vsel %vm3350_vm12, %v5602_v4, %v5601_v45 }
 0x9e7   :  { %11420 = vmatpush3.bf16.xpose.msra.mxu1 %v16101_v51 }
 0x9e8   :  { %11421 = vmatprep.subr.bf16.mxu1 %v15930_v59 }
 0x9ef   :  { %11422 = vmatpush3.bf16.xpose.msra.mxu1 %v16102_v8 }
 0x9f0   :  { %11423 = vmatprep.subr.bf16.mxu1 %v15930_v59 }
 0x9f7   :  { %11424 = vmatpush3.bf16.xpose.msra.mxu1 %v16103_v49 }
 0x9f8   :  { %11441 = vmatprep.subr.bf16.mxu1 %v15930_v59 }
 0x9fc   :  { %v5077_v41 = vpop.f32.mrf.mxu0 }
 0x9fd   :  { %v5492_v50 = vpack.c.bf16 %v5077_v41, %v5077_v41 }
 0x9fe   :  { %v11262_v25 = vpop.f32.mrf.mxu0  ;;  %v5120_v32 = vpop.f32.mrf.mxu1 }
 0x9ff   :  { %v5556_v19 = vunpack.c.l.b16 %v5492_v50  ;;  %v5493_v22 = vpack.c.bf16 %v5120_v32, %v5120_v32 }
 0xa00   :  { %v5080_v10 = vpop.f32.mrf.mxu0  ;;  %v11274_v57 = vpop.f32.mrf.mxu1 }
 0xa01   :  { %v5604_v45 = vrot.slane %v5556_v19, 2  ;;  %v5557_v4 = vunpack.c.l.b16 %v5493_v22 }
 0xa02   :  { %v11263_v42 = vpop.f32.mrf.mxu0  ;;  %v5123_v51 = vpop.f32.mrf.mxu1 }
 0xa03   :  { %v5605_v8 = vsel %vm3353_vm13, %v5604_v45, %v5603_v14  ;;  %v5606_v55 = vrot.slane %v5557_v4, 1 }
 0xa04   :  { %v11275_v36 = vpop.f32.mrf.mxu1 }
 0xa05   :  { %v14326_v49 = vsel %vm3356_vm14, %v5606_v55, %v5605_v8 }
 0xa1c   :  { %v5163_v53 = vpop.f32.mrf.mxu0 }
 0xa1d   :  { %v5494_v25 = vpack.c.bf16 %v5163_v53, %v5163_v53 }
 0xa1e   :  { %v11286_v1 = vpop.f32.mrf.mxu0  ;;  %v5206_v41 = vpop.f32.mrf.mxu1 }
 0xa1f   :  { %v5495_v34 = vpack.c.bf16 %v5206_v41, %v5206_v41  ;;  %v5558_v22 = vunpack.c.l.b16 %v5494_v25 }
 0xa20   :  { %v5166_v50 = vpop.f32.mrf.mxu0  ;;  %v11298_v32 = vpop.f32.mrf.mxu1 }
 0xa21   :  { %v5559_v10 = vunpack.c.l.b16 %v5495_v34 }
 0xa22   :  { %v11287_v57 = vpop.f32.mrf.mxu0  ;;  %v5209_v19 = vpop.f32.mrf.mxu1 }
 0xa23   :  { %v5608_v42 = vrot.slane %v5559_v10, 7 }
 0xa24   :  { %v11299_v51 = vpop.f32.mrf.mxu1 }
 0xa25   :  { %v5609_v14 = vsel %vm3338_vm8, %v5608_v42, %v5558_v22 }
 0xa3c   :  { %v5249_v45 = vpop.f32.mrf.mxu0 }
 0xa3d   :  { %v5496_v10 = vpack.c.bf16 %v5249_v45, %v5249_v45 }
 0xa3e   :  { %v11310_v36 = vpop.f32.mrf.mxu0  ;;  %v5292_v4 = vpop.f32.mrf.mxu1 }
 0xa3f   :  { %v5497_v51 = vpack.c.bf16 %v5292_v4, %v5292_v4  ;;  %v5560_v16 = vunpack.c.l.b16 %v5496_v10 }
 0xa40   :  { %v5252_v55 = vpop.f32.mrf.mxu0  ;;  %v11322_v8 = vpop.f32.mrf.mxu1 }
 0xa41   :  { %v5561_v42 = vunpack.c.l.b16 %v5497_v51  ;;  %v5610_v9 = vrot.slane %v5560_v16, 6 }
 0xa42   :  { %v11311_v29 = vpop.f32.mrf.mxu0  ;;  %v5295_v1 = vpop.f32.mrf.mxu1 }
 0xa43   :  { %v5612_v8 = vrot.slane %v5561_v42, 5 }
 0xa44   :  { %v11323_v17 = vpop.f32.mrf.mxu1 }
 0xa45   :  { %v5611_v17 = vsel %vm3341_vm9, %v5610_v9, %v5609_v14 }
 0xa5c   :  { %v5335_v53 = vpop.f32.mrf.mxu0 }
 0xa5d   :  { %v5498_v22 = vpack.c.bf16 %v5335_v53, %v5335_v53 }
 0xa5e   :  { %v11334_v41 = vpop.f32.mrf.mxu0  ;;  %v5378_v50 = vpop.f32.mrf.mxu1 }
 0xa5f   :  { %v5499_v36 = vpack.c.bf16 %v5378_v50, %v5378_v50  ;;  %v5562_v55 = vunpack.c.l.b16 %v5498_v22 }
 0xa60   :  { %v5338_v32 = vpop.f32.mrf.mxu0  ;;  %v11346_v34 = vpop.f32.mrf.mxu1 }
 0xa61   :  { %v5563_v29 = vunpack.c.l.b16 %v5499_v36  ;;  %v5614_v1 = vrot.slane %v5562_v55, 4  ;;  %v5613_v32 = vsel %vm3344_vm10, %v5612_v8, %v5611_v17  ;;  %v12160_v17 = vld [vmem:[%s15644_s9 + $0x70] sm:$0xff] }
 0xa62   :  { %v11335_v57 = vpop.f32.mrf.mxu0  ;;  %v5381_v19 = vpop.f32.mrf.mxu1 }
 0xa63   :  { %v5616_v34 = vrot.slane %v5563_v29, 3  ;;  %v5615_v45 = vsel %vm3347_vm11, %v5614_v1, %v5613_v32  ;;  %v12159_v29 = vld [vmem:[%s15644_s9 + $0x78] sm:$0xff]  ;;  %v12164_v1 = vld [vmem:[%s15644_s9 + $0x50] sm:$0xff]  ;;  %v12166_v32 = vld [vmem:[%s15644_s9 + $0x40] sm:$0xff] }
 0xa64   :  { %v11347_v25 = vpop.f32.mrf.mxu1 }
 0xa65   :  { %v5617_v51 = vsel %vm3350_vm12, %v5616_v34, %v5615_v45  ;;  %v12167_v34 = vld [vmem:[%s15644_s9 + $0x38] sm:$0xff]  ;;  %v12170_v45 = vld [vmem:[%s15644_s9 + $0x20] sm:$0xff] }
 0xa7c   :  { %v5421_v41 = vpop.f32.mrf.mxu0 }
 0xa7d   :  { %v5500_v5 = vpack.c.bf16 %v5421_v41, %v5421_v41  ;;  %v12165_v41 = vld [vmem:[%s15644_s9 + $0x48] sm:$0xff] }
 0xa7e   :  { %v11358_v57 = vpop.f32.mrf.mxu0  ;;  %v5464_v19 = vpop.f32.mrf.mxu1 }
 0xa7f   :  { %v5564_v4 = vunpack.c.l.b16 %v5500_v5  ;;  %v5501_v53 = vpack.c.bf16 %v5464_v19, %v5464_v19  ;;  %v16104_v5 = vpack.c.b16 %v14177_v38, %v14071_v31  ;;  %v12161_v31 = vld [vmem:[%s15644_s9 + $0x68] sm:$0xff]  ;;  %v12162_v38 = vld [vmem:[%s15644_s9 + $0x60] sm:$0xff]  ;;  %v12168_v57 = vld [vmem:[%s15644_s9 + $0x30] sm:$0xff] }
 0xa80   :  { %v5424_v25 = vpop.f32.mrf.mxu0  ;;  %v11370_v50 = vpop.f32.mrf.mxu1  ;;  %v12169_v19 = vld [vmem:[%s15644_s9 + $0x28] sm:$0xff] }
 0xa81   :  { %v5618_v16 = vrot.slane %v5564_v4, 2  ;;  %v5565_v10 = vunpack.c.l.b16 %v5501_v53  ;;  %v12171_v4 = vld [vmem:[%s15644_s9 + $0x18] sm:$0xff]  ;;  %v12172_v53 = vld [vmem:[%s15644_s9 + $0x10] sm:$0xff]  ;;  %v12173_v25 = vld [vmem:[%s15644_s9 + $0x8] sm:$0xff] }
 0xa82   :  { %v11359_v22 = vpop.f32.mrf.mxu0  ;;  %v5467_v9 = vpop.f32.mrf.mxu1  ;;  %v12174_v50 = vld [vmem:[%s15644_s9] sm:$0xff] }
 0xa83   :  { %v5619_v14 = vsel %vm3353_vm13, %v5618_v16, %v5617_v51  ;;  %v5620_v42 = vrot.slane %v5565_v10, 1 }
 0xa84   :  { %v11371_v36 = vpop.f32.mrf.mxu1 }
 0xa85   :  { %v5621_v55 = vsel %vm3356_vm14, %v5620_v42, %v5619_v14  ;;  %v12175_v36 = vld [vmem:[%s15645_s8] ss:$0 sm:$0xff] }
 0xa86   :  { %v5623_v8 = vpack.c.b16 %v5621_v55, %v14326_v49  ;;  %v12163_v49 = vld [vmem:[%s15644_s9 + $0x58] sm:$0xff] }
 0xa88   :  { %11373 = vmatpush3.bf16.msra.mxu0 %v5623_v8 }
 0xa89   :  { %11374 = vmatprep.subr.bf16.mxu0 %v15930_v59 }
 0xa8c   :  { %11375 = vmatpush3.bf16.msra.mxu0 %v16104_v5 }
 0xa8d   :  { %5780 = vmatprep.subr.mxu0 %v12159_v29 }
 0xa8e   :  { %v11398_v16 = vpop.f32.mrf.mxu1 }
 0xa8f   :  { %11377 = vmatmul.mubr.msk.bf16.vlgmr.msra.gmra.mxu0 %vm3404_vm2, %v13707_v39 }
 0xa90   :  { %5781 = vmatpush1.msra.mxu0 %v12160_v17  ;;  %5828 = vmatprep.mubr.f32.mxu0 %v15930_v59  ;;  %v5745_v22 = vpop.f32.mrf.mxu1 }
 0xa91   :  { %5782 = vmatprep.subr.mxu0 %v12161_v31 }
 0xa92   :  { %5783 = vmatpush1.msra.mxu0 %v12162_v38 }
 0xa93   :  { %5784 = vmatprep.subr.mxu0 %v12163_v49 }
 0xa94   :  { %5785 = vmatpush1.msra.mxu0 %v12164_v1 }
 0xa95   :  { %5786 = vmatprep.subr.mxu0 %v12165_v41 }
 0xa96   :  { %5787 = vmatpush1.msra.mxu0 %v12166_v32 }
 0xa97   :  { %5788 = vmatprep.subr.mxu0 %v12167_v34 }
 0xa98   :  { %5789 = vmatpush1.msra.mxu0 %v12168_v57 }
 0xa99   :  { %5790 = vmatprep.subr.mxu0 %v12169_v19 }
 0xa9a   :  { %5791 = vmatpush1.msra.mxu0 %v12170_v45 }
 0xa9b   :  { %5792 = vmatprep.subr.mxu0 %v12171_v4 }
 0xa9c   :  { %5793 = vmatpush1.msra.mxu0 %v12172_v53 }
 0xa9d   :  { %5794 = vmatprep.subr.mxu0 %v12173_v25 }
 0xa9e   :  { %5795 = vmatpush1.msra.mxu0 %v12174_v50  ;;  %v5907_v49 = vpop.f32.mrf.mxu1 }
 0xa9f   :  { %v5908_v32 = vadd.f32 %v5907_v49, %v13784_v54 }
 0xaa0   :  { %v5909_v1 = vpop.f32.mrf.mxu1 }
 0xaa2   :  { %v5913_v57 = vpop.f32.mrf.mxu1 }
 0xaa3   :  { %v5914_v53 = vadd.f32 %v5913_v57, %v13784_v54 }
 0xb4f   :  { %v5660_v10 = vpop.f32.mrf.mxu0 }
 0xb50   :  { %v5667_v51 = vmul.f32 %v5660_v10, %v13760_v26 }
 0xb51   :  { %v11378_v9 = vpop.f32.mrf.mxu0 }
 0xb52   :  { %v5746_v14 = vadd.f32 %v5745_v22, %v5667_v51 }
 0xb53   :  { %v5663_v42 = vpop.f32.mrf.mxu0 }
 0xb54   :  { %v5754_v55 = vadd.f32 %v12175_v36, %v5746_v14  ;;  %v5668_v8 = vmul.f32 %v5663_v42, %v13766_v40  ;;  %v5910_v14 = vadd.f32 %v5909_v1, %v13797_v30 }
 0xb55   :  { %v11379_v5 = vpop.f32.mrf.mxu0 }
 0xb56   :  { %v5756_v29 = vmax.f32 %v5754_v55, 0.0  ;;  %v5751_v17 = vadd.f32 %v11398_v16, %v5668_v8 }
 0xb58   :  { %v5755_v31 = vadd.f32 %v12175_v36, %v5751_v17  ;;  %9904 = vmatmul.mubr.msk.f32.vlgmr.msra.gmra.mxu0 %vm860_vm1, %v5756_v29  ;;  %v5915_v36 = vpop.f32.mrf.mxu1 }
 0xb59   :  { %5834 = vmatprep.mubr.f32.mxu0 %v15930_v59  ;;  %v5916_v29 = vadd.f32 %v5915_v36, %v13797_v30 }
 0xb5a   :  { %v5757_v38 = vmax.f32 %v5755_v31, 0.0 }
 0xb5c   :  { %9905 = vmatmul.mubr.msk.f32.gmra.mxu0 %vm860_vm1, %v5757_v38 }
 0xb5d   :  { %11401 = vmatprep.mubr.msk.bf16.mxu0 %vm520_vm4, %v12397_v23 }
 0xc18   :  { %v5830_v41 = vpop.f32.mrf.mxu0 }
 0xc19   :  { %v5831_v34 = vadd.f32 %v5830_v41, %v13787_v20 }
 0xc1a   :  { %v5832_v19 = vpop.f32.mrf.mxu0 }
 0xc1b   :  { %v5918_v45 = vadd.f32 %v5908_v32, %v5831_v34  ;;  %v5833_v55 = vadd.f32 %v5832_v19, %v13800_v48 }
 0xc1c   :  { %v5836_v4 = vpop.f32.mrf.mxu0 }
 0xc1d   :  { %v9908_v25 = vmul.f32 -1.442695, %v5918_v45  ;;  %v5837_v50 = vadd.f32 %v5836_v4, %v13787_v20 }
 0xc1e   :  { %v5838_v5 = vpop.f32.mrf.mxu0 }
 0xc1f   :  { %12063 = vpow2.f32 %v9908_v25  ;;  %v5919_v16 = vadd.f32 %v5914_v53, %v5837_v50  ;;  %v5839_v38 = vadd.f32 %v5838_v5, %v13800_v48  ;;  %v16114_v5 = vld [vmem:[#allocation17_spill] sm:$0xff] }
 0xc21   :  { %v9909_v10 = vmul.f32 -1.442695, %v5919_v16 }
 0xc23   :  { %12065 = vpow2.f32 %v9909_v10 }
 0xc2c   :  { %v12064_v23 = vpop.eup %12063 }
 0xc2d   :  { %v5926_v51 = vadd.f32 1.0, %v12064_v23 }
 0xc2f   :  { %12067 = vrcp.f32 %v5926_v51 }
 0xc30   :  { %v12066_v22 = vpop.eup %12065 }
 0xc31   :  { %v5927_v9 = vadd.f32 1.0, %v12066_v22 }
 0xc33   :  { %12069 = vrcp.f32 %v5927_v9 }
 0xc3c   :  { %v12068_v42 = vpop.eup %12067 }
 0xc3d   :  { %v5932_v8 = vmul.f32 %v12068_v42, %v5910_v14  ;;  %v5938_v34 = vsub.f32 1.0, %v12068_v42  ;;  %v5950_v19 = vmul.f32 %v12068_v42, %v13812_v60  ;;  %v16112_v42 = vld [vmem:[#allocation15_spill] sm:$0xff] }
 0xc3f   :  { %v5934_v17 = vadd.f32 %v5932_v8, %v5833_v55  ;;  %v16113_v8 = vld [vmem:[#allocation16_spill] sm:$0xff] }
 0xc40   :  { %v12070_v31 = vpop.eup %12069 }
 0xc41   :  { %12071 = vtanh.f32 %v5934_v17  ;;  %v5933_v49 = vmul.f32 %v12070_v31, %v5916_v29  ;;  %v5939_v53 = vsub.f32 1.0, %v12070_v31  ;;  %v5951_v50 = vmul.f32 %v12070_v31, %v13816_v46  ;;  %v16115_v31 = vld [vmem:[#allocation18_spill] sm:$0xff] }
 0xc43   :  { %v5935_v41 = vadd.f32 %v5933_v49, %v5839_v38  ;;  %v16116_v49 = vld [vmem:[#allocation19_spill] sm:$0xff] }
 0xc45   :  { %12073 = vtanh.f32 %v5935_v41 }
 0xc4e   :  { %v12072_v32 = vpop.eup %12071 }
 0xc4f   :  { %5942 = vrot.lane.b32.xlu1 %v12072_v32, %s12221_s10 }
 0xc52   :  { %v12074_v1 = vpop.eup %12073 }
 0xc53   :  { %5944 = vrot.lane.b32.xlu0 %v12074_v1, %s12221_s10 }
 0xcc1   :  { %v5943_v57 = vpop.permute.xlu1 %5942 }
 0xcc2   :  { %v5948_v45 = vmul.f32 %v5943_v57, %v5938_v34  ;;  %v16117_v34 = vld [vmem:[#allocation20_spill] sm:$0xff]  ;;  %v16118_v57 = vld [vmem:[#allocation21_spill] sm:$0xff] }
 0xcc4   :  { %v14412_v4 = vadd.f32 %v5950_v19, %v5948_v45  ;;  %v16119_v19 = vld [vmem:[#allocation22_spill] sm:$0xff]  ;;  %v16120_v45 = vld [vmem:[#allocation23_spill] sm:$0xff] }
 0xcc5   :  { %v5945_v25 = vpop.permute.xlu0 %5944 }
 0xcc6   :  { %v5949_v16 = vmul.f32 %v5945_v25, %v5939_v53  ;;  %7849 = vrot.lane.b32.xlu0 %v14412_v4, %s12221_s10  ;;  %v16121_v53 = vld [vmem:[#allocation24_spill] sm:$0xff]  ;;  %v16122_v25 = vld [vmem:[#allocation25_spill] sm:$0xff] }
 0xcc8   :  { %v14417_v10 = vadd.f32 %v5951_v50, %v5949_v16  ;;  %v16123_v50 = vld [vmem:[#allocation26_spill] sm:$0xff] }
 0xcca   :  { %v5954_v23 = vpack.c.bf16 %v14417_v10, %v14412_v4 }
 0xccc   :  { %5956 = vrot.lane.b32.xlu1 %v5954_v23, %s12221_s10  ;;  %v16124_v23 = vld [vmem:[#allocation27_spill] sm:$0xff] }
 0xcd0   :  { %7851 = vrot.lane.b32.xlu1 %v14417_v10, %s12221_s10 }
 0xd3e   :  { %v5957_v60 = vpop.permute.xlu1 %5956 }
 0xd3f   :  { %11399 = vmatprep.subr.bf16.mxu0 %v5957_v60 }
 0xd40   :  { %11400 = vmatpush3.bf16.msra.mxu0 %v5957_v60 }
 0xd41   :  { %11405 = vmatprep.subr.bf16.mxu0 %v15930_v59 }
 0xd43   :  { %11402 = vmatmul.mubr.msk.bf16.vlgmr.msra.gmra.mxu0 %vm520_vm4, %v12415_v37 }
 0xd44   :  { %11406 = vmatpush3.bf16.xpose.msra.mxu0 %v12375_v12  ;;  %11413 = vmatprep.mubr.msk.bf16.mxu0 %vm12219_vm7, %v15930_v59 }
 0xd45   :  { %11407 = vmatprep.subr.bf16.mxu0 %v15930_v59 }
 0xd4c   :  { %11408 = vmatpush3.bf16.xpose.msra.mxu0 %v12383_v15 }
 0xd4d   :  { %11409 = vmatprep.subr.bf16.mxu0 %v15930_v59 }
 0xd54   :  { %11410 = vmatpush3.bf16.xpose.msra.mxu0 %v12390_v18 }
 0xd55   :  { %11411 = vmatprep.subr.bf16.mxu0 %v15930_v59 }
 0xd5c   :  { %11412 = vmatpush3.bf16.xpose.msra.mxu0 %v12445_v44 }
 0xd5d   :  { %11429 = vmatprep.subr.bf16.mxu0 %v15930_v59 }
 0xe03   :  { %v14437_v37 = vpop.f32.mrf.mxu0 }
 0xe05   :  { %v5993_v12 = vpop.f32.mrf.mxu0 }
 0xe06   :  { %v6019_v46 = vrot.slane %v5993_v12, %v12466_v52 }
 0xe07   :  { %v14525_v36 = vpop.f32.mrf.mxu0 }
 0xe08   :  { %v6027_v51 = vcombine.high %v6019_v46, %v6019_v46  ;;  %v6035_v22 = vrot.slane %v6019_v46, %v12466_v52 }
 0xe09   :  { %v5996_v55 = vpop.f32.mrf.mxu0 }
 0xe0a   :  { %v6049_v15 = vrot.slane %v6027_v51, %v12466_v52  ;;  %v6240_v9 = vpack.c.bf16 %v6035_v22, %v6035_v22  ;;  %v6057_v18 = vcombine.high %v6035_v22, %v6035_v22  ;;  %v6068_v29 = vrot.slane %v5996_v55, %v12466_v52  ;;  %v16125_v51 = vld [vmem:[#allocation28_spill] sm:$0xff]  ;;  %v16126_v22 = vld [vmem:[#allocation29_spill] sm:$0xff] }
 0xe0c   :  { %v6241_v14 = vpack.c.bf16 %v6049_v15, %v6049_v15  ;;  %11414 = vmatmul.mubr.msk.bf16.vlgmr.msra.gmra.mxu0 %vm860_vm1, %v6240_v9  ;;  %v6059_v44 = vcombine.high %v6049_v15, %v6049_v15  ;;  %v6076_v17 = vcombine.high %v6068_v29, %v6068_v29  ;;  %v6084_v38 = vrot.slane %v6068_v29, %v12466_v52  ;;  %v16127_v15 = vld [vmem:[#allocation30_spill] sm:$0xff]  ;;  %v16128_v9 = vld [vmem:[#allocation31_spill] sm:$0xff] }
 0xe0d   :  { %11430 = vmatpush3.bf16.xpose.msra.mxu0 %v12481_v61  ;;  %11437 = vmatprep.mubr.msk.bf16.mxu0 %vm12219_vm7, %v15930_v59  ;;  %v6242_v61 = vpack.c.bf16 %v6057_v18, %v6057_v18  ;;  %v16129_v18 = vld [vmem:[#allocation32_spill] sm:$0xff]  ;;  %v16135_v29 = vld [vmem:[#allocation38_spill] sm:$0xff] }
 0xe0e   :  { %11426 = vmatmul.mubr.msk.bf16.vlgmr.msra.gmra.mxu1 %vm860_vm1, %v6241_v14  ;;  %11431 = vmatprep.subr.bf16.mxu0 %v15930_v59  ;;  %v6098_v41 = vrot.slane %v6076_v17, %v12466_v52  ;;  %v6248_v32 = vpack.c.bf16 %v6084_v38, %v6084_v38  ;;  %v6106_v16 = vcombine.high %v6084_v38, %v6084_v38  ;;  %v16136_v17 = vld [vmem:[#allocation39_spill] sm:$0xff]  ;;  %v16138_v38 = vld [vmem:[#allocation41_spill] sm:$0xff] }
 0xe0f   :  { %11442 = vmatpush3.bf16.xpose.msra.mxu1 %v12484_v63  ;;  %11449 = vmatprep.mubr.msk.bf16.mxu1 %vm12219_vm7, %v15930_v59  ;;  %v6243_v63 = vpack.c.bf16 %v6059_v44, %v6059_v44  ;;  %v6061_v14 = vcombine.high %v5996_v55, %v5996_v55  ;;  %v16130_v44 = vld [vmem:[#allocation33_spill] sm:$0xff] }
 0xe10   :  { %11443 = vmatprep.subr.bf16.mxu1 %v15930_v59  ;;  %v6249_v1 = vpack.c.bf16 %v6098_v41, %v6098_v41  ;;  %v6108_v60 = vcombine.high %v6098_v41, %v6098_v41 }
 0xe12   :  { %v6251_v46 = vpack.c.bf16 %v6108_v60, %v6108_v60  ;;  %v16142_v60 = vld [vmem:[#allocation45_spill] sm:$0xff] }
 0xe15   :  { %11432 = vmatpush3.bf16.xpose.msra.mxu0 %v12503_v2  ;;  %v6012_v2 = vcombine.high %v5993_v12, %v5993_v12  ;;  %v6250_v12 = vpack.c.bf16 %v6106_v16, %v6106_v16 }
 0xe16   :  { %11433 = vmatprep.subr.bf16.mxu0 %v15930_v59 }
 0xe17   :  { %11444 = vmatpush3.bf16.xpose.msra.mxu1 %v12506_v3  ;;  %v6026_v3 = vrot.slane %v6012_v2, %v12466_v52  ;;  %v16131_v2 = vld [vmem:[#allocation34_spill] sm:$0xff] }
 0xe18   :  { %11445 = vmatprep.subr.bf16.mxu1 %v15930_v59 }
 0xe1d   :  { %11434 = vmatpush3.bf16.xpose.msra.mxu0 %v12519_v6  ;;  %v6028_v6 = vcombine.high %v6026_v3, %v6026_v3 }
 0xe1e   :  { %11435 = vmatprep.subr.bf16.mxu0 %v15930_v59 }
 0xe1f   :  { %11446 = vmatpush3.bf16.xpose.msra.mxu1 %v12522_v7  ;;  %v6042_v7 = vrot.slane %v6026_v3, %v12466_v52 }
 0xe20   :  { %11447 = vmatprep.subr.bf16.mxu1 %v15930_v59 }
 0xe25   :  { %11436 = vmatpush3.bf16.xpose.msra.mxu0 %v12535_v11  ;;  %v6056_v11 = vrot.slane %v6028_v6, %v12466_v52  ;;  %v16132_v6 = vld [vmem:[#allocation35_spill] sm:$0xff] }
 0xe26   :  { %11453 = vmatprep.subr.bf16.mxu0 %v15930_v59 }
 0xe27   :  { %11448 = vmatpush3.bf16.xpose.msra.mxu1 %v12538_v13  ;;  %v6244_v13 = vpack.c.bf16 %v6042_v7, %v6042_v7 }
 0xe28   :  { %11465 = vmatprep.subr.bf16.mxu1 %v15930_v59 }
 0xe2c   :  { %11438 = vmatmul.mubr.msk.bf16.vlgmr.msra.gmra.mxu0 %vm860_vm1, %v6242_v61  ;;  %v6075_v61 = vrot.slane %v6061_v14, %v12466_v52 }
 0xe2d   :  { %11454 = vmatpush3.bf16.xpose.msra.mxu0 %v12551_v21  ;;  %11461 = vmatprep.mubr.msk.bf16.mxu0 %vm12219_vm7, %v15930_v59  ;;  %v6245_v21 = vpack.c.bf16 %v6056_v11, %v6056_v11 }
 0xe2e   :  { %11450 = vmatmul.mubr.msk.bf16.vlgmr.msra.gmra.mxu1 %vm860_vm1, %v6243_v63  ;;  %11455 = vmatprep.subr.bf16.mxu0 %v15930_v59  ;;  %v6077_v63 = vcombine.high %v6075_v61, %v6075_v61  ;;  %v6091_v3 = vrot.slane %v6075_v61, %v12466_v52 }
 0xe2f   :  { %11466 = vmatpush3.bf16.xpose.msra.mxu1 %v12554_v24  ;;  %11473 = vmatprep.mubr.msk.bf16.mxu1 %vm12219_vm7, %v15930_v59  ;;  %v16105_v24 = vld [vmem:[#allocation8_spill] sm:$0xff] }
 0xe30   :  { %11467 = vmatprep.subr.bf16.mxu1 %v15930_v59  ;;  %v6107_v41 = vcombine.high %v6091_v3, %v6091_v3 }
 0xe35   :  { %11456 = vmatpush3.bf16.xpose.msra.mxu0 %v12573_v27  ;;  %v16106_v27 = vld [vmem:[#allocation9_spill] sm:$0xff] }
 0xe36   :  { %11457 = vmatprep.subr.bf16.mxu0 %v15930_v59 }
 0xe37   :  { %11468 = vmatpush3.bf16.xpose.msra.mxu1 %v12576_v28  ;;  %v16107_v28 = vld [vmem:[#allocation10_spill] sm:$0xff] }
 0xe38   :  { %11469 = vmatprep.subr.bf16.mxu1 %v15930_v59 }
 0xe3d   :  { %11458 = vmatpush3.bf16.xpose.msra.mxu0 %v12589_v33  ;;  %v6058_v33 = vcombine.high %v6042_v7, %v6042_v7  ;;  %v6105_v7 = vrot.slane %v6077_v63, %v12466_v52  ;;  %v16143_v63 = vld [vmem:[#allocation46_spill] sm:$0xff] }
 0xe3e   :  { %11459 = vmatprep.subr.bf16.mxu0 %v15930_v59 }
 0xe3f   :  { %11470 = vmatpush3.bf16.xpose.msra.mxu1 %v12594_v35  ;;  %v16108_v35 = vld [vmem:[#allocation11_spill] sm:$0xff] }
 0xe40   :  { %11471 = vmatprep.subr.bf16.mxu1 %v15930_v59 }
 0xe45   :  { %11460 = vmatpush3.bf16.xpose.msra.mxu0 %v12608_v43  ;;  %v6060_v43 = vcombine.high %v6056_v11, %v6056_v11  ;;  %v6252_v11 = vpack.c.bf16 %v6091_v3, %v6091_v3  ;;  %v16145_v3 = vld [vmem:[#allocation48_spill] sm:$0xff] }
 0xe46   :  { %11477 = vmatprep.subr.bf16.mxu0 %v15930_v59 }
 0xe47   :  { %11472 = vmatpush3.bf16.xpose.msra.mxu1 %v12611_v47  ;;  %v6246_v47 = vpack.c.bf16 %v6058_v33, %v6058_v33 }
 0xe48   :  { %11489 = vmatprep.subr.bf16.mxu1 %v15930_v59 }
 0xe4c   :  { %11462 = vmatmul.mubr.msk.bf16.vlgmr.msra.gmra.mxu0 %vm860_vm1, %v6244_v13  ;;  %v6253_v13 = vpack.c.bf16 %v6105_v7, %v6105_v7 }
 0xe4d   :  { %11478 = vmatpush3.bf16.xpose.msra.mxu0 %v12626_v56  ;;  %11485 = vmatprep.mubr.msk.bf16.mxu0 %vm12219_vm7, %v15930_v59  ;;  %v6247_v56 = vpack.c.bf16 %v6060_v43, %v6060_v43  ;;  %v16134_v43 = vld [vmem:[#allocation37_spill] sm:$0xff] }
 0xe4e   :  { %11474 = vmatmul.mubr.msk.bf16.vlgmr.msra.gmra.mxu1 %vm860_vm1, %v6245_v21  ;;  %11479 = vmatprep.subr.bf16.mxu0 %v15930_v59 }
 0xe4f   :  { %11490 = vmatpush3.bf16.xpose.msra.mxu1 %v12629_v58  ;;  %11497 = vmatprep.mubr.msk.bf16.mxu1 %vm12219_vm7, %v15930_v59  ;;  %v16109_v58 = vld [vmem:[#allocation12_spill] sm:$0xff] }
 0xe50   :  { %11491 = vmatprep.subr.bf16.mxu1 %v15930_v59 }
 0xe55   :  { %11480 = vmatpush3.bf16.xpose.msra.mxu0 %v12648_v62  ;;  %v16110_v62 = vld [vmem:[#allocation13_spill] sm:$0xff] }
 0xe56   :  { %11481 = vmatprep.subr.bf16.mxu0 %v15930_v59 }
 0xe57   :  { %11492 = vmatpush3.bf16.xpose.msra.mxu1 %v12651_v0  ;;  %v16111_v0 = vld [vmem:[#allocation14_spill] sm:$0xff] }
 0xe58   :  { %11493 = vmatprep.subr.bf16.mxu1 %v15930_v59 }
 0xe5d   :  { %11482 = vmatpush3.bf16.xpose.msra.mxu0 %v16105_v24  ;;  %v16133_v24 = vld [vmem:[#allocation36_spill] sm:$0xff] }
 0xe5e   :  { %11483 = vmatprep.subr.bf16.mxu0 %v15930_v59 }
 0xe5f   :  { %11494 = vmatpush3.bf16.xpose.msra.mxu1 %v16106_v27 }
 0xe60   :  { %11495 = vmatprep.subr.bf16.mxu1 %v15930_v59 }
 0xe65   :  { %11484 = vmatpush3.bf16.xpose.msra.mxu0 %v16107_v28 }
 0xe66   :  { %11501 = vmatprep.subr.bf16.mxu0 %v15930_v59 }
 0xe67   :  { %11496 = vmatpush3.bf16.xpose.msra.mxu1 %v16108_v35 }
 0xe68   :  { %11513 = vmatprep.subr.bf16.mxu1 %v15930_v59 }
 0xe6c   :  { %11486 = vmatmul.mubr.msk.bf16.vlgmr.msra.gmra.mxu0 %vm860_vm1, %v6246_v47 }
 0xe6d   :  { %11502 = vmatpush3.bf16.xpose.msra.mxu0 %v16109_v58  ;;  %11509 = vmatprep.mubr.msk.bf16.mxu0 %vm12219_vm7, %v15930_v59 }
 0xe6e   :  { %11498 = vmatmul.mubr.msk.bf16.vlgmr.msra.gmra.mxu1 %vm860_vm1, %v6247_v56  ;;  %11503 = vmatprep.subr.bf16.mxu0 %v15930_v59 }
 0xe6f   :  { %11514 = vmatpush3.bf16.xpose.msra.mxu1 %v16110_v62  ;;  %11521 = vmatprep.mubr.msk.bf16.mxu1 %vm12219_vm7, %v15930_v59 }
 0xe70   :  { %11515 = vmatprep.subr.bf16.mxu1 %v15930_v59 }
 0xe75   :  { %11504 = vmatpush3.bf16.xpose.msra.mxu0 %v16111_v0 }
 0xe76   :  { %11505 = vmatprep.subr.bf16.mxu0 %v15930_v59 }
 0xe77   :  { %11516 = vmatpush3.bf16.xpose.msra.mxu1 %v16112_v42 }
 0xe78   :  { %11517 = vmatprep.subr.bf16.mxu1 %v15930_v59 }
 0xe7d   :  { %11506 = vmatpush3.bf16.xpose.msra.mxu0 %v16113_v8 }
 0xe7e   :  { %11507 = vmatprep.subr.bf16.mxu0 %v15930_v59 }
 0xe7f   :  { %11518 = vmatpush3.bf16.xpose.msra.mxu1 %v16114_v5 }
 0xe80   :  { %11519 = vmatprep.subr.bf16.mxu1 %v15930_v59 }
 0xe85   :  { %11508 = vmatpush3.bf16.xpose.msra.mxu0 %v16115_v31  ;;  %v16137_v31 = vld [vmem:[#allocation40_spill] sm:$0xff] }
 0xe86   :  { %11525 = vmatprep.subr.bf16.mxu0 %v15930_v59 }
 0xe87   :  { %11520 = vmatpush3.bf16.xpose.msra.mxu1 %v16116_v49  ;;  %v16139_v49 = vld [vmem:[#allocation42_spill] sm:$0xff] }
 0xe88   :  { %11537 = vmatprep.subr.bf16.mxu1 %v15930_v59 }
 0xe8c   :  { %11510 = vmatmul.mubr.msk.bf16.vlgmr.msra.gmra.mxu0 %vm860_vm1, %v6248_v32  ;;  %v16140_v32 = vld [vmem:[#allocation43_spill] sm:$0xff] }
 0xe8d   :  { %11526 = vmatpush3.bf16.xpose.msra.mxu0 %v16117_v34  ;;  %11533 = vmatprep.mubr.msk.bf16.mxu0 %vm12219_vm7, %v15930_v59  ;;  %v6254_v34 = vpack.c.bf16 %v6107_v41, %v6107_v41 }
 0xe8e   :  { %11522 = vmatmul.mubr.msk.bf16.vlgmr.msra.gmra.mxu1 %vm860_vm1, %v6249_v1  ;;  %11527 = vmatprep.subr.bf16.mxu0 %v15930_v59  ;;  %v6109_v1 = vcombine.high %v6105_v7, %v6105_v7  ;;  %v6117_v7 = vrot.slane %v14437_v37, %v12466_v52 }
 0xe8f   :  { %11538 = vmatpush3.bf16.xpose.msra.mxu1 %v16118_v57  ;;  %11545 = vmatprep.mubr.msk.bf16.mxu1 %vm12219_vm7, %v15930_v59 }
 0xe90   :  { %11539 = vmatprep.subr.bf16.mxu1 %v15930_v59  ;;  %v6255_v57 = vpack.c.bf16 %v6109_v1, %v6109_v1  ;;  %v16151_v1 = vld [vmem:[#allocation54_spill] sm:$0xff] }
 0xe95   :  { %11528 = vmatpush3.bf16.xpose.msra.mxu0 %v16119_v19 }
 0xe96   :  { %11529 = vmatprep.subr.bf16.mxu0 %v15930_v59 }
 0xe97   :  { %11540 = vmatpush3.bf16.xpose.msra.mxu1 %v16120_v45 }
 0xe98   :  { %11541 = vmatprep.subr.bf16.mxu1 %v15930_v59 }
 0xe9d   :  { %11530 = vmatpush3.bf16.xpose.msra.mxu0 %v16121_v53  ;;  %v16141_v53 = vld [vmem:[#allocation44_spill] sm:$0xff] }
 0xe9e   :  { %11531 = vmatprep.subr.bf16.mxu0 %v15930_v59 }
 0xe9f   :  { %11542 = vmatpush3.bf16.xpose.msra.mxu1 %v16122_v25 }
 0xea0   :  { %11543 = vmatprep.subr.bf16.mxu1 %v15930_v59 }
 0xea5   :  { %11532 = vmatpush3.bf16.xpose.msra.mxu0 %v16123_v50 }
 0xea6   :  { %11549 = vmatprep.subr.bf16.mxu0 %v15930_v59 }
 0xea7   :  { %11544 = vmatpush3.bf16.xpose.msra.mxu1 %v16124_v23 }
 0xea8   :  { %11561 = vmatprep.subr.bf16.mxu1 %v15930_v59 }
 0xeac   :  { %11534 = vmatmul.mubr.msk.bf16.vlgmr.msra.gmra.mxu0 %vm860_vm1, %v6250_v12 }
 0xead   :  { %11550 = vmatpush3.bf16.xpose.msra.mxu0 %v16125_v51  ;;  %11557 = vmatprep.mubr.msk.bf16.mxu0 %vm12219_vm7, %v15930_v59 }
 0xeae   :  { %11546 = vmatmul.mubr.msk.bf16.vlgmr.msra.gmra.mxu1 %vm860_vm1, %v6251_v46  ;;  %11551 = vmatprep.subr.bf16.mxu0 %v15930_v59 }
 0xeaf   :  { %11562 = vmatpush3.bf16.xpose.msra.mxu1 %v16126_v22  ;;  %11569 = vmatprep.mubr.msk.bf16.mxu1 %vm12219_vm7, %v15930_v59 }
 0xeb0   :  { %11563 = vmatprep.subr.bf16.mxu1 %v15930_v59 }
 0xeb5   :  { %11552 = vmatpush3.bf16.xpose.msra.mxu0 %v16127_v15 }
 0xeb6   :  { %11553 = vmatprep.subr.bf16.mxu0 %v15930_v59 }
 0xeb7   :  { %11564 = vmatpush3.bf16.xpose.msra.mxu1 %v16128_v9 }
 0xeb8   :  { %11565 = vmatprep.subr.bf16.mxu1 %v15930_v59 }
 0xebd   :  { %11554 = vmatpush3.bf16.xpose.msra.mxu0 %v16129_v18 }
 0xebe   :  { %11555 = vmatprep.subr.bf16.mxu0 %v15930_v59 }
 0xebf   :  { %11566 = vmatpush3.bf16.xpose.msra.mxu1 %v16130_v44 }
 0xec0   :  { %11567 = vmatprep.subr.bf16.mxu1 %v15930_v59 }
 0xec5   :  { %11556 = vmatpush3.bf16.xpose.msra.mxu0 %v16131_v2  ;;  %v16144_v2 = vld [vmem:[#allocation47_spill] sm:$0xff] }
 0xec6   :  { %11573 = vmatprep.subr.bf16.mxu0 %v15930_v59 }
 0xec7   :  { %11568 = vmatpush3.bf16.xpose.msra.mxu1 %v16132_v6  ;;  %v16146_v6 = vld [vmem:[#allocation49_spill] sm:$0xff] }
 0xec8   :  { %11585 = vmatprep.subr.bf16.mxu1 %v15930_v59 }
 0xecc   :  { %11558 = vmatmul.mubr.msk.bf16.vlgmr.msra.gmra.mxu0 %vm860_vm1, %v6252_v11  ;;  %v6309_v21 = vpop.f32.mrf.mxu0  ;;  %v6125_v11 = vcombine.high %v6117_v7, %v6117_v7 }
 0xecd   :  { %11574 = vmatpush3.bf16.xpose.msra.mxu0 %v16133_v24  ;;  %11581 = vmatprep.mubr.msk.bf16.mxu0 %vm12219_vm7, %v15930_v59  ;;  %v7648_v33 = vpack.c.bf16 %v6309_v21, %v6309_v21  ;;  %v6133_v21 = vrot.slane %v6117_v7, %v12466_v52  ;;  %v16148_v24 = vld [vmem:[#allocation51_spill] sm:$0xff] }
 0xece   :  { %11570 = vmatmul.mubr.msk.bf16.vlgmr.msra.gmra.mxu1 %vm860_vm1, %v6253_v13  ;;  %v11415_v27 = vpop.f32.mrf.mxu0  ;;  %v6352_v28 = vpop.f32.mrf.mxu1  ;;  %11575 = vmatprep.subr.bf16.mxu0 %v15930_v59  ;;  %v16147_v13 = vld [vmem:[#allocation50_spill] sm:$0xff] }
 0xecf   :  { %v7649_v35 = vpack.c.bf16 %v6352_v28, %v6352_v28  ;;  %11586 = vmatpush3.bf16.xpose.msra.mxu1 %v16134_v43  ;;  %11593 = vmatprep.mubr.msk.bf16.mxu1 %vm12219_vm7, %v15930_v59  ;;  %v7712_v42 = vunpack.c.l.b16 %v7648_v33  ;;  %v6147_v27 = vrot.slane %v6125_v11, %v12466_v52  ;;  %v6256_v28 = vpack.c.bf16 %v6133_v21, %v6133_v21 }
 0xed0   :  { %v6312_v47 = vpop.f32.mrf.mxu0  ;;  %v11427_v56 = vpop.f32.mrf.mxu1  ;;  %11587 = vmatprep.subr.bf16.mxu1 %v15930_v59 }
 0xed1   :  { %v7713_v58 = vunpack.c.l.b16 %v7649_v35  ;;  %v6257_v33 = vpack.c.bf16 %v6147_v27, %v6147_v27  ;;  %v16149_v47 = vld [vmem:[#allocation52_spill] sm:$0xff] }
 0xed2   :  { %v11416_v62 = vpop.f32.mrf.mxu0  ;;  %v6355_v0 = vpop.f32.mrf.mxu1 }
 0xed3   :  { %v7744_v55 = vrot.slane %v7713_v58, 7 }
 0xed4   :  { %v11428_v8 = vpop.f32.mrf.mxu1 }
 0xed5   :  { %v7745_v5 = vsel %vm3338_vm8, %v7744_v55, %v7712_v42  ;;  %11576 = vmatpush3.bf16.xpose.msra.mxu0 %v16135_v29  ;;  %v16150_v42 = vld [vmem:[#allocation53_spill] sm:$0xff] }
 0xed6   :  { %11577 = vmatprep.subr.bf16.mxu0 %v15930_v59 }
 0xed7   :  { %11588 = vmatpush3.bf16.xpose.msra.mxu1 %v16136_v17 }
 0xed8   :  { %11589 = vmatprep.subr.bf16.mxu1 %v15930_v59 }
 0xedd   :  { %11578 = vmatpush3.bf16.xpose.msra.mxu0 %v16137_v31 }
 0xede   :  { %11579 = vmatprep.subr.bf16.mxu0 %v15930_v59 }
 0xedf   :  { %11590 = vmatpush3.bf16.xpose.msra.mxu1 %v16138_v38 }
 0xee0   :  { %11591 = vmatprep.subr.bf16.mxu1 %v15930_v59 }
 0xee5   :  { %11580 = vmatpush3.bf16.xpose.msra.mxu0 %v16139_v49 }
 0xee6   :  { %11597 = vmatprep.subr.bf16.mxu0 %v15930_v59 }
 0xee7   :  { %11592 = vmatpush3.bf16.xpose.msra.mxu1 %v16140_v32 }
 0xee8   :  { %11609 = vmatprep.subr.bf16.mxu1 %v15930_v59 }
 0xeec   :  { %v6395_v19 = vpop.f32.mrf.mxu0  ;;  %11582 = vmatmul.mubr.msk.bf16.vlgmr.msra.gmra.mxu0 %vm860_vm1, %v6254_v34  ;;  %v16152_v34 = vld [vmem:[#allocation55_spill] sm:$0xff] }
 0xeed   :  { %v7650_v45 = vpack.c.bf16 %v6395_v19, %v6395_v19  ;;  %11598 = vmatpush3.bf16.xpose.msra.mxu0 %v16141_v53  ;;  %11605 = vmatprep.mubr.msk.bf16.mxu0 %vm12219_vm7, %v15930_v59  ;;  %v16154_v19 = vld [vmem:[#allocation57_spill] sm:$0xff]  ;;  %v6155_v53 = vcombine.high %v6133_v21, %v6133_v21  ;;  %v16159_v21 = vld [vmem:[#allocation62_spill] sm:$0xff] }
 0xeee   :  { %v11439_v25 = vpop.f32.mrf.mxu0  ;;  %v6438_v50 = vpop.f32.mrf.mxu1  ;;  %11594 = vmatmul.mubr.msk.bf16.vlgmr.msra.gmra.mxu1 %vm860_vm1, %v6255_v57  ;;  %11599 = vmatprep.subr.bf16.mxu0 %v15930_v59  ;;  %v16153_v57 = vld [vmem:[#allocation56_spill] sm:$0xff] }
 0xeef   :  { %v7714_v16 = vunpack.c.l.b16 %v7650_v45  ;;  %v7651_v23 = vpack.c.bf16 %v6438_v50, %v6438_v50  ;;  %11610 = vmatpush3.bf16.xpose.msra.mxu1 %v16142_v60  ;;  %11617 = vmatprep.mubr.msk.bf16.mxu1 %vm12219_vm7, %v15930_v59  ;;  %v16155_v45 = vld [vmem:[#allocation58_spill] sm:$0xff]  ;;  %v16156_v25 = vld [vmem:[#allocation59_spill] sm:$0xff]  ;;  %v6157_v50 = vcombine.high %v6147_v27, %v6147_v27  ;;  %v6110_v27 = vcombine.high %v14437_v37, %v14437_v37 }
 0xef0   :  { %v6398_v12 = vpop.f32.mrf.mxu0  ;;  %v11451_v46 = vpop.f32.mrf.mxu1  ;;  %11611 = vmatprep.subr.bf16.mxu1 %v15930_v59 }
 0xef1   :  { %v7746_v51 = vrot.slane %v7714_v16, 6  ;;  %v7715_v22 = vunpack.c.l.b16 %v7651_v23  ;;  %v6258_v16 = vpack.c.bf16 %v6155_v53, %v6155_v53  ;;  %v6259_v23 = vpack.c.bf16 %v6157_v50, %v6157_v50  ;;  %v16157_v46 = vld [vmem:[#allocation60_spill] sm:$0xff]  ;;  %v16167_v53 = vld [vmem:[#allocation70_spill] sm:$0xff] }
 0xef2   :  { %v11440_v15 = vpop.f32.mrf.mxu0  ;;  %v6441_v9 = vpop.f32.mrf.mxu1  ;;  %v16169_v50 = vld [vmem:[#allocation72_spill] sm:$0xff] }
 0xef3   :  { %v7747_v14 = vsel %vm3341_vm9, %v7746_v51, %v7745_v5  ;;  %v7748_v18 = vrot.slane %v7715_v22, 5 }
 0xef4   :  { %v11452_v44 = vpop.f32.mrf.mxu1 }
 0xef5   :  { %v7749_v61 = vsel %vm3344_vm10, %v7748_v18, %v7747_v14  ;;  %11600 = vmatpush3.bf16.xpose.msra.mxu0 %v16143_v63  ;;  %v16158_v14 = vld [vmem:[#allocation61_spill] sm:$0xff] }
 0xef6   :  { %11601 = vmatprep.subr.bf16.mxu0 %v15930_v59 }
 0xef7   :  { %11612 = vmatpush3.bf16.xpose.msra.mxu1 %v16144_v2 }
 0xef8   :  { %11613 = vmatprep.subr.bf16.mxu1 %v15930_v59 }
 0xefd   :  { %11602 = vmatpush3.bf16.xpose.msra.mxu0 %v16145_v3 }
 0xefe   :  { %11603 = vmatprep.subr.bf16.mxu0 %v15930_v59 }
 0xeff   :  { %11614 = vmatpush3.bf16.xpose.msra.mxu1 %v16146_v6 }
 0xf00   :  { %11615 = vmatprep.subr.bf16.mxu1 %v15930_v59 }
 0xf05   :  { %11604 = vmatpush3.bf16.xpose.msra.mxu0 %v16147_v13 }
 0xf06   :  { %11621 = vmatprep.subr.bf16.mxu0 %v15930_v59 }
 0xf07   :  { %11616 = vmatpush3.bf16.xpose.msra.mxu1 %v16148_v24  ;;  %v16160_v24 = vld [vmem:[#allocation63_spill] sm:$0xff] }
 0xf08   :  { %11633 = vmatprep.subr.bf16.mxu1 %v15930_v59 }
 0xf0c   :  { %v6481_v35 = vpop.f32.mrf.mxu0  ;;  %11606 = vmatmul.mubr.msk.bf16.vlgmr.msra.gmra.mxu0 %vm860_vm1, %v6256_v28  ;;  %v16161_v28 = vld [vmem:[#allocation64_spill] sm:$0xff] }
 0xf0d   :  { %v7652_v43 = vpack.c.bf16 %v6481_v35, %v6481_v35  ;;  %11622 = vmatpush3.bf16.xpose.msra.mxu0 %v16149_v47  ;;  %11629 = vmatprep.mubr.msk.bf16.mxu0 %vm12219_vm7, %v15930_v59  ;;  %v6124_v35 = vrot.slane %v6110_v27, %v12466_v52  ;;  %v16163_v47 = vld [vmem:[#allocation66_spill] sm:$0xff] }
 0xf0e   :  { %v11463_v56 = vpop.f32.mrf.mxu0  ;;  %v6524_v58 = vpop.f32.mrf.mxu1  ;;  %11618 = vmatmul.mubr.msk.bf16.vlgmr.msra.gmra.mxu1 %vm860_vm1, %v6257_v33  ;;  %11623 = vmatprep.subr.bf16.mxu0 %v15930_v59  ;;  %v16162_v33 = vld [vmem:[#allocation65_spill] sm:$0xff] }
 0xf0f   :  { %v7716_v62 = vunpack.c.l.b16 %v7652_v43  ;;  %v7653_v0 = vpack.c.bf16 %v6524_v58, %v6524_v58  ;;  %11634 = vmatpush3.bf16.xpose.msra.mxu1 %v16150_v42  ;;  %11641 = vmatprep.mubr.msk.bf16.mxu1 %vm12219_vm7, %v15930_v59  ;;  %v6126_v43 = vcombine.high %v6124_v35, %v6124_v35  ;;  %v6140_v56 = vrot.slane %v6124_v35, %v12466_v52  ;;  %v16164_v58 = vld [vmem:[#allocation67_spill] sm:$0xff] }
 0xf10   :  { %v6484_v55 = vpop.f32.mrf.mxu0  ;;  %v11475_v8 = vpop.f32.mrf.mxu1  ;;  %11635 = vmatprep.subr.bf16.mxu1 %v15930_v59 }
 0xf11   :  { %v7750_v5 = vrot.slane %v7716_v62, 4  ;;  %v7717_v29 = vunpack.c.l.b16 %v7653_v0  ;;  %v6154_v37 = vrot.slane %v6126_v43, %v12466_v52  ;;  %v6260_v62 = vpack.c.bf16 %v6140_v56, %v6140_v56  ;;  %v16165_v55 = vld [vmem:[#allocation68_spill] sm:$0xff]  ;;  %v16175_v43 = vld [vmem:[#allocation78_spill] sm:$0xff] }
 0xf12   :  { %v11464_v17 = vpop.f32.mrf.mxu0  ;;  %v6527_v31 = vpop.f32.mrf.mxu1 }
 0xf13   :  { %v7751_v38 = vsel %vm3347_vm11, %v7750_v5, %v7749_v61  ;;  %v7752_v49 = vrot.slane %v7717_v29, 3  ;;  %v6261_v0 = vpack.c.bf16 %v6154_v37, %v6154_v37  ;;  %v16166_v31 = vld [vmem:[#allocation69_spill] sm:$0xff] }
 0xf14   :  { %v11476_v41 = vpop.f32.mrf.mxu1 }
 0xf15   :  { %v7753_v32 = vsel %vm3350_vm12, %v7752_v49, %v7751_v38  ;;  %11624 = vmatpush3.bf16.xpose.msra.mxu0 %v16151_v1 }
 0xf16   :  { %11625 = vmatprep.subr.bf16.mxu0 %v15930_v59 }
 0xf17   :  { %11636 = vmatpush3.bf16.xpose.msra.mxu1 %v16152_v34 }
 0xf18   :  { %11637 = vmatprep.subr.bf16.mxu1 %v15930_v59 }
 0xf1d   :  { %11626 = vmatpush3.bf16.xpose.msra.mxu0 %v16153_v57 }
 0xf1e   :  { %11627 = vmatprep.subr.bf16.mxu0 %v15930_v59 }
 0xf1f   :  { %11638 = vmatpush3.bf16.xpose.msra.mxu1 %v16154_v19 }
 0xf20   :  { %11639 = vmatprep.subr.bf16.mxu1 %v15930_v59 }
 0xf25   :  { %11628 = vmatpush3.bf16.xpose.msra.mxu0 %v16155_v45 }
 0xf26   :  { %11645 = vmatprep.subr.bf16.mxu0 %v15930_v59 }
 0xf27   :  { %11640 = vmatpush3.bf16.xpose.msra.mxu1 %v16156_v25  ;;  %v16168_v25 = vld [vmem:[#allocation71_spill] sm:$0xff] }
 0xf28   :  { %11657 = vmatprep.subr.bf16.mxu1 %v15930_v59 }
 0xf2c   :  { %v6567_v60 = vpop.f32.mrf.mxu0  ;;  %11630 = vmatmul.mubr.msk.bf16.vlgmr.msra.gmra.mxu0 %vm860_vm1, %v6258_v16  ;;  %v16170_v16 = vld [vmem:[#allocation73_spill] sm:$0xff] }
 0xf2d   :  { %v7654_v12 = vpack.c.bf16 %v6567_v60, %v6567_v60  ;;  %11646 = vmatpush3.bf16.xpose.msra.mxu0 %v16157_v46  ;;  %11653 = vmatprep.mubr.msk.bf16.mxu0 %vm12219_vm7, %v15930_v59  ;;  %v6156_v60 = vcombine.high %v6140_v56, %v6140_v56  ;;  %v6158_v46 = vcombine.high %v6154_v37, %v6154_v37  ;;  %v16177_v56 = vld [vmem:[#allocation80_spill] sm:$0xff] }
 0xf2e   :  { %v11487_v51 = vpop.f32.mrf.mxu0  ;;  %v6610_v22 = vpop.f32.mrf.mxu1  ;;  %11642 = vmatmul.mubr.msk.bf16.vlgmr.msra.gmra.mxu1 %vm860_vm1, %v6259_v23  ;;  %11647 = vmatprep.subr.bf16.mxu0 %v15930_v59  ;;  %v16171_v23 = vld [vmem:[#allocation74_spill] sm:$0xff]  ;;  %v6166_v37 = vrot.slane %v14525_v36, %v12466_v52 }
 0xf2f   :  { %v7718_v15 = vunpack.c.l.b16 %v7654_v12  ;;  %v7655_v9 = vpack.c.bf16 %v6610_v22, %v6610_v22  ;;  %11658 = vmatpush3.bf16.xpose.msra.mxu1 %v16158_v14  ;;  %11665 = vmatprep.mubr.msk.bf16.mxu1 %vm12219_vm7, %v15930_v59  ;;  %v16172_v12 = vld [vmem:[#allocation75_spill] sm:$0xff]  ;;  %v6262_v51 = vpack.c.bf16 %v6156_v60, %v6156_v60  ;;  %v6263_v22 = vpack.c.bf16 %v6158_v46, %v6158_v46  ;;  %v16173_v14 = vld [vmem:[#allocation76_spill] sm:$0xff]  ;;  %v16183_v46 = vld [vmem:[#allocation86_spill] sm:$0xff] }
 0xf30   :  { %v6570_v18 = vpop.f32.mrf.mxu0  ;;  %v11499_v44 = vpop.f32.mrf.mxu1  ;;  %11659 = vmatprep.subr.bf16.mxu1 %v15930_v59 }
 0xf31   :  { %v7754_v61 = vrot.slane %v7718_v15, 2  ;;  %v7719_v63 = vunpack.c.l.b16 %v7655_v9 }
 0xf32   :  { %v11488_v2 = vpop.f32.mrf.mxu0  ;;  %v6613_v3 = vpop.f32.mrf.mxu1 }
 0xf33   :  { %v7755_v6 = vsel %vm3353_vm13, %v7754_v61, %v7753_v32  ;;  %v7756_v7 = vrot.slane %v7719_v63, 1  ;;  %v16174_v2 = vld [vmem:[#allocation77_spill] sm:$0xff] }
 0xf34   :  { %v11500_v11 = vpop.f32.mrf.mxu1 }
 0xf35   :  { %v14672_v13 = vsel %vm3356_vm14, %v7756_v7, %v7755_v6  ;;  %11648 = vmatpush3.bf16.xpose.msra.mxu0 %v16159_v21 }
 0xf36   :  { %11649 = vmatprep.subr.bf16.mxu0 %v15930_v59 }
 0xf37   :  { %11660 = vmatpush3.bf16.xpose.msra.mxu1 %v16160_v24 }
 0xf38   :  { %11661 = vmatprep.subr.bf16.mxu1 %v15930_v59 }
 0xf3d   :  { %11650 = vmatpush3.bf16.xpose.msra.mxu0 %v16161_v28 }
 0xf3e   :  { %11651 = vmatprep.subr.bf16.mxu0 %v15930_v59 }
 0xf3f   :  { %11662 = vmatpush3.bf16.xpose.msra.mxu1 %v16162_v33 }
 0xf40   :  { %11663 = vmatprep.subr.bf16.mxu1 %v15930_v59 }
 0xf45   :  { %11652 = vmatpush3.bf16.xpose.msra.mxu0 %v16163_v47  ;;  %v16176_v47 = vld [vmem:[#allocation79_spill] sm:$0xff] }
 0xf46   :  { %11669 = vmatprep.subr.bf16.mxu0 %v15930_v59 }
 0xf47   :  { %11664 = vmatpush3.bf16.xpose.msra.mxu1 %v16164_v58  ;;  %v16178_v58 = vld [vmem:[#allocation81_spill] sm:$0xff] }
 0xf48   :  { %11681 = vmatprep.subr.bf16.mxu1 %v15930_v59 }
 0xf4c   :  { %v6653_v42 = vpop.f32.mrf.mxu0  ;;  %11654 = vmatmul.mubr.msk.bf16.vlgmr.msra.gmra.mxu0 %vm860_vm1, %v6260_v62  ;;  %v6174_v62 = vcombine.high %v6166_v37, %v6166_v37 }
 0xf4d   :  { %11670 = vmatpush3.bf16.xpose.msra.mxu0 %v16165_v55  ;;  %11677 = vmatprep.mubr.msk.bf16.mxu0 %vm12219_vm7, %v15930_v59  ;;  %v7656_v29 = vpack.c.bf16 %v6653_v42, %v6653_v42  ;;  %v6182_v42 = vrot.slane %v6166_v37, %v12466_v52  ;;  %v16180_v55 = vld [vmem:[#allocation83_spill] sm:$0xff] }
 0xf4e   :  { %v11511_v8 = vpop.f32.mrf.mxu0  ;;  %v6696_v5 = vpop.f32.mrf.mxu1  ;;  %11666 = vmatmul.mubr.msk.bf16.vlgmr.msra.gmra.mxu1 %vm860_vm1, %v6261_v0  ;;  %11671 = vmatprep.subr.bf16.mxu0 %v15930_v59  ;;  %v16179_v0 = vld [vmem:[#allocation82_spill] sm:$0xff] }
 0xf4f   :  { %v7657_v17 = vpack.c.bf16 %v6696_v5, %v6696_v5  ;;  %11682 = vmatpush3.bf16.xpose.msra.mxu1 %v16166_v31  ;;  %11689 = vmatprep.mubr.msk.bf16.mxu1 %vm12219_vm7, %v15930_v59  ;;  %v7720_v34 = vunpack.c.l.b16 %v7656_v29  ;;  %v6196_v8 = vrot.slane %v6174_v62, %v12466_v52  ;;  %v6264_v5 = vpack.c.bf16 %v6182_v42, %v6182_v42 }
 0xf50   :  { %v6656_v38 = vpop.f32.mrf.mxu0  ;;  %v11523_v49 = vpop.f32.mrf.mxu1  ;;  %11683 = vmatprep.subr.bf16.mxu1 %v15930_v59 }
 0xf51   :  { %v7721_v41 = vunpack.c.l.b16 %v7657_v17  ;;  %v6265_v29 = vpack.c.bf16 %v6196_v8, %v6196_v8  ;;  %v16181_v38 = vld [vmem:[#allocation84_spill] sm:$0xff] }
 0xf52   :  { %v11512_v32 = vpop.f32.mrf.mxu0  ;;  %v6699_v1 = vpop.f32.mrf.mxu1 }
 0xf53   :  { %v7758_v57 = vrot.slane %v7721_v41, 7 }
 0xf54   :  { %v11524_v19 = vpop.f32.mrf.mxu1 }
 0xf55   :  { %v7759_v45 = vsel %vm3338_vm8, %v7758_v57, %v7720_v34  ;;  %11672 = vmatpush3.bf16.xpose.msra.mxu0 %v16167_v53  ;;  %v16182_v34 = vld [vmem:[#allocation85_spill] sm:$0xff] }
 0xf56   :  { %11673 = vmatprep.subr.bf16.mxu0 %v15930_v59 }
 0xf57   :  { %11684 = vmatpush3.bf16.xpose.msra.mxu1 %v16168_v25 }
 0xf58   :  { %11685 = vmatprep.subr.bf16.mxu1 %v15930_v59 }
 0xf5d   :  { %11674 = vmatpush3.bf16.xpose.msra.mxu0 %v16169_v50 }
 0xf5e   :  { %11675 = vmatprep.subr.bf16.mxu0 %v15930_v59 }
 0xf5f   :  { %11686 = vmatpush3.bf16.xpose.msra.mxu1 %v16170_v16 }
 0xf60   :  { %11687 = vmatprep.subr.bf16.mxu1 %v15930_v59 }
 0xf65   :  { %11676 = vmatpush3.bf16.xpose.msra.mxu0 %v16171_v23 }
 0xf66   :  { %11693 = vmatprep.subr.bf16.mxu0 %v15930_v59 }
 0xf67   :  { %11688 = vmatpush3.bf16.xpose.msra.mxu1 %v16172_v12 }
 0xf68   :  { %11705 = vmatprep.subr.bf16.mxu1 %v15930_v59 }
 0xf6c   :  { %v6739_v15 = vpop.f32.mrf.mxu0  ;;  %11678 = vmatmul.mubr.msk.bf16.vlgmr.msra.gmra.mxu0 %vm860_vm1, %v6262_v51  ;;  %v16184_v51 = vld [vmem:[#allocation87_spill] sm:$0xff] }
 0xf6d   :  { %v7658_v9 = vpack.c.bf16 %v6739_v15, %v6739_v15  ;;  %11694 = vmatpush3.bf16.xpose.msra.mxu0 %v16173_v14  ;;  %11701 = vmatprep.mubr.msk.bf16.mxu0 %vm12219_vm7, %v15930_v59  ;;  %v16186_v15 = vld [vmem:[#allocation89_spill] sm:$0xff]  ;;  %v6204_v14 = vcombine.high %v6182_v42, %v6182_v42  ;;  %v16191_v42 = vld [vmem:[#allocation94_spill] sm:$0xff] }
 0xf6e   :  { %v11535_v18 = vpop.f32.mrf.mxu0  ;;  %v6782_v44 = vpop.f32.mrf.mxu1  ;;  %11690 = vmatmul.mubr.msk.bf16.vlgmr.msra.gmra.mxu1 %vm860_vm1, %v6263_v22  ;;  %11695 = vmatprep.subr.bf16.mxu0 %v15930_v59  ;;  %v16185_v22 = vld [vmem:[#allocation88_spill] sm:$0xff] }
 0xf6f   :  { %v7722_v61 = vunpack.c.l.b16 %v7658_v9  ;;  %v7659_v63 = vpack.c.bf16 %v6782_v44, %v6782_v44  ;;  %11706 = vmatpush3.bf16.xpose.msra.mxu1 %v16174_v2  ;;  %11713 = vmatprep.mubr.msk.bf16.mxu1 %vm12219_vm7, %v15930_v59  ;;  %v16187_v9 = vld [vmem:[#allocation90_spill] sm:$0xff]  ;;  %v16188_v18 = vld [vmem:[#allocation91_spill] sm:$0xff]  ;;  %v6206_v44 = vcombine.high %v6196_v8, %v6196_v8 }
 0xf70   :  { %v6742_v3 = vpop.f32.mrf.mxu0  ;;  %v11547_v6 = vpop.f32.mrf.mxu1  ;;  %11707 = vmatprep.subr.bf16.mxu1 %v15930_v59  ;;  %v16192_v8 = vld [vmem:[#allocation95_spill] sm:$0xff] }
 0xf71   :  { %v7760_v7 = vrot.slane %v7722_v61, 6  ;;  %v7723_v11 = vunpack.c.l.b16 %v7659_v63  ;;  %v6266_v61 = vpack.c.bf16 %v6204_v14, %v6204_v14  ;;  %v6267_v63 = vpack.c.bf16 %v6206_v44, %v6206_v44  ;;  %v16189_v6 = vld [vmem:[#allocation92_spill] sm:$0xff]  ;;  %v16199_v14 = vld [vmem:[#allocation102_spill] sm:$0xff] }
 0xf72   :  { %v11536_v21 = vpop.f32.mrf.mxu0  ;;  %v6785_v24 = vpop.f32.mrf.mxu1  ;;  %v16201_v44 = vld [vmem:[#allocation104_spill] sm:$0xff] }
 0xf73   :  { %v7761_v27 = vsel %vm3341_vm9, %v7760_v7, %v7759_v45  ;;  %v7762_v28 = vrot.slane %v7723_v11, 5 }
 0xf74   :  { %v11548_v33 = vpop.f32.mrf.mxu1 }
 0xf75   :  { %v7763_v35 = vsel %vm3344_vm10, %v7762_v28, %v7761_v27  ;;  %11696 = vmatpush3.bf16.xpose.msra.mxu0 %v16175_v43  ;;  %v16190_v27 = vld [vmem:[#allocation93_spill] sm:$0xff] }
 0xf76   :  { %11697 = vmatprep.subr.bf16.mxu0 %v15930_v59 }
 0xf77   :  { %11708 = vmatpush3.bf16.xpose.msra.mxu1 %v16176_v47 }
 0xf78   :  { %11709 = vmatprep.subr.bf16.mxu1 %v15930_v59 }
 0xf7d   :  { %11698 = vmatpush3.bf16.xpose.msra.mxu0 %v16177_v56 }
 0xf7e   :  { %11699 = vmatprep.subr.bf16.mxu0 %v15930_v59 }
 0xf7f   :  { %11710 = vmatpush3.bf16.xpose.msra.mxu1 %v16178_v58 }
 0xf80   :  { %11711 = vmatprep.subr.bf16.mxu1 %v15930_v59 }
 0xf85   :  { %11700 = vmatpush3.bf16.xpose.msra.mxu0 %v16179_v0 }
 0xf86   :  { %11717 = vmatprep.subr.bf16.mxu0 %v15930_v59 }
 0xf87   :  { %11712 = vmatpush3.bf16.xpose.msra.mxu1 %v16180_v55 }
 0xf88   :  { %11729 = vmatprep.subr.bf16.mxu1 %v15930_v59 }
 0xf8c   :  { %v6825_v17 = vpop.f32.mrf.mxu0  ;;  %11702 = vmatmul.mubr.msk.bf16.vlgmr.msra.gmra.mxu0 %vm860_vm1, %v6264_v5  ;;  %v6159_v5 = vcombine.high %v14525_v36, %v14525_v36 }
 0xf8d   :  { %v7660_v31 = vpack.c.bf16 %v6825_v17, %v6825_v17  ;;  %11718 = vmatpush3.bf16.xpose.msra.mxu0 %v16181_v38  ;;  %11725 = vmatprep.mubr.msk.bf16.mxu0 %vm12219_vm7, %v15930_v59  ;;  %v16194_v17 = vld [vmem:[#allocation97_spill] sm:$0xff] }
 0xf8e   :  { %v11559_v49 = vpop.f32.mrf.mxu0  ;;  %v6868_v41 = vpop.f32.mrf.mxu1  ;;  %11714 = vmatmul.mubr.msk.bf16.vlgmr.msra.gmra.mxu1 %vm860_vm1, %v6265_v29  ;;  %11719 = vmatprep.subr.bf16.mxu0 %v15930_v59  ;;  %v16193_v29 = vld [vmem:[#allocation96_spill] sm:$0xff] }
 0xf8f   :  { %v7724_v32 = vunpack.c.l.b16 %v7660_v31  ;;  %v7661_v1 = vpack.c.bf16 %v6868_v41, %v6868_v41  ;;  %11730 = vmatpush3.bf16.xpose.msra.mxu1 %v16182_v34  ;;  %11737 = vmatprep.mubr.msk.bf16.mxu1 %vm12219_vm7, %v15930_v59  ;;  %v6173_v31 = vrot.slane %v6159_v5, %v12466_v52  ;;  %v16195_v49 = vld [vmem:[#allocation98_spill] sm:$0xff] }
 0xf90   :  { %v6828_v57 = vpop.f32.mrf.mxu0  ;;  %v11571_v19 = vpop.f32.mrf.mxu1  ;;  %11731 = vmatprep.subr.bf16.mxu1 %v15930_v59 }
 0xf91   :  { %v7764_v45 = vrot.slane %v7724_v32, 4  ;;  %v7725_v53 = vunpack.c.l.b16 %v7661_v1  ;;  %v6175_v38 = vcombine.high %v6173_v31, %v6173_v31  ;;  %v6189_v41 = vrot.slane %v6173_v31, %v12466_v52  ;;  %v16196_v32 = vld [vmem:[#allocation99_spill] sm:$0xff]  ;;  %v16197_v19 = vld [vmem:[#allocation100_spill] sm:$0xff] }
 0xf92   :  { %v11560_v25 = vpop.f32.mrf.mxu0  ;;  %v6871_v50 = vpop.f32.mrf.mxu1 }
 0xf93   :  { %v7765_v16 = vsel %vm3347_vm11, %v7764_v45, %v7763_v35  ;;  %v7766_v23 = vrot.slane %v7725_v53, 3  ;;  %v6203_v36 = vrot.slane %v6175_v38, %v12466_v52  ;;  %v6268_v1 = vpack.c.bf16 %v6189_v41, %v6189_v41  ;;  %v16198_v50 = vld [vmem:[#allocation101_spill] sm:$0xff] }
 0xf94   :  { %v11572_v60 = vpop.f32.mrf.mxu1 }
 0xf95   :  { %v7767_v12 = vsel %vm3350_vm12, %v7766_v23, %v7765_v16  ;;  %11720 = vmatpush3.bf16.xpose.msra.mxu0 %v16183_v46  ;;  %v6269_v34 = vpack.c.bf16 %v6203_v36, %v6203_v36 }
 0xf96   :  { %11721 = vmatprep.subr.bf16.mxu0 %v15930_v59 }
 0xf97   :  { %11732 = vmatpush3.bf16.xpose.msra.mxu1 %v16184_v51 }
 0xf98   :  { %11733 = vmatprep.subr.bf16.mxu1 %v15930_v59 }
 0xf9d   :  { %11722 = vmatpush3.bf16.xpose.msra.mxu0 %v16185_v22 }
 0xf9e   :  { %11723 = vmatprep.subr.bf16.mxu0 %v15930_v59 }
 0xf9f   :  { %11734 = vmatpush3.bf16.xpose.msra.mxu1 %v16186_v15 }
 0xfa0   :  { %11735 = vmatprep.subr.bf16.mxu1 %v15930_v59 }
 0xfa5   :  { %11724 = vmatpush3.bf16.xpose.msra.mxu0 %v16187_v9 }
 0xfa6   :  { %11741 = vmatprep.subr.bf16.mxu0 %v15930_v59 }
 0xfa7   :  { %11736 = vmatpush3.bf16.xpose.msra.mxu1 %v16188_v18  ;;  %v16200_v18 = vld [vmem:[#allocation103_spill] sm:$0xff] }
 0xfa8   :  { %11753 = vmatprep.subr.bf16.mxu1 %v15930_v59 }
 0xfac   :  { %v6911_v2 = vpop.f32.mrf.mxu0  ;;  %11726 = vmatmul.mubr.msk.bf16.vlgmr.msra.gmra.mxu0 %vm860_vm1, %v6266_v61  ;;  %v16202_v61 = vld [vmem:[#allocation105_spill] sm:$0xff] }
 0xfad   :  { %v7662_v3 = vpack.c.bf16 %v6911_v2, %v6911_v2  ;;  %11742 = vmatpush3.bf16.xpose.msra.mxu0 %v16189_v6  ;;  %11749 = vmatprep.mubr.msk.bf16.mxu0 %vm12219_vm7, %v15930_v59  ;;  %v6205_v2 = vcombine.high %v6189_v41, %v6189_v41  ;;  %v6207_v6 = vcombine.high %v6203_v36, %v6203_v36  ;;  %v12181_v36 = vld [vmem:[%s16001_s24 + $0x10] sm:$0xff] }
 0xfae   :  { %v11583_v7 = vpop.f32.mrf.mxu0  ;;  %v6954_v11 = vpop.f32.mrf.mxu1  ;;  %11738 = vmatmul.mubr.msk.bf16.vlgmr.msra.gmra.mxu1 %vm860_vm1, %v6267_v63  ;;  %11743 = vmatprep.subr.bf16.mxu0 %v15930_v59  ;;  %v16203_v63 = vld [vmem:[#allocation106_spill] sm:$0xff] }
 0xfaf   :  { %v7726_v21 = vunpack.c.l.b16 %v7662_v3  ;;  %v7663_v24 = vpack.c.bf16 %v6954_v11, %v6954_v11  ;;  %11754 = vmatpush3.bf16.xpose.msra.mxu1 %v16190_v27  ;;  %11761 = vmatprep.mubr.msk.bf16.mxu1 %vm12219_vm7, %v15930_v59  ;;  %v16204_v3 = vld [vmem:[#allocation107_spill] sm:$0xff]  ;;  %v12176_v7 = vld [vmem:[%s16001_s24 + $0x38] sm:$0xff]  ;;  %v6270_v11 = vpack.c.bf16 %v6205_v2, %v6205_v2  ;;  %v14825_v27 = vpop.permute.xlu0 %7849 }
 0xfb0   :  { %v6914_v28 = vpop.f32.mrf.mxu0  ;;  %v11595_v33 = vpop.f32.mrf.mxu1  ;;  %11755 = vmatprep.subr.bf16.mxu1 %v15930_v59 }
 0xfb1   :  { %v7768_v35 = vrot.slane %v7726_v21, 2  ;;  %v7727_v43 = vunpack.c.l.b16 %v7663_v24  ;;  %v6271_v21 = vpack.c.bf16 %v6207_v6, %v6207_v6 }
 0xfb2   :  { %v11584_v47 = vpop.f32.mrf.mxu0  ;;  %v6957_v56 = vpop.f32.mrf.mxu1 }
 0xfb3   :  { %v7769_v58 = vsel %vm3353_vm13, %v7768_v35, %v7767_v12  ;;  %v7770_v37 = vrot.slane %v7727_v43, 1 }
 0xfb4   :  { %v11596_v62 = vpop.f32.mrf.mxu1 }
 0xfb5   :  { %v14778_v0 = vsel %vm3356_vm14, %v7770_v37, %v7769_v58  ;;  %11744 = vmatpush3.bf16.xpose.msra.mxu0 %v16191_v42  ;;  %v12177_v37 = vld [vmem:[%s16001_s24 + $0x30] sm:$0xff] }
 0xfb6   :  { %v7800_v55 = vpack.c.b16 %v14778_v0, %v14672_v13  ;;  %11745 = vmatprep.subr.bf16.mxu0 %v15930_v59  ;;  %v12202_v13 = vld [vmem:[%s15644_s9 + $0x68] sm:$0xff]  ;;  %v12203_v0 = vld [vmem:[%s15644_s9 + $0x60] sm:$0xff] }
 0xfb7   :  { %11756 = vmatpush3.bf16.xpose.msra.mxu1 %v16192_v8 }
 0xfb8   :  { %11757 = vmatprep.subr.bf16.mxu1 %v15930_v59 }
 0xfbd   :  { %11746 = vmatpush3.bf16.xpose.msra.mxu0 %v16193_v29  ;;  %v12178_v29 = vld [vmem:[%s16001_s24 + $0x28] sm:$0xff] }
 0xfbe   :  { %11747 = vmatprep.subr.bf16.mxu0 %v15930_v59 }
 0xfbf   :  { %11758 = vmatpush3.bf16.xpose.msra.mxu1 %v16194_v17 }
 0xfc0   :  { %11759 = vmatprep.subr.bf16.mxu1 %v15930_v59 }
 0xfc5   :  { %11748 = vmatpush3.bf16.xpose.msra.mxu0 %v16195_v49  ;;  %v12179_v49 = vld [vmem:[%s16001_s24 + $0x20] sm:$0xff] }
 0xfc6   :  { %11765 = vmatprep.subr.bf16.mxu0 %v15930_v59 }
 0xfc7   :  { %11760 = vmatpush3.bf16.xpose.msra.mxu1 %v16196_v32  ;;  %v12180_v32 = vld [vmem:[%s16001_s24 + $0x18] sm:$0xff] }
 0xfc8   :  { %11777 = vmatprep.subr.bf16.mxu1 %v15930_v59 }
 0xfcc   :  { %v6997_v57 = vpop.f32.mrf.mxu0  ;;  %11750 = vmatmul.mubr.msk.bf16.vlgmr.msra.gmra.mxu0 %vm860_vm1, %v6268_v1  ;;  %v12182_v1 = vld [vmem:[%s16001_s24 + $0x8] sm:$0xff] }
 0xfcd   :  { %11766 = vmatpush3.bf16.xpose.msra.mxu0 %v16197_v19  ;;  %11773 = vmatprep.mubr.msk.bf16.mxu0 %vm12219_vm7, %v15930_v59  ;;  %v7664_v25 = vpack.c.bf16 %v6997_v57, %v6997_v57  ;;  %v7852_v57 = vpop.permute.xlu1 %7851  ;;  %v12184_v19 = vld [vmem:[%s16002_s2 + $0x78] sm:$0xff] }
 0xfce   :  { %v11607_v45 = vpop.f32.mrf.mxu0  ;;  %v7040_v53 = vpop.f32.mrf.mxu1  ;;  %11762 = vmatmul.mubr.msk.bf16.vlgmr.msra.gmra.mxu1 %vm860_vm1, %v6269_v34  ;;  %11767 = vmatprep.subr.bf16.mxu0 %v15930_v59  ;;  %v12183_v34 = vld [vmem:[%s16001_s24] sm:$0xff] }
 0xfcf   :  { %v7665_v52 = vpack.c.bf16 %v7040_v53, %v7040_v53  ;;  %11778 = vmatpush3.bf16.xpose.msra.mxu1 %v16198_v50  ;;  %11785 = vmatprep.mubr.msk.bf16.mxu1 %vm12219_vm7, %v15930_v59  ;;  %v7728_v51 = vunpack.c.l.b16 %v7664_v25  ;;  %v12185_v45 = vld [vmem:[%s16002_s2 + $0x70] sm:$0xff]  ;;  %v12186_v53 = vld [vmem:[%s16002_s2 + $0x68] sm:$0xff]  ;;  %v12187_v25 = vld [vmem:[%s16002_s2 + $0x60] sm:$0xff] }
 0xfd0   :  { %v7000_v16 = vpop.f32.mrf.mxu0  ;;  %v11619_v23 = vpop.f32.mrf.mxu1  ;;  %11779 = vmatprep.subr.bf16.mxu1 %v15930_v59  ;;  %v12189_v50 = vld [vmem:[%s16002_s2 + $0x50] sm:$0xff] }
 0xfd1   :  { %v7729_v60 = vunpack.c.l.b16 %v7665_v52  ;;  %v12188_v52 = vld [vmem:[%s16002_s2 + $0x58] sm:$0xff]  ;;  %v12190_v16 = vld [vmem:[%s16002_s2 + $0x48] sm:$0xff]  ;;  %v12191_v23 = vld [vmem:[%s16002_s2 + $0x40] sm:$0xff] }
 0xfd2   :  { %v11608_v12 = vpop.f32.mrf.mxu0  ;;  %v7043_v46 = vpop.f32.mrf.mxu1 }
 0xfd3   :  { %v7772_v22 = vrot.slane %v7729_v60, 7  ;;  %v12192_v60 = vld [vmem:[%s16002_s2 + $0x38] sm:$0xff]  ;;  %v12193_v12 = vld [vmem:[%s16002_s2 + $0x30] sm:$0xff]  ;;  %v12194_v46 = vld [vmem:[%s16002_s2 + $0x28] sm:$0xff] }
 0xfd4   :  { %v11620_v15 = vpop.f32.mrf.mxu1 }
 0xfd5   :  { %v7773_v9 = vsel %vm3338_vm8, %v7772_v22, %v7728_v51  ;;  %11768 = vmatpush3.bf16.xpose.msra.mxu0 %v16199_v14  ;;  %v12195_v51 = vld [vmem:[%s16002_s2 + $0x20] sm:$0xff]  ;;  %v12196_v22 = vld [vmem:[%s16002_s2 + $0x18] sm:$0xff]  ;;  %v12197_v15 = vld [vmem:[%s16002_s2 + $0x10] sm:$0xff] }
 0xfd6   :  { %11769 = vmatprep.subr.bf16.mxu0 %v15930_v59  ;;  %v12198_v14 = vld [vmem:[%s16002_s2 + $0x8] sm:$0xff] }
 0xfd7   :  { %11780 = vmatpush3.bf16.xpose.msra.mxu1 %v16200_v18 }
 0xfd8   :  { %11781 = vmatprep.subr.bf16.mxu1 %v15930_v59 }
 0xfdd   :  { %11770 = vmatpush3.bf16.xpose.msra.mxu0 %v16201_v44  ;;  %v12199_v44 = vld [vmem:[%s16002_s2] sm:$0xff] }
 0xfde   :  { %11771 = vmatprep.subr.bf16.mxu0 %v15930_v59 }
 0xfdf   :  { %11782 = vmatpush3.bf16.xpose.msra.mxu1 %v16202_v61 }
 0xfe0   :  { %11783 = vmatprep.subr.bf16.mxu1 %v15930_v59 }
 0xfe5   :  { %11772 = vmatpush3.bf16.xpose.msra.mxu0 %v16203_v63 }
 0xfe6   :  { %11789 = vmatprep.subr.bf16.mxu0 %v15930_v59 }
 0xfe7   :  { %11784 = vmatpush3.bf16.xpose.msra.mxu1 %v16204_v3 }
 0xfe8   :  { %11797 = vmatprep.subr.mxu1 %v12176_v7 }
 0xfec   :  { %v7083_v24 = vpop.f32.mrf.mxu0  ;;  %11774 = vmatmul.mubr.msk.bf16.vlgmr.msra.gmra.mxu0 %vm860_vm1, %v6270_v11 }
 0xfed   :  { %v7666_v28 = vpack.c.bf16 %v7083_v24, %v7083_v24  ;;  %11793 = vmatprep.mubr.msk.bf16.mxu0 %vm12219_vm7, %v15930_v59 }
 0xfee   :  { %v11631_v33 = vpop.f32.mrf.mxu0  ;;  %v7126_v35 = vpop.f32.mrf.mxu1  ;;  %11786 = vmatmul.mubr.msk.bf16.vlgmr.msra.gmra.mxu1 %vm860_vm1, %v6271_v21 }
 0xfef   :  { %v7730_v43 = vunpack.c.l.b16 %v7666_v28  ;;  %v7667_v47 = vpack.c.bf16 %v7126_v35, %v7126_v35  ;;  %11798 = vmatpush3.msra.mxu1 %v12176_v7  ;;  %11813 = vmatprep.mubr.msk.f32.mxu1 %vm860_vm1, %v14825_v27 }
 0xff0   :  { %v7086_v56 = vpop.f32.mrf.mxu0  ;;  %v11643_v58 = vpop.f32.mrf.mxu1  ;;  %11799 = vmatprep.subr.mxu1 %v12177_v37 }
 0xff1   :  { %v7774_v62 = vrot.slane %v7730_v43, 6  ;;  %v7731_v42 = vunpack.c.l.b16 %v7667_v47  ;;  %11800 = vmatpush3.msra.mxu1 %v12177_v37 }
 0xff2   :  { %v11632_v8 = vpop.f32.mrf.mxu0  ;;  %v7129_v5 = vpop.f32.mrf.mxu1  ;;  %11801 = vmatprep.subr.mxu1 %v12178_v29 }
 0xff3   :  { %v7775_v17 = vsel %vm3341_vm9, %v7774_v62, %v7773_v9  ;;  %v7776_v31 = vrot.slane %v7731_v42, 5  ;;  %11802 = vmatpush3.msra.mxu1 %v12178_v29 }
 0xff4   :  { %v11644_v38 = vpop.f32.mrf.mxu1  ;;  %11803 = vmatprep.subr.mxu1 %v12179_v49 }
 0xff5   :  { %v14843_v41 = vsel %vm3344_vm10, %v7776_v31, %v7775_v17  ;;  %11804 = vmatpush3.msra.mxu1 %v12179_v49 }
 0xff6   :  { %11805 = vmatprep.subr.mxu1 %v12180_v32 }
 0xff7   :  { %11806 = vmatpush3.msra.mxu1 %v12180_v32 }
 0xff8   :  { %11807 = vmatprep.subr.mxu1 %v12181_v36 }
 0xff9   :  { %11808 = vmatpush3.msra.mxu1 %v12181_v36 }
 0xffa   :  { %11809 = vmatprep.subr.mxu1 %v12182_v1 }
 0xffb   :  { %11810 = vmatpush3.msra.mxu1 %v12182_v1 }
 0xffc   :  { %11811 = vmatprep.subr.mxu1 %v12183_v34 }
 0xffd   :  { %11812 = vmatpush3.msra.mxu1 %v12183_v34 }
 0xffe   :  { %11814 = vmatmul.mubr.msk.f32.vlgmr.msra.gmra.mxu1 %vm860_vm1, %v7852_v57  ;;  %8035 = vmatprep.subr.mxu1 %v12184_v19 }
 0xfff   :  { %8036 = vmatpush1.msra.mxu1 %v12185_v45  ;;  %8083 = vmatprep.mubr.f32.mxu1 %v15930_v59 }
0x1000   :  { %8037 = vmatprep.subr.mxu1 %v12186_v53 }
0x1001   :  { %8038 = vmatpush1.msra.mxu1 %v12187_v25 }
0x1002   :  { %8039 = vmatprep.subr.mxu1 %v12188_v52 }
0x1003   :  { %8040 = vmatpush1.msra.mxu1 %v12189_v50 }
0x1004   :  { %8041 = vmatprep.subr.mxu1 %v12190_v16 }
0x1005   :  { %8042 = vmatpush1.msra.mxu1 %v12191_v23 }
0x1006   :  { %8043 = vmatprep.subr.mxu1 %v12192_v60 }
0x1007   :  { %8044 = vmatpush1.msra.mxu1 %v12193_v12 }
0x1008   :  { %8045 = vmatprep.subr.mxu1 %v12194_v46 }
0x1009   :  { %8046 = vmatpush1.msra.mxu1 %v12195_v51 }
0x100a   :  { %8047 = vmatprep.subr.mxu1 %v12196_v22 }
0x100b   :  { %8048 = vmatpush1.msra.mxu1 %v12197_v15 }
0x100c   :  { %v7169_v9 = vpop.f32.mrf.mxu0  ;;  %8049 = vmatprep.subr.mxu1 %v12198_v14 }
0x100d   :  { %v7668_v18 = vpack.c.bf16 %v7169_v9, %v7169_v9  ;;  %8050 = vmatpush1.msra.mxu1 %v12199_v44 }
0x100e   :  { %v11655_v61 = vpop.f32.mrf.mxu0  ;;  %v7212_v63 = vpop.f32.mrf.mxu1  ;;  %9949 = vmatmul.mubr.msk.f32.vlgmr.msra.gmra.mxu1 %vm860_vm1, %v14825_v27 }
0x100f   :  { %v7732_v2 = vunpack.c.l.b16 %v7668_v18  ;;  %v7669_v3 = vpack.c.bf16 %v7212_v63, %v7212_v63  ;;  %8089 = vmatprep.mubr.f32.mxu1 %v15930_v59 }
0x1010   :  { %v7172_v6 = vpop.f32.mrf.mxu0  ;;  %v11667_v7 = vpop.f32.mrf.mxu1 }
0x1011   :  { %v7778_v11 = vrot.slane %v7732_v2, 4  ;;  %v7733_v21 = vunpack.c.l.b16 %v7669_v3 }
0x1012   :  { %v11656_v24 = vpop.f32.mrf.mxu0  ;;  %v7215_v28 = vpop.f32.mrf.mxu1  ;;  %9950 = vmatmul.mubr.msk.f32.gmra.mxu1 %vm860_vm1, %v7852_v57 }
0x1013   :  { %v7779_v33 = vsel %vm3347_vm11, %v7778_v11, %v14843_v41  ;;  %v7780_v35 = vrot.slane %v7733_v21, 3  ;;  %8312 = vmatprep.mubr.f32.mxu1 %v15930_v59 }
0x1014   :  { %v11668_v43 = vpop.f32.mrf.mxu1 }
0x1015   :  { %v7781_v27 = vsel %vm3350_vm12, %v7780_v35, %v7779_v33 }
0x102c   :  { %v7255_v47 = vpop.f32.mrf.mxu0 }
0x102d   :  { %v7670_v56 = vpack.c.bf16 %v7255_v47, %v7255_v47 }
0x102e   :  { %v11679_v58 = vpop.f32.mrf.mxu0  ;;  %v7298_v37 = vpop.f32.mrf.mxu1 }
0x102f   :  { %v7734_v62 = vunpack.c.l.b16 %v7670_v56  ;;  %v7671_v42 = vpack.c.bf16 %v7298_v37, %v7298_v37 }
0x1030   :  { %v7258_v8 = vpop.f32.mrf.mxu0  ;;  %v11691_v5 = vpop.f32.mrf.mxu1 }
0x1031   :  { %v7782_v29 = vrot.slane %v7734_v62, 2  ;;  %v7735_v17 = vunpack.c.l.b16 %v7671_v42 }
0x1032   :  { %v11680_v31 = vpop.f32.mrf.mxu0  ;;  %v7301_v38 = vpop.f32.mrf.mxu1 }
0x1033   :  { %v7783_v49 = vsel %vm3353_vm13, %v7782_v29, %v7781_v27  ;;  %v7784_v41 = vrot.slane %v7735_v17, 1 }
0x1034   :  { %v11692_v32 = vpop.f32.mrf.mxu1 }
0x1035   :  { %v14917_v36 = vsel %vm3356_vm14, %v7784_v41, %v7783_v49 }
0x104c   :  { %v7341_v1 = vpop.f32.mrf.mxu0 }
0x104d   :  { %v7672_v19 = vpack.c.bf16 %v7341_v1, %v7341_v1 }
0x104e   :  { %v11703_v34 = vpop.f32.mrf.mxu0  ;;  %v7384_v57 = vpop.f32.mrf.mxu1 }
0x104f   :  { %v7673_v45 = vpack.c.bf16 %v7384_v57, %v7384_v57  ;;  %v7736_v23 = vunpack.c.l.b16 %v7672_v19 }
0x1050   :  { %v7344_v53 = vpop.f32.mrf.mxu0  ;;  %v11715_v25 = vpop.f32.mrf.mxu1 }
0x1051   :  { %v7737_v52 = vunpack.c.l.b16 %v7673_v45 }
0x1052   :  { %v11704_v50 = vpop.f32.mrf.mxu0  ;;  %v7387_v16 = vpop.f32.mrf.mxu1 }
0x1053   :  { %v7786_v60 = vrot.slane %v7737_v52, 7 }
0x1054   :  { %v11716_v12 = vpop.f32.mrf.mxu1 }
0x1055   :  { %v7787_v46 = vsel %vm3338_vm8, %v7786_v60, %v7736_v23 }
0x106c   :  { %v7427_v51 = vpop.f32.mrf.mxu0 }
0x106d   :  { %v7674_v28 = vpack.c.bf16 %v7427_v51, %v7427_v51  ;;  %v12201_v51 = vld [vmem:[%s15644_s9 + $0x70] sm:$0xff] }
0x106e   :  { %v11727_v22 = vpop.f32.mrf.mxu0  ;;  %v7470_v15 = vpop.f32.mrf.mxu1 }
0x106f   :  { %v7675_v33 = vpack.c.bf16 %v7470_v15, %v7470_v15  ;;  %v7738_v35 = vunpack.c.l.b16 %v7674_v28  ;;  %v12207_v22 = vld [vmem:[%s15644_s9 + $0x40] sm:$0xff]  ;;  %v12208_v15 = vld [vmem:[%s15644_s9 + $0x38] sm:$0xff]  ;;  %v15021_v28 = vld [vmem:[%s15649_s14 + $0x50] sm:$0xff] }
0x1070   :  { %v7430_v9 = vpop.f32.mrf.mxu0  ;;  %v11739_v14 = vpop.f32.mrf.mxu1 }
0x1071   :  { %v7739_v27 = vunpack.c.l.b16 %v7675_v33  ;;  %v7788_v56 = vrot.slane %v7738_v35, 6  ;;  %v12209_v9 = vld [vmem:[%s15644_s9 + $0x30] sm:$0xff]  ;;  %v12210_v14 = vld [vmem:[%s15644_s9 + $0x28] sm:$0xff]  ;;  %v15033_v35 = vld [vmem:[%s15649_s14 + $0x40] sm:$0xff] }
0x1072   :  { %v11728_v18 = vpop.f32.mrf.mxu0  ;;  %v7473_v44 = vpop.f32.mrf.mxu1  ;;  %v15027_v33 = vld [vmem:[%s15649_s14 + $0x48] sm:$0xff] }
0x1073   :  { %v7790_v37 = vrot.slane %v7739_v27, 5  ;;  %v7789_v42 = vsel %vm3341_vm9, %v7788_v56, %v7787_v46  ;;  %v12200_v46 = vld [vmem:[%s15644_s9 + $0x78] sm:$0xff]  ;;  %v12211_v18 = vld [vmem:[%s15644_s9 + $0x20] sm:$0xff]  ;;  %v15045_v27 = vld [vmem:[%s15649_s14 + $0x30] sm:$0xff] }
0x1074   :  { %v11740_v61 = vpop.f32.mrf.mxu1  ;;  %v12212_v44 = vld [vmem:[%s15644_s9 + $0x18] sm:$0xff]  ;;  %v15057_v56 = vld [vmem:[%s15649_s14 + $0x20] sm:$0xff] }
0x1075   :  { %v7791_v17 = vsel %vm3344_vm10, %v7790_v37, %v7789_v42  ;;  %v12213_v61 = vld [vmem:[%s15644_s9 + $0x10] sm:$0xff]  ;;  %v15080_v42 = vld [vmem:[%s15649_s14] sm:$0xff] }
0x1076   :  { %v15068_v37 = vld [vmem:[%s15649_s14 + $0x10] sm:$0xff] }
0x108c   :  { %v7513_v63 = vpop.f32.mrf.mxu0 }
0x108d   :  { %v7676_v43 = vpack.c.bf16 %v7513_v63, %v7513_v63  ;;  %v12214_v63 = vld [vmem:[%s15644_s9 + $0x8] sm:$0xff] }
0x108e   :  { %v11751_v2 = vpop.f32.mrf.mxu0  ;;  %v7556_v3 = vpop.f32.mrf.mxu1 }
0x108f   :  { %v7677_v47 = vpack.c.bf16 %v7556_v3, %v7556_v3  ;;  %v7740_v58 = vunpack.c.l.b16 %v7676_v43  ;;  %v12215_v2 = vld [vmem:[%s15644_s9] sm:$0xff]  ;;  %v14985_v3 = vld [vmem:[%s15648_s15 + $0x78] sm:$0xff] }
0x1090   :  { %v7516_v6 = vpop.f32.mrf.mxu0  ;;  %v11763_v7 = vpop.f32.mrf.mxu1  ;;  %v15039_v43 = vld [vmem:[%s15649_s14 + $0x38] sm:$0xff] }
0x1091   :  { %v7741_v62 = vunpack.c.l.b16 %v7677_v47  ;;  %v7792_v8 = vrot.slane %v7740_v58, 4  ;;  %v14991_v6 = vld [vmem:[%s15649_s14 + $0x78] sm:$0xff]  ;;  %v14997_v7 = vld [vmem:[%s15649_s14 + $0x70] sm:$0xff]  ;;  %v15051_v47 = vld [vmem:[%s15649_s14 + $0x28] sm:$0xff] }
0x1092   :  { %v11752_v11 = vpop.f32.mrf.mxu0  ;;  %v7559_v21 = vpop.f32.mrf.mxu1  ;;  %8264 = vmatprep.subr.mxu1 %v14991_v6  ;;  %v15062_v58 = vld [vmem:[%s15649_s14 + $0x18] sm:$0xff] }
0x1093   :  { %v7794_v31 = vrot.slane %v7741_v62, 3  ;;  %v7793_v41 = vsel %vm3347_vm11, %v7792_v8, %v7791_v17  ;;  %8265 = vmatpush1.msra.mxu1 %v14997_v7  ;;  %v15003_v11 = vld [vmem:[%s15649_s14 + $0x68] sm:$0xff]  ;;  %v15009_v21 = vld [vmem:[%s15649_s14 + $0x60] sm:$0xff]  ;;  %v15087_v8 = vld [vmem:[%s15648_s15 + $0x70] sm:$0xff] }
0x1094   :  { %v11764_v24 = vpop.f32.mrf.mxu1  ;;  %8266 = vmatprep.subr.mxu1 %v15003_v11  ;;  %v15074_v62 = vld [vmem:[%s15649_s14 + $0x8] sm:$0xff]  ;;  %v15107_v17 = vld [vmem:[%s15648_s15 + $0x58] sm:$0xff] }
0x1095   :  { %v7795_v53 = vsel %vm3350_vm12, %v7794_v31, %v7793_v41  ;;  %8267 = vmatpush1.msra.mxu1 %v15009_v21  ;;  %v15015_v24 = vld [vmem:[%s15649_s14 + $0x58] sm:$0xff]  ;;  %16205 = vst [vmem:[#allocation3_spill] sm:$0xff] %v15107_v17  ;;  %v15113_v31 = vld [vmem:[%s15648_s15 + $0x50] sm:$0xff] }
0x1096   :  { %8268 = vmatprep.subr.mxu1 %v15015_v24  ;;  %16206 = vst [vmem:[#allocation4_spill] sm:$0xff] %v15113_v31  ;;  %v15131_v41 = vld [vmem:[%s15648_s15 + $0x38] sm:$0xff] }
0x1097   :  { %8269 = vmatpush1.msra.mxu1 %v15021_v28  ;;  %16209 = vst [vmem:[#allocation8_spill] sm:$0xff] %v15131_v41 }
0x1098   :  { %8270 = vmatprep.subr.mxu1 %v15027_v33 }
0x1099   :  { %8271 = vmatpush1.msra.mxu1 %v15033_v35 }
0x109a   :  { %8272 = vmatprep.subr.mxu1 %v15039_v43 }
0x109b   :  { %8273 = vmatpush1.msra.mxu1 %v15045_v27 }
0x109c   :  { %8274 = vmatprep.subr.mxu1 %v15051_v47 }
0x109d   :  { %8275 = vmatpush1.msra.mxu1 %v15057_v56 }
0x109e   :  { %8276 = vmatprep.subr.mxu1 %v15062_v58 }
0x109f   :  { %8277 = vmatpush1.msra.mxu1 %v15068_v37 }
0x10a0   :  { %8278 = vmatprep.subr.mxu1 %v15074_v62 }
0x10a1   :  { %8279 = vmatpush1.msra.mxu1 %v15080_v42 }
0x10a2   :  { %8313 = vmatmul.mubr.f32.vlgmr.msra.gmra.mxu1 %v15930_v59  ;;  %8636 = vmatprep.subr.mxu1 %v14985_v3 }
0x10a3   :  { %8637 = vmatpush1.msra.mxu1 %v15087_v8  ;;  %8684 = vmatprep.mubr.f32.mxu1 %v15930_v59 }
0x10ac   :  { %v7599_v5 = vpop.f32.mrf.mxu0 }
0x10ad   :  { %v7678_v29 = vpack.c.bf16 %v7599_v5, %v7599_v5  ;;  %v15094_v5 = vld [vmem:[%s15648_s15 + $0x68] sm:$0xff] }
0x10ae   :  { %v11775_v38 = vpop.f32.mrf.mxu0  ;;  %v7642_v49 = vpop.f32.mrf.mxu1  ;;  %8638 = vmatprep.subr.mxu1 %v15094_v5 }
0x10af   :  { %v7742_v32 = vunpack.c.l.b16 %v7678_v29  ;;  %v7679_v1 = vpack.c.bf16 %v7642_v49, %v7642_v49  ;;  %v15101_v29 = vld [vmem:[%s15648_s15 + $0x60] sm:$0xff]  ;;  %v15119_v38 = vld [vmem:[%s15648_s15 + $0x48] sm:$0xff] }
0x10b0   :  { %v7602_v34 = vpop.f32.mrf.mxu0  ;;  %v11787_v57 = vpop.f32.mrf.mxu1  ;;  %8639 = vmatpush1.msra.mxu1 %v15101_v29  ;;  %16207 = vst [vmem:[#allocation5_spill] sm:$0xff] %v15119_v38  ;;  %v15125_v49 = vld [vmem:[%s15648_s15 + $0x40] sm:$0xff] }
0x10b1   :  { %v7796_v19 = vrot.slane %v7742_v32, 2  ;;  %v7743_v45 = vunpack.c.l.b16 %v7679_v1  ;;  %8640 = vmatprep.subr.mxu1 %v15107_v17  ;;  %16208 = vst [vmem:[#allocation6_spill] sm:$0xff] %v15125_v49  ;;  %v15137_v32 = vld [vmem:[%s15648_s15 + $0x30] sm:$0xff]  ;;  %v15143_v1 = vld [vmem:[%s15648_s15 + $0x28] sm:$0xff]  ;;  %v15149_v34 = vld [vmem:[%s15648_s15 + $0x20] sm:$0xff] }
0x10b2   :  { %v11776_v25 = vpop.f32.mrf.mxu0  ;;  %v7645_v52 = vpop.f32.mrf.mxu1  ;;  %8641 = vmatpush1.msra.mxu1 %v15113_v31  ;;  %16210 = vst [vmem:[#allocation9_spill] sm:$0xff] %v15137_v32  ;;  %16211 = vst [vmem:[#allocation10_spill] sm:$0xff] %v15143_v1  ;;  %v15155_v57 = vld [vmem:[%s15648_s15 + $0x18] sm:$0xff] }
0x10b3   :  { %v7797_v50 = vsel %vm3353_vm13, %v7796_v19, %v7795_v53  ;;  %v7798_v16 = vrot.slane %v7743_v45, 1  ;;  %8642 = vmatprep.subr.mxu1 %v15119_v38  ;;  %16212 = vst [vmem:[#allocation11_spill] sm:$0xff] %v15149_v34  ;;  %16213 = vst [vmem:[#allocation12_spill] sm:$0xff] %v15155_v57  ;;  %v15161_v19 = vld [vmem:[%s15648_s15 + $0x10] sm:$0xff]  ;;  %v15167_v45 = vld [vmem:[%s15648_s15 + $0x8] sm:$0xff] }
0x10b4   :  { %v11788_v23 = vpop.f32.mrf.mxu1  ;;  %8643 = vmatpush1.msra.mxu1 %v15125_v49  ;;  %16214 = vst [vmem:[#allocation13_spill] sm:$0xff] %v15161_v19  ;;  %16215 = vst [vmem:[#allocation14_spill] sm:$0xff] %v15167_v45  ;;  %v15173_v53 = vld [vmem:[%s15648_s15] sm:$0xff]  ;;  %v15179_v25 = vld [vmem:[%s15650_s16 + $0x78] sm:$0xff] }
0x10b5   :  { %v7799_v60 = vsel %vm3356_vm14, %v7798_v16, %v7797_v50  ;;  %8644 = vmatprep.subr.mxu1 %v15131_v41  ;;  %16216 = vst [vmem:[#allocation15_spill] sm:$0xff] %v15173_v53  ;;  %16217 = vst [vmem:[#allocation16_spill] sm:$0xff] %v15179_v25 }
0x10b6   :  { %v7801_v12 = vpack.c.b16 %v7799_v60, %v14917_v36  ;;  %v12206_v36 = vld [vmem:[%s15644_s9 + $0x48] sm:$0xff]  ;;  %8645 = vmatpush1.msra.mxu1 %v15137_v32 }
0x10b7   :  { %8646 = vmatprep.subr.mxu1 %v15143_v1 }
0x10b8   :  { %11790 = vmatpush3.bf16.msra.mxu0 %v7801_v12  ;;  %8647 = vmatpush1.msra.mxu1 %v15149_v34 }
0x10b9   :  { %11791 = vmatprep.subr.bf16.mxu0 %v15930_v59  ;;  %8648 = vmatprep.subr.mxu1 %v15155_v57 }
0x10ba   :  { %8649 = vmatpush1.msra.mxu1 %v15161_v19 }
0x10bb   :  { %8650 = vmatprep.subr.mxu1 %v15167_v45 }
0x10bc   :  { %11792 = vmatpush3.bf16.msra.mxu0 %v7800_v55  ;;  %v12205_v55 = vld [vmem:[%s15644_s9 + $0x50] sm:$0xff]  ;;  %8651 = vmatpush1.msra.mxu1 %v15173_v53 }
0x10bd   :  { %7958 = vmatprep.subr.mxu0 %v12200_v46  ;;  %8778 = vmatprep.subr.mxu1 %v15179_v25 }
0x10be   :  { %v11815_v52 = vpop.f32.mrf.mxu1 }
0x10bf   :  { %11794 = vmatmul.mubr.msk.bf16.vlgmr.msra.gmra.mxu0 %vm3404_vm2, %v13707_v39  ;;  %v12204_v39 = vld [vmem:[%s15644_s9 + $0x58] sm:$0xff] }
0x10c0   :  { %7959 = vmatpush1.msra.mxu0 %v12201_v51  ;;  %8006 = vmatprep.mubr.f32.mxu0 %v15930_v59  ;;  %v7923_v23 = vpop.f32.mrf.mxu1  ;;  %v12216_v51 = vld [vmem:[%s15645_s8] ss:$0 sm:$0xff] }
0x10c1   :  { %7960 = vmatprep.subr.mxu0 %v12202_v13 }
0x10c2   :  { %7961 = vmatpush1.msra.mxu0 %v12203_v0 }
0x10c3   :  { %7962 = vmatprep.subr.mxu0 %v12204_v39 }
0x10c4   :  { %7963 = vmatpush1.msra.mxu0 %v12205_v55 }
0x10c5   :  { %7964 = vmatprep.subr.mxu0 %v12206_v36 }
0x10c6   :  { %7965 = vmatpush1.msra.mxu0 %v12207_v22 }
0x10c7   :  { %7966 = vmatprep.subr.mxu0 %v12208_v15  ;;  %v15215_v15 = vld [vmem:[%s15650_s16 + $0x68] sm:$0xff] }
0x10c8   :  { %7967 = vmatpush1.msra.mxu0 %v12209_v9  ;;  %v15222_v9 = vld [vmem:[%s15650_s16 + $0x60] sm:$0xff] }
0x10c9   :  { %7968 = vmatprep.subr.mxu0 %v12210_v14  ;;  %v15228_v14 = vld [vmem:[%s15650_s16 + $0x58] sm:$0xff] }
0x10ca   :  { %7969 = vmatpush1.msra.mxu0 %v12211_v18  ;;  %v15235_v18 = vld [vmem:[%s15650_s16 + $0x50] sm:$0xff] }
0x10cb   :  { %7970 = vmatprep.subr.mxu0 %v12212_v44  ;;  %v15241_v44 = vld [vmem:[%s15650_s16 + $0x48] sm:$0xff] }
0x10cc   :  { %7971 = vmatpush1.msra.mxu0 %v12213_v61  ;;  %v15247_v61 = vld [vmem:[%s15650_s16 + $0x40] sm:$0xff] }
0x10cd   :  { %7972 = vmatprep.subr.mxu0 %v12214_v63  ;;  %v15253_v63 = vld [vmem:[%s15650_s16 + $0x38] sm:$0xff] }
0x10ce   :  { %7973 = vmatpush1.msra.mxu0 %v12215_v2  ;;  %v15259_v2 = vld [vmem:[%s15650_s16 + $0x30] sm:$0xff] }
0x10cf   :  { %8193 = vmatprep.subr.mxu0 %v14985_v3 }
0x117f   :  { %v7838_v50 = vpop.f32.mrf.mxu0 }
0x1180   :  { %v7845_v16 = vmul.f32 %v7838_v50, %v13760_v26  ;;  %v15271_v50 = vld [vmem:[%s15650_s16 + $0x20] sm:$0xff] }
0x1181   :  { %v11795_v60 = vpop.f32.mrf.mxu0 }
0x1182   :  { %v7924_v12 = vadd.f32 %v7923_v23, %v7845_v16  ;;  %v15277_v16 = vld [vmem:[%s15650_s16 + $0x18] sm:$0xff]  ;;  %v15283_v23 = vld [vmem:[%s15650_s16 + $0x10] sm:$0xff]  ;;  %v15289_v60 = vld [vmem:[%s15650_s16 + $0x8] sm:$0xff] }
0x1183   :  { %v7841_v46 = vpop.f32.mrf.mxu0 }
0x1184   :  { %v7932_v13 = vadd.f32 %v12216_v51, %v7924_v12  ;;  %v7846_v0 = vmul.f32 %v7841_v46, %v13766_v40  ;;  %v15209_v40 = vld [vmem:[%s15650_s16 + $0x70] sm:$0xff]  ;;  %v15295_v12 = vld [vmem:[%s15650_s16] sm:$0xff]  ;;  %v8085_v46 = vpop.f32.mrf.mxu1 }
0x1185   :  { %v11796_v39 = vpop.f32.mrf.mxu0 }
0x1186   :  { %v7934_v55 = vmax.f32 %v7932_v13, 0.0  ;;  %v7929_v36 = vadd.f32 %v11815_v52, %v7846_v0  ;;  %v15265_v52 = vld [vmem:[%s15650_s16 + $0x28] sm:$0xff] }
0x1188   :  { %v7933_v22 = vadd.f32 %v12216_v51, %v7929_v36  ;;  %9947 = vmatmul.mubr.msk.f32.vlgmr.msra.gmra.mxu0 %vm860_vm1, %v7934_v55  ;;  %v8087_v51 = vpop.f32.mrf.mxu1 }
0x1189   :  { %8194 = vmatpush1.msra.mxu0 %v15087_v8  ;;  %8012 = vmatprep.mubr.f32.mxu0 %v15930_v59 }
0x118a   :  { %v7935_v26 = vmax.f32 %v7933_v22, 0.0  ;;  %8195 = vmatprep.subr.mxu0 %v15094_v5  ;;  %v8091_v0 = vpop.f32.mrf.mxu1 }
0x118b   :  { %8196 = vmatpush1.msra.mxu0 %v15101_v29  ;;  %v8092_v36 = vadd.f32 %v8091_v0, %v13784_v54 }
0x118c   :  { %8197 = vmatprep.subr.mxu0 %v15107_v17  ;;  %9948 = vmatmul.mubr.msk.f32.gmra.mxu0 %vm860_vm1, %v7935_v26  ;;  %v16219_v17 = vld [vmem:[#allocation109_spill] sm:$0xff] }
0x118d   :  { %8198 = vmatpush1.msra.mxu0 %v15113_v31  ;;  %8241 = vmatprep.mubr.f32.mxu0 %v15930_v59 }
0x118e   :  { %8199 = vmatprep.subr.mxu0 %v15119_v38 }
0x118f   :  { %8200 = vmatpush1.msra.mxu0 %v15125_v49 }
0x1190   :  { %8201 = vmatprep.subr.mxu0 %v15131_v41  ;;  %v8093_v41 = vpop.f32.mrf.mxu1 }
0x1191   :  { %8202 = vmatpush1.msra.mxu0 %v15137_v32 }
0x1192   :  { %8203 = vmatprep.subr.mxu0 %v15143_v1  ;;  %v8314_v38 = vpop.f32.mrf.mxu1 }
0x1193   :  { %8204 = vmatpush1.msra.mxu0 %v15149_v34 }
0x1194   :  { %8205 = vmatprep.subr.mxu0 %v15155_v57 }
0x1195   :  { %8206 = vmatpush1.msra.mxu0 %v15161_v19 }
0x1196   :  { %8207 = vmatprep.subr.mxu0 %v15167_v45 }
0x1197   :  { %8208 = vmatpush1.msra.mxu0 %v15173_v53 }
0x1198   :  { %8351 = vmatprep.subr.mxu0 %v15179_v25  ;;  %8242 = vmatmul.mubr.f32.vlgmr.msra.gmra.mxu0 %v15930_v59  ;;  %v8086_v25 = vadd.f32 %v8085_v46, %v13784_v54  ;;  %v16218_v46 = vld [vmem:[#allocation108_spill] sm:$0xff] }
0x1199   :  { %8352 = vmatpush1.msra.mxu0 %v15209_v40  ;;  %8399 = vmatprep.mubr.f32.mxu0 %v15930_v59 }
0x119a   :  { %8353 = vmatprep.subr.mxu0 %v15215_v15 }
0x119b   :  { %8354 = vmatpush1.msra.mxu0 %v15222_v9 }
0x119c   :  { %8355 = vmatprep.subr.mxu0 %v15228_v14 }
0x119d   :  { %8356 = vmatpush1.msra.mxu0 %v15235_v18 }
0x119e   :  { %8357 = vmatprep.subr.mxu0 %v15241_v44 }
0x119f   :  { %8358 = vmatpush1.msra.mxu0 %v15247_v61 }
0x11a0   :  { %8359 = vmatprep.subr.mxu0 %v15253_v63 }
0x11a1   :  { %8360 = vmatpush1.msra.mxu0 %v15259_v2 }
0x11a2   :  { %8361 = vmatprep.subr.mxu0 %v15265_v52 }
0x11a3   :  { %8362 = vmatpush1.msra.mxu0 %v15271_v50 }
0x11a4   :  { %8363 = vmatprep.subr.mxu0 %v15277_v16 }
0x11a5   :  { %8364 = vmatpush1.msra.mxu0 %v15283_v23 }
0x11a6   :  { %8365 = vmatprep.subr.mxu0 %v15289_v60 }
0x11a7   :  { %8366 = vmatpush1.msra.mxu0 %v15295_v12 }
0x11a8   :  { %8400 = vmatmul.mubr.f32.vlgmr.msra.gmra.mxu0 %v15930_v59  ;;  %11816 = vmatprep.subr.mxu0 %v15930_v59 }
0x11a9   :  { %11820 = vmatprep.mubr.msk.f32.mxu0 %vm12219_vm7, %v15930_v59 }
0x1248   :  { %v8008_v13 = vpop.f32.mrf.mxu0 }
0x1249   :  { %v8009_v22 = vadd.f32 %v8008_v13, %v13787_v20  ;;  %v8408_v13 = vld [vmem:[%s15651_s17] sm:$0x3] }
0x124a   :  { %v8010_v39 = vpop.f32.mrf.mxu0 }
0x124b   :  { %v8096_v45 = vadd.f32 %v8086_v25, %v8009_v22  ;;  %v15312_v25 = vrot.slane %v8408_v13, %v16218_v46 }
0x124c   :  { %v8014_v55 = vpop.f32.mrf.mxu0 }
0x124d   :  { %v8015_v26 = vadd.f32 %v8014_v55, %v13787_v20  ;;  %v9951_v57 = vmul.f32 -1.442695, %v8096_v45 }
0x124e   :  { %v8016_v1 = vpop.f32.mrf.mxu0 }
0x124f   :  { %v8097_v53 = vadd.f32 %v8092_v36, %v8015_v26  ;;  %v8017_v36 = vadd.f32 %v8016_v1, %v13800_v48  ;;  %v8316_v26 = vpop.f32.mrf.mxu1  ;;  %v8011_v1 = vadd.f32 %v8010_v39, %v13800_v48 }
0x1251   :  { %v9952_v19 = vmul.f32 -1.442695, %v8097_v53 }
0x1253   :  { %12075 = vpow2.f32 %v9952_v19 }
0x1254   :  { %12077 = vpow2.f32 %v9951_v57 }
0x1258   :  { %v8243_v49 = vpop.f32.mrf.mxu0 }
0x1259   :  { %v8315_v54 = vadd.f32 %v8314_v38, %v8243_v49 }
0x125a   :  { %v8245_v0 = vpop.f32.mrf.mxu0 }
0x125b   :  { %v8317_v49 = vadd.f32 %v8316_v26, %v8245_v0 }
0x1260   :  { %v12076_v34 = vpop.eup %12075 }
0x1261   :  { %v8105_v32 = vadd.f32 1.0, %v12076_v34  ;;  %v12078_v20 = vpop.eup %12077 }
0x1262   :  { %v8104_v45 = vadd.f32 1.0, %v12078_v20  ;;  %v15318_v20 = vrot.slane %v8408_v13, %v16219_v17 }
0x1263   :  { %12079 = vrcp.f32 %v8105_v32  ;;  %v8094_v32 = vadd.f32 %v8093_v41, %v13797_v30 }
0x1264   :  { %12081 = vrcp.f32 %v8104_v45  ;;  %v8088_v45 = vadd.f32 %v8087_v51, %v13797_v30 }
0x1268   :  { %v8401_v19 = vpop.f32.mrf.mxu0 }
0x1269   :  { %v8406_v57 = vadd.f32 %v8401_v19, %v8315_v54 }
0x126a   :  { %v8403_v38 = vpop.f32.mrf.mxu0 }
0x126b   :  { %v8420_v53 = vadd.f32 %v15312_v25, %v8406_v57  ;;  %v8407_v46 = vadd.f32 %v8403_v38, %v8317_v49 }
0x126d   :  { %v9955_v34 = vmul.f32 -1.442695, %v8420_v53  ;;  %v8421_v19 = vadd.f32 %v15318_v20, %v8407_v46 }
0x126f   :  { %12083 = vpow2.f32 %v9955_v34  ;;  %v9956_v30 = vmul.f32 -1.442695, %v8421_v19 }
0x1270   :  { %v12080_v55 = vpop.eup %12079 }
0x1271   :  { %v8111_v22 = vmul.f32 %v12080_v55, %v8094_v32  ;;  %v12082_v54 = vpop.eup %12081  ;;  %v8117_v51 = vsub.f32 1.0, %v12080_v55  ;;  %v8129_v48 = vmul.f32 %v12080_v55, %v14417_v10 }
0x1272   :  { %v8110_v57 = vmul.f32 %v12082_v54, %v8088_v45 }
0x1273   :  { %v8113_v31 = vadd.f32 %v8111_v22, %v8017_v36 }
0x1274   :  { %v8112_v34 = vadd.f32 %v8110_v57, %v8011_v1  ;;  %v8128_v57 = vmul.f32 %v12082_v54, %v14412_v4 }
0x1275   :  { %12085 = vtanh.f32 %v8113_v31 }
0x1276   :  { %12087 = vtanh.f32 %v8421_v19 }
0x127c   :  { %v12084_v41 = vpop.eup %12083 }
0x127d   :  { %v8425_v53 = vadd.f32 1.0, %v12084_v41  ;;  %v8116_v41 = vsub.f32 1.0, %v12082_v54  ;;  %v9953_v54 = vld [vmem:[%s15652_s13] ss:$0 sm:$0xff] }
0x127f   :  { %12089 = vrcp.f32 %v8425_v53 }
0x1280   :  { %12091 = vtanh.f32 %v8112_v34 }
0x1281   :  { %12093 = vpow2.f32 %v9956_v30 }
0x1282   :  { %v12086_v32 = vpop.eup %12085 }
0x1283   :  { %8122 = vrot.lane.b32.xlu1 %v12086_v32, %s12221_s10  ;;  %v12088_v31 = vpop.eup %12087 }
0x128c   :  { %v12090_v17 = vpop.eup %12089 }
0x128d   :  { %v8436_v13 = vmul.f32 %v12090_v17, %v12088_v31  ;;  %v12092_v0 = vpop.eup %12091  ;;  %v8435_v49 = vmul.f32 0.0, %v12090_v17  ;;  %v16220_v17 = vld [vmem:[#allocation7_spill] sm:$0xff] }
0x128e   :  { %v12094_v26 = vpop.eup %12093  ;;  %vm8137_vm3 = vcmp.eq.s32.totalorder %v9953_v54, %v16220_v17 }
0x128f   :  { %8438 = vrot.lane.b32.xlu0 %v8436_v13, %s12221_s10  ;;  %v8432_v38 = vadd.f32 1.0, %v12094_v26  ;;  %v15359_v13 = vsel %vm8137_vm3, 1.0, %v15930_v59 }
0x1290   :  { %vm8140_vm5 = vcmp.gt.f32.partialorder %v15359_v13, 0.0 }
0x1291   :  { %12095 = vrcp.f32 %v8432_v38 }
0x1293   :  { %8120 = vrot.lane.b32.xlu0 %v12092_v0, %s12221_s10  ;;  %v12222_v0 = vmov -1e+30  }
0x1294   :  { %v15362_v30 = vsel %vm8140_vm5, 0.0, %v12222_v0 }
0x129e   :  { %v12096_v10 = vpop.eup %12095 }
0x12f5   :  { %v8123_v36 = vpop.permute.xlu1 %8122 }
0x12f6   :  { %v8127_v39 = vmul.f32 %v8123_v36, %v8117_v51 }
0x12f8   :  { %v8131_v22 = vadd.f32 %v8129_v48, %v8127_v39 }
0x12fa   :  { %8451 = vrot.lane.b32.xlu1 %v8131_v22, %s12221_s10 }
0x1301   :  { %v8439_v46 = vpop.permute.xlu0 %8438 }
0x1302   :  { %v15328_v45 = vadd.f32 %v8439_v46, %v8435_v49 }
0x1304   :  { %12097 = vtanh.f32 %v15328_v45 }
0x1305   :  { %v8121_v19 = vpop.permute.xlu0 %8120 }
0x1306   :  { %v8126_v53 = vmul.f32 %v8121_v19, %v8116_v41 }
0x1308   :  { %v8130_v1 = vadd.f32 %v8128_v57, %v8126_v53 }
0x130a   :  { %8449 = vrot.lane.b32.xlu0 %v8130_v1, %s12221_s10 }
0x1311   :  { %v12098_v55 = vpop.eup %12097 }
0x1312   :  { %v8443_v34 = vmul.f32 %v12098_v55, %v12096_v10 }
0x1314   :  { %8445 = vrot.lane.b32.xlu1 %v8443_v34, %s12221_s10 }
0x136c   :  { %v15334_v32 = vpop.permute.xlu1 %8451 }
0x136d   :  { %11817 = vmatpush3.xpose.msk.msra.mxu0 %vm860_vm1, %v15334_v32 }
0x136e   :  { %11818 = vmatprep.subr.mxu0 %v15930_v59 }
0x137c   :  { %v15339_v31 = vpop.permute.xlu0 %8449 }
0x137d   :  { %11819 = vmatpush3.xpose.msk.msra.mxu0 %vm860_vm1, %v15339_v31 }
0x137e   :  { %11823 = vmatprep.subr.mxu0 %v15930_v59 }
0x1386   :  { %v15344_v4 = vpop.permute.xlu1 %8445 }
0x1387   :  { %11821 = vmatmul.mubr.msk.f32.vlgmr.msra.gmra.mxu0 %vm860_vm1, %v15344_v4 }
0x1388   :  { %11824 = vmatpush3.msra.mxu0 %v15334_v32  ;;  %11827 = vmatprep.mubr.msk.f32.mxu0 %vm12219_vm7, %v15930_v59 }
0x1389   :  { %11825 = vmatprep.subr.mxu0 %v15930_v59 }
0x138a   :  { %11826 = vmatpush3.msra.mxu0 %v15339_v31 }
0x138b   :  { %8707 = vmatprep.subr.mxu0 %v14991_v6 }
0x1447   :  { %v8525_v51 = vpop.f32.mrf.mxu0 }
0x1448   :  { %v8526_v36 = vadd.f32 %v8525_v51, %v15362_v30 }
0x1449   :  { %v11822_v48 = vpop.f32.mrf.mxu0 }
0x144a   :  { %v8529_v39 = vsel %vm520_vm4, %v8526_v36, -inf }
0x144b   :  { %8530 = vmax.xlane.f32.xlu0 %v8529_v39 }
0x14d4   :  { %v8531_v22 = vpop.xlane.xlu0 %8530 }
0x14d5   :  { %v8532_v26 = vsub.f32 %v8526_v36, %v8531_v22 }
0x14d7   :  { %v8533_v38 = vmul.f32 1.442695, %v8532_v26 }
0x14d9   :  { %12099 = vpow2.f32 %v8533_v38 }
0x14e6   :  { %v12100_v49 = vpop.eup %12099 }
0x14e7   :  { %v8535_v46 = vmul.f32 %v12100_v49, %v15359_v13 }
0x14e9   :  { %v8536_v41 = vsel %vm520_vm4, %v8535_v46, 0.0 }
0x14ea   :  { %8537 = vadd.xlane.f32.xlu1 %v8536_v41 }
0x1573   :  { %v8538_v19 = vpop.xlane.xlu1 %8537 }
0x1574   :  { %v8539_v57 = vmax.f32 %v8538_v19, 1e-20 }
0x1576   :  { %12101 = vrcp.f32 %v8539_v57 }
0x1583   :  { %v12102_v53 = vpop.eup %12101 }
0x1584   :  { %v8541_v1 = vmul.f32 %v12102_v53, %v8535_v46 }
0x1586   :  { %11828 = vmatmul.mubr.msk.f32.vlgmr.msra.gmra.mxu0 %vm520_vm4, %v8541_v1 }
0x1587   :  { %8708 = vmatpush1.msra.mxu0 %v14997_v7  ;;  %8755 = vmatprep.mubr.f32.mxu0 %v15930_v59 }
0x1588   :  { %8709 = vmatprep.subr.mxu0 %v15003_v11 }
0x1589   :  { %8710 = vmatpush1.msra.mxu0 %v15009_v21 }
0x158a   :  { %8711 = vmatprep.subr.mxu0 %v15015_v24 }
0x158b   :  { %8712 = vmatpush1.msra.mxu0 %v15021_v28 }
0x158c   :  { %8713 = vmatprep.subr.mxu0 %v15027_v33 }
0x158d   :  { %8714 = vmatpush1.msra.mxu0 %v15033_v35 }
0x158e   :  { %8715 = vmatprep.subr.mxu0 %v15039_v43 }
0x158f   :  { %8716 = vmatpush1.msra.mxu0 %v15045_v27 }
0x1590   :  { %8717 = vmatprep.subr.mxu0 %v15051_v47 }
0x1591   :  { %8718 = vmatpush1.msra.mxu0 %v15057_v56 }
0x1592   :  { %8719 = vmatprep.subr.mxu0 %v15062_v58 }
0x1593   :  { %8720 = vmatpush1.msra.mxu0 %v15068_v37 }
0x1594   :  { %8721 = vmatprep.subr.mxu0 %v15074_v62 }
0x1595   :  { %8722 = vmatpush1.msra.mxu0 %v15080_v42 }
0x1596   :  { %9962 = vmatmul.mubr.msk.f32.vlgmr.msra.gmra.mxu0 %vm860_vm1, %v15344_v4  ;;  %11830 = vmatprep.subr.mxu0 %v15930_v59 }
0x1597   :  { %11831 = vmatpush3.xpose.msk.msra.mxu0 %vm860_vm1, %v15334_v32  ;;  %11834 = vmatprep.mubr.msk.f32.mxu0 %vm12219_vm7, %v15930_v59 }
0x1598   :  { %11832 = vmatprep.subr.mxu0 %v15930_v59 }
0x159b   :  { %11833 = vmatpush3.xpose.msk.msra.mxu0 %vm860_vm1, %v15339_v31 }
0x159c   :  { %11837 = vmatprep.subr.mxu0 %v15930_v59 }
0x1646   :  { %v8613_v10 = vpop.f32.mrf.mxu0 }
0x1647   :  { %9961 = vmatmul.mubr.msk.f32.vlgmr.msra.gmra.mxu1 %vm860_vm1, %v8613_v10 }
0x1648   :  { %8779 = vmatpush1.msra.mxu1 %v15209_v40  ;;  %v11829_v55 = vpop.f32.mrf.mxu0  ;;  %8826 = vmatprep.mubr.f32.mxu1 %v15930_v59 }
0x1649   :  { %8780 = vmatprep.subr.mxu1 %v15215_v15 }
0x164a   :  { %8781 = vmatpush1.msra.mxu1 %v15222_v9 }
0x164b   :  { %8782 = vmatprep.subr.mxu1 %v15228_v14 }
0x164c   :  { %8783 = vmatpush1.msra.mxu1 %v15235_v18 }
0x164d   :  { %8784 = vmatprep.subr.mxu1 %v15241_v44 }
0x164e   :  { %8785 = vmatpush1.msra.mxu1 %v15247_v61 }
0x164f   :  { %8786 = vmatprep.subr.mxu1 %v15253_v63 }
0x1650   :  { %8787 = vmatpush1.msra.mxu1 %v15259_v2 }
0x1651   :  { %8788 = vmatprep.subr.mxu1 %v15265_v52 }
0x1652   :  { %8789 = vmatpush1.msra.mxu1 %v15271_v50 }
0x1653   :  { %8790 = vmatprep.subr.mxu1 %v15277_v16 }
0x1654   :  { %8791 = vmatpush1.msra.mxu1 %v15283_v23 }
0x1655   :  { %8792 = vmatprep.subr.mxu1 %v15289_v60 }
0x1656   :  { %8793 = vmatpush1.msra.mxu1 %v15295_v12 }
0x1657   :  { %9963 = vmatmul.mubr.msk.f32.vlgmr.msra.gmra.mxu1 %vm860_vm1, %v15344_v4  ;;  %9110 = vmatprep.subr.mxu1 %v14991_v6 }
0x1658   :  { %9111 = vmatpush1.msra.mxu1 %v14997_v7  ;;  %9158 = vmatprep.mubr.f32.mxu1 %v15930_v59  ;;  %v8757_v7 = vpop.f32.mrf.mxu0 }
0x1659   :  { %9112 = vmatprep.subr.mxu1 %v15003_v11 }
0x165a   :  { %9113 = vmatpush1.msra.mxu1 %v15009_v21 }
0x165b   :  { %9114 = vmatprep.subr.mxu1 %v15015_v24 }
0x165c   :  { %9115 = vmatpush1.msra.mxu1 %v15021_v28 }
0x165d   :  { %9116 = vmatprep.subr.mxu1 %v15027_v33 }
0x165e   :  { %9117 = vmatpush1.msra.mxu1 %v15033_v35 }
0x165f   :  { %9118 = vmatprep.subr.mxu1 %v15039_v43  ;;  %v8759_v43 = vpop.f32.mrf.mxu0 }
0x1660   :  { %9119 = vmatpush1.msra.mxu1 %v15045_v27 }
0x1661   :  { %9120 = vmatprep.subr.mxu1 %v15051_v47 }
0x1662   :  { %9121 = vmatpush1.msra.mxu1 %v15057_v56 }
0x1663   :  { %9122 = vmatprep.subr.mxu1 %v15062_v58 }
0x1664   :  { %9123 = vmatpush1.msra.mxu1 %v15068_v37 }
0x1665   :  { %9124 = vmatprep.subr.mxu1 %v15074_v62 }
0x1666   :  { %9125 = vmatpush1.msra.mxu1 %v15080_v42 }
0x1667   :  { %11844 = vmatprep.subr.mxu1 %v15930_v59 }
0x1707   :  { %v8686_v6 = vpop.f32.mrf.mxu1 }
0x1708   :  { %v8758_v21 = vadd.f32 %v8757_v7, %v8686_v6 }
0x1709   :  { %v8688_v11 = vpop.f32.mrf.mxu1 }
0x170a   :  { %v8760_v47 = vadd.f32 %v8759_v43, %v8688_v11  ;;  %v16226_v43 = vld [vmem:[#allocation9_spill] sm:$0xff] }
0x1717   :  { %v8828_v24 = vpop.f32.mrf.mxu1 }
0x1718   :  { %v8833_v28 = vadd.f32 %v8828_v24, %v8758_v21  ;;  %v16221_v21 = vld [vmem:[#allocation3_spill] sm:$0xff]  ;;  %v16222_v24 = vld [vmem:[#allocation4_spill] sm:$0xff] }
0x1719   :  { %v8830_v27 = vpop.f32.mrf.mxu1 }
0x171a   :  { %v8835_v33 = vadd.f32 %v8833_v28, %v15312_v25  ;;  %v8834_v56 = vadd.f32 %v8830_v27, %v8760_v47  ;;  %v16223_v28 = vld [vmem:[#allocation5_spill] sm:$0xff]  ;;  %v16227_v27 = vld [vmem:[#allocation10_spill] sm:$0xff]  ;;  %v16229_v47 = vld [vmem:[#allocation12_spill] sm:$0xff] }
0x171c   :  { %v9964_v35 = vmul.f32 -1.442695, %v8835_v33  ;;  %v8836_v58 = vadd.f32 %v8834_v56, %v15318_v20  ;;  %v16224_v33 = vld [vmem:[#allocation6_spill] sm:$0xff]  ;;  %v16232_v56 = vld [vmem:[#allocation15_spill] sm:$0xff] }
0x171e   :  { %12103 = vpow2.f32 %v9964_v35  ;;  %v9965_v54 = vmul.f32 -1.442695, %v8836_v58  ;;  %v16225_v35 = vld [vmem:[#allocation8_spill] sm:$0xff] }
0x171f   :  { %12105 = vtanh.f32 %v8836_v58  ;;  %v16233_v58 = vld [vmem:[#allocation16_spill] sm:$0xff] }
0x172b   :  { %v12104_v37 = vpop.eup %12103 }
0x172c   :  { %v8840_v62 = vadd.f32 1.0, %v12104_v37  ;;  %v12106_v42 = vpop.eup %12105 }
0x172e   :  { %12107 = vrcp.f32 %v8840_v62 }
0x172f   :  { %12109 = vpow2.f32 %v9965_v54  ;;  %v9429_v54 = vld [vmem:[%s15653_s18 + $0x30] sm:$0xff] }
0x173b   :  { %v12108_v34 = vpop.eup %12107 }
0x173c   :  { %v8851_v4 = vmul.f32 %v12108_v34, %v12106_v42  ;;  %v12110_v17 = vpop.eup %12109  ;;  %v8850_v51 = vmul.f32 %v12108_v34, %v15328_v45 }
0x173d   :  { %v8847_v0 = vadd.f32 1.0, %v12110_v17  ;;  %v9427_v17 = vld [vmem:[%s15653_s18 + $0x20] sm:$0xff] }
0x173e   :  { %8853 = vrot.lane.b32.xlu0 %v8851_v4, %s12221_s10 }
0x173f   :  { %12111 = vrcp.f32 %v8847_v0  ;;  %v9426_v0 = vld [vmem:[%s15653_s18 + $0x18] sm:$0xff] }
0x174c   :  { %v12112_v39 = vpop.eup %12111 }
0x17b0   :  { %v8854_v36 = vpop.permute.xlu0 %8853 }
0x17b1   :  { %v15437_v48 = vadd.f32 %v8854_v36, %v8850_v51  ;;  %v9425_v51 = vld [vmem:[%s15653_s18 + $0x10] sm:$0xff]  ;;  %v9424_v36 = vld [vmem:[%s15653_s18 + $0x8] sm:$0xff] }
0x17b3   :  { %12113 = vtanh.f32 %v15437_v48 }
0x17c0   :  { %v12114_v22 = vpop.eup %12113 }
0x17c1   :  { %v8858_v26 = vmul.f32 %v12114_v22, %v12112_v39  ;;  %v9423_v39 = vld [vmem:[%s15653_s18] sm:$0xff] }
0x17c3   :  { %8860 = vrot.lane.b32.xlu1 %v8858_v26, %s12221_s10 }
0x1835   :  { %v15441_v38 = vpop.permute.xlu1 %8860 }
0x1836   :  { %11835 = vmatmul.mubr.msk.f32.vlgmr.msra.gmra.mxu0 %vm860_vm1, %v15441_v38  ;;  %9971 = vmatmul.mubr.msk.f32.vlgmr.msra.gmra.mxu1 %vm860_vm1, %v15441_v38 }
0x1837   :  { %11838 = vmatpush3.msra.mxu0 %v15334_v32  ;;  %11845 = vmatpush3.xpose.msk.msra.mxu1 %vm860_vm1, %v15334_v32 }
0x1838   :  { %11839 = vmatprep.subr.mxu0 %v15930_v59  ;;  %11846 = vmatprep.subr.mxu1 %v15930_v59 }
0x1839   :  { %11840 = vmatpush3.msra.mxu0 %v15339_v31  ;;  %11841 = vmatprep.mubr.msk.f32.mxu0 %vm12219_vm7, %v15930_v59 }
0x183a   :  { %9039 = vmatprep.subr.mxu0 %v14985_v3  ;;  %11848 = vmatprep.mubr.msk.f32.mxu1 %vm12219_vm7, %v15930_v59 }
0x183b   :  { %11847 = vmatpush3.xpose.msk.msra.mxu1 %vm860_vm1, %v15339_v31 }
0x183c   :  { %11851 = vmatprep.subr.mxu1 %v15930_v59 }
0x18f6   :  { %v8930_v45 = vpop.f32.mrf.mxu0 }
0x18f7   :  { %v8931_v49 = vadd.f32 %v8930_v45, %v15362_v30 }
0x18f8   :  { %v11836_v46 = vpop.f32.mrf.mxu0 }
0x18f9   :  { %v8934_v41 = vsel %vm520_vm4, %v8931_v49, -inf }
0x18fa   :  { %8935 = vmax.xlane.f32.xlu0 %v8934_v41 }
0x1983   :  { %v8936_v19 = vpop.xlane.xlu0 %8935 }
0x1984   :  { %v8937_v57 = vsub.f32 %v8931_v49, %v8936_v19 }
0x1986   :  { %v8938_v53 = vmul.f32 1.442695, %v8937_v57 }
0x1988   :  { %12115 = vpow2.f32 %v8938_v53 }
0x1995   :  { %v12116_v3 = vpop.eup %12115 }
0x1996   :  { %v8940_v1 = vmul.f32 %v12116_v3, %v15359_v13 }
0x1998   :  { %v8941_v10 = vsel %vm520_vm4, %v8940_v1, 0.0 }
0x1999   :  { %8942 = vadd.xlane.f32.xlu1 %v8941_v10 }
0x1a22   :  { %v8943_v55 = vpop.xlane.xlu1 %8942 }
0x1a23   :  { %v8944_v6 = vmax.f32 %v8943_v55, 1e-20 }
0x1a25   :  { %12117 = vrcp.f32 %v8944_v6 }
0x1a32   :  { %v12118_v7 = vpop.eup %12117 }
0x1a33   :  { %v8946_v11 = vmul.f32 %v12118_v7, %v8940_v1 }
0x1a35   :  { %11842 = vmatmul.mubr.msk.f32.vlgmr.msra.gmra.mxu0 %vm520_vm4, %v8946_v11 }
0x1a36   :  { %9040 = vmatpush1.msra.mxu0 %v15087_v8  ;;  %9087 = vmatprep.mubr.f32.mxu0 %v15930_v59  ;;  %v16228_v8 = vld [vmem:[#allocation11_spill] sm:$0xff] }
0x1a37   :  { %9041 = vmatprep.subr.mxu0 %v15094_v5  ;;  %v16230_v5 = vld [vmem:[#allocation13_spill] sm:$0xff] }
0x1a38   :  { %9042 = vmatpush1.msra.mxu0 %v15101_v29  ;;  %v16231_v29 = vld [vmem:[#allocation14_spill] sm:$0xff] }
0x1a39   :  { %9043 = vmatprep.subr.mxu0 %v16221_v21 }
0x1a3a   :  { %9044 = vmatpush1.msra.mxu0 %v16222_v24 }
0x1a3b   :  { %9045 = vmatprep.subr.mxu0 %v16223_v28 }
0x1a3c   :  { %9046 = vmatpush1.msra.mxu0 %v16224_v33 }
0x1a3d   :  { %9047 = vmatprep.subr.mxu0 %v16225_v35 }
0x1a3e   :  { %9048 = vmatpush1.msra.mxu0 %v16226_v43  ;;  %v9438_v43 = vld [vmem:[%s15654_s19 + $0x38] sm:$0xff] }
0x1a3f   :  { %9049 = vmatprep.subr.mxu0 %v16227_v27  ;;  %v9437_v27 = vld [vmem:[%s15654_s19 + $0x30] sm:$0xff] }
0x1a40   :  { %9050 = vmatpush1.msra.mxu0 %v16228_v8  ;;  %v9435_v8 = vld [vmem:[%s15654_s19 + $0x20] sm:$0xff] }
0x1a41   :  { %9051 = vmatprep.subr.mxu0 %v16229_v47  ;;  %v9434_v47 = vld [vmem:[%s15654_s19 + $0x18] sm:$0xff] }
0x1a42   :  { %9052 = vmatpush1.msra.mxu0 %v16230_v5  ;;  %v9433_v5 = vld [vmem:[%s15654_s19 + $0x10] sm:$0xff] }
0x1a43   :  { %9053 = vmatprep.subr.mxu0 %v16231_v29  ;;  %v9432_v29 = vld [vmem:[%s15654_s19 + $0x8] sm:$0xff] }
0x1a44   :  { %9054 = vmatpush1.msra.mxu0 %v16232_v56  ;;  %v9431_v56 = vld [vmem:[%s15654_s19] sm:$0xff] }
0x1a45   :  { %9181 = vmatprep.subr.mxu0 %v16233_v58  ;;  %v9598_v58 = vld [vmem:[%s15655_s21 + $0x38] sm:$0xff] }
0x1af5   :  { %v9016_v37 = vpop.f32.mrf.mxu0 }
0x1af6   :  { %9970 = vmatmul.mubr.msk.f32.vlgmr.msra.gmra.mxu0 %vm860_vm1, %v9016_v37 }
0x1af7   :  { %9182 = vmatpush1.msra.mxu0 %v15209_v40  ;;  %v11843_v62 = vpop.f32.mrf.mxu0  ;;  %9229 = vmatprep.mubr.f32.mxu0 %v15930_v59 }
0x1af8   :  { %9183 = vmatprep.subr.mxu0 %v15215_v15  ;;  %v9160_v15 = vpop.f32.mrf.mxu1  ;;  %v9597_v62 = vld [vmem:[%s15655_s21 + $0x30] sm:$0xff] }
0x1af9   :  { %9184 = vmatpush1.msra.mxu0 %v15222_v9 }
0x1afa   :  { %9185 = vmatprep.subr.mxu0 %v15228_v14 }
0x1afb   :  { %9186 = vmatpush1.msra.mxu0 %v15235_v18 }
0x1afc   :  { %9187 = vmatprep.subr.mxu0 %v15241_v44 }
0x1afd   :  { %9188 = vmatpush1.msra.mxu0 %v15247_v61 }
0x1afe   :  { %9189 = vmatprep.subr.mxu0 %v15253_v63 }
0x1aff   :  { %9190 = vmatpush1.msra.mxu0 %v15259_v2  ;;  %v9162_v2 = vpop.f32.mrf.mxu1 }
0x1b00   :  { %9191 = vmatprep.subr.mxu0 %v15265_v52 }
0x1b01   :  { %9192 = vmatpush1.msra.mxu0 %v15271_v50 }
0x1b02   :  { %9193 = vmatprep.subr.mxu0 %v15277_v16 }
0x1b03   :  { %9194 = vmatpush1.msra.mxu0 %v15283_v23 }
0x1b04   :  { %9195 = vmatprep.subr.mxu0 %v15289_v60 }
0x1b05   :  { %9196 = vmatpush1.msra.mxu0 %v15295_v12 }
0x1b06   :  { %9972 = vmatmul.mubr.msk.f32.vlgmr.msra.gmra.mxu0 %vm860_vm1, %v15441_v38  ;;  %11877 = vmatprep.subr.mxu0 %v15930_v59 }
0x1b07   :  { %11893 = vmatprep.mubr.msk.f32.mxu0 %vm12219_vm7, %v15930_v59 }
0x1bb6   :  { %v9089_v40 = vpop.f32.mrf.mxu0 }
0x1bb7   :  { %v9161_v14 = vadd.f32 %v9160_v15, %v9089_v40  ;;  %v9596_v15 = vld [vmem:[%s15655_s21 + $0x28] sm:$0xff] }
0x1bb8   :  { %v9091_v9 = vpop.f32.mrf.mxu0 }
0x1bb9   :  { %v9163_v50 = vadd.f32 %v9162_v2, %v9091_v9  ;;  %v9595_v9 = vld [vmem:[%s15655_s21 + $0x20] sm:$0xff] }
0x1bc6   :  { %v9231_v18 = vpop.f32.mrf.mxu0 }
0x1bc7   :  { %v9236_v44 = vadd.f32 %v9231_v18, %v9161_v14  ;;  %v9594_v14 = vld [vmem:[%s15655_s21 + $0x18] sm:$0xff]  ;;  %v9593_v18 = vld [vmem:[%s15655_s21 + $0x10] sm:$0xff] }
0x1bc8   :  { %v9233_v52 = vpop.f32.mrf.mxu0 }
0x1bc9   :  { %v9238_v61 = vadd.f32 %v9236_v44, %v15312_v25  ;;  %v9237_v16 = vadd.f32 %v9233_v52, %v9163_v50  ;;  %v9430_v25 = vld [vmem:[%s15653_s18 + $0x38] sm:$0xff]  ;;  %v9592_v44 = vld [vmem:[%s15655_s21 + $0x8] sm:$0xff]  ;;  %v9981_v52 = vld [vmem:[%s15657_s20] ss:$0 sm:$0xff] }
0x1bca   :  { %11878 = vmatpush3.msra.mxu0 %v9430_v25 }
0x1bcb   :  { %v9973_v63 = vmul.f32 -1.442695, %v9238_v61  ;;  %v9239_v23 = vadd.f32 %v9237_v16, %v15318_v20  ;;  %11879 = vmatprep.subr.mxu0 %v15930_v59  ;;  %v9428_v20 = vld [vmem:[%s15653_s18 + $0x28] sm:$0xff]  ;;  %v9591_v61 = vld [vmem:[%s15655_s21] sm:$0xff] }
0x1bcc   :  { %11880 = vmatpush3.msra.mxu0 %v9429_v54 }
0x1bcd   :  { %12119 = vpow2.f32 %v9973_v63  ;;  %11881 = vmatprep.subr.mxu0 %v15930_v59  ;;  %v9974_v22 = vmul.f32 -1.442695, %v9239_v23  ;;  %v28_v63 = vstv %s15656_s22 }
0x1bce   :  { %12121 = vtanh.f32 %v9239_v23  ;;  %11882 = vmatpush3.msra.mxu0 %v9428_v20  ;;  %29 = vst [vmem:[#allocation2] sm:$0x1] %v28_v63 }
0x1bcf   :  { %11883 = vmatprep.subr.mxu0 %v15930_v59 }
0x1bd0   :  { %11884 = vmatpush3.msra.mxu0 %v9427_v17 }
0x1bd1   :  { %11885 = vmatprep.subr.mxu0 %v15930_v59 }
0x1bd2   :  { %11886 = vmatpush3.msra.mxu0 %v9426_v0 }
0x1bd3   :  { %11887 = vmatprep.subr.mxu0 %v15930_v59 }
0x1bd4   :  { %11888 = vmatpush3.msra.mxu0 %v9425_v51 }
0x1bd5   :  { %11889 = vmatprep.subr.mxu0 %v15930_v59 }
0x1bd6   :  { %11890 = vmatpush3.msra.mxu0 %v9424_v36 }
0x1bd7   :  { %11891 = vmatprep.subr.mxu0 %v15930_v59 }
0x1bd8   :  { %11892 = vmatpush3.msra.mxu0 %v9423_v39 }
0x1bda   :  { %v12120_v60 = vpop.eup %12119 }
0x1bdb   :  { %v9243_v12 = vadd.f32 1.0, %v12120_v60  ;;  %v12122_v42 = vpop.eup %12121 }
0x1bdd   :  { %12123 = vrcp.f32 %v9243_v12  ;;  %v9982_v12 = vld [vmem:[#allocation2] ss:$0 sm:$0xff] }
0x1bde   :  { %12125 = vpow2.f32 %v9974_v22 }
0x1bea   :  { %v12124_v34 = vpop.eup %12123 }
0x1beb   :  { %v9254_v4 = vmul.f32 %v12124_v34, %v12122_v42  ;;  %v12126_v26 = vpop.eup %12125  ;;  %v9253_v45 = vmul.f32 %v12124_v34, %v15437_v48 }
0x1bec   :  { %v9250_v38 = vadd.f32 1.0, %v12126_v26 }
0x1bed   :  { %9256 = vrot.lane.b32.xlu0 %v9254_v4, %s12221_s10 }
0x1bee   :  { %12127 = vrcp.f32 %v9250_v38 }
0x1bfb   :  { %v12128_v41 = vpop.eup %12127 }
0x1c5f   :  { %v9257_v49 = vpop.permute.xlu0 %9256 }
0x1c60   :  { %v9259_v46 = vadd.f32 %v9257_v49, %v9253_v45 }
0x1c62   :  { %12129 = vtanh.f32 %v9259_v46 }
0x1c6f   :  { %v12130_v19 = vpop.eup %12129 }
0x1c70   :  { %v9261_v57 = vmul.f32 %v12130_v19, %v12128_v41 }
0x1c72   :  { %9263 = vrot.lane.b32.xlu1 %v9261_v57, %s12221_s10 }
0x1ce4   :  { %v9264_v53 = vpop.permute.xlu1 %9263 }
0x1ce5   :  { %11849 = vmatmul.mubr.msk.f32.vlgmr.msra.gmra.mxu1 %vm860_vm1, %v9264_v53  ;;  %11894 = vmatmul.mubr.msk.f32.vlgmr.msra.gmra.mxu0 %vm860_vm1, %v9264_v53 }
0x1ce6   :  { %11852 = vmatpush3.msra.mxu1 %v15334_v32  ;;  %11855 = vmatprep.mubr.msk.f32.mxu1 %vm12219_vm7, %v15930_v59 }
0x1ce7   :  { %11853 = vmatprep.subr.mxu1 %v15930_v59 }
0x1ce8   :  { %11854 = vmatpush3.msra.mxu1 %v15339_v31 }
0x1ce9   :  { %11858 = vmatprep.subr.mxu1 %v15930_v59 }
0x1da5   :  { %v9333_v48 = vpop.f32.mrf.mxu1  ;;  %v15549_v3 = vpop.f32.mrf.mxu0 }
0x1da6   :  { %v9334_v1 = vadd.f32 %v9333_v48, %v15362_v30 }
0x1da7   :  { %v11850_v10 = vpop.f32.mrf.mxu1  ;;  %v11895_v55 = vpop.f32.mrf.mxu0 }
0x1da8   :  { %v9337_v6 = vsel %vm520_vm4, %v9334_v1, -inf }
0x1da9   :  { %9338 = vmax.xlane.f32.xlu0 %v9337_v6 }
0x1e32   :  { %v9339_v32 = vpop.xlane.xlu0 %9338 }
0x1e33   :  { %v9340_v7 = vsub.f32 %v9334_v1, %v9339_v32 }
0x1e35   :  { %v9341_v11 = vmul.f32 1.442695, %v9340_v7 }
0x1e37   :  { %12131 = vpow2.f32 %v9341_v11 }
0x1e44   :  { %v12132_v21 = vpop.eup %12131 }
0x1e45   :  { %v9343_v24 = vmul.f32 %v12132_v21, %v15359_v13  ;;  %v9436_v13 = vld [vmem:[%s15654_s19 + $0x28] sm:$0xff] }
0x1e47   :  { %v9344_v31 = vsel %vm520_vm4, %v9343_v24, 0.0 }
0x1e48   :  { %9345 = vadd.xlane.f32.xlu1 %v9344_v31 }
0x1ed1   :  { %v9346_v28 = vpop.xlane.xlu1 %9345 }
0x1ed2   :  { %v9347_v33 = vmax.f32 %v9346_v28, 1e-20 }
0x1ed4   :  { %12133 = vrcp.f32 %v9347_v33 }
0x1ee1   :  { %v12134_v35 = vpop.eup %12133 }
0x1ee2   :  { %v9349_v30 = vmul.f32 %v12134_v35, %v9343_v24 }
0x1ee4   :  { %11856 = vmatmul.mubr.msk.f32.vlgmr.msra.gmra.mxu1 %vm520_vm4, %v9349_v30  ;;  %vm9679_vm4 = vcmask 7168  }
0x1ee5   :  { %11859 = vmatpush3.msra.mxu1 %v9438_v43  ;;  %11874 = vmatprep.mubr.msk.f32.mxu1 %vm12219_vm7, %v15930_v59 }
0x1ee6   :  { %11860 = vmatprep.subr.mxu1 %v15930_v59 }
0x1ee7   :  { %11861 = vmatpush3.msra.mxu1 %v9437_v27 }
0x1ee8   :  { %11862 = vmatprep.subr.mxu1 %v15930_v59 }
0x1ee9   :  { %11863 = vmatpush3.msra.mxu1 %v9436_v13 }
0x1eea   :  { %11864 = vmatprep.subr.mxu1 %v15930_v59 }
0x1eeb   :  { %11865 = vmatpush3.msra.mxu1 %v9435_v8 }
0x1eec   :  { %11866 = vmatprep.subr.mxu1 %v15930_v59 }
0x1eed   :  { %11867 = vmatpush3.msra.mxu1 %v9434_v47 }
0x1eee   :  { %11868 = vmatprep.subr.mxu1 %v15930_v59 }
0x1eef   :  { %11869 = vmatpush3.msra.mxu1 %v9433_v5 }
0x1ef0   :  { %11870 = vmatprep.subr.mxu1 %v15930_v59 }
0x1ef1   :  { %11871 = vmatpush3.msra.mxu1 %v9432_v29 }
0x1ef2   :  { %11872 = vmatprep.subr.mxu1 %v15930_v59 }
0x1ef3   :  { %11873 = vmatpush3.msra.mxu1 %v9431_v56 }
0x1ef4   :  { %11896 = vmatprep.subr.mxu1 %v15930_v59 }
0x1fa4   :  { %v9419_v37 = vpop.f32.mrf.mxu1 }
0x1fa5   :  { %11875 = vmatmul.mubr.msk.f32.vlgmr.msra.gmra.mxu1 %vm860_vm1, %v9419_v37 }
0x1fa6   :  { %v11857_v40 = vpop.f32.mrf.mxu1  ;;  %11897 = vmatpush3.msra.mxu1 %v9598_v58  ;;  %11912 = vmatprep.mubr.msk.f32.mxu1 %vm12219_vm7, %v15930_v59 }
0x1fa7   :  { %11898 = vmatprep.subr.mxu1 %v15930_v59 }
0x1fa8   :  { %11899 = vmatpush3.msra.mxu1 %v9597_v62 }
0x1fa9   :  { %11900 = vmatprep.subr.mxu1 %v15930_v59 }
0x1faa   :  { %11901 = vmatpush3.msra.mxu1 %v9596_v15 }
0x1fab   :  { %11902 = vmatprep.subr.mxu1 %v15930_v59 }
0x1fac   :  { %11903 = vmatpush3.msra.mxu1 %v9595_v9 }
0x1fad   :  { %11904 = vmatprep.subr.mxu1 %v15930_v59 }
0x1fae   :  { %11905 = vmatpush3.msra.mxu1 %v9594_v14 }
0x1faf   :  { %11906 = vmatprep.subr.mxu1 %v15930_v59 }
0x1fb0   :  { %11907 = vmatpush3.msra.mxu1 %v9593_v18 }
0x1fb1   :  { %11908 = vmatprep.subr.mxu1 %v15930_v59 }
0x1fb2   :  { %11909 = vmatpush3.msra.mxu1 %v9592_v44 }
0x1fb3   :  { %11910 = vmatprep.subr.mxu1 %v15930_v59 }
0x1fb4   :  { %11911 = vmatpush3.msra.mxu1 %v9591_v61 }
0x2065   :  { %v9508_v2 = vpop.f32.mrf.mxu1 }
0x2066   :  { %v9579_v50 = vadd.f32 %v15549_v3, %v9508_v2 }
0x2067   :  { %v11876_v16 = vpop.f32.mrf.mxu1 }
0x2068   :  { %v9589_v23 = vadd.f32 %v9981_v52, %v9579_v50 }
0x206a   :  { %v9590_v60 = vmax.f32 %v9589_v23, 0.0 }
0x206c   :  { %11913 = vmatmul.mubr.msk.f32.vlgmr.msra.gmra.mxu1 %vm860_vm1, %v9590_v60 }
0x212c   :  { %v9675_v59 = vpop.f32.mrf.mxu1 }
0x212d   :  { %v9676_v42 = vadd.f32 %v9982_v12, %v9675_v59 }
0x212e   :  { %v11914_v34 = vpop.f32.mrf.mxu1 }
0x212f   :  { %9680 = vst.msk [vmem:[%s15658_s23] sm:$0xff] %vm9679_vm4, %v9676_v42 }

</bundles_post_ra>
